<compile_context>
chip_gen: v6e
topology: v6e:2x2x1
jax: 0.10.0
libtpu: 0.0.40
codegen_flags: <defaults>
</compile_context>

<pallas_src>
import functools

import jax
import jax.numpy as jnp
from jax.experimental import pallas as pl
from jax.experimental.pallas import tpu as pltpu

# Layer widths of SimpleDNN (excluding data-driven input/output dims).
# TODO(synk): 1028 is kept as-is to match the PyTorch module (likely a typo for
# 1024); it is padded to 1152 internally for lane alignment.
HIDDEN_DIMS = [64, 256, 2560, 1028, 512, 128, 64, 36]

LANE = 128
SUBLANE = 8
MAX_BATCH_TILE = 256


def _round_up(x, m):
    return ((x + m - 1) // m) * m


def _mlp_kernel(*refs):
    """refs = (x_ref, w1, b1, ..., w9, b9, out_ref).

    x/W are bf16, biases f32; each matmul accumulates in f32 on the MXU and the
    activation is cast back to bf16 between layers. All weights live in VMEM
    and (thanks to constant index_maps) are DMA'd only once across the batch
    grid; intermediates never touch HBM.
    """
    x_ref = refs[0]
    out_ref = refs[-1]
    param_refs = refs[1:-1]
    n_layers = len(param_refs) // 2

    h = x_ref[...]  # bf16 (tile_b, in_pad)
    for i in range(n_layers):
        w = param_refs[2 * i][...]          # bf16 (in_pad, out_pad)
        b = param_refs[2 * i + 1][...]      # f32  (1, out_pad)
        acc = jnp.dot(h, w, preferred_element_type=jnp.float32) + b
        if i < n_layers - 1:
            h = jnp.maximum(acc, 0.0).astype(jnp.bfloat16)  # ReLU, back to bf16
        else:
            h = acc                                         # final layer: no ReLU
    out_ref[...] = h.astype(out_ref.dtype)


def pad_params(params):
    """f32 (in, out) weights / (1, out) biases -> lane-padded bf16 W, f32 b.

    Padded rows/columns are exactly zero so they are inert through the matmul
    chain and ReLUs.
    """
    padded = []
    for w, b in params:
        fi, fo = w.shape
        pi = _round_up(max(fi, LANE), LANE)
        po = _round_up(max(fo, LANE), LANE)
        wp = jnp.zeros((pi, po), jnp.bfloat16).at[:fi, :fo].set(
            w.astype(jnp.bfloat16))
        bp = jnp.zeros((1, po), jnp.float32).at[:, :fo].set(b)
        padded.append((wp, bp))
    return padded


@functools.partial(jax.jit, static_argnames=("output_dim",))
def simple_dnn_forward(x, padded_params, output_dim):
    """x: (batch, input_dim) f32. padded_params from pad_params()."""
    batch, in_dim = x.shape
    in_pad = padded_params[0][0].shape[0]
    out_pad = padded_params[-1][0].shape[1]

    # Batch tile: fill MXU rows for large batches, otherwise a single
    # sublane-aligned tile (avoids wasted padded rows at tiny batch).
    tile_b = MAX_BATCH_TILE if batch >= MAX_BATCH_TILE else _round_up(batch, SUBLANE)
    batch_pad = _round_up(batch, tile_b)

    # Zero-pad x to (batch_pad, in_pad) and cast once to bf16.
    xp = jnp.zeros((batch_pad, in_pad), jnp.bfloat16)
    xp = xp.at[:batch, :in_dim].set(x.astype(jnp.bfloat16))

    flat_args = [xp]
    in_specs = [pl.BlockSpec((tile_b, in_pad), lambda i: (i, 0))]
    for w, b in padded_params:
        flat_args += [w, b]
        # Constant index_map -> weights/biases resident in VMEM across the
        # whole batch grid (single DMA).
        in_specs.append(pl.BlockSpec(w.shape, lambda i: (0, 0)))
        in_specs.append(pl.BlockSpec(b.shape, lambda i: (0, 0)))
    out_spec = pl.BlockSpec((tile_b, out_pad), lambda i: (i, 0))

    flops = 2 * batch_pad * sum(int(w.shape[0]) * int(w.shape[1])
                                for w, _ in padded_params)
    bytes_accessed = (
        xp.size * xp.dtype.itemsize
        + sum(w.size * w.dtype.itemsize + b.size * b.dtype.itemsize
              for w, b in padded_params)
        + batch_pad * out_pad * 4)

    out_padded = pl.pallas_call(
        _mlp_kernel,
        out_shape=jax.ShapeDtypeStruct((batch_pad, out_pad), jnp.float32),
        grid=(batch_pad // tile_b,),
        in_specs=in_specs,
        out_specs=out_spec,
        compiler_params=pltpu.CompilerParams(
            dimension_semantics=("parallel",),   # batch tiles are independent
            vmem_limit_bytes=48 << 20,           # fits v7x's 64 MiB physical VMEM
        ),
        cost_estimate=pl.CostEstimate(
            flops=flops, transcendentals=0, bytes_accessed=bytes_accessed),
    )(*flat_args)

    # Slice away batch / lane padding.
    return out_padded[:batch, :output_dim]


def init_params(key, input_dim, output_dim):
    """Deterministic init mimicking nn.Linear default (U[-1/sqrt(in), 1/sqrt(in)]).

    Weights stored as (in, out) == transposed PyTorch weight, biases (1, out).
    """
    dims = [input_dim] + HIDDEN_DIMS + [output_dim]
    params = []
    for i in range(len(dims) - 1):
        fan_in, fan_out = dims[i], dims[i + 1]
        key, kw, kb = jax.random.split(key, 3)
        bound = 1.0 / jnp.sqrt(jnp.float32(fan_in))
        w = jax.random.uniform(kw, (fan_in, fan_out), jnp.float32, -bound, bound)
        b = jax.random.uniform(kb, (1, fan_out), jnp.float32, -bound, bound)
        params.append((w, b))
    return params


def reference_forward_bf16(x, params):
    """Pure-JAX reference matching the kernel's bf16-weight / f32-accum numerics."""
    h = x.astype(jnp.bfloat16).astype(jnp.float32)
    for i, (w, b) in enumerate(params):
        wf = w.astype(jnp.bfloat16).astype(jnp.float32)
        h = h @ wf + b
        if i < len(params) - 1:
            h = jnp.maximum(h, 0.0).astype(jnp.bfloat16).astype(jnp.float32)
    return h


if __name__ == "__main__":
    key = jax.random.PRNGKey(0)
    key, kx = jax.random.split(key)

    batch = 8
    input_dim = 16   # X_train.shape[1] stand-in
    output_dim = 8   # Y_train.shape[1] stand-in

    x = jax.random.normal(kx, (batch, input_dim), dtype=jnp.float32)
    params = init_params(key, input_dim, output_dim)
    padded_params = pad_params(params)

    out = simple_dnn_forward(x, padded_params, output_dim)
    out = jax.block_until_ready(out)

    ref = reference_forward_bf16(x, params)
    assert out.shape == (batch, output_dim), out.shape
    max_diff = jnp.max(jnp.abs(out - ref))
    assert jnp.allclose(out, ref, atol=2e-2, rtol=2e-2), (
        f"mismatch vs reference, max abs diff = {max_diff:.4e}")

    print("KERNEL_OK")
</pallas_src>

<mosaic_0001>
module attributes {stable_mosaic.version = 11 : i64} {
  func.func @_mlp_kernel(%arg0: i32, %arg1: memref<8x128xbf16, #tpu.memory_space<vmem>>, %arg2: memref<128x128xbf16, #tpu.memory_space<vmem>>, %arg3: memref<1x128xf32, #tpu.memory_space<vmem>>, %arg4: memref<128x256xbf16, #tpu.memory_space<vmem>>, %arg5: memref<1x256xf32, #tpu.memory_space<vmem>>, %arg6: memref<256x2560xbf16, #tpu.memory_space<vmem>>, %arg7: memref<1x2560xf32, #tpu.memory_space<vmem>>, %arg8: memref<2560x1152xbf16, #tpu.memory_space<vmem>>, %arg9: memref<1x1152xf32, #tpu.memory_space<vmem>>, %arg10: memref<1152x512xbf16, #tpu.memory_space<vmem>>, %arg11: memref<1x512xf32, #tpu.memory_space<vmem>>, %arg12: memref<512x128xbf16, #tpu.memory_space<vmem>>, %arg13: memref<1x128xf32, #tpu.memory_space<vmem>>, %arg14: memref<128x128xbf16, #tpu.memory_space<vmem>>, %arg15: memref<1x128xf32, #tpu.memory_space<vmem>>, %arg16: memref<128x128xbf16, #tpu.memory_space<vmem>>, %arg17: memref<1x128xf32, #tpu.memory_space<vmem>>, %arg18: memref<128x128xbf16, #tpu.memory_space<vmem>>, %arg19: memref<1x128xf32, #tpu.memory_space<vmem>>, %arg20: memref<8x128xf32, #tpu.memory_space<vmem>>) attributes {dimension_semantics = [#tpu.dimension_semantics<parallel>], iteration_bounds = array<i64: 1>, scalar_prefetch = 0 : i64, scratch_operands = 0 : i64, tpu.core_type = #tpu.core_type<tc>, window_params = [{transform_indices = @transform_0, window_bounds = array<i64: 8, 128>}, {pipeline_mode = #tpu.pipeline_mode<synchronous>, transform_indices = @transform_1, window_bounds = array<i64: 128, 128>}, {pipeline_mode = #tpu.pipeline_mode<synchronous>, transform_indices = @transform_2, window_bounds = array<i64: 1, 128>}, {pipeline_mode = #tpu.pipeline_mode<synchronous>, transform_indices = @transform_3, window_bounds = array<i64: 128, 256>}, {pipeline_mode = #tpu.pipeline_mode<synchronous>, transform_indices = @transform_4, window_bounds = array<i64: 1, 256>}, {pipeline_mode = #tpu.pipeline_mode<synchronous>, transform_indices = @transform_5, window_bounds = array<i64: 256, 2560>}, {pipeline_mode = #tpu.pipeline_mode<synchronous>, transform_indices = @transform_6, window_bounds = array<i64: 1, 2560>}, {pipeline_mode = #tpu.pipeline_mode<synchronous>, transform_indices = @transform_7, window_bounds = array<i64: 2560, 1152>}, {pipeline_mode = #tpu.pipeline_mode<synchronous>, transform_indices = @transform_8, window_bounds = array<i64: 1, 1152>}, {pipeline_mode = #tpu.pipeline_mode<synchronous>, transform_indices = @transform_9, window_bounds = array<i64: 1152, 512>}, {pipeline_mode = #tpu.pipeline_mode<synchronous>, transform_indices = @transform_10, window_bounds = array<i64: 1, 512>}, {pipeline_mode = #tpu.pipeline_mode<synchronous>, transform_indices = @transform_11, window_bounds = array<i64: 512, 128>}, {pipeline_mode = #tpu.pipeline_mode<synchronous>, transform_indices = @transform_12, window_bounds = array<i64: 1, 128>}, {pipeline_mode = #tpu.pipeline_mode<synchronous>, transform_indices = @transform_13, window_bounds = array<i64: 128, 128>}, {pipeline_mode = #tpu.pipeline_mode<synchronous>, transform_indices = @transform_14, window_bounds = array<i64: 1, 128>}, {pipeline_mode = #tpu.pipeline_mode<synchronous>, transform_indices = @transform_15, window_bounds = array<i64: 128, 128>}, {pipeline_mode = #tpu.pipeline_mode<synchronous>, transform_indices = @transform_16, window_bounds = array<i64: 1, 128>}, {pipeline_mode = #tpu.pipeline_mode<synchronous>, transform_indices = @transform_17, window_bounds = array<i64: 128, 128>}, {pipeline_mode = #tpu.pipeline_mode<synchronous>, transform_indices = @transform_18, window_bounds = array<i64: 1, 128>}, {transform_indices = @transform_19, window_bounds = array<i64: 8, 128>}]} {
    %c0 = arith.constant 0 : index
    %c0_0 = arith.constant 0 : index
    %0 = vector.load %arg1[%c0, %c0_0] : memref<8x128xbf16, #tpu.memory_space<vmem>>, vector<8x128xbf16>
    %c0_1 = arith.constant 0 : index
    %c0_2 = arith.constant 0 : index
    %1 = vector.load %arg2[%c0_1, %c0_2] : memref<128x128xbf16, #tpu.memory_space<vmem>>, vector<128x128xbf16>
    %c0_3 = arith.constant 0 : index
    %c0_4 = arith.constant 0 : index
    %2 = vector.load %arg3[%c0_3, %c0_4] : memref<1x128xf32, #tpu.memory_space<vmem>>, vector<1x128xf32>
    %cst = arith.constant dense<0.000000e+00> : vector<8x128xf32>
    %3 = tpu.matmul %0, %1, %cst {dimension_numbers = #tpu.dot_dimension_numbers<[1], [0], [0], [1], [0, 0, 1, 1], [], []>} : vector<8x128xbf16>, vector<128x128xbf16>, vector<8x128xf32> -> vector<8x128xf32>
    %4 = vector.broadcast %2 : vector<1x128xf32> to vector<8x128xf32>
    %5 = arith.addf %3, %4 : vector<8x128xf32>
    %cst_5 = arith.constant 0.000000e+00 : f32
    %6 = vector.broadcast %cst_5 : f32 to vector<8x128xf32>
    %7 = arith.maximumf %5, %6 : vector<8x128xf32>
    %8 = arith.truncf %7 : vector<8x128xf32> to vector<8x128xbf16>
    %c0_6 = arith.constant 0 : index
    %c0_7 = arith.constant 0 : index
    %9 = vector.load %arg4[%c0_6, %c0_7] : memref<128x256xbf16, #tpu.memory_space<vmem>>, vector<128x256xbf16>
    %c0_8 = arith.constant 0 : index
    %c0_9 = arith.constant 0 : index
    %10 = vector.load %arg5[%c0_8, %c0_9] : memref<1x256xf32, #tpu.memory_space<vmem>>, vector<1x256xf32>
    %cst_10 = arith.constant dense<0.000000e+00> : vector<8x256xf32>
    %11 = tpu.matmul %8, %9, %cst_10 {dimension_numbers = #tpu.dot_dimension_numbers<[1], [0], [0], [1], [0, 0, 1, 1], [], []>} : vector<8x128xbf16>, vector<128x256xbf16>, vector<8x256xf32> -> vector<8x256xf32>
    %12 = vector.broadcast %10 : vector<1x256xf32> to vector<8x256xf32>
    %13 = arith.addf %11, %12 : vector<8x256xf32>
    %cst_11 = arith.constant 0.000000e+00 : f32
    %14 = vector.broadcast %cst_11 : f32 to vector<8x256xf32>
    %15 = arith.maximumf %13, %14 : vector<8x256xf32>
    %16 = arith.truncf %15 : vector<8x256xf32> to vector<8x256xbf16>
    %c0_12 = arith.constant 0 : index
    %c0_13 = arith.constant 0 : index
    %17 = vector.load %arg6[%c0_12, %c0_13] : memref<256x2560xbf16, #tpu.memory_space<vmem>>, vector<256x2560xbf16>
    %c0_14 = arith.constant 0 : index
    %c0_15 = arith.constant 0 : index
    %18 = vector.load %arg7[%c0_14, %c0_15] : memref<1x2560xf32, #tpu.memory_space<vmem>>, vector<1x2560xf32>
    %cst_16 = arith.constant dense<0.000000e+00> : vector<8x2560xf32>
    %19 = tpu.matmul %16, %17, %cst_16 {dimension_numbers = #tpu.dot_dimension_numbers<[1], [0], [0], [1], [0, 0, 1, 1], [], []>} : vector<8x256xbf16>, vector<256x2560xbf16>, vector<8x2560xf32> -> vector<8x2560xf32>
    %20 = vector.broadcast %18 : vector<1x2560xf32> to vector<8x2560xf32>
    %21 = arith.addf %19, %20 : vector<8x2560xf32>
    %cst_17 = arith.constant 0.000000e+00 : f32
    %22 = vector.broadcast %cst_17 : f32 to vector<8x2560xf32>
    %23 = arith.maximumf %21, %22 : vector<8x2560xf32>
    %24 = arith.truncf %23 : vector<8x2560xf32> to vector<8x2560xbf16>
    %c0_18 = arith.constant 0 : index
    %c0_19 = arith.constant 0 : index
    %25 = vector.load %arg8[%c0_18, %c0_19] : memref<2560x1152xbf16, #tpu.memory_space<vmem>>, vector<2560x1152xbf16>
    %c0_20 = arith.constant 0 : index
    %c0_21 = arith.constant 0 : index
    %26 = vector.load %arg9[%c0_20, %c0_21] : memref<1x1152xf32, #tpu.memory_space<vmem>>, vector<1x1152xf32>
    %cst_22 = arith.constant dense<0.000000e+00> : vector<8x1152xf32>
    %27 = tpu.matmul %24, %25, %cst_22 {dimension_numbers = #tpu.dot_dimension_numbers<[1], [0], [0], [1], [0, 0, 1, 1], [], []>} : vector<8x2560xbf16>, vector<2560x1152xbf16>, vector<8x1152xf32> -> vector<8x1152xf32>
    %28 = vector.broadcast %26 : vector<1x1152xf32> to vector<8x1152xf32>
    %29 = arith.addf %27, %28 : vector<8x1152xf32>
    %cst_23 = arith.constant 0.000000e+00 : f32
    %30 = vector.broadcast %cst_23 : f32 to vector<8x1152xf32>
    %31 = arith.maximumf %29, %30 : vector<8x1152xf32>
    %32 = arith.truncf %31 : vector<8x1152xf32> to vector<8x1152xbf16>
    %c0_24 = arith.constant 0 : index
    %c0_25 = arith.constant 0 : index
    %33 = vector.load %arg10[%c0_24, %c0_25] : memref<1152x512xbf16, #tpu.memory_space<vmem>>, vector<1152x512xbf16>
    %c0_26 = arith.constant 0 : index
    %c0_27 = arith.constant 0 : index
    %34 = vector.load %arg11[%c0_26, %c0_27] : memref<1x512xf32, #tpu.memory_space<vmem>>, vector<1x512xf32>
    %cst_28 = arith.constant dense<0.000000e+00> : vector<8x512xf32>
    %35 = tpu.matmul %32, %33, %cst_28 {dimension_numbers = #tpu.dot_dimension_numbers<[1], [0], [0], [1], [0, 0, 1, 1], [], []>} : vector<8x1152xbf16>, vector<1152x512xbf16>, vector<8x512xf32> -> vector<8x512xf32>
    %36 = vector.broadcast %34 : vector<1x512xf32> to vector<8x512xf32>
    %37 = arith.addf %35, %36 : vector<8x512xf32>
    %cst_29 = arith.constant 0.000000e+00 : f32
    %38 = vector.broadcast %cst_29 : f32 to vector<8x512xf32>
    %39 = arith.maximumf %37, %38 : vector<8x512xf32>
    %40 = arith.truncf %39 : vector<8x512xf32> to vector<8x512xbf16>
    %c0_30 = arith.constant 0 : index
    %c0_31 = arith.constant 0 : index
    %41 = vector.load %arg12[%c0_30, %c0_31] : memref<512x128xbf16, #tpu.memory_space<vmem>>, vector<512x128xbf16>
    %c0_32 = arith.constant 0 : index
    %c0_33 = arith.constant 0 : index
    %42 = vector.load %arg13[%c0_32, %c0_33] : memref<1x128xf32, #tpu.memory_space<vmem>>, vector<1x128xf32>
    %cst_34 = arith.constant dense<0.000000e+00> : vector<8x128xf32>
    %43 = tpu.matmul %40, %41, %cst_34 {dimension_numbers = #tpu.dot_dimension_numbers<[1], [0], [0], [1], [0, 0, 1, 1], [], []>} : vector<8x512xbf16>, vector<512x128xbf16>, vector<8x128xf32> -> vector<8x128xf32>
    %44 = vector.broadcast %42 : vector<1x128xf32> to vector<8x128xf32>
    %45 = arith.addf %43, %44 : vector<8x128xf32>
    %cst_35 = arith.constant 0.000000e+00 : f32
    %46 = vector.broadcast %cst_35 : f32 to vector<8x128xf32>
    %47 = arith.maximumf %45, %46 : vector<8x128xf32>
    %48 = arith.truncf %47 : vector<8x128xf32> to vector<8x128xbf16>
    %c0_36 = arith.constant 0 : index
    %c0_37 = arith.constant 0 : index
    %49 = vector.load %arg14[%c0_36, %c0_37] : memref<128x128xbf16, #tpu.memory_space<vmem>>, vector<128x128xbf16>
    %c0_38 = arith.constant 0 : index
    %c0_39 = arith.constant 0 : index
    %50 = vector.load %arg15[%c0_38, %c0_39] : memref<1x128xf32, #tpu.memory_space<vmem>>, vector<1x128xf32>
    %cst_40 = arith.constant dense<0.000000e+00> : vector<8x128xf32>
    %51 = tpu.matmul %48, %49, %cst_40 {dimension_numbers = #tpu.dot_dimension_numbers<[1], [0], [0], [1], [0, 0, 1, 1], [], []>} : vector<8x128xbf16>, vector<128x128xbf16>, vector<8x128xf32> -> vector<8x128xf32>
    %52 = vector.broadcast %50 : vector<1x128xf32> to vector<8x128xf32>
    %53 = arith.addf %51, %52 : vector<8x128xf32>
    %cst_41 = arith.constant 0.000000e+00 : f32
    %54 = vector.broadcast %cst_41 : f32 to vector<8x128xf32>
    %55 = arith.maximumf %53, %54 : vector<8x128xf32>
    %56 = arith.truncf %55 : vector<8x128xf32> to vector<8x128xbf16>
    %c0_42 = arith.constant 0 : index
    %c0_43 = arith.constant 0 : index
    %57 = vector.load %arg16[%c0_42, %c0_43] : memref<128x128xbf16, #tpu.memory_space<vmem>>, vector<128x128xbf16>
    %c0_44 = arith.constant 0 : index
    %c0_45 = arith.constant 0 : index
    %58 = vector.load %arg17[%c0_44, %c0_45] : memref<1x128xf32, #tpu.memory_space<vmem>>, vector<1x128xf32>
    %cst_46 = arith.constant dense<0.000000e+00> : vector<8x128xf32>
    %59 = tpu.matmul %56, %57, %cst_46 {dimension_numbers = #tpu.dot_dimension_numbers<[1], [0], [0], [1], [0, 0, 1, 1], [], []>} : vector<8x128xbf16>, vector<128x128xbf16>, vector<8x128xf32> -> vector<8x128xf32>
    %60 = vector.broadcast %58 : vector<1x128xf32> to vector<8x128xf32>
    %61 = arith.addf %59, %60 : vector<8x128xf32>
    %cst_47 = arith.constant 0.000000e+00 : f32
    %62 = vector.broadcast %cst_47 : f32 to vector<8x128xf32>
    %63 = arith.maximumf %61, %62 : vector<8x128xf32>
    %64 = arith.truncf %63 : vector<8x128xf32> to vector<8x128xbf16>
    %c0_48 = arith.constant 0 : index
    %c0_49 = arith.constant 0 : index
    %65 = vector.load %arg18[%c0_48, %c0_49] : memref<128x128xbf16, #tpu.memory_space<vmem>>, vector<128x128xbf16>
    %c0_50 = arith.constant 0 : index
    %c0_51 = arith.constant 0 : index
    %66 = vector.load %arg19[%c0_50, %c0_51] : memref<1x128xf32, #tpu.memory_space<vmem>>, vector<1x128xf32>
    %cst_52 = arith.constant dense<0.000000e+00> : vector<8x128xf32>
    %67 = tpu.matmul %64, %65, %cst_52 {dimension_numbers = #tpu.dot_dimension_numbers<[1], [0], [0], [1], [0, 0, 1, 1], [], []>} : vector<8x128xbf16>, vector<128x128xbf16>, vector<8x128xf32> -> vector<8x128xf32>
    %68 = vector.broadcast %66 : vector<1x128xf32> to vector<8x128xf32>
    %69 = arith.addf %67, %68 : vector<8x128xf32>
    %c0_53 = arith.constant 0 : index
    %c0_54 = arith.constant 0 : index
    %70 = vector.load %arg20[%c0_53, %c0_54] : memref<8x128xf32, #tpu.memory_space<vmem>>, vector<8x128xf32>
    tpu.vector_store %arg20[%c0_53, %c0_54], %69 {strides = array<i32>} : memref<8x128xf32, #tpu.memory_space<vmem>>, vector<8x128xf32>,
    return
  }
  func.func @transform_0(%arg0: i32) -> (i32, i32) {
    %c0_i32 = arith.constant 0 : i32
    %c0_i32_0 = arith.constant 0 : i32
    return %arg0, %c0_i32 : i32, i32
  }
  func.func @transform_1(%arg0: i32) -> (i32, i32) {
    %c0_i32 = arith.constant 0 : i32
    %c0_i32_0 = arith.constant 0 : i32
    %c0_i32_1 = arith.constant 0 : i32
    return %c0_i32, %c0_i32_0 : i32, i32
  }
  func.func @transform_2(%arg0: i32) -> (i32, i32) {
    %c0_i32 = arith.constant 0 : i32
    %c0_i32_0 = arith.constant 0 : i32
    %c0_i32_1 = arith.constant 0 : i32
    return %c0_i32, %c0_i32_0 : i32, i32
  }
  func.func @transform_3(%arg0: i32) -> (i32, i32) {
    %c0_i32 = arith.constant 0 : i32
    %c0_i32_0 = arith.constant 0 : i32
    %c0_i32_1 = arith.constant 0 : i32
    return %c0_i32, %c0_i32_0 : i32, i32
  }
  func.func @transform_4(%arg0: i32) -> (i32, i32) {
    %c0_i32 = arith.constant 0 : i32
    %c0_i32_0 = arith.constant 0 : i32
    %c0_i32_1 = arith.constant 0 : i32
    return %c0_i32, %c0_i32_0 : i32, i32
  }
  func.func @transform_5(%arg0: i32) -> (i32, i32) {
    %c0_i32 = arith.constant 0 : i32
    %c0_i32_0 = arith.constant 0 : i32
    %c0_i32_1 = arith.constant 0 : i32
    return %c0_i32, %c0_i32_0 : i32, i32
  }
  func.func @transform_6(%arg0: i32) -> (i32, i32) {
    %c0_i32 = arith.constant 0 : i32
    %c0_i32_0 = arith.constant 0 : i32
    %c0_i32_1 = arith.constant 0 : i32
    return %c0_i32, %c0_i32_0 : i32, i32
  }
  func.func @transform_7(%arg0: i32) -> (i32, i32) {
    %c0_i32 = arith.constant 0 : i32
    %c0_i32_0 = arith.constant 0 : i32
    %c0_i32_1 = arith.constant 0 : i32
    return %c0_i32, %c0_i32_0 : i32, i32
  }
  func.func @transform_8(%arg0: i32) -> (i32, i32) {
    %c0_i32 = arith.constant 0 : i32
    %c0_i32_0 = arith.constant 0 : i32
    %c0_i32_1 = arith.constant 0 : i32
    return %c0_i32, %c0_i32_0 : i32, i32
  }
  func.func @transform_9(%arg0: i32) -> (i32, i32) {
    %c0_i32 = arith.constant 0 : i32
    %c0_i32_0 = arith.constant 0 : i32
    %c0_i32_1 = arith.constant 0 : i32
    return %c0_i32, %c0_i32_0 : i32, i32
  }
  func.func @transform_10(%arg0: i32) -> (i32, i32) {
    %c0_i32 = arith.constant 0 : i32
    %c0_i32_0 = arith.constant 0 : i32
    %c0_i32_1 = arith.constant 0 : i32
    return %c0_i32, %c0_i32_0 : i32, i32
  }
  func.func @transform_11(%arg0: i32) -> (i32, i32) {
    %c0_i32 = arith.constant 0 : i32
    %c0_i32_0 = arith.constant 0 : i32
    %c0_i32_1 = arith.constant 0 : i32
    return %c0_i32, %c0_i32_0 : i32, i32
  }
  func.func @transform_12(%arg0: i32) -> (i32, i32) {
    %c0_i32 = arith.constant 0 : i32
    %c0_i32_0 = arith.constant 0 : i32
    %c0_i32_1 = arith.constant 0 : i32
    return %c0_i32, %c0_i32_0 : i32, i32
  }
  func.func @transform_13(%arg0: i32) -> (i32, i32) {
    %c0_i32 = arith.constant 0 : i32
    %c0_i32_0 = arith.constant 0 : i32
    %c0_i32_1 = arith.constant 0 : i32
    return %c0_i32, %c0_i32_0 : i32, i32
  }
  func.func @transform_14(%arg0: i32) -> (i32, i32) {
    %c0_i32 = arith.constant 0 : i32
    %c0_i32_0 = arith.constant 0 : i32
    %c0_i32_1 = arith.constant 0 : i32
    return %c0_i32, %c0_i32_0 : i32, i32
  }
  func.func @transform_15(%arg0: i32) -> (i32, i32) {
    %c0_i32 = arith.constant 0 : i32
    %c0_i32_0 = arith.constant 0 : i32
    %c0_i32_1 = arith.constant 0 : i32
    return %c0_i32, %c0_i32_0 : i32, i32
  }
  func.func @transform_16(%arg0: i32) -> (i32, i32) {
    %c0_i32 = arith.constant 0 : i32
    %c0_i32_0 = arith.constant 0 : i32
    %c0_i32_1 = arith.constant 0 : i32
    return %c0_i32, %c0_i32_0 : i32, i32
  }
  func.func @transform_17(%arg0: i32) -> (i32, i32) {
    %c0_i32 = arith.constant 0 : i32
    %c0_i32_0 = arith.constant 0 : i32
    %c0_i32_1 = arith.constant 0 : i32
    return %c0_i32, %c0_i32_0 : i32, i32
  }
  func.func @transform_18(%arg0: i32) -> (i32, i32) {
    %c0_i32 = arith.constant 0 : i32
    %c0_i32_0 = arith.constant 0 : i32
    %c0_i32_1 = arith.constant 0 : i32
    return %c0_i32, %c0_i32_0 : i32, i32
  }
  func.func @transform_19(%arg0: i32) -> (i32, i32) {
    %c0_i32 = arith.constant 0 : i32
    %c0_i32_0 = arith.constant 0 : i32
    return %arg0, %c0_i32 : i32, i32
  }
}

</mosaic_0001>

<bundles_post_ra>
// kernel: simple_dnn_forward.1
= control target key start
LH: loop header
LB: loop body
LE: loop exit
PB: predicated region body
PF: predicated region fallthrough
CT: control target
= control target key end

     0   :  { %s23753_s0 = inlined_call_operand.vmem [shape: bf16[8,128], index: 0, kind: input, shape index: {}]   ;;  %s23754_s1 = inlined_call_operand.hbm [shape: bf16[128,128], index: 1, kind: input, shape index: {}]   ;;  %s23755_s2 = inlined_call_operand.hbm [shape: f32[1,128], index: 2, kind: input, shape index: {}]   ;;  %s23756_s3 = inlined_call_operand.hbm [shape: bf16[128,256], index: 3, kind: input, shape index: {}]   ;;  %s23757_s4 = inlined_call_operand.hbm [shape: f32[1,256], index: 4, kind: input, shape index: {}]   ;;  %s23758_s5 = inlined_call_operand.hbm [shape: bf16[256,2560], index: 5, kind: input, shape index: {}]   ;;  %s23759_s6 = inlined_call_operand.hbm [shape: f32[1,2560], index: 6, kind: input, shape index: {}]   ;;  %s23760_s7 = inlined_call_operand.hbm [shape: bf16[2560,1152], index: 7, kind: input, shape index: {}]   ;;  %s23761_s8 = inlined_call_operand.hbm [shape: f32[1,1152], index: 8, kind: input, shape index: {}]   ;;  %s23762_s9 = inlined_call_operand.hbm [shape: bf16[1152,512], index: 9, kind: input, shape index: {}]   ;;  %s23763_s10 = inlined_call_operand.hbm [shape: f32[1,512], index: 10, kind: input, shape index: {}]   ;;  %s23764_s11 = inlined_call_operand.hbm [shape: bf16[512,128], index: 11, kind: input, shape index: {}]   ;;  %s23765_s12 = inlined_call_operand.hbm [shape: f32[1,128], index: 12, kind: input, shape index: {}]   ;;  %s23766_s13 = inlined_call_operand.hbm [shape: bf16[128,128], index: 13, kind: input, shape index: {}]   ;;  %s23767_s14 = inlined_call_operand.hbm [shape: f32[1,128], index: 14, kind: input, shape index: {}]   ;;  %s23768_s15 = inlined_call_operand.hbm [shape: bf16[128,128], index: 15, kind: input, shape index: {}]   ;;  %s23769_s16 = inlined_call_operand.hbm [shape: f32[1,128], index: 16, kind: input, shape index: {}]   ;;  %s23770_s17 = inlined_call_operand.hbm [shape: bf16[128,128], index: 17, kind: input, shape index: {}]   ;;  %s23771_s18 = inlined_call_operand.hbm [shape: f32[1,128], index: 18, kind: input, shape index: {}]   ;;  %s23772_s19 = inlined_call_operand.hbm [shape: f32[8,128], index: 19, kind: output, shape index: {}]  }
   0x1   :  { %23773 = sst [smem:[#allocation43_spill]] %s23753_s0 }
   0x2   :  { %23774 = sst [smem:[#allocation44_spill]] %s23754_s1 }
   0x3   :  { %23775 = sst [smem:[#allocation45_spill]] %s23755_s2 }
   0x4   :  { %23776 = sst [smem:[#allocation46_spill]] %s23756_s3 }
   0x5   :  { %24 = vsyncpa [#allocation3], 0 }
   0x6   :  { %25 = vsyncpa [#allocation6], 0 }
   0x7   :  { %26 = vsyncpa [#allocation9], 0 }
   0x8   :  { %27 = vsyncpa [#allocation12], 0 }
   0x9   :  { %28 = vsyncpa [#allocation15], 0 }
   0xa   :  { %29 = vsyncpa [#allocation18], 0 }
   0xb   :  { %30 = vsyncpa [#allocation21], 0 }
   0xc   :  { %31 = vsyncpa [#allocation24], 0 }
   0xd   :  { %32 = vsyncpa [#allocation27], 0 }
   0xe   :  { %33 = vsyncpa [#allocation30], 0 }
   0xf   :  { %34 = vsyncpa [#allocation4], 0  ;;  %s23008_s0 = smov [#allocation5]   ;;  %s23009_s20 = smov [#allocation8]  }
  0x10   :  { %s55_s30 = sshll.u32 %s23008_s0, 4  ;;  %s77_s21 = sshll.u32 %s23009_s20, 4  ;;  %s56_s30 = int_to_ptr.vmem [resolvable:$true] %s55_s30  ;;  %s78_s21 = int_to_ptr.vmem [resolvable:$true] %s77_s21 }
  0x11   :  { %s22614_s1 = scalar_lea.vmem %s56_s30, 16  ;;  %s22618_s22 = scalar_lea.vmem %s56_s30, 32 }
  0x12   :  { %p22615_p0 = scmp.ne.s32.totalorder %s56_s30, %s22614_s1  ;;  %p22619_p1 = scmp.lt.s32.totalorder %s56_s30, %s56_s30 }
  0x13   :  { %p22620_p2 = scmp.lt.s32.totalorder %s22618_s22, %s22614_s1 }
  0x15   :  { %p22621_p3 = por %p22620_p2, %p22619_p1 }
  0x17   :  { %p22622_p4 = pnand %p22621_p3, %p22615_p0 }
  0x19   :  { %22625 = shalt.err (!%p22622_p4)
}
  0x1a   :  { %s23777_s24 = sld [smem:[#allocation45_spill]]  ;;  %s22634_s25 = scalar_lea.vmem %s78_s21, 32 }
  0x1b   :  { %p22635_p5 = scmp.ne.s32.totalorder %s78_s21, %s22634_s25  ;;  %p22639_p6 = scmp.lt.s32.totalorder %s78_s21, %s78_s21 }
  0x1c   :  { %p22640_p7 = scmp.lt.s32.totalorder %s22634_s25, %s22634_s25 }
  0x1e   :  { %p22641_p8 = por %p22640_p7, %p22639_p6 }
  0x20   :  { %58 = dma.hbm_to_vmem [thread:$0]  %s23777_s24, 16, %s56_s30, [#allocation6]  }
  0x21   :  { %p22642_p9 = pnand %p22641_p8, %p22635_p5 }
  0x23   :  { %22645 = shalt.err (!%p22642_p9)
}
  0x24   :  { %80 = dma.hbm_to_vmem [thread:$0]  %s23757_s4, 32, %s78_s21, [#allocation9]  }
  0x25   :  { %s23010_s27 = smov [#allocation11]   ;;  %s23011_s29 = smov [#allocation14]  }
  0x26   :  { %s99_s28 = sshll.u32 %s23010_s27, 4  ;;  %s121_s0 = sshll.u32 %s23011_s29, 4  ;;  %s100_s28 = int_to_ptr.vmem [resolvable:$true] %s99_s28  ;;  %s122_s0 = int_to_ptr.vmem [resolvable:$true] %s121_s0 }
  0x27   :  { %s22654_s20 = scalar_lea.vmem %s100_s28, 320  ;;  %p22659_p11 = scmp.lt.s32.totalorder %s100_s28, %s100_s28 }
  0x28   :  { %p22655_p10 = scmp.ne.s32.totalorder %s100_s28, %s22654_s20  ;;  %p22660_p12 = scmp.lt.s32.totalorder %s22654_s20, %s22654_s20 }
  0x2a   :  { %p22661_p13 = por %p22660_p12, %p22659_p11 }
  0x2c   :  { %p22662_p0 = pnand %p22661_p13, %p22655_p10 }
  0x2e   :  { %22665 = shalt.err (!%p22662_p0)
}
  0x2f   :  { %102 = dma.hbm_to_vmem [thread:$0]  %s23759_s6, 320, %s100_s28, [#allocation12]  }
  0x30   :  { %s22674_s22 = scalar_lea.vmem %s122_s0, 144  ;;  %s22678_s4 = scalar_lea.vmem %s122_s0, 160 }
  0x31   :  { %p22675_p1 = scmp.ne.s32.totalorder %s122_s0, %s22674_s22  ;;  %p22679_p2 = scmp.lt.s32.totalorder %s122_s0, %s122_s0 }
  0x32   :  { %p22680_p3 = scmp.lt.s32.totalorder %s22678_s4, %s22674_s22 }
  0x34   :  { %p22681_p4 = por %p22680_p3, %p22679_p2 }
  0x36   :  { %p22682_p5 = pnand %p22681_p4, %p22675_p1 }
  0x38   :  { %22685 = shalt.err (!%p22682_p5)
}
  0x39   :  { %124 = dma.hbm_to_vmem [thread:$0]  %s23761_s8, 144, %s122_s0, [#allocation15]  }
  0x3a   :  { %s23012_s23 = smov [#allocation17]   ;;  %s23013_s25 = smov [#allocation20]  }
  0x3b   :  { %s143_s24 = sshll.u32 %s23012_s23, 4  ;;  %s165_s3 = sshll.u32 %s23013_s25, 4  ;;  %s144_s24 = int_to_ptr.vmem [resolvable:$true] %s143_s24  ;;  %s166_s3 = int_to_ptr.vmem [resolvable:$true] %s165_s3 }
  0x3c   :  { %s22694_s26 = scalar_lea.vmem %s144_s24, 64  ;;  %p22699_p7 = scmp.lt.s32.totalorder %s144_s24, %s144_s24 }
  0x3d   :  { %p22695_p6 = scmp.ne.s32.totalorder %s144_s24, %s22694_s26  ;;  %p22700_p8 = scmp.lt.s32.totalorder %s22694_s26, %s22694_s26 }
  0x3f   :  { %p22701_p9 = por %p22700_p8, %p22699_p7 }
  0x41   :  { %p22702_p10 = pnand %p22701_p9, %p22695_p6 }
  0x43   :  { %22705 = shalt.err (!%p22702_p10)
}
  0x44   :  { %146 = dma.hbm_to_vmem [thread:$0]  %s23763_s10, 64, %s144_s24, [#allocation18]  }
  0x45   :  { %s22714_s28 = scalar_lea.vmem %s166_s3, 16  ;;  %s22718_s8 = scalar_lea.vmem %s166_s3, 32 }
  0x46   :  { %p22715_p11 = scmp.ne.s32.totalorder %s166_s3, %s22714_s28  ;;  %p22719_p12 = scmp.lt.s32.totalorder %s166_s3, %s166_s3 }
  0x47   :  { %p22720_p13 = scmp.lt.s32.totalorder %s22718_s8, %s22714_s28 }
  0x49   :  { %p22721_p0 = por %p22720_p13, %p22719_p12 }
  0x4b   :  { %p22722_p1 = pnand %p22721_p0, %p22715_p11 }
  0x4d   :  { %22725 = shalt.err (!%p22722_p1)
}
  0x4e   :  { %168 = dma.hbm_to_vmem [thread:$0]  %s23765_s12, 16, %s166_s3, [#allocation21]  }
  0x4f   :  { %s23014_s20 = smov [#allocation23]   ;;  %s23015_s1 = smov [#allocation26]  }
  0x50   :  { %s187_s30 = sshll.u32 %s23014_s20, 4  ;;  %s209_s22 = sshll.u32 %s23015_s1, 4  ;;  %s188_s30 = int_to_ptr.vmem [resolvable:$true] %s187_s30  ;;  %s210_s22 = int_to_ptr.vmem [resolvable:$true] %s209_s22 }
  0x51   :  { %s22734_s4 = scalar_lea.vmem %s188_s30, 16  ;;  %s22738_s10 = scalar_lea.vmem %s188_s30, 32 }
  0x52   :  { %p22735_p2 = scmp.ne.s32.totalorder %s188_s30, %s22734_s4  ;;  %p22739_p3 = scmp.lt.s32.totalorder %s188_s30, %s188_s30 }
  0x53   :  { %p22740_p4 = scmp.lt.s32.totalorder %s22738_s10, %s22734_s4 }
  0x55   :  { %p22741_p5 = por %p22740_p4, %p22739_p3 }
  0x57   :  { %p22742_p6 = pnand %p22741_p5, %p22735_p2 }
  0x59   :  { %22745 = shalt.err (!%p22742_p6)
}
  0x5a   :  { %190 = dma.hbm_to_vmem [thread:$0]  %s23767_s14, 16, %s188_s30, [#allocation24]  }
  0x5b   :  { %s22754_s23 = scalar_lea.vmem %s210_s22, 16  ;;  %s22758_s12 = scalar_lea.vmem %s210_s22, 32 }
  0x5c   :  { %p22755_p7 = scmp.ne.s32.totalorder %s210_s22, %s22754_s23  ;;  %p22759_p8 = scmp.lt.s32.totalorder %s210_s22, %s210_s22 }
  0x5d   :  { %p22760_p9 = scmp.lt.s32.totalorder %s22758_s12, %s22754_s23 }
  0x5f   :  { %p22761_p10 = por %p22760_p9, %p22759_p8 }
  0x61   :  { %p22762_p11 = pnand %p22761_p10, %p22755_p7 }
  0x63   :  { %22765 = shalt.err (!%p22762_p11)
}
  0x64   :  { %212 = dma.hbm_to_vmem [thread:$0]  %s23769_s16, 16, %s210_s22, [#allocation27]  }
  0x65   :  { %s23016_s3 = smov [#allocation2]  }
  0x66   :  { %s42_s26 = sshll.u32 %s23016_s3, 4  ;;  %s43_s26 = int_to_ptr.vmem [resolvable:$true] %s42_s26 }
  0x67   :  { %s22774_s6 = scalar_lea.vmem %s43_s26, 1024  ;;  %p22779_p13 = scmp.lt.s32.totalorder %s43_s26, %s43_s26 }
  0x68   :  { %p22775_p12 = scmp.ne.s32.totalorder %s43_s26, %s22774_s6  ;;  %p22780_p0 = scmp.lt.s32.totalorder %s22774_s6, %s22774_s6 }
  0x6a   :  { %p22781_p1 = por %p22780_p0, %p22779_p13 }
  0x6c   :  { %p22782_p2 = pnand %p22781_p1, %p22775_p12 }
  0x6e   :  { %22785 = shalt.err (!%p22782_p2)
}
  0x6f   :  { %s23017_s14 = smov 64   ;;  %s23018_s27 = smov 4  }
  0x70   :  { %s23778_s29 = sld [smem:[#allocation44_spill]]  ;;  %s23019_s16 = smov [#allocation7]  }
  0x71   :  { %s64_s0 = sshll.u32 %s23019_s16, 4  ;;  %s65_s0 = int_to_ptr.vmem [resolvable:$true] %s64_s0 }
  0x72   :  { %s22794_s20 = scalar_lea.vmem %s65_s0, 2048  ;;  %p22799_p4 = scmp.lt.s32.totalorder %s65_s0, %s65_s0 }
  0x73   :  { %p22795_p3 = scmp.ne.s32.totalorder %s65_s0, %s22794_s20  ;;  %p22800_p5 = scmp.lt.s32.totalorder %s22794_s20, %s22794_s20 }
  0x75   :  { %p22801_p6 = por %p22800_p5, %p22799_p4 }
  0x76   :  { %48 = dma.hbm_to_vmem [thread:$0]  %s23778_s29, 1024, %s43_s26, [#allocation3], %s23017_s14, %s23017_s14, %s23018_s27  }
  0x77   :  { %p22802_p7 = pnand %p22801_p6, %p22795_p3 }
  0x79   :  { %22805 = shalt.err (!%p22802_p7)
}
  0x7a   :  { %s23020_s30 = smov 128   ;;  %s23021_s1 = smov 8  }
  0x7b   :  { %s23779_s10 = sld [smem:[#allocation46_spill]]  ;;  %s23022_s21 = smov [#allocation10]  }
  0x7c   :  { %s86_s2 = sshll.u32 %s23022_s21, 4  ;;  %s87_s2 = int_to_ptr.vmem [resolvable:$true] %s86_s2 }
  0x7d   :  { %s22814_s23 = scalar_lea.vmem %s87_s2, 40960  ;;  %p22819_p9 = scmp.lt.s32.totalorder %s87_s2, %s87_s2 }
  0x7e   :  { %p22815_p8 = scmp.ne.s32.totalorder %s87_s2, %s22814_s23  ;;  %p22820_p10 = scmp.lt.s32.totalorder %s22814_s23, %s22814_s23 }
  0x80   :  { %p22821_p11 = por %p22820_p10, %p22819_p9 }
  0x81   :  { %70 = dma.hbm_to_vmem [thread:$0]  %s23779_s10, 2048, %s65_s0, [#allocation6], %s23020_s30, %s23020_s30, %s23021_s1  }
  0x82   :  { %p22822_p12 = pnand %p22821_p11, %p22815_p8 }
  0x84   :  { %22825 = shalt.err (!%p22822_p12)
}
  0x85   :  { %s23023_s12 = smov 1280   ;;  %s23024_s24 = smov 80  }
  0x86   :  { %92 = dma.hbm_to_vmem [thread:$0]  %s23758_s5, 40960, %s87_s2, [#allocation9], %s23023_s12, %s23023_s12, %s23024_s24  }
  0x87   :  { %s23025_s26 = smov [#allocation13]  }
  0x88   :  { %s108_s6 = sshll.u32 %s23025_s26, 4  ;;  %s109_s6 = int_to_ptr.vmem [resolvable:$true] %s108_s6 }
  0x89   :  { %s22834_s28 = scalar_lea.vmem %s109_s6, 184320  ;;  %p22839_p0 = scmp.lt.s32.totalorder %s109_s6, %s109_s6 }
  0x8a   :  { %p22835_p13 = scmp.ne.s32.totalorder %s109_s6, %s22834_s28  ;;  %p22840_p1 = scmp.lt.s32.totalorder %s22834_s28, %s22834_s28 }
  0x8c   :  { %p22841_p2 = por %p22840_p1, %p22839_p0 }
  0x8e   :  { %p22842_p3 = pnand %p22841_p2, %p22835_p13 }
  0x90   :  { %22845 = shalt.err (!%p22842_p3)
}
  0x91   :  { %s23026_s8 = smov 576   ;;  %s23027_s29 = smov 36  }
  0x92   :  { %114 = dma.hbm_to_vmem [thread:$0]  %s23760_s7, 184320, %s109_s6, [#allocation12], %s23026_s8, %s23026_s8, %s23027_s29  }
  0x93   :  { %s23028_s20 = smov [#allocation16]  }
  0x94   :  { %s130_s30 = sshll.u32 %s23028_s20, 4  ;;  %s131_s30 = int_to_ptr.vmem [resolvable:$true] %s130_s30 }
  0x95   :  { %s22854_s5 = scalar_lea.vmem %s131_s30, 36864  ;;  %p22859_p5 = scmp.lt.s32.totalorder %s131_s30, %s131_s30 }
  0x96   :  { %p22855_p4 = scmp.ne.s32.totalorder %s131_s30, %s22854_s5  ;;  %p22860_p6 = scmp.lt.s32.totalorder %s22854_s5, %s22854_s5 }
  0x98   :  { %p22861_p7 = por %p22860_p6, %p22859_p5 }
  0x9a   :  { %p22862_p8 = pnand %p22861_p7, %p22855_p4 }
  0x9c   :  { %22865 = shalt.err (!%p22862_p8)
}
  0x9d   :  { %s23029_s1 = smov 256   ;;  %s23030_s22 = smov 16  }
  0x9e   :  { %136 = dma.hbm_to_vmem [thread:$0]  %s23762_s9, 36864, %s131_s30, [#allocation15], %s23029_s1, %s23029_s1, %s23030_s22  }
  0x9f   :  { %s23031_s21 = smov [#allocation19]   ;;  %s23032_s7 = smov [#allocation22]  }
  0xa0   :  { %s152_s2 = sshll.u32 %s23031_s21, 4  ;;  %s174_s23 = sshll.u32 %s23032_s7, 4  ;;  %s153_s2 = int_to_ptr.vmem [resolvable:$true] %s152_s2  ;;  %s175_s23 = int_to_ptr.vmem [resolvable:$true] %s174_s23 }
  0xa1   :  { %s22874_s12 = scalar_lea.vmem %s153_s2, 4096  ;;  %p22879_p10 = scmp.lt.s32.totalorder %s153_s2, %s153_s2 }
  0xa2   :  { %p22875_p9 = scmp.ne.s32.totalorder %s153_s2, %s22874_s12  ;;  %p22880_p11 = scmp.lt.s32.totalorder %s22874_s12, %s22874_s12 }
  0xa4   :  { %p22881_p12 = por %p22880_p11, %p22879_p10 }
  0xa6   :  { %p22882_p13 = pnand %p22881_p12, %p22875_p9 }
  0xa8   :  { %22885 = shalt.err (!%p22882_p13)
}
  0xa9   :  { %158 = dma.hbm_to_vmem [thread:$0]  %s23764_s11, 4096, %s153_s2, [#allocation18], %s23017_s14, %s23017_s14, %s23018_s27  }
  0xaa   :  { %s22894_s9 = scalar_lea.vmem %s175_s23, 1024  ;;  %p22899_p1 = scmp.lt.s32.totalorder %s175_s23, %s175_s23 }
  0xab   :  { %p22895_p0 = scmp.ne.s32.totalorder %s175_s23, %s22894_s9  ;;  %p22900_p2 = scmp.lt.s32.totalorder %s22894_s9, %s22894_s9 }
  0xad   :  { %p22901_p3 = por %p22900_p2, %p22899_p1 }
  0xaf   :  { %p22902_p4 = pnand %p22901_p3, %p22895_p0 }
  0xb1   :  { %22905 = shalt.err (!%p22902_p4)
}
  0xb2   :  { %180 = dma.hbm_to_vmem [thread:$0]  %s23766_s13, 1024, %s175_s23, [#allocation21], %s23017_s14, %s23017_s14, %s23018_s27  }
  0xb3   :  { %s23033_s6 = smov [#allocation25]   ;;  %s23034_s8 = smov [#allocation28]  }
  0xb4   :  { %s196_s28 = sshll.u32 %s23033_s6, 4  ;;  %s218_s11 = sshll.u32 %s23034_s8, 4  ;;  %s197_s28 = int_to_ptr.vmem [resolvable:$true] %s196_s28  ;;  %s219_s11 = int_to_ptr.vmem [resolvable:$true] %s218_s11 }
  0xb5   :  { %s22914_s29 = scalar_lea.vmem %s197_s28, 1024  ;;  %p22919_p6 = scmp.lt.s32.totalorder %s197_s28, %s197_s28 }
  0xb6   :  { %p22915_p5 = scmp.ne.s32.totalorder %s197_s28, %s22914_s29  ;;  %p22920_p7 = scmp.lt.s32.totalorder %s22914_s29, %s22914_s29 }
  0xb8   :  { %p22921_p8 = por %p22920_p7, %p22919_p6 }
  0xba   :  { %p22922_p9 = pnand %p22921_p8, %p22915_p5 }
  0xbc   :  { %22925 = shalt.err (!%p22922_p9)
}
  0xbd   :  { %202 = dma.hbm_to_vmem [thread:$0]  %s23768_s15, 1024, %s197_s28, [#allocation24], %s23017_s14, %s23017_s14, %s23018_s27  }
  0xbe   :  { %s22934_s13 = scalar_lea.vmem %s219_s11, 1024  ;;  %p22939_p11 = scmp.lt.s32.totalorder %s219_s11, %s219_s11 }
  0xbf   :  { %p22935_p10 = scmp.ne.s32.totalorder %s219_s11, %s22934_s13  ;;  %p22940_p12 = scmp.lt.s32.totalorder %s22934_s13, %s22934_s13 }
  0xc1   :  { %p22941_p13 = por %p22940_p12, %p22939_p11 }
  0xc3   :  { %p22942_p0 = pnand %p22941_p13, %p22935_p10 }
  0xc5   :  { %22945 = shalt.err (!%p22942_p0)
}
  0xc6   :  { %224 = dma.hbm_to_vmem [thread:$0]  %s23770_s17, 1024, %s219_s11, [#allocation27], %s23017_s14, %s23017_s14, %s23018_s27  }
  0xc7   :  { %s23035_s5 = smov [#allocation29]  }
  0xc8   :  { %s231_s1 = sshll.u32 %s23035_s5, 4  ;;  %s232_s1 = int_to_ptr.vmem [resolvable:$true] %s231_s1 }
  0xc9   :  { %s22954_s22 = scalar_lea.vmem %s232_s1, 16  ;;  %s22958_s15 = scalar_lea.vmem %s232_s1, 32 }
  0xca   :  { %p22955_p1 = scmp.ne.s32.totalorder %s232_s1, %s22954_s22  ;;  %p22959_p2 = scmp.lt.s32.totalorder %s232_s1, %s232_s1 }
  0xcb   :  { %p22960_p3 = scmp.lt.s32.totalorder %s22958_s15, %s22954_s22 }
  0xcd   :  { %p22961_p4 = por %p22960_p3, %p22959_p2 }
  0xcf   :  { %p22962_p5 = pnand %p22961_p4, %p22955_p1 }
  0xd1   :  { %22965 = shalt.err (!%p22962_p5)
}
  0xd2   :  { %234 = dma.hbm_to_vmem [thread:$0]  %s23771_s18, 16, %s232_s1, [#allocation30]  }
  0xd3   :  { %22986 = dma.done.wait [#allocation3], 1024  }
  0xd4   :  { %22987 = vsyncadd [#allocation3], 4294966272 }
  0xd5   :  { %22988 = dma.done.wait [#allocation6], 2064  }
  0xd6   :  { %22989 = vsyncadd [#allocation6], 4294965232 }
  0xd7   :  { %22990 = dma.done.wait [#allocation9], 40992  }
  0xd8   :  { %22991 = vsyncadd [#allocation9], 4294926304 }
  0xd9   :  { %22992 = dma.done.wait [#allocation12], 184640  }
  0xda   :  { %22993 = vsyncadd [#allocation12], 4294782656 }
  0xdb   :  { %22994 = dma.done.wait [#allocation15], 37008  }
  0xdc   :  { %22995 = vsyncadd [#allocation15], 4294930288 }
  0xdd   :  { %22996 = dma.done.wait [#allocation18], 4160  }
  0xde   :  { %22997 = vsyncadd [#allocation18], 4294963136 }
  0xdf   :  { %22998 = dma.done.wait [#allocation21], 1040  }
  0xe0   :  { %22999 = vsyncadd [#allocation21], 4294966256 }
  0xe1   :  { %23000 = dma.done.wait [#allocation24], 1040  }
  0xe2   :  { %23001 = vsyncadd [#allocation24], 4294966256 }
  0xe3   :  { %23002 = dma.done.wait [#allocation27], 1040  }
  0xe4   :  { %23003 = vsyncadd [#allocation27], 4294966256 }
  0xe5   :  { %23004 = dma.done.wait [#allocation30], 16  }
  0xe6   :  { %23005 = vsyncadd [#allocation30], 4294967280  ;;  %v23036_v0 = vmov 0.0   ;;  %vm23037_vm0 = vmmov 0   ;;  %v19521_v1 = vld [vmem:[#allocation2 + $0x38] sm:$0xff]   ;;  %v19522_v2 = vld [vmem:[#allocation2 + $0x30] sm:$0xff]  }
  0xe7   :  { %19409 = vmatprep.subr.bf16.mxu0 %v23036_v0  ;;  %19425 = vmatprep.mubr.msk.bf16.mxu0 %vm23037_vm0, %v23036_v0  ;;  %v19523_v3 = vld [vmem:[#allocation2 + $0x28] sm:$0xff]   ;;  %v19529_v4 = vld [vmem:[#allocation7 + $0x74] ss:$8 sps:$4 sm:$0xff]   ;;  %v19531_v5 = vld [vmem:[#allocation7 + $0x70] ss:$8 sps:$4 sm:$0xff]   ;;  %s23780_s14 = sld [smem:[#allocation43_spill]] }
  0xe8   :  { %19410 = vmatpush3.bf16.msra.mxu0 %v19521_v1  ;;  %v19524_v6 = vld [vmem:[#allocation2 + $0x20] sm:$0xff]   ;;  %512 = vmatprep.subr.bf16.mxu1 %v19529_v4  ;;  %v19525_v10 = vld [vmem:[#allocation2 + $0x18] sm:$0xff]   ;;  %v19526_v12 = vld [vmem:[#allocation2 + $0x10] sm:$0xff]   ;;  %v23038_v26 = vmov 0   ;;  %s23039_s27 = smov [#allocation31]  }
  0xe9   :  { %19411 = vmatprep.subr.bf16.mxu0 %v23036_v0  ;;  %v19532_v7 = vld [vmem:[#allocation7 + $0x64] ss:$8 sps:$4 sm:$0xff]   ;;  %513 = vmatpush1.bf16.msra.mxu1 %v19531_v5  ;;  %v19534_v8 = vld [vmem:[#allocation7 + $0x60] ss:$8 sps:$4 sm:$0xff]   ;;  %v19535_v9 = vld [vmem:[#allocation7 + $0x54] ss:$8 sps:$4 sm:$0xff]  }
  0xea   :  { %514 = vmatprep.subr.bf16.mxu1 %v19532_v7  ;;  %v19537_v11 = vld [vmem:[#allocation7 + $0x50] ss:$8 sps:$4 sm:$0xff]   ;;  %v19538_v13 = vld [vmem:[#allocation7 + $0x44] ss:$8 sps:$4 sm:$0xff]   ;;  %v19540_v14 = vld [vmem:[#allocation7 + $0x40] ss:$8 sps:$4 sm:$0xff]   ;;  %544 = vmatprep.mubr.bf16.mxu1 %v23038_v26 }
  0xeb   :  { %v19541_v15 = vld [vmem:[#allocation7 + $0x34] ss:$8 sps:$4 sm:$0xff]   ;;  %v19527_v16 = vld [vmem:[#allocation2 + $0x8] sm:$0xff]   ;;  %v19543_v17 = vld [vmem:[#allocation7 + $0x30] ss:$8 sps:$4 sm:$0xff]   ;;  %s16957_s21 = sshll.u32 %s23039_s27, 4  ;;  %s16958_s21 = int_to_ptr.vmem [resolvable:$true] %s16957_s21 }
  0xec   :  { %19412 = vmatpush3.bf16.msra.mxu0 %v19522_v2  ;;  %v19544_v18 = vld [vmem:[#allocation7 + $0x24] ss:$8 sps:$4 sm:$0xff]   ;;  %v19546_v20 = vld [vmem:[#allocation7 + $0x20] ss:$8 sps:$4 sm:$0xff]   ;;  %v19547_v21 = vld [vmem:[#allocation7 + $0x14] ss:$8 sps:$4 sm:$0xff]   ;;  %p22971_p7 = scmp.lt.s32.totalorder %s16958_s21, %s16958_s21 }
  0xed   :  { %19413 = vmatprep.subr.bf16.mxu0 %v23036_v0  ;;  %515 = vmatpush1.bf16.msra.mxu1 %v19534_v8  ;;  %v19528_v19 = vld [vmem:[#allocation2] sm:$0xff]   ;;  %v19549_v23 = vld [vmem:[#allocation7 + $0x10] ss:$8 sps:$4 sm:$0xff]   ;;  %s22966_s2 = scalar_lea.vmem %s16958_s21, 128 }
  0xee   :  { %516 = vmatprep.subr.bf16.mxu1 %v19535_v9  ;;  %v290_v22 = vld [vmem:[%s23780_s14] sm:$0xf]  ;;  %v19550_v24 = vld [vmem:[#allocation7 + $0x4] ss:$8 sps:$4 sm:$0xff]   ;;  %p22967_p6 = scmp.ne.s32.totalorder %s16958_s21, %s22966_s2  ;;  %p22972_p8 = scmp.lt.s32.totalorder %s22966_s2, %s22966_s2 }
  0xef   :  { %v19552_v25 = vld [vmem:[#allocation7] ss:$8 sps:$4 sm:$0xff]   ;;  %v16975_v56 = vld [vmem:[#allocation5] ss:$0 sm:$0xff] }
  0xf0   :  { %19414 = vmatpush3.bf16.msra.mxu0 %v19523_v3  ;;  %v19553_v27 = vld [vmem:[#allocation10 + $0x460] ss:$80 sps:$4 sm:$0xff]   ;;  %v19555_v28 = vld [vmem:[#allocation10 + $0x464] ss:$80 sps:$4 sm:$0xff]   ;;  %v19558_v29 = vld [vmem:[#allocation10 + $0x46c] ss:$80 sps:$4 sm:$0xff]   ;;  %p22973_p9 = por %p22972_p8, %p22971_p7 }
  0xf1   :  { %19415 = vmatprep.subr.bf16.mxu0 %v23036_v0  ;;  %517 = vmatpush1.bf16.msra.mxu1 %v19537_v11  ;;  %v19561_v30 = vld [vmem:[#allocation10 + $0x3c4] ss:$80 sps:$4 sm:$0xff]   ;;  %v19559_v31 = vld [vmem:[#allocation10 + $0x3c0] ss:$80 sps:$4 sm:$0xff]   ;;  %v19556_v60 = vld [vmem:[#allocation10 + $0x468] ss:$80 sps:$4 sm:$0xff]  }
  0xf2   :  { %518 = vmatprep.subr.bf16.mxu1 %v19538_v13  ;;  %v19567_v32 = vld [vmem:[#allocation10 + $0x324] ss:$80 sps:$4 sm:$0xff]   ;;  %v19565_v33 = vld [vmem:[#allocation10 + $0x320] ss:$80 sps:$4 sm:$0xff]   ;;  %v19564_v62 = vld [vmem:[#allocation10 + $0x3cc] ss:$80 sps:$4 sm:$0xff]   ;;  %p22974_p10 = pnand %p22973_p9, %p22967_p6 }
  0xf3   :  { %v19573_v34 = vld [vmem:[#allocation10 + $0x284] ss:$80 sps:$4 sm:$0xff]   ;;  %v19571_v35 = vld [vmem:[#allocation10 + $0x280] ss:$80 sps:$4 sm:$0xff]   ;;  %v19562_v3 = vld [vmem:[#allocation10 + $0x3c8] ss:$80 sps:$4 sm:$0xff]  }
  0xf4   :  { %19416 = vmatpush3.bf16.msra.mxu0 %v19524_v6  ;;  %v19579_v36 = vld [vmem:[#allocation10 + $0x1e4] ss:$80 sps:$4 sm:$0xff]   ;;  %v19577_v37 = vld [vmem:[#allocation10 + $0x1e0] ss:$80 sps:$4 sm:$0xff]   ;;  %v19570_v4 = vld [vmem:[#allocation10 + $0x32c] ss:$80 sps:$4 sm:$0xff]  }
  0xf5   :  { %19417 = vmatprep.subr.bf16.mxu0 %v23036_v0  ;;  %519 = vmatpush1.bf16.msra.mxu1 %v19540_v14  ;;  %v19585_v38 = vld [vmem:[#allocation10 + $0x144] ss:$80 sps:$4 sm:$0xff]   ;;  %v19583_v39 = vld [vmem:[#allocation10 + $0x140] ss:$80 sps:$4 sm:$0xff]   ;;  %v19568_v5 = vld [vmem:[#allocation10 + $0x328] ss:$80 sps:$4 sm:$0xff]  }
  0xf6   :  { %520 = vmatprep.subr.bf16.mxu1 %v19541_v15  ;;  %v19591_v40 = vld [vmem:[#allocation10 + $0xa4] ss:$80 sps:$4 sm:$0xff]   ;;  %v19589_v41 = vld [vmem:[#allocation10 + $0xa0] ss:$80 sps:$4 sm:$0xff]   ;;  %v19576_v6 = vld [vmem:[#allocation10 + $0x28c] ss:$80 sps:$4 sm:$0xff]  }
  0xf7   :  { %v19597_v42 = vld [vmem:[#allocation10 + $0x4] ss:$80 sps:$4 sm:$0xff]   ;;  %v19595_v43 = vld [vmem:[#allocation10] ss:$80 sps:$4 sm:$0xff]   ;;  %v19574_v7 = vld [vmem:[#allocation10 + $0x288] ss:$80 sps:$4 sm:$0xff]  }
  0xf8   :  { %19418 = vmatpush3.bf16.msra.mxu0 %v19525_v10  ;;  %v19603_v44 = vld [vmem:[#allocation10 + $0x964] ss:$80 sps:$4 sm:$0xff]   ;;  %v19601_v45 = vld [vmem:[#allocation10 + $0x960] ss:$80 sps:$4 sm:$0xff]   ;;  %v19582_v8 = vld [vmem:[#allocation10 + $0x1ec] ss:$80 sps:$4 sm:$0xff]  }
  0xf9   :  { %19419 = vmatprep.subr.bf16.mxu0 %v23036_v0  ;;  %521 = vmatpush1.bf16.msra.mxu1 %v19543_v17  ;;  %v19609_v46 = vld [vmem:[#allocation10 + $0x8c4] ss:$80 sps:$4 sm:$0xff]   ;;  %v19607_v47 = vld [vmem:[#allocation10 + $0x8c0] ss:$80 sps:$4 sm:$0xff]   ;;  %v19580_v9 = vld [vmem:[#allocation10 + $0x1e8] ss:$80 sps:$4 sm:$0xff]  }
  0xfa   :  { %522 = vmatprep.subr.bf16.mxu1 %v19544_v18  ;;  %v19615_v48 = vld [vmem:[#allocation10 + $0x824] ss:$80 sps:$4 sm:$0xff]   ;;  %v19613_v49 = vld [vmem:[#allocation10 + $0x820] ss:$80 sps:$4 sm:$0xff]   ;;  %v19588_v10 = vld [vmem:[#allocation10 + $0x14c] ss:$80 sps:$4 sm:$0xff]  }
  0xfb   :  { %v19621_v50 = vld [vmem:[#allocation10 + $0x784] ss:$80 sps:$4 sm:$0xff]   ;;  %v19619_v51 = vld [vmem:[#allocation10 + $0x780] ss:$80 sps:$4 sm:$0xff]   ;;  %v19586_v11 = vld [vmem:[#allocation10 + $0x148] ss:$80 sps:$4 sm:$0xff]  }
  0xfc   :  { %19420 = vmatpush3.bf16.msra.mxu0 %v19526_v12  ;;  %v19627_v52 = vld [vmem:[#allocation10 + $0x6e4] ss:$80 sps:$4 sm:$0xff]   ;;  %v19625_v53 = vld [vmem:[#allocation10 + $0x6e0] ss:$80 sps:$4 sm:$0xff]   ;;  %v19594_v12 = vld [vmem:[#allocation10 + $0xac] ss:$80 sps:$4 sm:$0xff]  }
  0xfd   :  { %19421 = vmatprep.subr.bf16.mxu0 %v23036_v0  ;;  %523 = vmatpush1.bf16.msra.mxu1 %v19546_v20  ;;  %v19633_v54 = vld [vmem:[#allocation10 + $0x644] ss:$80 sps:$4 sm:$0xff]   ;;  %v19631_v55 = vld [vmem:[#allocation10 + $0x640] ss:$80 sps:$4 sm:$0xff]   ;;  %v19592_v13 = vld [vmem:[#allocation10 + $0xa8] ss:$80 sps:$4 sm:$0xff]  }
  0xfe   :  { %524 = vmatprep.subr.bf16.mxu1 %v19547_v21  ;;  %v19600_v14 = vld [vmem:[#allocation10 + $0xc] ss:$80 sps:$4 sm:$0xff]   ;;  %v19598_v15 = vld [vmem:[#allocation10 + $0x8] ss:$80 sps:$4 sm:$0xff]  }
  0xff   :  { %v19604_v17 = vld [vmem:[#allocation10 + $0x968] ss:$80 sps:$4 sm:$0xff]   ;;  %v19612_v18 = vld [vmem:[#allocation10 + $0x8cc] ss:$80 sps:$4 sm:$0xff]  }
 0x100   :  { %19422 = vmatpush3.bf16.msra.mxu0 %v19527_v16  ;;  %v19606_v16 = vld [vmem:[#allocation10 + $0x96c] ss:$80 sps:$4 sm:$0xff]   ;;  %v19616_v21 = vld [vmem:[#allocation10 + $0x828] ss:$80 sps:$4 sm:$0xff]  }
 0x101   :  { %19423 = vmatprep.subr.bf16.mxu0 %v23036_v0  ;;  %525 = vmatpush1.bf16.msra.mxu1 %v19549_v23  ;;  %v19618_v20 = vld [vmem:[#allocation10 + $0x82c] ss:$80 sps:$4 sm:$0xff]   ;;  %v19622_v23 = vld [vmem:[#allocation10 + $0x788] ss:$80 sps:$4 sm:$0xff]  }
 0x102   :  { %526 = vmatprep.subr.bf16.mxu1 %v19550_v24  ;;  %v19630_v24 = vld [vmem:[#allocation10 + $0x6ec] ss:$80 sps:$4 sm:$0xff]  }
 0x104   :  { %19424 = vmatpush3.bf16.msra.mxu0 %v19528_v19  ;;  %v19610_v19 = vld [vmem:[#allocation10 + $0x8c8] ss:$80 sps:$4 sm:$0xff]  }
 0x105   :  { %527 = vmatpush1.bf16.msra.mxu1 %v19552_v25  ;;  %2583 = vmatprep.subr.bf16.mxu0 %v19555_v28  ;;  %v19628_v25 = vld [vmem:[#allocation10 + $0x6e8] ss:$80 sps:$4 sm:$0xff]  }
 0x106   :  { %2624 = vmatprep.subr.bf16.mxu1 %v19558_v29  ;;  %v19634_v28 = vld [vmem:[#allocation10 + $0x648] ss:$80 sps:$4 sm:$0xff]   ;;  %v19639_v29 = vld [vmem:[#allocation10 + $0x5a4] ss:$80 sps:$4 sm:$0xff]  }
 0x107   :  { %19426 = vmatmul.mubr.bf16.vlgmr.msra.gmra.mxu0 %v290_v22  ;;  %v19624_v22 = vld [vmem:[#allocation10 + $0x78c] ss:$80 sps:$4 sm:$0xff]  }
 0x108   :  { %2584 = vmatpush1.bf16.msra.mxu0 %v19553_v27  ;;  %v19636_v27 = vld [vmem:[#allocation10 + $0x64c] ss:$80 sps:$4 sm:$0xff]  }
 0x109   :  { %2585 = vmatprep.subr.bf16.mxu0 %v19561_v30  ;;  %v19642_v30 = vld [vmem:[#allocation10 + $0x5ac] ss:$80 sps:$4 sm:$0xff]  }
 0x10c   :  { %2586 = vmatpush1.bf16.msra.mxu0 %v19559_v31  ;;  %v19637_v31 = vld [vmem:[#allocation10 + $0x5a0] ss:$80 sps:$4 sm:$0xff]  }
 0x10d   :  { %2587 = vmatprep.subr.bf16.mxu0 %v19567_v32  ;;  %v19640_v32 = vld [vmem:[#allocation10 + $0x5a8] ss:$80 sps:$4 sm:$0xff]  }
 0x110   :  { %2588 = vmatpush1.bf16.msra.mxu0 %v19565_v33  ;;  %v19645_v33 = vld [vmem:[#allocation10 + $0x504] ss:$80 sps:$4 sm:$0xff]  }
 0x111   :  { %2589 = vmatprep.subr.bf16.mxu0 %v19573_v34  ;;  %v19648_v34 = vld [vmem:[#allocation10 + $0x50c] ss:$80 sps:$4 sm:$0xff]  }
 0x114   :  { %2590 = vmatpush1.bf16.msra.mxu0 %v19571_v35  ;;  %v19643_v35 = vld [vmem:[#allocation10 + $0x500] ss:$80 sps:$4 sm:$0xff]  }
 0x115   :  { %2591 = vmatprep.subr.bf16.mxu0 %v19579_v36  ;;  %v19646_v36 = vld [vmem:[#allocation10 + $0x508] ss:$80 sps:$4 sm:$0xff]  }
 0x118   :  { %2592 = vmatpush1.bf16.msra.mxu0 %v19577_v37  ;;  %v19651_v37 = vld [vmem:[#allocation10 + $0x474] ss:$80 sps:$4 sm:$0xff]  }
 0x119   :  { %2593 = vmatprep.subr.bf16.mxu0 %v19585_v38  ;;  %v19654_v38 = vld [vmem:[#allocation10 + $0x47c] ss:$80 sps:$4 sm:$0xff]  }
 0x11c   :  { %2594 = vmatpush1.bf16.msra.mxu0 %v19583_v39  ;;  %v422_v39 = vlaneseq }
 0x11d   :  { %2595 = vmatprep.subr.bf16.mxu0 %v19591_v40 }
 0x11e   :  { %v23223_v40 = vshrl.u32 %v422_v39, 7  ;;  %v19718_v39 = vld [vmem:[#allocation10 + $0x798] ss:$80 sps:$4 sm:$0xff]  }
 0x120   :  { %2596 = vmatpush1.bf16.msra.mxu0 %v19589_v41  ;;  %v420_v41 = vld [vmem:[#allocation8] sm:$0x3] }
 0x121   :  { %2597 = vmatprep.subr.bf16.mxu0 %v19597_v42  ;;  %v23226_v42 = vsub.s32 0, %v23223_v40 }
 0x124   :  { %2598 = vmatpush1.bf16.msra.mxu0 %v19595_v43  ;;  %v23229_v43 = vsub.s32 1, %v23223_v40 }
 0x125   :  { %2599 = vmatprep.subr.bf16.mxu0 %v19603_v44  ;;  %v425_v44 = vrot.slane %v420_v41, %v23226_v42 }
 0x128   :  { %2600 = vmatpush2.bf16.msra.mxu0 %v19601_v45  ;;  %v429_v45 = vrot.slane %v420_v41, %v23229_v43  ;;  %v19723_v41 = vld [vmem:[#allocation10 + $0x6f4] ss:$80 sps:$4 sm:$0xff]  }
 0x129   :  { %2601 = vmatprep.subr.bf16.mxu0 %v19609_v46 }
 0x12c   :  { %2602 = vmatpush2.bf16.msra.mxu0 %v19607_v47 }
 0x12d   :  { %2603 = vmatprep.subr.bf16.mxu0 %v19615_v48 }
 0x130   :  { %2604 = vmatpush2.bf16.msra.mxu0 %v19613_v49 }
 0x131   :  { %2605 = vmatprep.subr.bf16.mxu0 %v19621_v50 }
 0x134   :  { %2606 = vmatpush2.bf16.msra.mxu0 %v19619_v51 }
 0x135   :  { %2607 = vmatprep.subr.bf16.mxu0 %v19627_v52 }
 0x138   :  { %2608 = vmatpush2.bf16.msra.mxu0 %v19625_v53  ;;  %v19649_v53 = vld [vmem:[#allocation10 + $0x470] ss:$80 sps:$4 sm:$0xff]  }
 0x139   :  { %2609 = vmatprep.subr.bf16.mxu0 %v19633_v54  ;;  %v19652_v54 = vld [vmem:[#allocation10 + $0x478] ss:$80 sps:$4 sm:$0xff]  }
 0x13c   :  { %2610 = vmatpush2.bf16.msra.mxu0 %v19631_v55 }
 0x13d   :  { %2611 = vmatprep.subr.bf16.mxu0 %v19639_v29  ;;  %v19708_v29 = vld [vmem:[#allocation10 + $0x8dc] ss:$80 sps:$4 sm:$0xff]  }
 0x140   :  { %2612 = vmatpush2.bf16.msra.mxu0 %v19637_v31  ;;  %v19706_v31 = vld [vmem:[#allocation10 + $0x8d8] ss:$80 sps:$4 sm:$0xff]  }
 0x141   :  { %2613 = vmatprep.subr.bf16.mxu0 %v19645_v33  ;;  %v19714_v33 = vld [vmem:[#allocation10 + $0x83c] ss:$80 sps:$4 sm:$0xff]  }
 0x144   :  { %2614 = vmatpush2.bf16.msra.mxu0 %v19643_v35  ;;  %v19712_v35 = vld [vmem:[#allocation10 + $0x838] ss:$80 sps:$4 sm:$0xff]  }
 0x145   :  { %2665 = vmatprep.subr.bf16.mxu0 %v19651_v37  ;;  %v19720_v37 = vld [vmem:[#allocation10 + $0x79c] ss:$80 sps:$4 sm:$0xff]  }
 0x1c7   :  { %v396_v57 = vpop.f32.mrf.mxu0 }
 0x1c8   :  { %v397_v58 = vadd.f32 %v16975_v56, %v396_v57  ;;  %v19657_v57 = vld [vmem:[#allocation10 + $0x3d4] ss:$80 sps:$4 sm:$0xff]  }
 0x1c9   :  { %v19427_v59 = vpop.f32.mrf.mxu0 }
 0x1ca   :  { %v402_v61 = vmax.f32 %v397_v58, 0.0  ;;  %v19655_v59 = vld [vmem:[#allocation10 + $0x3d0] ss:$80 sps:$4 sm:$0xff]  }
 0x1cb   :  { %v399_v63 = vpop.f32.mrf.mxu0 }
 0x1cc   :  { %v403_v1 = vpack.c.bf16 %v402_v61, %v402_v61  ;;  %v19660_v61 = vld [vmem:[#allocation10 + $0x3dc] ss:$80 sps:$4 sm:$0xff]  }
 0x1cd   :  { %v19428_v2 = vpop.f32.mrf.mxu0  ;;  %v19666_v63 = vld [vmem:[#allocation10 + $0x33c] ss:$80 sps:$4 sm:$0xff]  }
 0x1ce   :  { %545 = vmatmul.mubr.bf16.vlgmr.msra.gmra.mxu1 %v403_v1  ;;  %v19661_v1 = vld [vmem:[#allocation10 + $0x330] ss:$80 sps:$4 sm:$0xff]   ;;  %v19664_v2 = vld [vmem:[#allocation10 + $0x338] ss:$80 sps:$4 sm:$0xff]  }
 0x1cf   :  { %2625 = vmatpush1.bf16.msra.mxu1 %v19556_v60  ;;  %v19658_v60 = vld [vmem:[#allocation10 + $0x3d8] ss:$80 sps:$4 sm:$0xff]  }
 0x1d0   :  { %2626 = vmatprep.subr.bf16.mxu1 %v19564_v62  ;;  %v19663_v62 = vld [vmem:[#allocation10 + $0x334] ss:$80 sps:$4 sm:$0xff]  }
 0x1d3   :  { %2627 = vmatpush1.bf16.msra.mxu1 %v19562_v3  ;;  %v19669_v3 = vld [vmem:[#allocation10 + $0x294] ss:$80 sps:$4 sm:$0xff]  }
 0x1d4   :  { %2628 = vmatprep.subr.bf16.mxu1 %v19570_v4  ;;  %v19672_v4 = vld [vmem:[#allocation10 + $0x29c] ss:$80 sps:$4 sm:$0xff]  }
 0x1d7   :  { %2629 = vmatpush1.bf16.msra.mxu1 %v19568_v5  ;;  %v19667_v5 = vld [vmem:[#allocation10 + $0x290] ss:$80 sps:$4 sm:$0xff]  }
 0x1d8   :  { %2630 = vmatprep.subr.bf16.mxu1 %v19576_v6  ;;  %v19670_v6 = vld [vmem:[#allocation10 + $0x298] ss:$80 sps:$4 sm:$0xff]  }
 0x1db   :  { %2631 = vmatpush1.bf16.msra.mxu1 %v19574_v7  ;;  %v19675_v7 = vld [vmem:[#allocation10 + $0x1f4] ss:$80 sps:$4 sm:$0xff]  }
 0x1dc   :  { %2632 = vmatprep.subr.bf16.mxu1 %v19582_v8  ;;  %v19678_v8 = vld [vmem:[#allocation10 + $0x1fc] ss:$80 sps:$4 sm:$0xff]  }
 0x1df   :  { %2633 = vmatpush1.bf16.msra.mxu1 %v19580_v9  ;;  %v19673_v9 = vld [vmem:[#allocation10 + $0x1f0] ss:$80 sps:$4 sm:$0xff]  }
 0x1e0   :  { %2634 = vmatprep.subr.bf16.mxu1 %v19588_v10  ;;  %v19676_v10 = vld [vmem:[#allocation10 + $0x1f8] ss:$80 sps:$4 sm:$0xff]  }
 0x1e3   :  { %2635 = vmatpush1.bf16.msra.mxu1 %v19586_v11  ;;  %v19681_v11 = vld [vmem:[#allocation10 + $0x154] ss:$80 sps:$4 sm:$0xff]  }
 0x1e4   :  { %2636 = vmatprep.subr.bf16.mxu1 %v19594_v12  ;;  %v19684_v12 = vld [vmem:[#allocation10 + $0x15c] ss:$80 sps:$4 sm:$0xff]  }
 0x1e7   :  { %2637 = vmatpush1.bf16.msra.mxu1 %v19592_v13  ;;  %v19679_v13 = vld [vmem:[#allocation10 + $0x150] ss:$80 sps:$4 sm:$0xff]  }
 0x1e8   :  { %2638 = vmatprep.subr.bf16.mxu1 %v19600_v14  ;;  %v19682_v14 = vld [vmem:[#allocation10 + $0x158] ss:$80 sps:$4 sm:$0xff]  }
 0x1eb   :  { %2639 = vmatpush1.bf16.msra.mxu1 %v19598_v15  ;;  %v19687_v15 = vld [vmem:[#allocation10 + $0xb4] ss:$80 sps:$4 sm:$0xff]  }
 0x1ec   :  { %2640 = vmatprep.subr.bf16.mxu1 %v19606_v16  ;;  %v19690_v16 = vld [vmem:[#allocation10 + $0xbc] ss:$80 sps:$4 sm:$0xff]  }
 0x1ef   :  { %2641 = vmatpush2.bf16.msra.mxu1 %v19604_v17  ;;  %v19685_v17 = vld [vmem:[#allocation10 + $0xb0] ss:$80 sps:$4 sm:$0xff]  }
 0x1f0   :  { %2642 = vmatprep.subr.bf16.mxu1 %v19612_v18  ;;  %v19688_v18 = vld [vmem:[#allocation10 + $0xb8] ss:$80 sps:$4 sm:$0xff]  }
 0x1f3   :  { %2643 = vmatpush2.bf16.msra.mxu1 %v19610_v19  ;;  %v19693_v19 = vld [vmem:[#allocation10 + $0x14] ss:$80 sps:$4 sm:$0xff]  }
 0x1f4   :  { %2644 = vmatprep.subr.bf16.mxu1 %v19618_v20  ;;  %v19696_v20 = vld [vmem:[#allocation10 + $0x1c] ss:$80 sps:$4 sm:$0xff]  }
 0x1f7   :  { %2645 = vmatpush2.bf16.msra.mxu1 %v19616_v21  ;;  %v19691_v21 = vld [vmem:[#allocation10 + $0x10] ss:$80 sps:$4 sm:$0xff]  }
 0x1f8   :  { %2646 = vmatprep.subr.bf16.mxu1 %v19624_v22  ;;  %v19694_v22 = vld [vmem:[#allocation10 + $0x18] ss:$80 sps:$4 sm:$0xff]  }
 0x1fb   :  { %2647 = vmatpush2.bf16.msra.mxu1 %v19622_v23  ;;  %v19699_v23 = vld [vmem:[#allocation10 + $0x974] ss:$80 sps:$4 sm:$0xff]  }
 0x1fc   :  { %2648 = vmatprep.subr.bf16.mxu1 %v19630_v24  ;;  %v19702_v24 = vld [vmem:[#allocation10 + $0x97c] ss:$80 sps:$4 sm:$0xff]  }
 0x1ff   :  { %2649 = vmatpush2.bf16.msra.mxu1 %v19628_v25  ;;  %v19697_v25 = vld [vmem:[#allocation10 + $0x970] ss:$80 sps:$4 sm:$0xff]  }
 0x200   :  { %2650 = vmatprep.subr.bf16.mxu1 %v19636_v27  ;;  %v19700_v27 = vld [vmem:[#allocation10 + $0x978] ss:$80 sps:$4 sm:$0xff]  }
 0x203   :  { %2651 = vmatpush2.bf16.msra.mxu1 %v19634_v28  ;;  %v19705_v28 = vld [vmem:[#allocation10 + $0x8d4] ss:$80 sps:$4 sm:$0xff]  }
 0x204   :  { %2652 = vmatprep.subr.bf16.mxu1 %v19642_v30  ;;  %v19703_v30 = vld [vmem:[#allocation10 + $0x8d0] ss:$80 sps:$4 sm:$0xff]  }
 0x207   :  { %2653 = vmatpush2.bf16.msra.mxu1 %v19640_v32  ;;  %v19711_v32 = vld [vmem:[#allocation10 + $0x834] ss:$80 sps:$4 sm:$0xff]  }
 0x208   :  { %2654 = vmatprep.subr.bf16.mxu1 %v19648_v34  ;;  %v19709_v34 = vld [vmem:[#allocation10 + $0x830] ss:$80 sps:$4 sm:$0xff]  }
 0x20b   :  { %2655 = vmatpush2.bf16.msra.mxu1 %v19646_v36  ;;  %v19717_v36 = vld [vmem:[#allocation10 + $0x794] ss:$80 sps:$4 sm:$0xff]  }
 0x20c   :  { %2706 = vmatprep.subr.bf16.mxu1 %v19654_v38  ;;  %v19715_v38 = vld [vmem:[#allocation10 + $0x790] ss:$80 sps:$4 sm:$0xff]  }
 0x28e   :  { %v546_v46 = vpop.f32.mrf.mxu1 }
 0x28f   :  { %v547_v47 = vadd.f32 %v546_v46, %v425_v44  ;;  %v19726_v44 = vld [vmem:[#allocation10 + $0x6fc] ss:$80 sps:$4 sm:$0xff]   ;;  %v19724_v46 = vld [vmem:[#allocation10 + $0x6f8] ss:$80 sps:$4 sm:$0xff]  }
 0x290   :  { %v548_v48 = vpop.f32.mrf.mxu1 }
 0x291   :  { %v549_v49 = vadd.f32 %v548_v48, %v429_v45  ;;  %v553_v50 = vmax.f32 %v547_v47, 0.0  ;;  %v19721_v45 = vld [vmem:[#allocation10 + $0x6f0] ss:$80 sps:$4 sm:$0xff]   ;;  %v19729_v47 = vld [vmem:[#allocation10 + $0x654] ss:$80 sps:$4 sm:$0xff]  }
 0x292   :  { %v550_v51 = vpop.f32.mrf.mxu1  ;;  %v19732_v48 = vld [vmem:[#allocation10 + $0x65c] ss:$80 sps:$4 sm:$0xff]  }
 0x293   :  { %v554_v52 = vmax.f32 %v549_v49, 0.0  ;;  %v23235_v58 = vpack.c.bf16 %v553_v50, %v553_v50  ;;  %v19727_v49 = vld [vmem:[#allocation10 + $0x650] ss:$80 sps:$4 sm:$0xff]   ;;  %v19730_v50 = vld [vmem:[#allocation10 + $0x658] ss:$80 sps:$4 sm:$0xff]  }
 0x294   :  { %v551_v55 = vpop.f32.mrf.mxu1  ;;  %v19735_v51 = vld [vmem:[#allocation10 + $0x5b4] ss:$80 sps:$4 sm:$0xff]  }
 0x295   :  { %v23233_v56 = vpack.c.bf16 %v554_v52, %v554_v52  ;;  %v19738_v52 = vld [vmem:[#allocation10 + $0x5bc] ss:$80 sps:$4 sm:$0xff]   ;;  %v19741_v55 = vld [vmem:[#allocation10 + $0x514] ss:$80 sps:$4 sm:$0xff]  }
 0x297   :  { %2615 = vmatprep.mubr.bf16.mxu0 %v23233_v56  ;;  %2656 = vmatprep.mubr.bf16.mxu1 %v23233_v56 }
 0x298   :  { %2616 = vmatmul.mubr.bf16.vlgmr.msra.gmra.mxu0 %v23235_v58  ;;  %2657 = vmatmul.mubr.bf16.vlgmr.msra.gmra.mxu1 %v23235_v58 }
 0x299   :  { %2666 = vmatpush1.bf16.msra.mxu0 %v19649_v53  ;;  %2707 = vmatpush1.bf16.msra.mxu1 %v19652_v54  ;;  %v19733_v53 = vld [vmem:[#allocation10 + $0x5b0] ss:$80 sps:$4 sm:$0xff]   ;;  %v19736_v54 = vld [vmem:[#allocation10 + $0x5b8] ss:$80 sps:$4 sm:$0xff]  }
 0x29a   :  { %2697 = vmatprep.mubr.bf16.mxu0 %v23233_v56  ;;  %2738 = vmatprep.mubr.bf16.mxu1 %v23233_v56 }
 0x29b   :  { %2667 = vmatprep.subr.bf16.mxu0 %v19657_v57  ;;  %2708 = vmatprep.subr.bf16.mxu1 %v19660_v61  ;;  %v19744_v57 = vld [vmem:[#allocation10 + $0x51c] ss:$80 sps:$4 sm:$0xff]   ;;  %v19747_v61 = vld [vmem:[#allocation10 + $0x484] ss:$80 sps:$4 sm:$0xff]  }
 0x29d   :  { %2668 = vmatpush1.bf16.msra.mxu0 %v19655_v59  ;;  %2709 = vmatpush1.bf16.msra.mxu1 %v19658_v60  ;;  %v19739_v59 = vld [vmem:[#allocation10 + $0x510] ss:$80 sps:$4 sm:$0xff]   ;;  %v19742_v60 = vld [vmem:[#allocation10 + $0x518] ss:$80 sps:$4 sm:$0xff]  }
 0x29e   :  { %2669 = vmatprep.subr.bf16.mxu0 %v19663_v62  ;;  %2710 = vmatprep.subr.bf16.mxu1 %v19666_v63  ;;  %v19750_v62 = vld [vmem:[#allocation10 + $0x48c] ss:$80 sps:$4 sm:$0xff]   ;;  %v19745_v63 = vld [vmem:[#allocation10 + $0x480] ss:$80 sps:$4 sm:$0xff]  }
 0x2a1   :  { %2670 = vmatpush1.bf16.msra.mxu0 %v19661_v1  ;;  %2711 = vmatpush1.bf16.msra.mxu1 %v19664_v2  ;;  %v19748_v1 = vld [vmem:[#allocation10 + $0x488] ss:$80 sps:$4 sm:$0xff]   ;;  %v19753_v2 = vld [vmem:[#allocation10 + $0x3e4] ss:$80 sps:$4 sm:$0xff]  }
 0x2a2   :  { %2671 = vmatprep.subr.bf16.mxu0 %v19669_v3  ;;  %2712 = vmatprep.subr.bf16.mxu1 %v19672_v4  ;;  %v19756_v3 = vld [vmem:[#allocation10 + $0x3ec] ss:$80 sps:$4 sm:$0xff]   ;;  %v19751_v4 = vld [vmem:[#allocation10 + $0x3e0] ss:$80 sps:$4 sm:$0xff]  }
 0x2a5   :  { %2672 = vmatpush1.bf16.msra.mxu0 %v19667_v5  ;;  %2713 = vmatpush1.bf16.msra.mxu1 %v19670_v6  ;;  %v19754_v5 = vld [vmem:[#allocation10 + $0x3e8] ss:$80 sps:$4 sm:$0xff]   ;;  %v19759_v6 = vld [vmem:[#allocation10 + $0x344] ss:$80 sps:$4 sm:$0xff]  }
 0x2a6   :  { %2673 = vmatprep.subr.bf16.mxu0 %v19675_v7  ;;  %2714 = vmatprep.subr.bf16.mxu1 %v19678_v8  ;;  %v19762_v7 = vld [vmem:[#allocation10 + $0x34c] ss:$80 sps:$4 sm:$0xff]   ;;  %v19757_v8 = vld [vmem:[#allocation10 + $0x340] ss:$80 sps:$4 sm:$0xff]  }
 0x2a9   :  { %2674 = vmatpush1.bf16.msra.mxu0 %v19673_v9  ;;  %2715 = vmatpush1.bf16.msra.mxu1 %v19676_v10  ;;  %v19760_v9 = vld [vmem:[#allocation10 + $0x348] ss:$80 sps:$4 sm:$0xff]   ;;  %v19765_v10 = vld [vmem:[#allocation10 + $0x2a4] ss:$80 sps:$4 sm:$0xff]  }
 0x2aa   :  { %2675 = vmatprep.subr.bf16.mxu0 %v19681_v11  ;;  %2716 = vmatprep.subr.bf16.mxu1 %v19684_v12  ;;  %v19768_v11 = vld [vmem:[#allocation10 + $0x2ac] ss:$80 sps:$4 sm:$0xff]   ;;  %v19763_v12 = vld [vmem:[#allocation10 + $0x2a0] ss:$80 sps:$4 sm:$0xff]  }
 0x2ad   :  { %2676 = vmatpush1.bf16.msra.mxu0 %v19679_v13  ;;  %2717 = vmatpush1.bf16.msra.mxu1 %v19682_v14  ;;  %v19766_v13 = vld [vmem:[#allocation10 + $0x2a8] ss:$80 sps:$4 sm:$0xff]   ;;  %v19771_v14 = vld [vmem:[#allocation10 + $0x204] ss:$80 sps:$4 sm:$0xff]  }
 0x2ae   :  { %2677 = vmatprep.subr.bf16.mxu0 %v19687_v15  ;;  %2718 = vmatprep.subr.bf16.mxu1 %v19690_v16  ;;  %v19769_v15 = vld [vmem:[#allocation10 + $0x200] ss:$80 sps:$4 sm:$0xff]   ;;  %v19774_v16 = vld [vmem:[#allocation10 + $0x20c] ss:$80 sps:$4 sm:$0xff]  }
 0x2b1   :  { %2678 = vmatpush1.bf16.msra.mxu0 %v19685_v17  ;;  %2719 = vmatpush1.bf16.msra.mxu1 %v19688_v18  ;;  %v19772_v17 = vld [vmem:[#allocation10 + $0x208] ss:$80 sps:$4 sm:$0xff]   ;;  %v19777_v18 = vld [vmem:[#allocation10 + $0x164] ss:$80 sps:$4 sm:$0xff]  }
 0x2b2   :  { %2679 = vmatprep.subr.bf16.mxu0 %v19693_v19  ;;  %2720 = vmatprep.subr.bf16.mxu1 %v19696_v20  ;;  %v19775_v19 = vld [vmem:[#allocation10 + $0x160] ss:$80 sps:$4 sm:$0xff]   ;;  %v19780_v20 = vld [vmem:[#allocation10 + $0x16c] ss:$80 sps:$4 sm:$0xff]  }
 0x2b5   :  { %2680 = vmatpush1.bf16.msra.mxu0 %v19691_v21  ;;  %2721 = vmatpush1.bf16.msra.mxu1 %v19694_v22  ;;  %v19778_v21 = vld [vmem:[#allocation10 + $0x168] ss:$80 sps:$4 sm:$0xff]   ;;  %v19783_v22 = vld [vmem:[#allocation10 + $0xc4] ss:$80 sps:$4 sm:$0xff]  }
 0x2b6   :  { %2681 = vmatprep.subr.bf16.mxu0 %v19699_v23  ;;  %2722 = vmatprep.subr.bf16.mxu1 %v19702_v24  ;;  %v19781_v23 = vld [vmem:[#allocation10 + $0xc0] ss:$80 sps:$4 sm:$0xff]   ;;  %v19786_v24 = vld [vmem:[#allocation10 + $0xcc] ss:$80 sps:$4 sm:$0xff]  }
 0x2b9   :  { %2682 = vmatpush2.bf16.msra.mxu0 %v19697_v25  ;;  %2723 = vmatpush2.bf16.msra.mxu1 %v19700_v27  ;;  %v19784_v25 = vld [vmem:[#allocation10 + $0xc8] ss:$80 sps:$4 sm:$0xff]   ;;  %v19789_v27 = vld [vmem:[#allocation10 + $0x24] ss:$80 sps:$4 sm:$0xff]  }
 0x2ba   :  { %2683 = vmatprep.subr.bf16.mxu0 %v19705_v28  ;;  %2724 = vmatprep.subr.bf16.mxu1 %v19708_v29  ;;  %v19787_v28 = vld [vmem:[#allocation10 + $0x20] ss:$80 sps:$4 sm:$0xff]   ;;  %v19792_v29 = vld [vmem:[#allocation10 + $0x2c] ss:$80 sps:$4 sm:$0xff]  }
 0x2bd   :  { %2684 = vmatpush2.bf16.msra.mxu0 %v19703_v30  ;;  %2725 = vmatpush2.bf16.msra.mxu1 %v19706_v31  ;;  %v19790_v30 = vld [vmem:[#allocation10 + $0x28] ss:$80 sps:$4 sm:$0xff]   ;;  %v19795_v31 = vld [vmem:[#allocation10 + $0x984] ss:$80 sps:$4 sm:$0xff]  }
 0x2be   :  { %2685 = vmatprep.subr.bf16.mxu0 %v19711_v32  ;;  %2726 = vmatprep.subr.bf16.mxu1 %v19714_v33  ;;  %v19793_v32 = vld [vmem:[#allocation10 + $0x980] ss:$80 sps:$4 sm:$0xff]   ;;  %v19798_v33 = vld [vmem:[#allocation10 + $0x98c] ss:$80 sps:$4 sm:$0xff]  }
 0x2c1   :  { %2686 = vmatpush2.bf16.msra.mxu0 %v19709_v34  ;;  %2727 = vmatpush2.bf16.msra.mxu1 %v19712_v35  ;;  %v19796_v34 = vld [vmem:[#allocation10 + $0x988] ss:$80 sps:$4 sm:$0xff]   ;;  %v19801_v35 = vld [vmem:[#allocation10 + $0x8e4] ss:$80 sps:$4 sm:$0xff]  }
 0x2c2   :  { %2687 = vmatprep.subr.bf16.mxu0 %v19717_v36  ;;  %2728 = vmatprep.subr.bf16.mxu1 %v19720_v37  ;;  %v19799_v36 = vld [vmem:[#allocation10 + $0x8e0] ss:$80 sps:$4 sm:$0xff]   ;;  %v19804_v37 = vld [vmem:[#allocation10 + $0x8ec] ss:$80 sps:$4 sm:$0xff]  }
 0x2c5   :  { %2688 = vmatpush2.bf16.msra.mxu0 %v19715_v38  ;;  %2729 = vmatpush2.bf16.msra.mxu1 %v19718_v39  ;;  %v19802_v38 = vld [vmem:[#allocation10 + $0x8e8] ss:$80 sps:$4 sm:$0xff]   ;;  %v19807_v39 = vld [vmem:[#allocation10 + $0x844] ss:$80 sps:$4 sm:$0xff]  }
 0x2c6   :  { %2689 = vmatprep.subr.bf16.mxu0 %v19723_v41  ;;  %2730 = vmatprep.subr.bf16.mxu1 %v19726_v44  ;;  %v19805_v41 = vld [vmem:[#allocation10 + $0x840] ss:$80 sps:$4 sm:$0xff]   ;;  %v19810_v44 = vld [vmem:[#allocation10 + $0x84c] ss:$80 sps:$4 sm:$0xff]  }
 0x2c9   :  { %2690 = vmatpush2.bf16.msra.mxu0 %v19721_v45  ;;  %2731 = vmatpush2.bf16.msra.mxu1 %v19724_v46  ;;  %v19808_v45 = vld [vmem:[#allocation10 + $0x848] ss:$80 sps:$4 sm:$0xff]   ;;  %v19813_v46 = vld [vmem:[#allocation10 + $0x7a4] ss:$80 sps:$4 sm:$0xff]  }
 0x2ca   :  { %2691 = vmatprep.subr.bf16.mxu0 %v19729_v47  ;;  %2732 = vmatprep.subr.bf16.mxu1 %v19732_v48  ;;  %v19811_v47 = vld [vmem:[#allocation10 + $0x7a0] ss:$80 sps:$4 sm:$0xff]   ;;  %v19816_v48 = vld [vmem:[#allocation10 + $0x7ac] ss:$80 sps:$4 sm:$0xff]  }
 0x2cd   :  { %2692 = vmatpush2.bf16.msra.mxu0 %v19727_v49  ;;  %2733 = vmatpush2.bf16.msra.mxu1 %v19730_v50  ;;  %v19814_v49 = vld [vmem:[#allocation10 + $0x7a8] ss:$80 sps:$4 sm:$0xff]   ;;  %v19819_v50 = vld [vmem:[#allocation10 + $0x704] ss:$80 sps:$4 sm:$0xff]  }
 0x2ce   :  { %2693 = vmatprep.subr.bf16.mxu0 %v19735_v51  ;;  %2734 = vmatprep.subr.bf16.mxu1 %v19738_v52  ;;  %v19817_v51 = vld [vmem:[#allocation10 + $0x700] ss:$80 sps:$4 sm:$0xff]   ;;  %v19822_v52 = vld [vmem:[#allocation10 + $0x70c] ss:$80 sps:$4 sm:$0xff]  }
 0x2d1   :  { %2694 = vmatpush2.bf16.msra.mxu0 %v19733_v53  ;;  %2735 = vmatpush2.bf16.msra.mxu1 %v19736_v54  ;;  %v19820_v53 = vld [vmem:[#allocation10 + $0x708] ss:$80 sps:$4 sm:$0xff]   ;;  %v19825_v54 = vld [vmem:[#allocation10 + $0x664] ss:$80 sps:$4 sm:$0xff]  }
 0x2d2   :  { %2695 = vmatprep.subr.bf16.mxu0 %v19741_v55  ;;  %2736 = vmatprep.subr.bf16.mxu1 %v19744_v57  ;;  %v19823_v55 = vld [vmem:[#allocation10 + $0x660] ss:$80 sps:$4 sm:$0xff]   ;;  %v19828_v57 = vld [vmem:[#allocation10 + $0x66c] ss:$80 sps:$4 sm:$0xff]  }
 0x2d5   :  { %2696 = vmatpush2.bf16.msra.mxu0 %v19739_v59  ;;  %2737 = vmatpush2.bf16.msra.mxu1 %v19742_v60  ;;  %v19826_v59 = vld [vmem:[#allocation10 + $0x668] ss:$80 sps:$4 sm:$0xff]   ;;  %v19831_v60 = vld [vmem:[#allocation10 + $0x5c4] ss:$80 sps:$4 sm:$0xff]  }
 0x2d6   :  { %2747 = vmatprep.subr.bf16.mxu0 %v19747_v61  ;;  %2788 = vmatprep.subr.bf16.mxu1 %v19750_v62  ;;  %v19829_v61 = vld [vmem:[#allocation10 + $0x5c0] ss:$80 sps:$4 sm:$0xff]   ;;  %v19834_v62 = vld [vmem:[#allocation10 + $0x5cc] ss:$80 sps:$4 sm:$0xff]  }
 0x2d8   :  { %2698 = vmatmul.mubr.bf16.vlgmr.msra.gmra.mxu0 %v23235_v58  ;;  %2739 = vmatmul.mubr.bf16.vlgmr.msra.gmra.mxu1 %v23235_v58 }
 0x2d9   :  { %2748 = vmatpush1.bf16.msra.mxu0 %v19745_v63  ;;  %2779 = vmatprep.mubr.bf16.mxu0 %v23233_v56  ;;  %v19832_v63 = vld [vmem:[#allocation10 + $0x5c8] ss:$80 sps:$4 sm:$0xff]  }
 0x2da   :  { %2789 = vmatpush1.bf16.msra.mxu1 %v19748_v1  ;;  %2820 = vmatprep.mubr.bf16.mxu1 %v23233_v56  ;;  %v19837_v1 = vld [vmem:[#allocation10 + $0x524] ss:$80 sps:$4 sm:$0xff]  }
 0x2db   :  { %2749 = vmatprep.subr.bf16.mxu0 %v19753_v2  ;;  %2790 = vmatprep.subr.bf16.mxu1 %v19756_v3  ;;  %v19835_v2 = vld [vmem:[#allocation10 + $0x520] ss:$80 sps:$4 sm:$0xff]   ;;  %v19840_v3 = vld [vmem:[#allocation10 + $0x52c] ss:$80 sps:$4 sm:$0xff]  }
 0x2dd   :  { %2750 = vmatpush1.bf16.msra.mxu0 %v19751_v4  ;;  %v19838_v4 = vld [vmem:[#allocation10 + $0x528] ss:$80 sps:$4 sm:$0xff]  }
 0x2de   :  { %2791 = vmatpush1.bf16.msra.mxu1 %v19754_v5  ;;  %2751 = vmatprep.subr.bf16.mxu0 %v19759_v6  ;;  %v19843_v5 = vld [vmem:[#allocation10 + $0x494] ss:$80 sps:$4 sm:$0xff]   ;;  %v19846_v6 = vld [vmem:[#allocation10 + $0x49c] ss:$80 sps:$4 sm:$0xff]  }
 0x2df   :  { %2792 = vmatprep.subr.bf16.mxu1 %v19762_v7  ;;  %v19841_v7 = vld [vmem:[#allocation10 + $0x490] ss:$80 sps:$4 sm:$0xff]  }
 0x2e1   :  { %2752 = vmatpush1.bf16.msra.mxu0 %v19757_v8  ;;  %v19844_v8 = vld [vmem:[#allocation10 + $0x498] ss:$80 sps:$4 sm:$0xff]  }
 0x2e2   :  { %2793 = vmatpush1.bf16.msra.mxu1 %v19760_v9  ;;  %2753 = vmatprep.subr.bf16.mxu0 %v19765_v10  ;;  %v19849_v9 = vld [vmem:[#allocation10 + $0x3f4] ss:$80 sps:$4 sm:$0xff]   ;;  %v19847_v10 = vld [vmem:[#allocation10 + $0x3f0] ss:$80 sps:$4 sm:$0xff]  }
 0x2e3   :  { %2794 = vmatprep.subr.bf16.mxu1 %v19768_v11  ;;  %v19852_v11 = vld [vmem:[#allocation10 + $0x3fc] ss:$80 sps:$4 sm:$0xff]  }
 0x2e5   :  { %2754 = vmatpush1.bf16.msra.mxu0 %v19763_v12  ;;  %v19850_v12 = vld [vmem:[#allocation10 + $0x3f8] ss:$80 sps:$4 sm:$0xff]  }
 0x2e6   :  { %2795 = vmatpush1.bf16.msra.mxu1 %v19766_v13  ;;  %2755 = vmatprep.subr.bf16.mxu0 %v19771_v14  ;;  %v19855_v13 = vld [vmem:[#allocation10 + $0x354] ss:$80 sps:$4 sm:$0xff]   ;;  %v19858_v14 = vld [vmem:[#allocation10 + $0x35c] ss:$80 sps:$4 sm:$0xff]  }
 0x2e7   :  { %2796 = vmatprep.subr.bf16.mxu1 %v19774_v16  ;;  %v19856_v16 = vld [vmem:[#allocation10 + $0x358] ss:$80 sps:$4 sm:$0xff]  }
 0x2e9   :  { %2756 = vmatpush1.bf16.msra.mxu0 %v19769_v15  ;;  %v19853_v15 = vld [vmem:[#allocation10 + $0x350] ss:$80 sps:$4 sm:$0xff]  }
 0x2ea   :  { %2797 = vmatpush1.bf16.msra.mxu1 %v19772_v17  ;;  %2757 = vmatprep.subr.bf16.mxu0 %v19777_v18  ;;  %v19861_v17 = vld [vmem:[#allocation10 + $0x2b4] ss:$80 sps:$4 sm:$0xff]   ;;  %v19864_v18 = vld [vmem:[#allocation10 + $0x2bc] ss:$80 sps:$4 sm:$0xff]  }
 0x2eb   :  { %2798 = vmatprep.subr.bf16.mxu1 %v19780_v20  ;;  %v19862_v20 = vld [vmem:[#allocation10 + $0x2b8] ss:$80 sps:$4 sm:$0xff]  }
 0x2ed   :  { %2758 = vmatpush1.bf16.msra.mxu0 %v19775_v19  ;;  %v19859_v19 = vld [vmem:[#allocation10 + $0x2b0] ss:$80 sps:$4 sm:$0xff]  }
 0x2ee   :  { %2799 = vmatpush1.bf16.msra.mxu1 %v19778_v21  ;;  %2759 = vmatprep.subr.bf16.mxu0 %v19783_v22  ;;  %v19867_v21 = vld [vmem:[#allocation10 + $0x214] ss:$80 sps:$4 sm:$0xff]   ;;  %v19865_v22 = vld [vmem:[#allocation10 + $0x210] ss:$80 sps:$4 sm:$0xff]  }
 0x2ef   :  { %2800 = vmatprep.subr.bf16.mxu1 %v19786_v24  ;;  %v19868_v24 = vld [vmem:[#allocation10 + $0x218] ss:$80 sps:$4 sm:$0xff]  }
 0x2f1   :  { %2760 = vmatpush1.bf16.msra.mxu0 %v19781_v23  ;;  %v19870_v23 = vld [vmem:[#allocation10 + $0x21c] ss:$80 sps:$4 sm:$0xff]  }
 0x2f2   :  { %2801 = vmatpush1.bf16.msra.mxu1 %v19784_v25  ;;  %2761 = vmatprep.subr.bf16.mxu0 %v19789_v27  ;;  %v19873_v25 = vld [vmem:[#allocation10 + $0x174] ss:$80 sps:$4 sm:$0xff]   ;;  %v19871_v27 = vld [vmem:[#allocation10 + $0x170] ss:$80 sps:$4 sm:$0xff]  }
 0x2f3   :  { %2802 = vmatprep.subr.bf16.mxu1 %v19792_v29  ;;  %v19874_v29 = vld [vmem:[#allocation10 + $0x178] ss:$80 sps:$4 sm:$0xff]  }
 0x2f5   :  { %2762 = vmatpush1.bf16.msra.mxu0 %v19787_v28  ;;  %v19876_v28 = vld [vmem:[#allocation10 + $0x17c] ss:$80 sps:$4 sm:$0xff]  }
 0x2f6   :  { %2803 = vmatpush1.bf16.msra.mxu1 %v19790_v30  ;;  %2763 = vmatprep.subr.bf16.mxu0 %v19795_v31  ;;  %v19879_v30 = vld [vmem:[#allocation10 + $0xd4] ss:$80 sps:$4 sm:$0xff]   ;;  %v19877_v31 = vld [vmem:[#allocation10 + $0xd0] ss:$80 sps:$4 sm:$0xff]  }
 0x2f7   :  { %2804 = vmatprep.subr.bf16.mxu1 %v19798_v33  ;;  %v19880_v33 = vld [vmem:[#allocation10 + $0xd8] ss:$80 sps:$4 sm:$0xff]  }
 0x2f9   :  { %2764 = vmatpush2.bf16.msra.mxu0 %v19793_v32  ;;  %v19882_v32 = vld [vmem:[#allocation10 + $0xdc] ss:$80 sps:$4 sm:$0xff]  }
 0x2fa   :  { %2805 = vmatpush2.bf16.msra.mxu1 %v19796_v34  ;;  %2765 = vmatprep.subr.bf16.mxu0 %v19801_v35  ;;  %v19885_v34 = vld [vmem:[#allocation10 + $0x34] ss:$80 sps:$4 sm:$0xff]   ;;  %v19883_v35 = vld [vmem:[#allocation10 + $0x30] ss:$80 sps:$4 sm:$0xff]  }
 0x2fb   :  { %2806 = vmatprep.subr.bf16.mxu1 %v19804_v37  ;;  %v19886_v37 = vld [vmem:[#allocation10 + $0x38] ss:$80 sps:$4 sm:$0xff]  }
 0x2fd   :  { %2766 = vmatpush2.bf16.msra.mxu0 %v19799_v36  ;;  %v19888_v36 = vld [vmem:[#allocation10 + $0x3c] ss:$80 sps:$4 sm:$0xff]  }
 0x2fe   :  { %2807 = vmatpush2.bf16.msra.mxu1 %v19802_v38  ;;  %2767 = vmatprep.subr.bf16.mxu0 %v19807_v39  ;;  %v19891_v38 = vld [vmem:[#allocation10 + $0x994] ss:$80 sps:$4 sm:$0xff]   ;;  %v19889_v39 = vld [vmem:[#allocation10 + $0x990] ss:$80 sps:$4 sm:$0xff]  }
 0x2ff   :  { %2808 = vmatprep.subr.bf16.mxu1 %v19810_v44  ;;  %v19892_v44 = vld [vmem:[#allocation10 + $0x998] ss:$80 sps:$4 sm:$0xff]  }
 0x301   :  { %2768 = vmatpush2.bf16.msra.mxu0 %v19805_v41  ;;  %v19894_v41 = vld [vmem:[#allocation10 + $0x99c] ss:$80 sps:$4 sm:$0xff]  }
 0x302   :  { %2809 = vmatpush2.bf16.msra.mxu1 %v19808_v45  ;;  %2769 = vmatprep.subr.bf16.mxu0 %v19813_v46  ;;  %v19897_v45 = vld [vmem:[#allocation10 + $0x8f4] ss:$80 sps:$4 sm:$0xff]   ;;  %v19895_v46 = vld [vmem:[#allocation10 + $0x8f0] ss:$80 sps:$4 sm:$0xff]  }
 0x303   :  { %2810 = vmatprep.subr.bf16.mxu1 %v19816_v48  ;;  %v19898_v48 = vld [vmem:[#allocation10 + $0x8f8] ss:$80 sps:$4 sm:$0xff]  }
 0x305   :  { %2770 = vmatpush2.bf16.msra.mxu0 %v19811_v47  ;;  %v19900_v47 = vld [vmem:[#allocation10 + $0x8fc] ss:$80 sps:$4 sm:$0xff]  }
 0x306   :  { %2811 = vmatpush2.bf16.msra.mxu1 %v19814_v49  ;;  %2771 = vmatprep.subr.bf16.mxu0 %v19819_v50  ;;  %v19903_v49 = vld [vmem:[#allocation10 + $0x854] ss:$80 sps:$4 sm:$0xff]   ;;  %v19901_v50 = vld [vmem:[#allocation10 + $0x850] ss:$80 sps:$4 sm:$0xff]  }
 0x307   :  { %2812 = vmatprep.subr.bf16.mxu1 %v19822_v52  ;;  %v19904_v52 = vld [vmem:[#allocation10 + $0x858] ss:$80 sps:$4 sm:$0xff]  }
 0x309   :  { %2772 = vmatpush2.bf16.msra.mxu0 %v19817_v51  ;;  %v19906_v51 = vld [vmem:[#allocation10 + $0x85c] ss:$80 sps:$4 sm:$0xff]  }
 0x30a   :  { %2813 = vmatpush2.bf16.msra.mxu1 %v19820_v53  ;;  %2773 = vmatprep.subr.bf16.mxu0 %v19825_v54  ;;  %v19909_v53 = vld [vmem:[#allocation10 + $0x7b4] ss:$80 sps:$4 sm:$0xff]   ;;  %v19907_v54 = vld [vmem:[#allocation10 + $0x7b0] ss:$80 sps:$4 sm:$0xff]  }
 0x30b   :  { %2814 = vmatprep.subr.bf16.mxu1 %v19828_v57  ;;  %v19910_v57 = vld [vmem:[#allocation10 + $0x7b8] ss:$80 sps:$4 sm:$0xff]  }
 0x30d   :  { %2774 = vmatpush2.bf16.msra.mxu0 %v19823_v55  ;;  %v19912_v55 = vld [vmem:[#allocation10 + $0x7bc] ss:$80 sps:$4 sm:$0xff]  }
 0x30e   :  { %2815 = vmatpush2.bf16.msra.mxu1 %v19826_v59  ;;  %2775 = vmatprep.subr.bf16.mxu0 %v19831_v60  ;;  %v19915_v59 = vld [vmem:[#allocation10 + $0x714] ss:$80 sps:$4 sm:$0xff]   ;;  %v19913_v60 = vld [vmem:[#allocation10 + $0x710] ss:$80 sps:$4 sm:$0xff]  }
 0x30f   :  { %2816 = vmatprep.subr.bf16.mxu1 %v19834_v62  ;;  %v19916_v62 = vld [vmem:[#allocation10 + $0x718] ss:$80 sps:$4 sm:$0xff]  }
 0x311   :  { %2776 = vmatpush2.bf16.msra.mxu0 %v19829_v61  ;;  %v19918_v61 = vld [vmem:[#allocation10 + $0x71c] ss:$80 sps:$4 sm:$0xff]  }
 0x312   :  { %2817 = vmatpush2.bf16.msra.mxu1 %v19832_v63  ;;  %2777 = vmatprep.subr.bf16.mxu0 %v19837_v1  ;;  %v19921_v63 = vld [vmem:[#allocation10 + $0x674] ss:$80 sps:$4 sm:$0xff]   ;;  %v19919_v1 = vld [vmem:[#allocation10 + $0x670] ss:$80 sps:$4 sm:$0xff]  }
 0x313   :  { %2818 = vmatprep.subr.bf16.mxu1 %v19840_v3  ;;  %v19922_v3 = vld [vmem:[#allocation10 + $0x678] ss:$80 sps:$4 sm:$0xff]  }
 0x315   :  { %2778 = vmatpush2.bf16.msra.mxu0 %v19835_v2  ;;  %v19924_v2 = vld [vmem:[#allocation10 + $0x67c] ss:$80 sps:$4 sm:$0xff]  }
 0x316   :  { %2819 = vmatpush2.bf16.msra.mxu1 %v19838_v4  ;;  %2829 = vmatprep.subr.bf16.mxu0 %v19843_v5  ;;  %v19927_v4 = vld [vmem:[#allocation10 + $0x5d4] ss:$80 sps:$4 sm:$0xff]   ;;  %v19925_v5 = vld [vmem:[#allocation10 + $0x5d0] ss:$80 sps:$4 sm:$0xff]  }
 0x317   :  { %2870 = vmatprep.subr.bf16.mxu1 %v19846_v6  ;;  %v19930_v6 = vld [vmem:[#allocation10 + $0x5dc] ss:$80 sps:$4 sm:$0xff]  }
 0x318   :  { %2780 = vmatmul.mubr.bf16.vlgmr.msra.gmra.mxu0 %v23235_v58 }
 0x319   :  { %2821 = vmatmul.mubr.bf16.vlgmr.msra.gmra.mxu1 %v23235_v58  ;;  %2830 = vmatpush1.bf16.msra.mxu0 %v19841_v7  ;;  %v19928_v7 = vld [vmem:[#allocation10 + $0x5d8] ss:$80 sps:$4 sm:$0xff]  }
 0x31a   :  { %2861 = vmatprep.mubr.bf16.mxu0 %v23233_v56  ;;  %2871 = vmatpush1.bf16.msra.mxu1 %v19844_v8  ;;  %v19933_v8 = vld [vmem:[#allocation10 + $0x534] ss:$80 sps:$4 sm:$0xff]  }
 0x31b   :  { %2902 = vmatprep.mubr.bf16.mxu1 %v23233_v56  ;;  %2831 = vmatprep.subr.bf16.mxu0 %v19849_v9  ;;  %v19931_v9 = vld [vmem:[#allocation10 + $0x530] ss:$80 sps:$4 sm:$0xff]  }
 0x31c   :  { %2872 = vmatprep.subr.bf16.mxu1 %v19852_v11  ;;  %v19934_v11 = vld [vmem:[#allocation10 + $0x538] ss:$80 sps:$4 sm:$0xff]  }
 0x31d   :  { %2832 = vmatpush1.bf16.msra.mxu0 %v19847_v10  ;;  %v19936_v10 = vld [vmem:[#allocation10 + $0x53c] ss:$80 sps:$4 sm:$0xff]  }
 0x31e   :  { %2873 = vmatpush1.bf16.msra.mxu1 %v19850_v12  ;;  %2833 = vmatprep.subr.bf16.mxu0 %v19855_v13  ;;  %v19939_v12 = vld [vmem:[#allocation10 + $0x4a4] ss:$80 sps:$4 sm:$0xff]   ;;  %v19942_v13 = vld [vmem:[#allocation10 + $0x4ac] ss:$80 sps:$4 sm:$0xff]  }
 0x31f   :  { %2874 = vmatprep.subr.bf16.mxu1 %v19858_v14  ;;  %v19937_v14 = vld [vmem:[#allocation10 + $0x4a0] ss:$80 sps:$4 sm:$0xff]  }
 0x321   :  { %2834 = vmatpush1.bf16.msra.mxu0 %v19853_v15  ;;  %v19940_v15 = vld [vmem:[#allocation10 + $0x4a8] ss:$80 sps:$4 sm:$0xff]  }
 0x322   :  { %2875 = vmatpush1.bf16.msra.mxu1 %v19856_v16  ;;  %2835 = vmatprep.subr.bf16.mxu0 %v19861_v17  ;;  %v19945_v16 = vld [vmem:[#allocation10 + $0x404] ss:$80 sps:$4 sm:$0xff]   ;;  %v19948_v17 = vld [vmem:[#allocation10 + $0x40c] ss:$80 sps:$4 sm:$0xff]  }
 0x323   :  { %2876 = vmatprep.subr.bf16.mxu1 %v19864_v18 }
 0x325   :  { %2836 = vmatpush1.bf16.msra.mxu0 %v19859_v19 }
 0x326   :  { %2877 = vmatpush1.bf16.msra.mxu1 %v19862_v20  ;;  %2837 = vmatprep.subr.bf16.mxu0 %v19867_v21  ;;  %v19943_v20 = vld [vmem:[#allocation10 + $0x400] ss:$80 sps:$4 sm:$0xff]   ;;  %v19946_v21 = vld [vmem:[#allocation10 + $0x408] ss:$80 sps:$4 sm:$0xff]  }
 0x327   :  { %2878 = vmatprep.subr.bf16.mxu1 %v19870_v23  ;;  %v19954_v23 = vld [vmem:[#allocation10 + $0x36c] ss:$80 sps:$4 sm:$0xff]  }
 0x329   :  { %2838 = vmatpush1.bf16.msra.mxu0 %v19865_v22  ;;  %v19951_v22 = vld [vmem:[#allocation10 + $0x364] ss:$80 sps:$4 sm:$0xff]  }
 0x32a   :  { %2879 = vmatpush1.bf16.msra.mxu1 %v19868_v24  ;;  %2839 = vmatprep.subr.bf16.mxu0 %v19873_v25 }
 0x32b   :  { %2880 = vmatprep.subr.bf16.mxu1 %v19876_v28 }
 0x32d   :  { %2840 = vmatpush1.bf16.msra.mxu0 %v19871_v27 }
 0x32e   :  { %2881 = vmatpush1.bf16.msra.mxu1 %v19874_v29  ;;  %2841 = vmatprep.subr.bf16.mxu0 %v19879_v30  ;;  %v19949_v29 = vld [vmem:[#allocation10 + $0x360] ss:$80 sps:$4 sm:$0xff]   ;;  %v19952_v30 = vld [vmem:[#allocation10 + $0x368] ss:$80 sps:$4 sm:$0xff]  }
 0x32f   :  { %2882 = vmatprep.subr.bf16.mxu1 %v19882_v32  ;;  %v19960_v32 = vld [vmem:[#allocation10 + $0x2cc] ss:$80 sps:$4 sm:$0xff]  }
 0x331   :  { %2842 = vmatpush1.bf16.msra.mxu0 %v19877_v31  ;;  %v19957_v31 = vld [vmem:[#allocation10 + $0x2c4] ss:$80 sps:$4 sm:$0xff]  }
 0x332   :  { %2883 = vmatpush1.bf16.msra.mxu1 %v19880_v33  ;;  %2843 = vmatprep.subr.bf16.mxu0 %v19885_v34 }
 0x333   :  { %2884 = vmatprep.subr.bf16.mxu1 %v19888_v36  ;;  %v19958_v36 = vld [vmem:[#allocation10 + $0x2c8] ss:$80 sps:$4 sm:$0xff]  }
 0x335   :  { %2844 = vmatpush1.bf16.msra.mxu0 %v19883_v35  ;;  %v19955_v35 = vld [vmem:[#allocation10 + $0x2c0] ss:$80 sps:$4 sm:$0xff]  }
 0x336   :  { %2885 = vmatpush1.bf16.msra.mxu1 %v19886_v37  ;;  %2845 = vmatprep.subr.bf16.mxu0 %v19891_v38  ;;  %v19961_v37 = vld [vmem:[#allocation10 + $0x220] ss:$80 sps:$4 sm:$0xff]   ;;  %v19966_v38 = vld [vmem:[#allocation10 + $0x22c] ss:$80 sps:$4 sm:$0xff]  }
 0x337   :  { %2886 = vmatprep.subr.bf16.mxu1 %v19894_v41  ;;  %v19969_v41 = vld [vmem:[#allocation10 + $0x184] ss:$80 sps:$4 sm:$0xff]  }
 0x339   :  { %2846 = vmatpush2.bf16.msra.mxu0 %v19889_v39  ;;  %v19964_v39 = vld [vmem:[#allocation10 + $0x228] ss:$80 sps:$4 sm:$0xff]  }
 0x33a   :  { %2887 = vmatpush2.bf16.msra.mxu1 %v19892_v44  ;;  %2847 = vmatprep.subr.bf16.mxu0 %v19897_v45  ;;  %v19967_v44 = vld [vmem:[#allocation10 + $0x180] ss:$80 sps:$4 sm:$0xff]   ;;  %v19972_v45 = vld [vmem:[#allocation10 + $0x18c] ss:$80 sps:$4 sm:$0xff]  }
 0x33b   :  { %2888 = vmatprep.subr.bf16.mxu1 %v19900_v47  ;;  %v19975_v47 = vld [vmem:[#allocation10 + $0xe4] ss:$80 sps:$4 sm:$0xff]  }
 0x33d   :  { %2848 = vmatpush2.bf16.msra.mxu0 %v19895_v46  ;;  %v19970_v46 = vld [vmem:[#allocation10 + $0x188] ss:$80 sps:$4 sm:$0xff]  }
 0x33e   :  { %2889 = vmatpush2.bf16.msra.mxu1 %v19898_v48  ;;  %2849 = vmatprep.subr.bf16.mxu0 %v19903_v49  ;;  %v19973_v48 = vld [vmem:[#allocation10 + $0xe0] ss:$80 sps:$4 sm:$0xff]   ;;  %v19978_v49 = vld [vmem:[#allocation10 + $0xec] ss:$80 sps:$4 sm:$0xff]  }
 0x33f   :  { %2890 = vmatprep.subr.bf16.mxu1 %v19906_v51  ;;  %v19981_v51 = vld [vmem:[#allocation10 + $0x44] ss:$80 sps:$4 sm:$0xff]  }
 0x341   :  { %2850 = vmatpush2.bf16.msra.mxu0 %v19901_v50  ;;  %v19976_v50 = vld [vmem:[#allocation10 + $0xe8] ss:$80 sps:$4 sm:$0xff]  }
 0x342   :  { %2891 = vmatpush2.bf16.msra.mxu1 %v19904_v52  ;;  %2851 = vmatprep.subr.bf16.mxu0 %v19909_v53  ;;  %v19979_v52 = vld [vmem:[#allocation10 + $0x40] ss:$80 sps:$4 sm:$0xff]   ;;  %v19984_v53 = vld [vmem:[#allocation10 + $0x4c] ss:$80 sps:$4 sm:$0xff]  }
 0x343   :  { %2892 = vmatprep.subr.bf16.mxu1 %v19912_v55  ;;  %v19987_v55 = vld [vmem:[#allocation10 + $0x9a4] ss:$80 sps:$4 sm:$0xff]  }
 0x345   :  { %2852 = vmatpush2.bf16.msra.mxu0 %v19907_v54  ;;  %v19982_v54 = vld [vmem:[#allocation10 + $0x48] ss:$80 sps:$4 sm:$0xff]  }
 0x346   :  { %2893 = vmatpush2.bf16.msra.mxu1 %v19910_v57  ;;  %2853 = vmatprep.subr.bf16.mxu0 %v19915_v59  ;;  %v19985_v57 = vld [vmem:[#allocation10 + $0x9a0] ss:$80 sps:$4 sm:$0xff]   ;;  %v19990_v59 = vld [vmem:[#allocation10 + $0x9ac] ss:$80 sps:$4 sm:$0xff]  }
 0x347   :  { %2894 = vmatprep.subr.bf16.mxu1 %v19918_v61  ;;  %v19993_v61 = vld [vmem:[#allocation10 + $0x904] ss:$80 sps:$4 sm:$0xff]  }
 0x349   :  { %2854 = vmatpush2.bf16.msra.mxu0 %v19913_v60  ;;  %v19988_v60 = vld [vmem:[#allocation10 + $0x9a8] ss:$80 sps:$4 sm:$0xff]  }
 0x34a   :  { %2895 = vmatpush2.bf16.msra.mxu1 %v19916_v62  ;;  %2855 = vmatprep.subr.bf16.mxu0 %v19921_v63  ;;  %v19991_v62 = vld [vmem:[#allocation10 + $0x900] ss:$80 sps:$4 sm:$0xff]   ;;  %v19996_v63 = vld [vmem:[#allocation10 + $0x90c] ss:$80 sps:$4 sm:$0xff]  }
 0x34b   :  { %2896 = vmatprep.subr.bf16.mxu1 %v19924_v2  ;;  %v19999_v2 = vld [vmem:[#allocation10 + $0x864] ss:$80 sps:$4 sm:$0xff]  }
 0x34d   :  { %2856 = vmatpush2.bf16.msra.mxu0 %v19919_v1  ;;  %v19994_v1 = vld [vmem:[#allocation10 + $0x908] ss:$80 sps:$4 sm:$0xff]  }
 0x34e   :  { %2897 = vmatpush2.bf16.msra.mxu1 %v19922_v3  ;;  %2857 = vmatprep.subr.bf16.mxu0 %v19927_v4  ;;  %v19997_v3 = vld [vmem:[#allocation10 + $0x860] ss:$80 sps:$4 sm:$0xff]   ;;  %v20002_v4 = vld [vmem:[#allocation10 + $0x86c] ss:$80 sps:$4 sm:$0xff]  }
 0x34f   :  { %2898 = vmatprep.subr.bf16.mxu1 %v19930_v6  ;;  %v20005_v6 = vld [vmem:[#allocation10 + $0x7c4] ss:$80 sps:$4 sm:$0xff]  }
 0x351   :  { %2858 = vmatpush2.bf16.msra.mxu0 %v19925_v5  ;;  %v20000_v5 = vld [vmem:[#allocation10 + $0x868] ss:$80 sps:$4 sm:$0xff]  }
 0x352   :  { %2899 = vmatpush2.bf16.msra.mxu1 %v19928_v7  ;;  %2859 = vmatprep.subr.bf16.mxu0 %v19933_v8  ;;  %v20003_v7 = vld [vmem:[#allocation10 + $0x7c0] ss:$80 sps:$4 sm:$0xff]   ;;  %v20008_v8 = vld [vmem:[#allocation10 + $0x7cc] ss:$80 sps:$4 sm:$0xff]  }
 0x353   :  { %2900 = vmatprep.subr.bf16.mxu1 %v19936_v10  ;;  %v20011_v10 = vld [vmem:[#allocation10 + $0x724] ss:$80 sps:$4 sm:$0xff]  }
 0x355   :  { %2860 = vmatpush2.bf16.msra.mxu0 %v19931_v9  ;;  %v20006_v9 = vld [vmem:[#allocation10 + $0x7c8] ss:$80 sps:$4 sm:$0xff]  }
 0x356   :  { %2901 = vmatpush2.bf16.msra.mxu1 %v19934_v11  ;;  %2911 = vmatprep.subr.bf16.mxu0 %v19939_v12  ;;  %v20009_v11 = vld [vmem:[#allocation10 + $0x720] ss:$80 sps:$4 sm:$0xff]   ;;  %v20014_v12 = vld [vmem:[#allocation10 + $0x72c] ss:$80 sps:$4 sm:$0xff]  }
 0x357   :  { %2952 = vmatprep.subr.bf16.mxu1 %v19942_v13  ;;  %v20012_v13 = vld [vmem:[#allocation10 + $0x728] ss:$80 sps:$4 sm:$0xff]  }
 0x358   :  { %2862 = vmatmul.mubr.bf16.vlgmr.msra.gmra.mxu0 %v23235_v58  ;;  %v23252_v18 = vpop.f32.mrf.mxu0  ;;  %v23254_v19 = vpop.f32.mrf.mxu1 }
 0x359   :  { %2903 = vmatmul.mubr.bf16.vlgmr.msra.gmra.mxu1 %v23235_v58  ;;  %2912 = vmatpush1.bf16.msra.mxu0 %v19937_v14  ;;  %v20017_v14 = vld [vmem:[#allocation10 + $0x684] ss:$80 sps:$4 sm:$0xff]  }
 0x35a   :  { %2943 = vmatprep.mubr.bf16.mxu0 %v23233_v56  ;;  %2953 = vmatpush1.bf16.msra.mxu1 %v19940_v15  ;;  %v23258_v24 = vpop.f32.mrf.mxu0  ;;  %v23260_v25 = vpop.f32.mrf.mxu1  ;;  %v20015_v15 = vld [vmem:[#allocation10 + $0x680] ss:$80 sps:$4 sm:$0xff]  }
 0x35b   :  { %2984 = vmatprep.mubr.bf16.mxu1 %v23233_v56  ;;  %2913 = vmatprep.subr.bf16.mxu0 %v19945_v16  ;;  %v19963_v56 = vld [vmem:[#allocation10 + $0x224] ss:$80 sps:$4 sm:$0xff]   ;;  %v20020_v16 = vld [vmem:[#allocation10 + $0x68c] ss:$80 sps:$4 sm:$0xff]  }
 0x35c   :  { %2954 = vmatprep.subr.bf16.mxu1 %v19948_v17  ;;  %v2621_v27 = vpop.f32.mrf.mxu0  ;;  %v2662_v28 = vpop.f32.mrf.mxu1  ;;  %v23264_v17 = vsub.s32 3, %v23223_v40 }
 0x35d   :  { %2914 = vmatpush1.bf16.msra.mxu0 %v19943_v20  ;;  %v23266_v20 = vld [vmem:[#allocation11] sm:$0xff]  ;;  %v20026_v27 = vld [vmem:[#allocation10 + $0x5ec] ss:$80 sps:$4 sm:$0xff]  }
 0x35e   :  { %2955 = vmatpush1.bf16.msra.mxu1 %v19946_v21  ;;  %v2622_v33 = vpop.f32.mrf.mxu0  ;;  %v2663_v34 = vpop.f32.mrf.mxu1  ;;  %2915 = vmatprep.subr.bf16.mxu0 %v19951_v22  ;;  %v20018_v21 = vld [vmem:[#allocation10 + $0x688] ss:$80 sps:$4 sm:$0xff]   ;;  %v20023_v22 = vld [vmem:[#allocation10 + $0x5e4] ss:$80 sps:$4 sm:$0xff]   ;;  %v890_v28 = vrot.slane %v23266_v20, %v23229_v43 }
 0x35f   :  { %2956 = vmatprep.subr.bf16.mxu1 %v19954_v23  ;;  %v20021_v23 = vld [vmem:[#allocation10 + $0x5e0] ss:$80 sps:$4 sm:$0xff]   ;;  %v20032_v33 = vld [vmem:[#allocation10 + $0x54c] ss:$80 sps:$4 sm:$0xff]  }
 0x360   :  { %v2620_v34 = vadd.f32 %v23258_v24, %v890_v28  ;;  %v20086_v28 = vld [vmem:[#allocation13 + $0x8bc] ss:$36 sps:$4 sm:$0xff]  }
 0x361   :  { %2916 = vmatpush1.bf16.msra.mxu0 %v19949_v29  ;;  %v898_v29 = vrot.slane %v23266_v20, %v23264_v17 }
 0x362   :  { %2957 = vmatpush1.bf16.msra.mxu1 %v19952_v30  ;;  %2917 = vmatprep.subr.bf16.mxu0 %v19957_v31  ;;  %v20024_v30 = vld [vmem:[#allocation10 + $0x5e8] ss:$80 sps:$4 sm:$0xff]   ;;  %v20029_v31 = vld [vmem:[#allocation10 + $0x544] ss:$80 sps:$4 sm:$0xff]  }
 0x363   :  { %2958 = vmatprep.subr.bf16.mxu1 %v19960_v32  ;;  %v20027_v32 = vld [vmem:[#allocation10 + $0x540] ss:$80 sps:$4 sm:$0xff]  }
 0x365   :  { %2918 = vmatpush1.bf16.msra.mxu0 %v19955_v35  ;;  %v2661_v35 = vadd.f32 %v23260_v25, %v898_v29  ;;  %v20084_v29 = vld [vmem:[#allocation13 + $0x8b8] ss:$36 sps:$4 sm:$0xff]  }
 0x366   :  { %2959 = vmatpush1.bf16.msra.mxu1 %v19958_v36  ;;  %2919 = vmatprep.subr.bf16.mxu0 %v19963_v56  ;;  %v20030_v36 = vld [vmem:[#allocation10 + $0x548] ss:$80 sps:$4 sm:$0xff]   ;;  %v20035_v56 = vld [vmem:[#allocation13 + $0x1fc] ss:$36 sps:$4 sm:$0xff]  }
 0x367   :  { %2960 = vmatprep.subr.bf16.mxu1 %v19966_v38  ;;  %v20033_v38 = vld [vmem:[#allocation13 + $0x1f8] ss:$36 sps:$4 sm:$0xff]  }
 0x369   :  { %2920 = vmatpush1.bf16.msra.mxu0 %v19961_v37  ;;  %v20038_v37 = vld [vmem:[#allocation13 + $0x67c] ss:$36 sps:$4 sm:$0xff]  }
 0x36a   :  { %2961 = vmatpush1.bf16.msra.mxu1 %v19964_v39  ;;  %2921 = vmatprep.subr.bf16.mxu0 %v19969_v41  ;;  %v2994_v39 = vmax.f32 %v2620_v34, 0.0  ;;  %v20036_v41 = vld [vmem:[#allocation13 + $0x678] ss:$36 sps:$4 sm:$0xff]   ;;  %v20095_v34 = vld [vmem:[#allocation13 + $0x3ac] ss:$36 sps:$4 sm:$0xff]  }
 0x36b   :  { %2962 = vmatprep.subr.bf16.mxu1 %v19972_v45  ;;  %v20041_v45 = vld [vmem:[#allocation13 + $0x1b4] ss:$36 sps:$4 sm:$0xff]  }
 0x36c   :  { %v23274_v24 = vpack.c.bf16 %v2994_v39, %v2994_v39  ;;  %v20104_v39 = vld [vmem:[#allocation13 + $0x7e4] ss:$36 sps:$4 sm:$0xff]  }
 0x36d   :  { %2922 = vmatpush1.bf16.msra.mxu0 %v19967_v44  ;;  %v2996_v44 = vmax.f32 %v2661_v35, 0.0  ;;  %v20093_v35 = vld [vmem:[#allocation13 + $0x3a8] ss:$36 sps:$4 sm:$0xff]  }
 0x36e   :  { %2963 = vmatpush1.bf16.msra.mxu1 %v19970_v46  ;;  %2923 = vmatprep.subr.bf16.mxu0 %v19975_v47  ;;  %v20044_v46 = vld [vmem:[#allocation13 + $0x634] ss:$36 sps:$4 sm:$0xff]  }
 0x36f   :  { %2964 = vmatprep.subr.bf16.mxu1 %v19978_v49  ;;  %v20042_v49 = vld [vmem:[#allocation13 + $0x630] ss:$36 sps:$4 sm:$0xff]  }
 0x371   :  { %2924 = vmatpush1.bf16.msra.mxu0 %v19973_v48  ;;  %v20039_v48 = vld [vmem:[#allocation13 + $0x1b0] ss:$36 sps:$4 sm:$0xff]  }
 0x372   :  { %2965 = vmatpush1.bf16.msra.mxu1 %v19976_v50  ;;  %2925 = vmatprep.subr.bf16.mxu0 %v19981_v51  ;;  %v23281_v50 = vpack.c.bf16 %v2996_v44, %v2996_v44  ;;  %v20047_v51 = vld [vmem:[#allocation13 + $0x16c] ss:$36 sps:$4 sm:$0xff]   ;;  %v20102_v44 = vld [vmem:[#allocation13 + $0x7e0] ss:$36 sps:$4 sm:$0xff]  }
 0x373   :  { %2966 = vmatprep.subr.bf16.mxu1 %v19984_v53 }
 0x375   :  { %2926 = vmatpush1.bf16.msra.mxu0 %v19979_v52  ;;  %v20050_v52 = vld [vmem:[#allocation13 + $0x5ec] ss:$36 sps:$4 sm:$0xff]  }
 0x376   :  { %2967 = vmatpush1.bf16.msra.mxu1 %v19982_v54  ;;  %2927 = vmatprep.subr.bf16.mxu0 %v19987_v55 }
 0x377   :  { %2968 = vmatprep.subr.bf16.mxu1 %v19990_v59  ;;  %v20045_v59 = vld [vmem:[#allocation13 + $0x168] ss:$36 sps:$4 sm:$0xff]  }
 0x379   :  { %2928 = vmatpush2.bf16.msra.mxu0 %v19985_v57 }
 0x37a   :  { %2969 = vmatpush2.bf16.msra.mxu1 %v19988_v60  ;;  %2929 = vmatprep.subr.bf16.mxu0 %v19993_v61  ;;  %v20048_v60 = vld [vmem:[#allocation13 + $0x5e8] ss:$36 sps:$4 sm:$0xff]  }
 0x37b   :  { %2970 = vmatprep.subr.bf16.mxu1 %v19996_v63  ;;  %v20056_v61 = vld [vmem:[#allocation13 + $0x5a4] ss:$36 sps:$4 sm:$0xff]  }
 0x37d   :  { %2930 = vmatpush2.bf16.msra.mxu0 %v19991_v62 }
 0x37e   :  { %2971 = vmatpush2.bf16.msra.mxu1 %v19994_v1  ;;  %2931 = vmatprep.subr.bf16.mxu0 %v19999_v2  ;;  %v20051_v1 = vld [vmem:[#allocation13 + $0x120] ss:$36 sps:$4 sm:$0xff]  }
 0x37f   :  { %2972 = vmatprep.subr.bf16.mxu1 %v20002_v4  ;;  %v20054_v2 = vld [vmem:[#allocation13 + $0x5a0] ss:$36 sps:$4 sm:$0xff]   ;;  %v20057_v4 = vld [vmem:[#allocation13 + $0xd8] ss:$36 sps:$4 sm:$0xff]  }
 0x381   :  { %2932 = vmatpush2.bf16.msra.mxu0 %v19997_v3  ;;  %v20059_v3 = vld [vmem:[#allocation13 + $0xdc] ss:$36 sps:$4 sm:$0xff]  }
 0x382   :  { %2973 = vmatpush2.bf16.msra.mxu1 %v20000_v5  ;;  %2933 = vmatprep.subr.bf16.mxu0 %v20005_v6  ;;  %v20062_v5 = vld [vmem:[#allocation13 + $0x55c] ss:$36 sps:$4 sm:$0xff]  }
 0x383   :  { %2974 = vmatprep.subr.bf16.mxu1 %v20008_v8  ;;  %v20060_v6 = vld [vmem:[#allocation13 + $0x558] ss:$36 sps:$4 sm:$0xff]   ;;  %v20063_v8 = vld [vmem:[#allocation13 + $0x90] ss:$36 sps:$4 sm:$0xff]  }
 0x385   :  { %2934 = vmatpush2.bf16.msra.mxu0 %v20003_v7  ;;  %v20065_v7 = vld [vmem:[#allocation13 + $0x94] ss:$36 sps:$4 sm:$0xff]  }
 0x386   :  { %2975 = vmatpush2.bf16.msra.mxu1 %v20006_v9  ;;  %2935 = vmatprep.subr.bf16.mxu0 %v20011_v10  ;;  %v20068_v9 = vld [vmem:[#allocation13 + $0x514] ss:$36 sps:$4 sm:$0xff]  }
 0x387   :  { %2976 = vmatprep.subr.bf16.mxu1 %v20014_v12  ;;  %v20066_v10 = vld [vmem:[#allocation13 + $0x510] ss:$36 sps:$4 sm:$0xff]   ;;  %v20069_v12 = vld [vmem:[#allocation13 + $0x48] ss:$36 sps:$4 sm:$0xff]  }
 0x389   :  { %2936 = vmatpush2.bf16.msra.mxu0 %v20009_v11  ;;  %v20071_v11 = vld [vmem:[#allocation13 + $0x4c] ss:$36 sps:$4 sm:$0xff]  }
 0x38a   :  { %2977 = vmatpush2.bf16.msra.mxu1 %v20012_v13  ;;  %2937 = vmatprep.subr.bf16.mxu0 %v20017_v14  ;;  %v20074_v13 = vld [vmem:[#allocation13 + $0x4cc] ss:$36 sps:$4 sm:$0xff]  }
 0x38b   :  { %2978 = vmatprep.subr.bf16.mxu1 %v20020_v16  ;;  %v20072_v14 = vld [vmem:[#allocation13 + $0x4c8] ss:$36 sps:$4 sm:$0xff]   ;;  %v20075_v16 = vld [vmem:[#allocation13] ss:$36 sps:$4 sm:$0xff]  }
 0x38d   :  { %2938 = vmatpush2.bf16.msra.mxu0 %v20015_v15  ;;  %v20077_v15 = vld [vmem:[#allocation13 + $0x4] ss:$36 sps:$4 sm:$0xff]  }
 0x38e   :  { %2979 = vmatpush2.bf16.msra.mxu1 %v20018_v21  ;;  %2939 = vmatprep.subr.bf16.mxu0 %v20023_v22  ;;  %v20080_v21 = vld [vmem:[#allocation13 + $0x484] ss:$36 sps:$4 sm:$0xff]  }
 0x38f   :  { %2980 = vmatprep.subr.bf16.mxu1 %v20026_v27  ;;  %v20078_v22 = vld [vmem:[#allocation13 + $0x480] ss:$36 sps:$4 sm:$0xff]   ;;  %v20081_v27 = vld [vmem:[#allocation13 + $0x438] ss:$36 sps:$4 sm:$0xff]  }
 0x391   :  { %2940 = vmatpush2.bf16.msra.mxu0 %v20021_v23  ;;  %v20083_v23 = vld [vmem:[#allocation13 + $0x43c] ss:$36 sps:$4 sm:$0xff]  }
 0x392   :  { %2981 = vmatpush2.bf16.msra.mxu1 %v20024_v30  ;;  %2941 = vmatprep.subr.bf16.mxu0 %v20029_v31  ;;  %v20089_v30 = vld [vmem:[#allocation13 + $0x3f4] ss:$36 sps:$4 sm:$0xff]  }
 0x393   :  { %2982 = vmatprep.subr.bf16.mxu1 %v20032_v33  ;;  %v20087_v31 = vld [vmem:[#allocation13 + $0x3f0] ss:$36 sps:$4 sm:$0xff]  }
 0x394   :  { %v20090_v33 = vld [vmem:[#allocation13 + $0x870] ss:$36 sps:$4 sm:$0xff]  }
 0x395   :  { %2942 = vmatpush2.bf16.msra.mxu0 %v20027_v32  ;;  %v20092_v32 = vld [vmem:[#allocation13 + $0x874] ss:$36 sps:$4 sm:$0xff]  }
 0x396   :  { %2983 = vmatpush2.bf16.msra.mxu1 %v20030_v36  ;;  %12042 = vmatprep.subr.bf16.mxu0 %v20035_v56  ;;  %v20098_v36 = vld [vmem:[#allocation13 + $0x82c] ss:$36 sps:$4 sm:$0xff]  }
 0x397   :  { %12083 = vmatprep.subr.bf16.mxu1 %v20038_v37  ;;  %v20096_v56 = vld [vmem:[#allocation13 + $0x828] ss:$36 sps:$4 sm:$0xff]  }
 0x398   :  { %v23276_v25 = vpop.f32.mrf.mxu0  ;;  %v23278_v47 = vpop.f32.mrf.mxu1  ;;  %2944 = vmatmul.mubr.bf16.vlgmr.msra.gmra.mxu0 %v23235_v58  ;;  %v20101_v37 = vld [vmem:[#allocation13 + $0x364] ss:$36 sps:$4 sm:$0xff]  }
 0x399   :  { %2985 = vmatmul.mubr.bf16.vlgmr.msra.gmra.mxu1 %v23235_v58  ;;  %12043 = vmatpush1.bf16.msra.mxu0 %v20033_v38  ;;  %v20053_v58 = vld [vmem:[#allocation13 + $0x124] ss:$36 sps:$4 sm:$0xff]  }
 0x39a   :  { %12074 = vmatprep.mubr.bf16.mxu0 %v23274_v24  ;;  %12084 = vmatpush1.bf16.msra.mxu1 %v20036_v41  ;;  %v23285_v53 = vpop.f32.mrf.mxu0  ;;  %v23287_v54 = vpop.f32.mrf.mxu1  ;;  %v20099_v38 = vld [vmem:[#allocation13 + $0x360] ss:$36 sps:$4 sm:$0xff]   ;;  %v23291_v41 = vsub.s32 2, %v23223_v40 }
 0x39b   :  { %12115 = vmatprep.mubr.bf16.mxu1 %v23281_v50  ;;  %12044 = vmatprep.subr.bf16.mxu0 %v20041_v45  ;;  %v20107_v45 = vld [vmem:[#allocation13 + $0x31c] ss:$36 sps:$4 sm:$0xff]  }
 0x39c   :  { %v2703_v55 = vpop.f32.mrf.mxu0  ;;  %v2744_v57 = vpop.f32.mrf.mxu1  ;;  %12085 = vmatprep.subr.bf16.mxu1 %v20044_v46  ;;  %v20105_v46 = vld [vmem:[#allocation13 + $0x318] ss:$36 sps:$4 sm:$0xff]  }
 0x39d   :  { %12045 = vmatpush1.bf16.msra.mxu0 %v20039_v48  ;;  %v20110_v48 = vld [vmem:[#allocation13 + $0x79c] ss:$36 sps:$4 sm:$0xff]   ;;  %v20113_v55 = vld [vmem:[#allocation13 + $0x2d4] ss:$36 sps:$4 sm:$0xff]  }
 0x39e   :  { %12086 = vmatpush1.bf16.msra.mxu1 %v20042_v49  ;;  %v2704_v62 = vpop.f32.mrf.mxu0  ;;  %v2745_v63 = vpop.f32.mrf.mxu1  ;;  %12046 = vmatprep.subr.bf16.mxu0 %v20047_v51  ;;  %v23294_v49 = vsub.s32 5, %v23223_v40  ;;  %v23297_v51 = vsub.s32 7, %v23223_v40  ;;  %v20111_v57 = vld [vmem:[#allocation13 + $0x2d0] ss:$36 sps:$4 sm:$0xff]  }
 0x39f   :  { %12087 = vmatprep.subr.bf16.mxu1 %v20050_v52  ;;  %v20108_v52 = vld [vmem:[#allocation13 + $0x798] ss:$36 sps:$4 sm:$0xff]   ;;  %v20119_v62 = vld [vmem:[#allocation13 + $0x28c] ss:$36 sps:$4 sm:$0xff]  }
 0x3a0   :  { %v906_v63 = vrot.slane %v23266_v20, %v23294_v49 }
 0x3a1   :  { %12047 = vmatpush1.bf16.msra.mxu0 %v20045_v59  ;;  %v20116_v59 = vld [vmem:[#allocation13 + $0x754] ss:$36 sps:$4 sm:$0xff]  }
 0x3a2   :  { %12088 = vmatpush1.bf16.msra.mxu1 %v20048_v60  ;;  %12048 = vmatprep.subr.bf16.mxu0 %v20053_v58  ;;  %v886_v60 = vrot.slane %v23266_v20, %v23226_v42  ;;  %v894_v58 = vrot.slane %v23266_v20, %v23291_v41 }
 0x3a3   :  { %12089 = vmatprep.subr.bf16.mxu1 %v20056_v61  ;;  %v20114_v61 = vld [vmem:[#allocation13 + $0x750] ss:$36 sps:$4 sm:$0xff]  }
 0x3a5   :  { %12049 = vmatpush1.bf16.msra.mxu0 %v20051_v1  ;;  %v914_v1 = vrot.slane %v23266_v20, %v23297_v51  ;;  %v20126_v20 = vld [vmem:[#allocation13 + $0x6c0] ss:$36 sps:$4 sm:$0xff]  }
 0x3a6   :  { %12090 = vmatpush1.bf16.msra.mxu1 %v20054_v2  ;;  %12050 = vmatprep.subr.bf16.mxu0 %v20059_v3  ;;  %v20117_v2 = vld [vmem:[#allocation13 + $0x288] ss:$36 sps:$4 sm:$0xff]  }
 0x3a7   :  { %12091 = vmatprep.subr.bf16.mxu1 %v20062_v5  ;;  %v20122_v3 = vld [vmem:[#allocation13 + $0x70c] ss:$36 sps:$4 sm:$0xff]   ;;  %v2659_v5 = vadd.f32 %v23254_v19, %v894_v58  ;;  %v20156_v58 = vld [vmem:[#allocation13 + $0xe58] ss:$36 sps:$4 sm:$0xff]  }
 0x3a9   :  { %12051 = vmatpush1.bf16.msra.mxu0 %v20057_v4  ;;  %v2618_v4 = vadd.f32 %v23252_v18, %v886_v60  ;;  %v20131_v18 = vld [vmem:[#allocation13 + $0xafc] ss:$36 sps:$4 sm:$0xff]  }
 0x3aa   :  { %12092 = vmatpush1.bf16.msra.mxu1 %v20060_v6  ;;  %12052 = vmatprep.subr.bf16.mxu0 %v20065_v7  ;;  %v20120_v6 = vld [vmem:[#allocation13 + $0x708] ss:$36 sps:$4 sm:$0xff]   ;;  %v20158_v60 = vld [vmem:[#allocation13 + $0xe5c] ss:$36 sps:$4 sm:$0xff]  }
 0x3ab   :  { %12093 = vmatprep.subr.bf16.mxu1 %v20068_v9  ;;  %v20125_v7 = vld [vmem:[#allocation13 + $0x244] ss:$36 sps:$4 sm:$0xff]   ;;  %v2743_v9 = vadd.f32 %v23287_v54, %v914_v1  ;;  %v20140_v54 = vld [vmem:[#allocation13 + $0xf34] ss:$36 sps:$4 sm:$0xff]  }
 0x3ac   :  { %v20162_v1 = vld [vmem:[#allocation13 + $0xe10] ss:$36 sps:$4 sm:$0xff]  }
 0x3ad   :  { %12053 = vmatpush1.bf16.msra.mxu0 %v20063_v8  ;;  %v2702_v8 = vadd.f32 %v23285_v53, %v906_v63  ;;  %v20137_v53 = vld [vmem:[#allocation13 + $0xab4] ss:$36 sps:$4 sm:$0xff]  }
 0x3ae   :  { %12094 = vmatpush1.bf16.msra.mxu1 %v20066_v10  ;;  %12054 = vmatprep.subr.bf16.mxu0 %v20071_v11  ;;  %v20123_v10 = vld [vmem:[#allocation13 + $0x240] ss:$36 sps:$4 sm:$0xff]   ;;  %v20164_v63 = vld [vmem:[#allocation13 + $0xe14] ss:$36 sps:$4 sm:$0xff]  }
 0x3af   :  { %12095 = vmatprep.subr.bf16.mxu1 %v20074_v13  ;;  %v20128_v11 = vld [vmem:[#allocation13 + $0x6c4] ss:$36 sps:$4 sm:$0xff]   ;;  %v2995_v13 = vmax.f32 %v2659_v5, 0.0  ;;  %v2998_v19 = vmax.f32 %v2702_v8, 0.0 }
 0x3b0   :  { %v20168_v5 = vld [vmem:[#allocation13 + $0xdc8] ss:$36 sps:$4 sm:$0xff]  }
 0x3b1   :  { %12055 = vmatpush1.bf16.msra.mxu0 %v20069_v12  ;;  %v2993_v12 = vmax.f32 %v2618_v4, 0.0  ;;  %v20170_v4 = vld [vmem:[#allocation13 + $0xdcc] ss:$36 sps:$4 sm:$0xff]   ;;  %v20176_v8 = vld [vmem:[#allocation13 + $0xd84] ss:$36 sps:$4 sm:$0xff]  }
 0x3b2   :  { %12096 = vmatpush1.bf16.msra.mxu1 %v20072_v14  ;;  %12056 = vmatprep.subr.bf16.mxu0 %v20077_v15  ;;  %v20134_v14 = vld [vmem:[#allocation13 + $0xf7c] ss:$36 sps:$4 sm:$0xff]   ;;  %v3000_v15 = vmax.f32 %v2743_v9, 0.0 }
 0x3b3   :  { %12097 = vmatprep.subr.bf16.mxu1 %v20080_v21  ;;  %v20132_v21 = vld [vmem:[#allocation13 + $0xf78] ss:$36 sps:$4 sm:$0xff]   ;;  %v20174_v9 = vld [vmem:[#allocation13 + $0xd80] ss:$36 sps:$4 sm:$0xff]  }
 0x3b5   :  { %12057 = vmatpush1.bf16.msra.mxu0 %v20075_v16  ;;  %v20129_v16 = vld [vmem:[#allocation13 + $0xaf8] ss:$36 sps:$4 sm:$0xff]  }
 0x3b6   :  { %12098 = vmatpush1.bf16.msra.mxu1 %v20078_v22  ;;  %12058 = vmatprep.subr.bf16.mxu0 %v20083_v23  ;;  %v23311_v22 = vpack.c.bf16 %v2993_v12, %v2993_v12  ;;  %v23313_v23 = vpack.c.bf16 %v2995_v13, %v2995_v13  ;;  %v20180_v12 = vld [vmem:[#allocation13 + $0x11b8] ss:$36 sps:$4 sm:$0xff]  }
 0x3b7   :  { %12099 = vmatprep.subr.bf16.mxu1 %v20086_v28  ;;  %v20185_v13 = vld [vmem:[#allocation13 + $0xcf4] ss:$36 sps:$4 sm:$0xff]  }
 0x3b9   :  { %12059 = vmatpush2.bf16.msra.mxu0 %v20081_v27  ;;  %v23315_v27 = vpack.c.bf16 %v2998_v19, %v2998_v19  ;;  %v20186_v19 = vld [vmem:[#allocation13 + $0x1170] ss:$36 sps:$4 sm:$0xff]  }
 0x3ba   :  { %12100 = vmatpush2.bf16.msra.mxu1 %v20084_v29  ;;  %12060 = vmatprep.subr.bf16.mxu0 %v20089_v30  ;;  %v20135_v29 = vld [vmem:[#allocation13 + $0xab0] ss:$36 sps:$4 sm:$0xff]  }
 0x3bb   :  { %12101 = vmatprep.subr.bf16.mxu1 %v20092_v32  ;;  %v20138_v30 = vld [vmem:[#allocation13 + $0xf30] ss:$36 sps:$4 sm:$0xff]  }
 0x3bd   :  { %12061 = vmatpush2.bf16.msra.mxu0 %v20087_v31  ;;  %v23320_v31 = vpack.c.bf16 %v3000_v15, %v3000_v15  ;;  %v20191_v15 = vld [vmem:[#allocation13 + $0xcac] ss:$36 sps:$4 sm:$0xff]  }
 0x3be   :  { %12102 = vmatpush2.bf16.msra.mxu1 %v20090_v33  ;;  %12062 = vmatprep.subr.bf16.mxu0 %v20095_v34  ;;  %v20143_v33 = vld [vmem:[#allocation13 + $0xa6c] ss:$36 sps:$4 sm:$0xff]  }
 0x3bf   :  { %12103 = vmatprep.subr.bf16.mxu1 %v20098_v36  ;;  %v20146_v34 = vld [vmem:[#allocation13 + $0xeec] ss:$36 sps:$4 sm:$0xff]  }
 0x3c1   :  { %12063 = vmatpush2.bf16.msra.mxu0 %v20093_v35 }
 0x3c2   :  { %12104 = vmatpush2.bf16.msra.mxu1 %v20096_v56  ;;  %12064 = vmatprep.subr.bf16.mxu0 %v20101_v37  ;;  %v20141_v37 = vld [vmem:[#allocation13 + $0xa68] ss:$36 sps:$4 sm:$0xff]  }
 0x3c3   :  { %12105 = vmatprep.subr.bf16.mxu1 %v20104_v39 }
 0x3c5   :  { %12065 = vmatpush2.bf16.msra.mxu0 %v20099_v38  ;;  %v20144_v38 = vld [vmem:[#allocation13 + $0xee8] ss:$36 sps:$4 sm:$0xff]  }
 0x3c6   :  { %12106 = vmatpush2.bf16.msra.mxu1 %v20102_v44  ;;  %12066 = vmatprep.subr.bf16.mxu0 %v20107_v45  ;;  %v20149_v44 = vld [vmem:[#allocation13 + $0xa24] ss:$36 sps:$4 sm:$0xff]  }
 0x3c7   :  { %12107 = vmatprep.subr.bf16.mxu1 %v20110_v48  ;;  %v20152_v45 = vld [vmem:[#allocation13 + $0xea4] ss:$36 sps:$4 sm:$0xff]  }
 0x3c9   :  { %12067 = vmatpush2.bf16.msra.mxu0 %v20105_v46 }
 0x3ca   :  { %12108 = vmatpush2.bf16.msra.mxu1 %v20108_v52  ;;  %12068 = vmatprep.subr.bf16.mxu0 %v20113_v55  ;;  %v20147_v52 = vld [vmem:[#allocation13 + $0xa20] ss:$36 sps:$4 sm:$0xff]  }
 0x3cb   :  { %12109 = vmatprep.subr.bf16.mxu1 %v20116_v59  ;;  %v20150_v55 = vld [vmem:[#allocation13 + $0xea0] ss:$36 sps:$4 sm:$0xff]   ;;  %v20153_v59 = vld [vmem:[#allocation13 + $0x9d8] ss:$36 sps:$4 sm:$0xff]  }
 0x3cd   :  { %12069 = vmatpush2.bf16.msra.mxu0 %v20111_v57  ;;  %v20155_v57 = vld [vmem:[#allocation13 + $0x9dc] ss:$36 sps:$4 sm:$0xff]  }
 0x3ce   :  { %12110 = vmatpush2.bf16.msra.mxu1 %v20114_v61  ;;  %12070 = vmatprep.subr.bf16.mxu0 %v20119_v62  ;;  %v20161_v61 = vld [vmem:[#allocation13 + $0x994] ss:$36 sps:$4 sm:$0xff]  }
 0x3cf   :  { %12111 = vmatprep.subr.bf16.mxu1 %v20122_v3  ;;  %v20159_v62 = vld [vmem:[#allocation13 + $0x990] ss:$36 sps:$4 sm:$0xff]   ;;  %v20165_v3 = vld [vmem:[#allocation13 + $0x948] ss:$36 sps:$4 sm:$0xff]  }
 0x3d1   :  { %12071 = vmatpush2.bf16.msra.mxu0 %v20117_v2  ;;  %v20167_v2 = vld [vmem:[#allocation13 + $0x94c] ss:$36 sps:$4 sm:$0xff]  }
 0x3d2   :  { %12112 = vmatpush2.bf16.msra.mxu1 %v20120_v6  ;;  %12072 = vmatprep.subr.bf16.mxu0 %v20125_v7  ;;  %v20173_v6 = vld [vmem:[#allocation13 + $0x904] ss:$36 sps:$4 sm:$0xff]  }
 0x3d3   :  { %12113 = vmatprep.subr.bf16.mxu1 %v20128_v11  ;;  %v20171_v7 = vld [vmem:[#allocation13 + $0x900] ss:$36 sps:$4 sm:$0xff]   ;;  %v20177_v11 = vld [vmem:[#allocation13 + $0xd38] ss:$36 sps:$4 sm:$0xff]  }
 0x3d5   :  { %12073 = vmatpush2.bf16.msra.mxu0 %v20123_v10  ;;  %v20179_v10 = vld [vmem:[#allocation13 + $0xd3c] ss:$36 sps:$4 sm:$0xff]  }
 0x3d6   :  { %12114 = vmatpush2.bf16.msra.mxu1 %v20126_v20  ;;  %12124 = vmatprep.subr.bf16.mxu0 %v20131_v18  ;;  %v20182_v20 = vld [vmem:[#allocation13 + $0x11bc] ss:$36 sps:$4 sm:$0xff]   ;;  %v20183_v18 = vld [vmem:[#allocation13 + $0xcf0] ss:$36 sps:$4 sm:$0xff]  }
 0x3d7   :  { %12165 = vmatprep.subr.bf16.mxu1 %v20134_v14  ;;  %v20188_v14 = vld [vmem:[#allocation13 + $0x1174] ss:$36 sps:$4 sm:$0xff]  }
 0x3d8   :  { %v23317_v28 = vpop.f32.mrf.mxu0  ;;  %12075 = vmatmul.mubr.bf16.vlgmr.msra.gmra.mxu0 %v23311_v22 }
 0x3d9   :  { %v23322_v32 = vpop.f32.mrf.mxu1  ;;  %12116 = vmatmul.mubr.bf16.vlgmr.msra.gmra.mxu1 %v23313_v23  ;;  %12125 = vmatpush1.bf16.msra.mxu0 %v20129_v16  ;;  %v20189_v16 = vld [vmem:[#allocation13 + $0xca8] ss:$36 sps:$4 sm:$0xff]  }
 0x3da   :  { %12156 = vmatprep.mubr.bf16.mxu0 %v23315_v27  ;;  %12166 = vmatpush1.bf16.msra.mxu1 %v20132_v21  ;;  %v23326_v35 = vpop.f32.mrf.mxu0  ;;  %v20194_v21 = vld [vmem:[#allocation13 + $0x112c] ss:$36 sps:$4 sm:$0xff]  }
 0x3db   :  { %12197 = vmatprep.mubr.bf16.mxu1 %v23320_v31  ;;  %v23329_v36 = vpop.f32.mrf.mxu1  ;;  %12126 = vmatprep.subr.bf16.mxu0 %v20137_v53  ;;  %v20192_v53 = vld [vmem:[#allocation13 + $0x1128] ss:$36 sps:$4 sm:$0xff]  }
 0x3dc   :  { %v2785_v56 = vpop.f32.mrf.mxu0  ;;  %12167 = vmatprep.subr.bf16.mxu1 %v20140_v54  ;;  %v20197_v54 = vld [vmem:[#allocation13 + $0xc64] ss:$36 sps:$4 sm:$0xff]  }
 0x3dd   :  { %v2826_v39 = vpop.f32.mrf.mxu1  ;;  %12127 = vmatpush1.bf16.msra.mxu0 %v20135_v29  ;;  %v20195_v29 = vld [vmem:[#allocation13 + $0xc60] ss:$36 sps:$4 sm:$0xff]   ;;  %v20201_v56 = vld [vmem:[#allocation13 + $0xc18] ss:$36 sps:$4 sm:$0xff]  }
 0x3de   :  { %12168 = vmatpush1.bf16.msra.mxu1 %v20138_v30  ;;  %v2786_v46 = vpop.f32.mrf.mxu0  ;;  %12128 = vmatprep.subr.bf16.mxu0 %v20143_v33  ;;  %v20200_v30 = vld [vmem:[#allocation13 + $0x10e4] ss:$36 sps:$4 sm:$0xff]   ;;  %v23335_v39 = vsub.s32 6, %v23223_v40 }
 0x3df   :  { %v2827_v48 = vpop.f32.mrf.mxu1  ;;  %12169 = vmatprep.subr.bf16.mxu1 %v20146_v34  ;;  %v20198_v33 = vld [vmem:[#allocation13 + $0x10e0] ss:$36 sps:$4 sm:$0xff]   ;;  %v20207_v46 = vld [vmem:[#allocation13 + $0xbd0] ss:$36 sps:$4 sm:$0xff]  }
 0x3e0   :  { %v20203_v34 = vld [vmem:[#allocation13 + $0xc1c] ss:$36 sps:$4 sm:$0xff]   ;;  %v20212_v48 = vld [vmem:[#allocation13 + $0x1054] ss:$36 sps:$4 sm:$0xff]  }
 0x3e1   :  { %12129 = vmatpush1.bf16.msra.mxu0 %v20141_v37  ;;  %v20206_v37 = vld [vmem:[#allocation13 + $0x109c] ss:$36 sps:$4 sm:$0xff]  }
 0x3e2   :  { %12170 = vmatpush1.bf16.msra.mxu1 %v20144_v38  ;;  %12130 = vmatprep.subr.bf16.mxu0 %v20149_v44  ;;  %v23332_v38 = vsub.s32 4, %v23223_v40  ;;  %v20204_v44 = vld [vmem:[#allocation13 + $0x1098] ss:$36 sps:$4 sm:$0xff]   ;;  %v20215_v40 = vld [vmem:[#allocation13 + $0xb8c] ss:$36 sps:$4 sm:$0xff]  }
 0x3e3   :  { %12171 = vmatprep.subr.bf16.mxu1 %v20152_v45  ;;  %v20209_v45 = vld [vmem:[#allocation13 + $0xbd4] ss:$36 sps:$4 sm:$0xff]  }
 0x3e5   :  { %12131 = vmatpush1.bf16.msra.mxu0 %v20147_v52  ;;  %v22601_v52 = vld [vmem:[#allocation11] sm:$0xff] }
 0x3e6   :  { %12172 = vmatpush1.bf16.msra.mxu1 %v20150_v55  ;;  %12132 = vmatprep.subr.bf16.mxu0 %v20155_v57  ;;  %v902_v55 = vrot.slane %v22601_v52, %v23332_v38  ;;  %v910_v57 = vrot.slane %v22601_v52, %v23335_v39 }
 0x3e7   :  { %12173 = vmatprep.subr.bf16.mxu1 %v20158_v60  ;;  %v20210_v60 = vld [vmem:[#allocation13 + $0x1050] ss:$36 sps:$4 sm:$0xff]  }
 0x3e9   :  { %12133 = vmatpush1.bf16.msra.mxu0 %v20153_v59  ;;  %v23339_v59 = vld [vmem:[#allocation11 + $0x8] sm:$0xff] }
 0x3ea   :  { %12174 = vmatpush1.bf16.msra.mxu1 %v20156_v58  ;;  %12134 = vmatprep.subr.bf16.mxu0 %v20161_v61  ;;  %v922_v58 = vrot.slane %v23339_v59, %v23229_v43  ;;  %v930_v61 = vrot.slane %v23339_v59, %v23264_v17 }
 0x3eb   :  { %12175 = vmatprep.subr.bf16.mxu1 %v20164_v63  ;;  %v20218_v63 = vld [vmem:[#allocation13 + $0x100c] ss:$36 sps:$4 sm:$0xff]  }
 0x3ed   :  { %12135 = vmatpush1.bf16.msra.mxu0 %v20159_v62  ;;  %v20213_v62 = vld [vmem:[#allocation13 + $0xb88] ss:$36 sps:$4 sm:$0xff]  }
 0x3ee   :  { %12176 = vmatpush1.bf16.msra.mxu1 %v20162_v1  ;;  %12136 = vmatprep.subr.bf16.mxu0 %v20167_v2  ;;  %v2700_v1 = vadd.f32 %v23276_v25, %v902_v55  ;;  %v2741_v2 = vadd.f32 %v23278_v47, %v910_v57  ;;  %v20227_v25 = vld [vmem:[#allocation13 + $0x13fc] ss:$36 sps:$4 sm:$0xff]   ;;  %v20248_v57 = vld [vmem:[#allocation13 + $0x17a4] ss:$36 sps:$4 sm:$0xff]  }
 0x3ef   :  { %12177 = vmatprep.subr.bf16.mxu1 %v20170_v4  ;;  %v20221_v4 = vld [vmem:[#allocation13 + $0xb44] ss:$36 sps:$4 sm:$0xff]  }
 0x3f1   :  { %12137 = vmatpush1.bf16.msra.mxu0 %v20165_v3  ;;  %v20216_v3 = vld [vmem:[#allocation13 + $0x1008] ss:$36 sps:$4 sm:$0xff]  }
 0x3f2   :  { %12178 = vmatpush1.bf16.msra.mxu1 %v20168_v5  ;;  %12138 = vmatprep.subr.bf16.mxu0 %v20173_v6  ;;  %v2784_v5 = vadd.f32 %v23326_v35, %v922_v58  ;;  %v2825_v6 = vadd.f32 %v23329_v36, %v930_v61  ;;  %v20233_v35 = vld [vmem:[#allocation13 + $0x13b4] ss:$36 sps:$4 sm:$0xff]   ;;  %v20251_v58 = vld [vmem:[#allocation13 + $0x12dc] ss:$36 sps:$4 sm:$0xff]  }
 0x3f3   :  { %12179 = vmatprep.subr.bf16.mxu1 %v20176_v8  ;;  %v20224_v8 = vld [vmem:[#allocation13 + $0xfc4] ss:$36 sps:$4 sm:$0xff]   ;;  %v20236_v36 = vld [vmem:[#allocation13 + $0x1834] ss:$36 sps:$4 sm:$0xff]  }
 0x3f4   :  { %v3002_v47 = vmax.f32 %v2784_v5, 0.0  ;;  %v20249_v61 = vld [vmem:[#allocation13 + $0x12d8] ss:$36 sps:$4 sm:$0xff]   ;;  %v20263_v5 = vld [vmem:[#allocation13 + $0x124c] ss:$36 sps:$4 sm:$0xff]  }
 0x3f5   :  { %12139 = vmatpush1.bf16.msra.mxu0 %v20171_v7  ;;  %v20219_v7 = vld [vmem:[#allocation13 + $0xb40] ss:$36 sps:$4 sm:$0xff]  }
 0x3f6   :  { %12180 = vmatpush1.bf16.msra.mxu1 %v20174_v9  ;;  %12140 = vmatprep.subr.bf16.mxu0 %v20179_v10  ;;  %v20222_v9 = vld [vmem:[#allocation13 + $0xfc0] ss:$36 sps:$4 sm:$0xff]   ;;  %v2997_v10 = vmax.f32 %v2700_v1, 0.0  ;;  %v20257_v1 = vld [vmem:[#allocation13 + $0x1294] ss:$36 sps:$4 sm:$0xff]  }
 0x3f7   :  { %12181 = vmatprep.subr.bf16.mxu1 %v20182_v20  ;;  %v20230_v20 = vld [vmem:[#allocation13 + $0x187c] ss:$36 sps:$4 sm:$0xff]  }
 0x3f9   :  { %12141 = vmatpush2.bf16.msra.mxu0 %v20177_v11  ;;  %v2999_v11 = vmax.f32 %v2741_v2, 0.0  ;;  %v20255_v2 = vld [vmem:[#allocation13 + $0x1290] ss:$36 sps:$4 sm:$0xff]  }
 0x3fa   :  { %12182 = vmatpush2.bf16.msra.mxu1 %v20180_v12  ;;  %12142 = vmatprep.subr.bf16.mxu0 %v20185_v13  ;;  %v3004_v12 = vmax.f32 %v2825_v6, 0.0  ;;  %v20225_v13 = vld [vmem:[#allocation13 + $0x13f8] ss:$36 sps:$4 sm:$0xff]   ;;  %v20261_v6 = vld [vmem:[#allocation13 + $0x1248] ss:$36 sps:$4 sm:$0xff]  }
 0x3fb   :  { %12183 = vmatprep.subr.bf16.mxu1 %v20188_v14  ;;  %v23349_v14 = vpack.c.bf16 %v2997_v10, %v2997_v10  ;;  %v20267_v10 = vld [vmem:[#allocation13 + $0x1200] ss:$36 sps:$4 sm:$0xff]  }
 0x3fd   :  { %12143 = vmatpush2.bf16.msra.mxu0 %v20183_v18  ;;  %v20228_v18 = vld [vmem:[#allocation13 + $0x1878] ss:$36 sps:$4 sm:$0xff]  }
 0x3fe   :  { %12184 = vmatpush2.bf16.msra.mxu1 %v20186_v19  ;;  %12144 = vmatprep.subr.bf16.mxu0 %v20191_v15  ;;  %v23351_v19 = vpack.c.bf16 %v2999_v11, %v2999_v11  ;;  %v23353_v15 = vpack.c.bf16 %v3002_v47, %v3002_v47  ;;  %v20272_v11 = vld [vmem:[#allocation13 + $0x1684] ss:$36 sps:$4 sm:$0xff]   ;;  %v20273_v47 = vld [vmem:[#allocation13 + $0x1638] ss:$36 sps:$4 sm:$0xff]  }
 0x3ff   :  { %12185 = vmatprep.subr.bf16.mxu1 %v20194_v21  ;;  %v20231_v21 = vld [vmem:[#allocation13 + $0x13b0] ss:$36 sps:$4 sm:$0xff]  }
 0x401   :  { %12145 = vmatpush2.bf16.msra.mxu0 %v20189_v16 }
 0x402   :  { %12186 = vmatpush2.bf16.msra.mxu1 %v20192_v53  ;;  %12146 = vmatprep.subr.bf16.mxu0 %v20197_v54  ;;  %v20234_v53 = vld [vmem:[#allocation13 + $0x1830] ss:$36 sps:$4 sm:$0xff]   ;;  %v23358_v54 = vpack.c.bf16 %v3004_v12, %v3004_v12  ;;  %v20278_v12 = vld [vmem:[#allocation13 + $0x1abc] ss:$36 sps:$4 sm:$0xff]  }
 0x403   :  { %12187 = vmatprep.subr.bf16.mxu1 %v20200_v30  ;;  %v20239_v30 = vld [vmem:[#allocation13 + $0x136c] ss:$36 sps:$4 sm:$0xff]  }
 0x405   :  { %12147 = vmatpush2.bf16.msra.mxu0 %v20195_v29 }
 0x406   :  { %12188 = vmatpush2.bf16.msra.mxu1 %v20198_v33  ;;  %12148 = vmatprep.subr.bf16.mxu0 %v20203_v34  ;;  %v20242_v33 = vld [vmem:[#allocation13 + $0x17ec] ss:$36 sps:$4 sm:$0xff]  }
 0x407   :  { %12189 = vmatprep.subr.bf16.mxu1 %v20206_v37 }
 0x409   :  { %12149 = vmatpush2.bf16.msra.mxu0 %v20201_v56 }
 0x40a   :  { %12190 = vmatpush2.bf16.msra.mxu1 %v20204_v44  ;;  %12150 = vmatprep.subr.bf16.mxu0 %v20209_v45  ;;  %v20237_v44 = vld [vmem:[#allocation13 + $0x1368] ss:$36 sps:$4 sm:$0xff]  }
 0x40b   :  { %12191 = vmatprep.subr.bf16.mxu1 %v20212_v48  ;;  %v20245_v48 = vld [vmem:[#allocation13 + $0x1324] ss:$36 sps:$4 sm:$0xff]  }
 0x40d   :  { %12151 = vmatpush2.bf16.msra.mxu0 %v20207_v46  ;;  %v20240_v46 = vld [vmem:[#allocation13 + $0x17e8] ss:$36 sps:$4 sm:$0xff]  }
 0x40e   :  { %12192 = vmatpush2.bf16.msra.mxu1 %v20210_v60  ;;  %12152 = vmatprep.subr.bf16.mxu0 %v20215_v40  ;;  %v20243_v60 = vld [vmem:[#allocation13 + $0x1320] ss:$36 sps:$4 sm:$0xff]  }
 0x40f   :  { %12193 = vmatprep.subr.bf16.mxu1 %v20218_v63  ;;  %v20246_v40 = vld [vmem:[#allocation13 + $0x17a0] ss:$36 sps:$4 sm:$0xff]   ;;  %v20252_v63 = vld [vmem:[#allocation13 + $0x1758] ss:$36 sps:$4 sm:$0xff]  }
 0x411   :  { %12153 = vmatpush2.bf16.msra.mxu0 %v20213_v62  ;;  %v20254_v62 = vld [vmem:[#allocation13 + $0x175c] ss:$36 sps:$4 sm:$0xff]  }
 0x412   :  { %12194 = vmatpush2.bf16.msra.mxu1 %v20216_v3  ;;  %12154 = vmatprep.subr.bf16.mxu0 %v20221_v4  ;;  %v20260_v3 = vld [vmem:[#allocation13 + $0x1714] ss:$36 sps:$4 sm:$0xff]  }
 0x413   :  { %12195 = vmatprep.subr.bf16.mxu1 %v20224_v8  ;;  %v20258_v4 = vld [vmem:[#allocation13 + $0x1710] ss:$36 sps:$4 sm:$0xff]   ;;  %v20264_v8 = vld [vmem:[#allocation13 + $0x16c8] ss:$36 sps:$4 sm:$0xff]  }
 0x415   :  { %12155 = vmatpush2.bf16.msra.mxu0 %v20219_v7  ;;  %v20266_v7 = vld [vmem:[#allocation13 + $0x16cc] ss:$36 sps:$4 sm:$0xff]  }
 0x416   :  { %12196 = vmatpush2.bf16.msra.mxu1 %v20222_v9  ;;  %12206 = vmatprep.subr.bf16.mxu0 %v20227_v25  ;;  %v20269_v9 = vld [vmem:[#allocation13 + $0x1204] ss:$36 sps:$4 sm:$0xff]  }
 0x417   :  { %12247 = vmatprep.subr.bf16.mxu1 %v20230_v20  ;;  %v20270_v25 = vld [vmem:[#allocation13 + $0x1680] ss:$36 sps:$4 sm:$0xff]  }
 0x418   :  { %v23355_v16 = vpop.f32.mrf.mxu0  ;;  %12157 = vmatmul.mubr.bf16.vlgmr.msra.gmra.mxu0 %v23349_v14  ;;  %v20275_v20 = vld [vmem:[#allocation13 + $0x163c] ss:$36 sps:$4 sm:$0xff]  }
 0x419   :  { %v23360_v29 = vpop.f32.mrf.mxu1  ;;  %12198 = vmatmul.mubr.bf16.vlgmr.msra.gmra.mxu1 %v23351_v19  ;;  %12207 = vmatpush1.bf16.msra.mxu0 %v20225_v13  ;;  %v20276_v13 = vld [vmem:[#allocation13 + $0x1ab8] ss:$36 sps:$4 sm:$0xff]  }
 0x41a   :  { %12238 = vmatprep.mubr.bf16.mxu0 %v23353_v15  ;;  %12248 = vmatpush1.bf16.msra.mxu1 %v20228_v18  ;;  %v23364_v34 = vpop.f32.mrf.mxu0  ;;  %v20281_v18 = vld [vmem:[#allocation13 + $0x15f4] ss:$36 sps:$4 sm:$0xff]  }
 0x41b   :  { %12279 = vmatprep.mubr.bf16.mxu1 %v23358_v54  ;;  %v23367_v56 = vpop.f32.mrf.mxu1  ;;  %12208 = vmatprep.subr.bf16.mxu0 %v20233_v35  ;;  %v20279_v35 = vld [vmem:[#allocation13 + $0x15f0] ss:$36 sps:$4 sm:$0xff]  }
 0x41c   :  { %v2867_v37 = vpop.f32.mrf.mxu0  ;;  %12249 = vmatprep.subr.bf16.mxu1 %v20236_v36  ;;  %v20284_v36 = vld [vmem:[#allocation13 + $0x1a74] ss:$36 sps:$4 sm:$0xff]  }
 0x41d   :  { %v2908_v45 = vpop.f32.mrf.mxu1  ;;  %12209 = vmatpush1.bf16.msra.mxu0 %v20231_v21  ;;  %v20282_v21 = vld [vmem:[#allocation13 + $0x1a70] ss:$36 sps:$4 sm:$0xff]   ;;  %v20288_v37 = vld [vmem:[#allocation13 + $0x1a28] ss:$36 sps:$4 sm:$0xff]  }
 0x41e   :  { %12250 = vmatpush1.bf16.msra.mxu1 %v20234_v53  ;;  %v2868_v52 = vpop.f32.mrf.mxu0  ;;  %12210 = vmatprep.subr.bf16.mxu0 %v20239_v30  ;;  %v20287_v53 = vld [vmem:[#allocation13 + $0x15ac] ss:$36 sps:$4 sm:$0xff]   ;;  %v20291_v45 = vld [vmem:[#allocation13 + $0x1560] ss:$36 sps:$4 sm:$0xff]  }
 0x41f   :  { %v2909_v55 = vpop.f32.mrf.mxu1  ;;  %12251 = vmatprep.subr.bf16.mxu1 %v20242_v33  ;;  %v20285_v30 = vld [vmem:[#allocation13 + $0x15a8] ss:$36 sps:$4 sm:$0xff]   ;;  %v20299_v52 = vld [vmem:[#allocation13 + $0x151c] ss:$36 sps:$4 sm:$0xff]  }
 0x420   :  { %v20290_v33 = vld [vmem:[#allocation13 + $0x1a2c] ss:$36 sps:$4 sm:$0xff]   ;;  %v20297_v55 = vld [vmem:[#allocation13 + $0x1518] ss:$36 sps:$4 sm:$0xff]  }
 0x421   :  { %12211 = vmatpush1.bf16.msra.mxu0 %v20237_v44  ;;  %v20293_v44 = vld [vmem:[#allocation13 + $0x1564] ss:$36 sps:$4 sm:$0xff]  }
 0x422   :  { %12252 = vmatpush1.bf16.msra.mxu1 %v20240_v46  ;;  %12212 = vmatprep.subr.bf16.mxu0 %v20245_v48  ;;  %v20296_v46 = vld [vmem:[#allocation13 + $0x19e4] ss:$36 sps:$4 sm:$0xff]  }
 0x423   :  { %12253 = vmatprep.subr.bf16.mxu1 %v20248_v57  ;;  %v20294_v48 = vld [vmem:[#allocation13 + $0x19e0] ss:$36 sps:$4 sm:$0xff]  }
 0x424   :  { %v20302_v57 = vld [vmem:[#allocation13 + $0x199c] ss:$36 sps:$4 sm:$0xff]  }
 0x425   :  { %12213 = vmatpush1.bf16.msra.mxu0 %v20243_v60  ;;  %v20300_v60 = vld [vmem:[#allocation13 + $0x1998] ss:$36 sps:$4 sm:$0xff]  }
 0x426   :  { %12254 = vmatpush1.bf16.msra.mxu1 %v20246_v40  ;;  %12214 = vmatprep.subr.bf16.mxu0 %v20251_v58  ;;  %v20305_v40 = vld [vmem:[#allocation13 + $0x14d4] ss:$36 sps:$4 sm:$0xff]  }
 0x427   :  { %12255 = vmatprep.subr.bf16.mxu1 %v20254_v62  ;;  %v20303_v58 = vld [vmem:[#allocation13 + $0x14d0] ss:$36 sps:$4 sm:$0xff]   ;;  %v918_v62 = vrot.slane %v23339_v59, %v23226_v42 }
 0x429   :  { %12215 = vmatpush1.bf16.msra.mxu0 %v20249_v61  ;;  %v20308_v61 = vld [vmem:[#allocation13 + $0x1954] ss:$36 sps:$4 sm:$0xff]  }
 0x42a   :  { %12256 = vmatpush1.bf16.msra.mxu1 %v20252_v63  ;;  %12216 = vmatprep.subr.bf16.mxu0 %v20257_v1  ;;  %v20306_v63 = vld [vmem:[#allocation13 + $0x1950] ss:$36 sps:$4 sm:$0xff]  }
 0x42b   :  { %12257 = vmatprep.subr.bf16.mxu1 %v20260_v3  ;;  %v20311_v1 = vld [vmem:[#allocation13 + $0x148c] ss:$36 sps:$4 sm:$0xff]  }
 0x42c   :  { %v20309_v3 = vld [vmem:[#allocation13 + $0x1488] ss:$36 sps:$4 sm:$0xff]  }
 0x42d   :  { %12217 = vmatpush1.bf16.msra.mxu0 %v20255_v2  ;;  %v926_v2 = vrot.slane %v23339_v59, %v23291_v41 }
 0x42e   :  { %12258 = vmatpush1.bf16.msra.mxu1 %v20258_v4  ;;  %12218 = vmatprep.subr.bf16.mxu0 %v20263_v5  ;;  %v20314_v4 = vld [vmem:[#allocation13 + $0x190c] ss:$36 sps:$4 sm:$0xff]   ;;  %v938_v5 = vrot.slane %v23339_v59, %v23294_v49 }
 0x42f   :  { %12259 = vmatprep.subr.bf16.mxu1 %v20266_v7  ;;  %v2782_v7 = vadd.f32 %v23317_v28, %v918_v62  ;;  %v20326_v28 = vld [vmem:[#allocation13 + $0x217c] ss:$36 sps:$4 sm:$0xff]   ;;  %v20336_v62 = vld [vmem:[#allocation13 + $0x20e8] ss:$36 sps:$4 sm:$0xff]  }
 0x431   :  { %12219 = vmatpush1.bf16.msra.mxu0 %v20261_v6  ;;  %v946_v6 = vrot.slane %v23339_v59, %v23297_v51  ;;  %v20323_v59 = vld [vmem:[#allocation13 + $0x1cfc] ss:$36 sps:$4 sm:$0xff]  }
 0x432   :  { %12260 = vmatpush1.bf16.msra.mxu1 %v20264_v8  ;;  %12220 = vmatprep.subr.bf16.mxu0 %v20269_v9  ;;  %v20312_v8 = vld [vmem:[#allocation13 + $0x1908] ss:$36 sps:$4 sm:$0xff]  }
 0x433   :  { %12261 = vmatprep.subr.bf16.mxu1 %v20272_v11  ;;  %v20317_v9 = vld [vmem:[#allocation13 + $0x1444] ss:$36 sps:$4 sm:$0xff]  }
 0x434   :  { %v20315_v11 = vld [vmem:[#allocation13 + $0x1440] ss:$36 sps:$4 sm:$0xff]  }
 0x435   :  { %12221 = vmatpush1.bf16.msra.mxu0 %v20267_v10  ;;  %v2823_v10 = vadd.f32 %v23322_v32, %v926_v2 }
 0x436   :  { %12262 = vmatpush1.bf16.msra.mxu1 %v20270_v25  ;;  %12222 = vmatprep.subr.bf16.mxu0 %v20275_v20  ;;  %v20320_v25 = vld [vmem:[#allocation13 + $0x18c4] ss:$36 sps:$4 sm:$0xff]   ;;  %v2866_v20 = vadd.f32 %v23364_v34, %v938_v5  ;;  %v20332_v34 = vld [vmem:[#allocation13 + $0x2134] ss:$36 sps:$4 sm:$0xff]  }
 0x437   :  { %12263 = vmatprep.subr.bf16.mxu1 %v20278_v12  ;;  %v2907_v12 = vadd.f32 %v23367_v56, %v946_v6  ;;  %v20342_v5 = vld [vmem:[#allocation13 + $0x20a0] ss:$36 sps:$4 sm:$0xff]  }
 0x438   :  { %v20347_v6 = vld [vmem:[#allocation13 + $0x1bdc] ss:$36 sps:$4 sm:$0xff]  }
 0x439   :  { %12223 = vmatpush2.bf16.msra.mxu0 %v20273_v47  ;;  %v20318_v47 = vld [vmem:[#allocation13 + $0x18c0] ss:$36 sps:$4 sm:$0xff]   ;;  %v3008_v32 = vmax.f32 %v2907_v12, 0.0  ;;  %v20357_v12 = vld [vmem:[#allocation13 + $0x1b48] ss:$36 sps:$4 sm:$0xff]  }
 0x43a   :  { %12264 = vmatpush2.bf16.msra.mxu1 %v20276_v13  ;;  %12224 = vmatprep.subr.bf16.mxu0 %v20281_v18  ;;  %v3001_v13 = vmax.f32 %v2782_v7, 0.0  ;;  %v3003_v18 = vmax.f32 %v2823_v10, 0.0  ;;  %v20345_v7 = vld [vmem:[#allocation13 + $0x1bd8] ss:$36 sps:$4 sm:$0xff]  }
 0x43b   :  { %12265 = vmatprep.subr.bf16.mxu1 %v20284_v36  ;;  %v3006_v36 = vmax.f32 %v2866_v20, 0.0  ;;  %v20353_v10 = vld [vmem:[#allocation13 + $0x1b94] ss:$36 sps:$4 sm:$0xff]  }
 0x43c   :  { %v23383_v56 = vpack.c.bf16 %v3003_v18, %v3003_v18  ;;  %v20354_v20 = vld [vmem:[#allocation13 + $0x2010] ss:$36 sps:$4 sm:$0xff]   ;;  %v20363_v18 = vld [vmem:[#allocation13 + $0x1b00] ss:$36 sps:$4 sm:$0xff]  }
 0x43d   :  { %12225 = vmatpush2.bf16.msra.mxu0 %v20279_v35  ;;  %v20321_v35 = vld [vmem:[#allocation13 + $0x1cf8] ss:$36 sps:$4 sm:$0xff]  }
 0x43e   :  { %12266 = vmatpush2.bf16.msra.mxu1 %v20282_v21  ;;  %12226 = vmatprep.subr.bf16.mxu0 %v20287_v53  ;;  %v20324_v21 = vld [vmem:[#allocation13 + $0x2178] ss:$36 sps:$4 sm:$0xff]  }
 0x43f   :  { %12267 = vmatprep.subr.bf16.mxu1 %v20290_v33  ;;  %v20329_v53 = vld [vmem:[#allocation13 + $0x1cb4] ss:$36 sps:$4 sm:$0xff]   ;;  %v23385_v33 = vpack.c.bf16 %v3006_v36, %v3006_v36  ;;  %v20366_v36 = vld [vmem:[#allocation13 + $0x1f80] ss:$36 sps:$4 sm:$0xff]  }
 0x441   :  { %12227 = vmatpush2.bf16.msra.mxu0 %v20285_v30  ;;  %v23381_v30 = vpack.c.bf16 %v3001_v13, %v3001_v13  ;;  %v20362_v13 = vld [vmem:[#allocation13 + $0x1fcc] ss:$36 sps:$4 sm:$0xff]  }
 0x442   :  { %12268 = vmatpush2.bf16.msra.mxu1 %v20288_v37  ;;  %12228 = vmatprep.subr.bf16.mxu0 %v20293_v44  ;;  %v20327_v44 = vld [vmem:[#allocation13 + $0x1cb0] ss:$36 sps:$4 sm:$0xff]  }
 0x443   :  { %12269 = vmatprep.subr.bf16.mxu1 %v20296_v46  ;;  %v23390_v46 = vpack.c.bf16 %v3008_v32, %v3008_v32  ;;  %v20369_v32 = vld [vmem:[#allocation13 + $0x1f38] ss:$36 sps:$4 sm:$0xff]  }
 0x445   :  { %12229 = vmatpush2.bf16.msra.mxu0 %v20291_v45  ;;  %v20330_v45 = vld [vmem:[#allocation13 + $0x2130] ss:$36 sps:$4 sm:$0xff]  }
 0x446   :  { %12270 = vmatpush2.bf16.msra.mxu1 %v20294_v48  ;;  %12230 = vmatprep.subr.bf16.mxu0 %v20299_v52  ;;  %v20335_v52 = vld [vmem:[#allocation13 + $0x1c6c] ss:$36 sps:$4 sm:$0xff]  }
 0x447   :  { %12271 = vmatprep.subr.bf16.mxu1 %v20302_v57 }
 0x449   :  { %12231 = vmatpush2.bf16.msra.mxu0 %v20297_v55  ;;  %v20338_v55 = vld [vmem:[#allocation13 + $0x20ec] ss:$36 sps:$4 sm:$0xff]  }
 0x44a   :  { %12272 = vmatpush2.bf16.msra.mxu1 %v20300_v60  ;;  %12232 = vmatprep.subr.bf16.mxu0 %v20305_v40 }
 0x44b   :  { %12273 = vmatprep.subr.bf16.mxu1 %v20308_v61 }
 0x44d   :  { %12233 = vmatpush2.bf16.msra.mxu0 %v20303_v58  ;;  %v20333_v58 = vld [vmem:[#allocation13 + $0x1c68] ss:$36 sps:$4 sm:$0xff]  }
 0x44e   :  { %12274 = vmatpush2.bf16.msra.mxu1 %v20306_v63  ;;  %12234 = vmatprep.subr.bf16.mxu0 %v20311_v1  ;;  %v20341_v63 = vld [vmem:[#allocation13 + $0x1c24] ss:$36 sps:$4 sm:$0xff]  }
 0x44f   :  { %12275 = vmatprep.subr.bf16.mxu1 %v20314_v4  ;;  %v20339_v4 = vld [vmem:[#allocation13 + $0x1c20] ss:$36 sps:$4 sm:$0xff]  }
 0x451   :  { %12235 = vmatpush2.bf16.msra.mxu0 %v20309_v3  ;;  %v20344_v3 = vld [vmem:[#allocation13 + $0x20a4] ss:$36 sps:$4 sm:$0xff]  }
 0x452   :  { %12276 = vmatpush2.bf16.msra.mxu1 %v20312_v8  ;;  %12236 = vmatprep.subr.bf16.mxu0 %v20317_v9  ;;  %v20350_v8 = vld [vmem:[#allocation13 + $0x205c] ss:$36 sps:$4 sm:$0xff]  }
 0x453   :  { %12277 = vmatprep.subr.bf16.mxu1 %v20320_v25  ;;  %v20348_v9 = vld [vmem:[#allocation13 + $0x2058] ss:$36 sps:$4 sm:$0xff]  }
 0x454   :  { %v20356_v25 = vld [vmem:[#allocation13 + $0x2014] ss:$36 sps:$4 sm:$0xff]  }
 0x455   :  { %12237 = vmatpush2.bf16.msra.mxu0 %v20315_v11  ;;  %v20351_v11 = vld [vmem:[#allocation13 + $0x1b90] ss:$36 sps:$4 sm:$0xff]  }
 0x456   :  { %12278 = vmatpush2.bf16.msra.mxu1 %v20318_v47  ;;  %12288 = vmatprep.subr.bf16.mxu0 %v20323_v59  ;;  %v20359_v47 = vld [vmem:[#allocation13 + $0x1b4c] ss:$36 sps:$4 sm:$0xff]  }
 0x457   :  { %12329 = vmatprep.subr.bf16.mxu1 %v20326_v28  ;;  %v20360_v59 = vld [vmem:[#allocation13 + $0x1fc8] ss:$36 sps:$4 sm:$0xff]  }
 0x458   :  { %v23387_v37 = vpop.f32.mrf.mxu0  ;;  %12239 = vmatmul.mubr.bf16.vlgmr.msra.gmra.mxu0 %v23381_v30  ;;  %v20365_v28 = vld [vmem:[#allocation13 + $0x1b04] ss:$36 sps:$4 sm:$0xff]  }
 0x459   :  { %v23392_v48 = vpop.f32.mrf.mxu1  ;;  %12280 = vmatmul.mubr.bf16.vlgmr.msra.gmra.mxu1 %v23383_v56  ;;  %12289 = vmatpush1.bf16.msra.mxu0 %v20321_v35  ;;  %v20368_v35 = vld [vmem:[#allocation13 + $0x1f84] ss:$36 sps:$4 sm:$0xff]  }
 0x45a   :  { %12320 = vmatprep.mubr.bf16.mxu0 %v23385_v33  ;;  %12330 = vmatpush1.bf16.msra.mxu1 %v20324_v21  ;;  %v23396_v57 = vpop.f32.mrf.mxu0  ;;  %v20371_v21 = vld [vmem:[#allocation13 + $0x1f3c] ss:$36 sps:$4 sm:$0xff]  }
 0x45b   :  { %12361 = vmatprep.mubr.bf16.mxu1 %v23390_v46  ;;  %v23399_v60 = vpop.f32.mrf.mxu1  ;;  %12290 = vmatprep.subr.bf16.mxu0 %v20329_v53  ;;  %v20374_v53 = vld [vmem:[#allocation13 + $0x23bc] ss:$36 sps:$4 sm:$0xff]  }
 0x45c   :  { %v2949_v40 = vpop.f32.mrf.mxu0  ;;  %12331 = vmatprep.subr.bf16.mxu1 %v20332_v34  ;;  %v20372_v34 = vld [vmem:[#allocation13 + $0x23b8] ss:$36 sps:$4 sm:$0xff]  }
 0x45d   :  { %v2990_v61 = vpop.f32.mrf.mxu1  ;;  %12291 = vmatpush1.bf16.msra.mxu0 %v20327_v44  ;;  %v20377_v44 = vld [vmem:[#allocation13 + $0x1ef4] ss:$36 sps:$4 sm:$0xff]   ;;  %v20383_v40 = vld [vmem:[#allocation13 + $0x1eac] ss:$36 sps:$4 sm:$0xff]  }
 0x45e   :  { %12332 = vmatpush1.bf16.msra.mxu1 %v20330_v45  ;;  %v2950_v1 = vpop.f32.mrf.mxu0  ;;  %12292 = vmatprep.subr.bf16.mxu0 %v20335_v52  ;;  %v20375_v45 = vld [vmem:[#allocation13 + $0x1ef0] ss:$36 sps:$4 sm:$0xff]  }
 0x45f   :  { %v2991_v2 = vpop.f32.mrf.mxu1  ;;  %12333 = vmatprep.subr.bf16.mxu1 %v20338_v55  ;;  %v20380_v52 = vld [vmem:[#allocation13 + $0x2374] ss:$36 sps:$4 sm:$0xff]   ;;  %v20386_v61 = vld [vmem:[#allocation13 + $0x232c] ss:$36 sps:$4 sm:$0xff]   ;;  %v20387_v1 = vld [vmem:[#allocation13 + $0x1e60] ss:$36 sps:$4 sm:$0xff]  }
 0x460   :  { %v20378_v55 = vld [vmem:[#allocation13 + $0x2370] ss:$36 sps:$4 sm:$0xff]   ;;  %v20392_v2 = vld [vmem:[#allocation13 + $0x22e4] ss:$36 sps:$4 sm:$0xff]  }
 0x461   :  { %12293 = vmatpush1.bf16.msra.mxu0 %v20333_v58  ;;  %v20381_v58 = vld [vmem:[#allocation13 + $0x1ea8] ss:$36 sps:$4 sm:$0xff]  }
 0x462   :  { %12334 = vmatpush1.bf16.msra.mxu1 %v20336_v62  ;;  %12294 = vmatprep.subr.bf16.mxu0 %v20341_v63  ;;  %v20384_v62 = vld [vmem:[#allocation13 + $0x2328] ss:$36 sps:$4 sm:$0xff]  }
 0x463   :  { %12335 = vmatprep.subr.bf16.mxu1 %v20344_v3  ;;  %v20389_v63 = vld [vmem:[#allocation13 + $0x1e64] ss:$36 sps:$4 sm:$0xff]  }
 0x464   :  { %v20390_v3 = vld [vmem:[#allocation13 + $0x22e0] ss:$36 sps:$4 sm:$0xff]  }
 0x465   :  { %12295 = vmatpush1.bf16.msra.mxu0 %v20339_v4  ;;  %v20395_v4 = vld [vmem:[#allocation13 + $0x1e1c] ss:$36 sps:$4 sm:$0xff]  }
 0x466   :  { %12336 = vmatpush1.bf16.msra.mxu1 %v20342_v5  ;;  %12296 = vmatprep.subr.bf16.mxu0 %v20347_v6  ;;  %v20393_v5 = vld [vmem:[#allocation13 + $0x1e18] ss:$36 sps:$4 sm:$0xff]  }
 0x467   :  { %12337 = vmatprep.subr.bf16.mxu1 %v20350_v8  ;;  %v20398_v6 = vld [vmem:[#allocation13 + $0x229c] ss:$36 sps:$4 sm:$0xff]   ;;  %v20401_v8 = vld [vmem:[#allocation13 + $0x1dd4] ss:$36 sps:$4 sm:$0xff]  }
 0x469   :  { %12297 = vmatpush1.bf16.msra.mxu0 %v20345_v7  ;;  %v20396_v7 = vld [vmem:[#allocation13 + $0x2298] ss:$36 sps:$4 sm:$0xff]  }
 0x46a   :  { %12338 = vmatpush1.bf16.msra.mxu1 %v20348_v9  ;;  %12298 = vmatprep.subr.bf16.mxu0 %v20353_v10  ;;  %v20399_v9 = vld [vmem:[#allocation13 + $0x1dd0] ss:$36 sps:$4 sm:$0xff]  }
 0x46b   :  { %12339 = vmatprep.subr.bf16.mxu1 %v20356_v25  ;;  %v20404_v10 = vld [vmem:[#allocation13 + $0x2254] ss:$36 sps:$4 sm:$0xff]  }
 0x46d   :  { %12299 = vmatpush1.bf16.msra.mxu0 %v20351_v11  ;;  %v22602_v11 = vld [vmem:[#allocation11 + $0x8] sm:$0xff] }
 0x46e   :  { %12340 = vmatpush1.bf16.msra.mxu1 %v20354_v20  ;;  %12300 = vmatprep.subr.bf16.mxu0 %v20359_v47  ;;  %v934_v25 = vrot.slane %v22602_v11, %v23332_v38  ;;  %v23402_v20 = vld [vmem:[#allocation11 + $0x10] sm:$0xf]  ;;  %v20402_v47 = vld [vmem:[#allocation13 + $0x2250] ss:$36 sps:$4 sm:$0xff]  }
 0x46f   :  { %12341 = vmatprep.subr.bf16.mxu1 %v20362_v13  ;;  %v942_v13 = vrot.slane %v22602_v11, %v23335_v39 }
 0x471   :  { %12301 = vmatpush1.bf16.msra.mxu0 %v20357_v12  ;;  %v20407_v12 = vld [vmem:[#allocation13 + $0x1d8c] ss:$36 sps:$4 sm:$0xff]  }
 0x472   :  { %12342 = vmatpush1.bf16.msra.mxu1 %v20360_v59  ;;  %12302 = vmatprep.subr.bf16.mxu0 %v20365_v28  ;;  %v20405_v59 = vld [vmem:[#allocation13 + $0x1d88] ss:$36 sps:$4 sm:$0xff]  }
 0x473   :  { %12343 = vmatprep.subr.bf16.mxu1 %v20368_v35  ;;  %v20410_v28 = vld [vmem:[#allocation13 + $0x220c] ss:$36 sps:$4 sm:$0xff]   ;;  %v962_v35 = vrot.slane %v23402_v20, %v23264_v17 }
 0x475   :  { %12303 = vmatpush1.bf16.msra.mxu0 %v20363_v18  ;;  %v954_v18 = vrot.slane %v23402_v20, %v23229_v43 }
 0x476   :  { %12344 = vmatpush1.bf16.msra.mxu1 %v20366_v36  ;;  %12304 = vmatprep.subr.bf16.mxu0 %v20371_v21  ;;  %v2864_v36 = vadd.f32 %v23355_v16, %v934_v25  ;;  %v20408_v21 = vld [vmem:[#allocation13 + $0x2208] ss:$36 sps:$4 sm:$0xff]   ;;  %v20419_v16 = vld [vmem:[#allocation13 + $0x25fc] ss:$36 sps:$4 sm:$0xff]  }
 0x477   :  { %12345 = vmatprep.subr.bf16.mxu1 %v20374_v53  ;;  %v2905_v53 = vadd.f32 %v23360_v29, %v942_v13  ;;  %v20420_v29 = vld [vmem:[#allocation13 + $0x2a78] ss:$36 sps:$4 sm:$0xff]   ;;  %v20434_v13 = vld [vmem:[#allocation13 + $0x29ec] ss:$36 sps:$4 sm:$0xff]  }
 0x479   :  { %12305 = vmatpush2.bf16.msra.mxu0 %v20369_v32  ;;  %v20413_v32 = vld [vmem:[#allocation13 + $0x1d44] ss:$36 sps:$4 sm:$0xff]  }
 0x47a   :  { %12346 = vmatpush2.bf16.msra.mxu1 %v20372_v34  ;;  %12306 = vmatprep.subr.bf16.mxu0 %v20377_v44  ;;  %v20411_v34 = vld [vmem:[#allocation13 + $0x1d40] ss:$36 sps:$4 sm:$0xff]  }
 0x47b   :  { %12347 = vmatprep.subr.bf16.mxu1 %v20380_v52  ;;  %v20416_v44 = vld [vmem:[#allocation13 + $0x21c4] ss:$36 sps:$4 sm:$0xff]  }
 0x47c   :  { %v20414_v52 = vld [vmem:[#allocation13 + $0x21c0] ss:$36 sps:$4 sm:$0xff]  }
 0x47d   :  { %12307 = vmatpush2.bf16.msra.mxu0 %v20375_v45  ;;  %v2948_v45 = vadd.f32 %v23396_v57, %v954_v18  ;;  %v20425_v57 = vld [vmem:[#allocation13 + $0x25b4] ss:$36 sps:$4 sm:$0xff]  }
 0x47e   :  { %12348 = vmatpush2.bf16.msra.mxu1 %v20378_v55  ;;  %12308 = vmatprep.subr.bf16.mxu0 %v20383_v40  ;;  %v2989_v55 = vadd.f32 %v23399_v60, %v962_v35  ;;  %v3005_v40 = vmax.f32 %v2864_v36, 0.0  ;;  %v20428_v60 = vld [vmem:[#allocation13 + $0x2a34] ss:$36 sps:$4 sm:$0xff]  }
 0x47f   :  { %12349 = vmatprep.subr.bf16.mxu1 %v20386_v61  ;;  %v20422_v61 = vld [vmem:[#allocation13 + $0x2a7c] ss:$36 sps:$4 sm:$0xff]  }
 0x481   :  { %12309 = vmatpush2.bf16.msra.mxu0 %v20381_v58  ;;  %v4633_v58 = vld [vmem:[#allocation14] sm:$0xff] }
 0x482   :  { %12350 = vmatpush2.bf16.msra.mxu1 %v20384_v62  ;;  %12310 = vmatprep.subr.bf16.mxu0 %v20389_v63  ;;  %v3007_v62 = vmax.f32 %v2905_v53, 0.0  ;;  %v20417_v63 = vld [vmem:[#allocation13 + $0x25f8] ss:$36 sps:$4 sm:$0xff]  }
 0x483   :  { %12351 = vmatprep.subr.bf16.mxu1 %v20392_v2  ;;  %v3012_v2 = vmax.f32 %v2989_v55, 0.0  ;;  %v20440_v55 = vld [vmem:[#allocation13 + $0x29a4] ss:$36 sps:$4 sm:$0xff]  }
 0x485   :  { %12311 = vmatpush2.bf16.msra.mxu0 %v20387_v1  ;;  %v3010_v1 = vmax.f32 %v2948_v45, 0.0  ;;  %v23422_v11 = vpack.c.bf16 %v3012_v2, %v3012_v2  ;;  %v20452_v2 = vld [vmem:[#allocation13 + $0x2914] ss:$36 sps:$4 sm:$0xff]  }
 0x486   :  { %12352 = vmatpush2.bf16.msra.mxu1 %v20390_v3  ;;  %12312 = vmatprep.subr.bf16.mxu0 %v20395_v4  ;;  %v4640_v3 = vrot.slane %v4633_v58, %v23226_v42  ;;  %v23414_v4 = vpack.c.bf16 %v3005_v40, %v3005_v40  ;;  %v20435_v40 = vld [vmem:[#allocation13 + $0x2520] ss:$36 sps:$4 sm:$0xff]  }
 0x487   :  { %12353 = vmatprep.subr.bf16.mxu1 %v20398_v6  ;;  %v4644_v6 = vrot.slane %v4633_v58, %v23229_v43  ;;  %v20438_v58 = vld [vmem:[#allocation13 + $0x29a0] ss:$36 sps:$4 sm:$0xff]  }
 0x489   :  { %12313 = vmatpush2.bf16.msra.mxu0 %v20393_v5  ;;  %v23416_v5 = vpack.c.bf16 %v3007_v62, %v3007_v62  ;;  %v20446_v62 = vld [vmem:[#allocation13 + $0x295c] ss:$36 sps:$4 sm:$0xff]  }
 0x48a   :  { %12354 = vmatpush2.bf16.msra.mxu1 %v20396_v7  ;;  %12314 = vmatprep.subr.bf16.mxu0 %v20401_v8  ;;  %v23419_v7 = vpack.c.bf16 %v3010_v1, %v3010_v1  ;;  %v20449_v1 = vld [vmem:[#allocation13 + $0x2494] ss:$36 sps:$4 sm:$0xff]  }
 0x48b   :  { %12355 = vmatprep.subr.bf16.mxu1 %v20404_v10  ;;  %v20426_v10 = vld [vmem:[#allocation13 + $0x2a30] ss:$36 sps:$4 sm:$0xff]  }
 0x48d   :  { %12315 = vmatpush2.bf16.msra.mxu0 %v20399_v9  ;;  %v20423_v9 = vld [vmem:[#allocation13 + $0x25b0] ss:$36 sps:$4 sm:$0xff]  }
 0x48e   :  { %12356 = vmatpush2.bf16.msra.mxu1 %v20402_v47  ;;  %12316 = vmatprep.subr.bf16.mxu0 %v20407_v12  ;;  %v20431_v12 = vld [vmem:[#allocation13 + $0x256c] ss:$36 sps:$4 sm:$0xff]  }
 0x48f   :  { %12357 = vmatprep.subr.bf16.mxu1 %v20410_v28 }
 0x491   :  { %12317 = vmatpush2.bf16.msra.mxu0 %v20405_v59 }
 0x492   :  { %12358 = vmatpush2.bf16.msra.mxu1 %v20408_v21  ;;  %12318 = vmatprep.subr.bf16.mxu0 %v20413_v32  ;;  %v20429_v21 = vld [vmem:[#allocation13 + $0x2568] ss:$36 sps:$4 sm:$0xff]  }
 0x493   :  { %12359 = vmatprep.subr.bf16.mxu1 %v20416_v44  ;;  %v20437_v44 = vld [vmem:[#allocation13 + $0x2524] ss:$36 sps:$4 sm:$0xff]  }
 0x495   :  { %12319 = vmatpush2.bf16.msra.mxu0 %v20411_v34  ;;  %v20432_v34 = vld [vmem:[#allocation13 + $0x29e8] ss:$36 sps:$4 sm:$0xff]  }
 0x496   :  { %12360 = vmatpush2.bf16.msra.mxu1 %v20414_v52  ;;  %12370 = vmatprep.subr.bf16.mxu0 %v20419_v16  ;;  %v20443_v16 = vld [vmem:[#allocation13 + $0x24dc] ss:$36 sps:$4 sm:$0xff]  }
 0x497   :  { %12411 = vmatprep.subr.bf16.mxu1 %v20422_v61  ;;  %v20441_v61 = vld [vmem:[#allocation13 + $0x24d8] ss:$36 sps:$4 sm:$0xff]  }
 0x498   :  { %v12076_v8 = vpop.f32.mrf.mxu0  ;;  %12321 = vmatmul.mubr.bf16.vlgmr.msra.gmra.mxu0 %v23414_v4 }
 0x499   :  { %v12077_v25 = vadd.f32 %v12076_v8, %v4640_v3  ;;  %v12117_v47 = vpop.f32.mrf.mxu1  ;;  %12362 = vmatmul.mubr.bf16.vlgmr.msra.gmra.mxu1 %v23416_v5  ;;  %12371 = vmatpush1.bf16.msra.mxu0 %v20417_v63  ;;  %v20444_v63 = vld [vmem:[#allocation13 + $0x2958] ss:$36 sps:$4 sm:$0xff]   ;;  %v20450_v3 = vld [vmem:[#allocation13 + $0x2910] ss:$36 sps:$4 sm:$0xff]   ;;  %v20456_v8 = vld [vmem:[#allocation13 + $0x28c8] ss:$36 sps:$4 sm:$0xff]  }
 0x49a   :  { %12402 = vmatprep.mubr.bf16.mxu0 %v23419_v7  ;;  %12412 = vmatpush1.bf16.msra.mxu1 %v20420_v29  ;;  %v12078_v59 = vpop.f32.mrf.mxu0  ;;  %v20447_v29 = vld [vmem:[#allocation13 + $0x2490] ss:$36 sps:$4 sm:$0xff]  }
 0x49b   :  { %v23426_v28 = vadd.f32 %v12117_v47, %v12077_v25  ;;  %12443 = vmatprep.mubr.bf16.mxu1 %v23422_v11  ;;  %v12079_v18 = vadd.f32 %v12078_v59, %v4644_v6  ;;  %v12119_v35 = vpop.f32.mrf.mxu1  ;;  %12372 = vmatprep.subr.bf16.mxu0 %v20425_v57  ;;  %v20455_v57 = vld [vmem:[#allocation13 + $0x244c] ss:$36 sps:$4 sm:$0xff]   ;;  %v20464_v25 = vld [vmem:[#allocation13 + $0x2884] ss:$36 sps:$4 sm:$0xff]   ;;  %v20470_v59 = vld [vmem:[#allocation13 + $0x2cbc] ss:$36 sps:$4 sm:$0xff]  }
 0x49c   :  { %v12080_v36 = vpop.f32.mrf.mxu0  ;;  %12413 = vmatprep.subr.bf16.mxu1 %v20428_v60  ;;  %v20453_v60 = vld [vmem:[#allocation13 + $0x2448] ss:$36 sps:$4 sm:$0xff]   ;;  %v20462_v47 = vld [vmem:[#allocation13 + $0x2880] ss:$36 sps:$4 sm:$0xff]  }
 0x49d   :  { %v23429_v32 = vadd.f32 %v12119_v35, %v12079_v18  ;;  %v12121_v53 = vpop.f32.mrf.mxu1  ;;  %12373 = vmatpush1.bf16.msra.mxu0 %v20423_v9  ;;  %v20458_v6 = vld [vmem:[#allocation13 + $0x28cc] ss:$36 sps:$4 sm:$0xff]   ;;  %v20461_v9 = vld [vmem:[#allocation13 + $0x2404] ss:$36 sps:$4 sm:$0xff]   ;;  %v20468_v18 = vld [vmem:[#allocation13 + $0x2cb8] ss:$36 sps:$4 sm:$0xff]  }
 0x49e   :  { %12414 = vmatpush1.bf16.msra.mxu1 %v20426_v10  ;;  %v12081_v45 = vpop.f32.mrf.mxu0  ;;  %12374 = vmatprep.subr.bf16.mxu0 %v20431_v12  ;;  %v20459_v10 = vld [vmem:[#allocation13 + $0x2400] ss:$36 sps:$4 sm:$0xff]   ;;  %v20473_v35 = vld [vmem:[#allocation13 + $0x27f4] ss:$36 sps:$4 sm:$0xff]  }
 0x49f   :  { %v12122_v52 = vpop.f32.mrf.mxu1  ;;  %12415 = vmatprep.subr.bf16.mxu1 %v20434_v13  ;;  %v20467_v12 = vld [vmem:[#allocation13 + $0x283c] ss:$36 sps:$4 sm:$0xff]   ;;  %v20471_v36 = vld [vmem:[#allocation13 + $0x27f0] ss:$36 sps:$4 sm:$0xff]  }
 0x4a0   :  { %v20465_v13 = vld [vmem:[#allocation13 + $0x2838] ss:$36 sps:$4 sm:$0xff]   ;;  %v20474_v53 = vld [vmem:[#allocation13 + $0x2c70] ss:$36 sps:$4 sm:$0xff]   ;;  %v20480_v52 = vld [vmem:[#allocation13 + $0x2c28] ss:$36 sps:$4 sm:$0xff]  }
 0x4a1   :  { %12375 = vmatpush1.bf16.msra.mxu0 %v20429_v21  ;;  %v20476_v21 = vld [vmem:[#allocation13 + $0x2c74] ss:$36 sps:$4 sm:$0xff]   ;;  %v20482_v45 = vld [vmem:[#allocation13 + $0x2c2c] ss:$36 sps:$4 sm:$0xff]  }
 0x4a2   :  { %12416 = vmatpush1.bf16.msra.mxu1 %v20432_v34  ;;  %12376 = vmatprep.subr.bf16.mxu0 %v20437_v44  ;;  %v20479_v34 = vld [vmem:[#allocation13 + $0x27ac] ss:$36 sps:$4 sm:$0xff]  }
 0x4a3   :  { %12417 = vmatprep.subr.bf16.mxu1 %v20440_v55  ;;  %v20477_v44 = vld [vmem:[#allocation13 + $0x27a8] ss:$36 sps:$4 sm:$0xff]  }
 0x4a4   :  { %v20485_v55 = vld [vmem:[#allocation13 + $0x2764] ss:$36 sps:$4 sm:$0xff]  }
 0x4a5   :  { %12377 = vmatpush1.bf16.msra.mxu0 %v20435_v40  ;;  %v20483_v40 = vld [vmem:[#allocation13 + $0x2760] ss:$36 sps:$4 sm:$0xff]  }
 0x4a6   :  { %12418 = vmatpush1.bf16.msra.mxu1 %v20438_v58  ;;  %12378 = vmatprep.subr.bf16.mxu0 %v20443_v16  ;;  %v20488_v58 = vld [vmem:[#allocation13 + $0x2be4] ss:$36 sps:$4 sm:$0xff]  }
 0x4a7   :  { %12419 = vmatprep.subr.bf16.mxu1 %v20446_v62  ;;  %v20486_v16 = vld [vmem:[#allocation13 + $0x2be0] ss:$36 sps:$4 sm:$0xff]   ;;  %v20489_v62 = vld [vmem:[#allocation13 + $0x2718] ss:$36 sps:$4 sm:$0xff]  }
 0x4a9   :  { %12379 = vmatpush1.bf16.msra.mxu0 %v20441_v61  ;;  %v20491_v61 = vld [vmem:[#allocation13 + $0x271c] ss:$36 sps:$4 sm:$0xff]  }
 0x4aa   :  { %12420 = vmatpush1.bf16.msra.mxu1 %v20444_v63  ;;  %12380 = vmatprep.subr.bf16.mxu0 %v20449_v1  ;;  %v20494_v63 = vld [vmem:[#allocation13 + $0x2b9c] ss:$36 sps:$4 sm:$0xff]  }
 0x4ab   :  { %12421 = vmatprep.subr.bf16.mxu1 %v20452_v2  ;;  %v20492_v1 = vld [vmem:[#allocation13 + $0x2b98] ss:$36 sps:$4 sm:$0xff]   ;;  %v20495_v2 = vld [vmem:[#allocation13 + $0x26d0] ss:$36 sps:$4 sm:$0xff]  }
 0x4ad   :  { %12381 = vmatpush1.bf16.msra.mxu0 %v20447_v29  ;;  %v20497_v29 = vld [vmem:[#allocation13 + $0x26d4] ss:$36 sps:$4 sm:$0xff]  }
 0x4ae   :  { %12422 = vmatpush1.bf16.msra.mxu1 %v20450_v3  ;;  %12382 = vmatprep.subr.bf16.mxu0 %v20455_v57  ;;  %v20500_v3 = vld [vmem:[#allocation13 + $0x2b54] ss:$36 sps:$4 sm:$0xff]   ;;  %v950_v57 = vrot.slane %v23402_v20, %v23226_v42 }
 0x4af   :  { %12423 = vmatprep.subr.bf16.mxu1 %v20458_v6  ;;  %v20503_v6 = vld [vmem:[#allocation13 + $0x268c] ss:$36 sps:$4 sm:$0xff]  }
 0x4b1   :  { %12383 = vmatpush1.bf16.msra.mxu0 %v20453_v60  ;;  %v20498_v60 = vld [vmem:[#allocation13 + $0x2b50] ss:$36 sps:$4 sm:$0xff]  }
 0x4b2   :  { %12424 = vmatpush1.bf16.msra.mxu1 %v20456_v8  ;;  %12384 = vmatprep.subr.bf16.mxu0 %v20461_v9  ;;  %v958_v8 = vrot.slane %v23402_v20, %v23291_v41  ;;  %v20501_v9 = vld [vmem:[#allocation13 + $0x2688] ss:$36 sps:$4 sm:$0xff]  }
 0x4b3   :  { %12425 = vmatprep.subr.bf16.mxu1 %v20464_v25  ;;  %v2946_v25 = vadd.f32 %v23387_v37, %v950_v57  ;;  %v20515_v20 = vld [vmem:[#allocation13 + $0x204] ss:$36 sps:$4 sm:$0xff]  }
 0x4b4   :  { %v20516_v37 = vld [vmem:[#allocation13 + $0x680] ss:$36 sps:$4 sm:$0xff]  }
 0x4b5   :  { %12385 = vmatpush1.bf16.msra.mxu0 %v20459_v10  ;;  %v20506_v10 = vld [vmem:[#allocation13 + $0x2b0c] ss:$36 sps:$4 sm:$0xff]  }
 0x4b6   :  { %12426 = vmatpush1.bf16.msra.mxu1 %v20462_v47  ;;  %12386 = vmatprep.subr.bf16.mxu0 %v20467_v12  ;;  %v20504_v47 = vld [vmem:[#allocation13 + $0x2b08] ss:$36 sps:$4 sm:$0xff]  }
 0x4b7   :  { %12427 = vmatprep.subr.bf16.mxu1 %v20470_v59  ;;  %v20509_v12 = vld [vmem:[#allocation13 + $0x2644] ss:$36 sps:$4 sm:$0xff]  }
 0x4b8   :  { %v20507_v59 = vld [vmem:[#allocation13 + $0x2640] ss:$36 sps:$4 sm:$0xff]  }
 0x4b9   :  { %12387 = vmatpush2.bf16.msra.mxu0 %v20465_v13  ;;  %v2987_v13 = vadd.f32 %v23392_v48, %v958_v8  ;;  %v20524_v48 = vld [vmem:[#allocation13 + $0x63c] ss:$36 sps:$4 sm:$0xff]   ;;  %v20528_v8 = vld [vmem:[#allocation13 + $0x5f0] ss:$36 sps:$4 sm:$0xff]  }
 0x4ba   :  { %12428 = vmatpush2.bf16.msra.mxu1 %v20468_v18  ;;  %12388 = vmatprep.subr.bf16.mxu0 %v20473_v35  ;;  %v20512_v18 = vld [vmem:[#allocation13 + $0x2ac4] ss:$36 sps:$4 sm:$0xff]  }
 0x4bb   :  { %12429 = vmatprep.subr.bf16.mxu1 %v20476_v21  ;;  %v20510_v35 = vld [vmem:[#allocation13 + $0x2ac0] ss:$36 sps:$4 sm:$0xff]  }
 0x4bc   :  { %v20518_v21 = vld [vmem:[#allocation13 + $0x684] ss:$36 sps:$4 sm:$0xff]  }
 0x4bd   :  { %12389 = vmatpush2.bf16.msra.mxu0 %v20471_v36  ;;  %v3009_v36 = vmax.f32 %v2946_v25, 0.0 }
 0x4be   :  { %12430 = vmatpush2.bf16.msra.mxu1 %v20474_v53  ;;  %12390 = vmatprep.subr.bf16.mxu0 %v20479_v34  ;;  %v3011_v53 = vmax.f32 %v2987_v13, 0.0  ;;  %v20513_v34 = vld [vmem:[#allocation13 + $0x200] ss:$36 sps:$4 sm:$0xff]  }
 0x4bf   :  { %12431 = vmatprep.subr.bf16.mxu1 %v20482_v45  ;;  %v23437_v45 = vpack.c.bf16 %v3009_v36, %v3009_v36  ;;  %v20539_v13 = vld [vmem:[#allocation13 + $0xe4] ss:$36 sps:$4 sm:$0xff]   ;;  %v20545_v36 = vld [vmem:[#allocation13 + $0x9c] ss:$36 sps:$4 sm:$0xff]  }
 0x4c1   :  { %12391 = vmatpush2.bf16.msra.mxu0 %v20477_v44  ;;  %v20521_v44 = vld [vmem:[#allocation13 + $0x1bc] ss:$36 sps:$4 sm:$0xff]  }
 0x4c2   :  { %12432 = vmatpush2.bf16.msra.mxu1 %v20480_v52  ;;  %12392 = vmatprep.subr.bf16.mxu0 %v20485_v55  ;;  %v23439_v52 = vpack.c.bf16 %v3011_v53, %v3011_v53  ;;  %v20546_v53 = vld [vmem:[#allocation13 + $0x518] ss:$36 sps:$4 sm:$0xff]  }
 0x4c3   :  { %12433 = vmatprep.subr.bf16.mxu1 %v20488_v58  ;;  %v20522_v58 = vld [vmem:[#allocation13 + $0x638] ss:$36 sps:$4 sm:$0xff]  }
 0x4c5   :  { %12393 = vmatpush2.bf16.msra.mxu0 %v20483_v40  ;;  %v20519_v40 = vld [vmem:[#allocation13 + $0x1b8] ss:$36 sps:$4 sm:$0xff]  }
 0x4c6   :  { %12434 = vmatpush2.bf16.msra.mxu1 %v20486_v16  ;;  %12394 = vmatprep.subr.bf16.mxu0 %v20491_v61 }
 0x4c7   :  { %12435 = vmatprep.subr.bf16.mxu1 %v20494_v63  ;;  %v20530_v63 = vld [vmem:[#allocation13 + $0x5f4] ss:$36 sps:$4 sm:$0xff]  }
 0x4c9   :  { %12395 = vmatpush2.bf16.msra.mxu0 %v20489_v62  ;;  %v20527_v62 = vld [vmem:[#allocation13 + $0x174] ss:$36 sps:$4 sm:$0xff]  }
 0x4ca   :  { %12436 = vmatpush2.bf16.msra.mxu1 %v20492_v1  ;;  %12396 = vmatprep.subr.bf16.mxu0 %v20497_v29 }
 0x4cb   :  { %12437 = vmatprep.subr.bf16.mxu1 %v20500_v3 }
 0x4cd   :  { %12397 = vmatpush2.bf16.msra.mxu0 %v20495_v2 }
 0x4ce   :  { %12438 = vmatpush2.bf16.msra.mxu1 %v20498_v60  ;;  %12398 = vmatprep.subr.bf16.mxu0 %v20503_v6 }
 0x4cf   :  { %12439 = vmatprep.subr.bf16.mxu1 %v20506_v10 }
 0x4d1   :  { %12399 = vmatpush2.bf16.msra.mxu0 %v20501_v9  ;;  %v20533_v9 = vld [vmem:[#allocation13 + $0x12c] ss:$36 sps:$4 sm:$0xff]  }
 0x4d2   :  { %12440 = vmatpush2.bf16.msra.mxu1 %v20504_v47  ;;  %12400 = vmatprep.subr.bf16.mxu0 %v20509_v12  ;;  %v20536_v47 = vld [vmem:[#allocation13 + $0x5ac] ss:$36 sps:$4 sm:$0xff]  }
 0x4d3   :  { %12441 = vmatprep.subr.bf16.mxu1 %v20512_v18  ;;  %v20531_v12 = vld [vmem:[#allocation13 + $0x128] ss:$36 sps:$4 sm:$0xff]  }
 0x4d4   :  { %v20542_v18 = vld [vmem:[#allocation13 + $0x564] ss:$36 sps:$4 sm:$0xff]  }
 0x4d5   :  { %12401 = vmatpush2.bf16.msra.mxu0 %v20507_v59  ;;  %v20537_v59 = vld [vmem:[#allocation13 + $0xe0] ss:$36 sps:$4 sm:$0xff]  }
 0x4d6   :  { %12442 = vmatpush2.bf16.msra.mxu1 %v20510_v35  ;;  %12452 = vmatprep.subr.bf16.mxu0 %v20515_v20  ;;  %v20540_v35 = vld [vmem:[#allocation13 + $0x560] ss:$36 sps:$4 sm:$0xff]   ;;  %v20543_v20 = vld [vmem:[#allocation13 + $0x98] ss:$36 sps:$4 sm:$0xff]  }
 0x4d7   :  { %12493 = vmatprep.subr.bf16.mxu1 %v20518_v21  ;;  %v20548_v21 = vld [vmem:[#allocation13 + $0x51c] ss:$36 sps:$4 sm:$0xff]  }
 0x4d8   :  { %v12158_v55 = vpop.f32.mrf.mxu0  ;;  %12403 = vmatmul.mubr.bf16.vlgmr.msra.gmra.mxu0 %v23437_v45 }
 0x4d9   :  { %v12159_v16 = vadd.f32 %v12158_v55, %v23426_v28  ;;  %v12199_v61 = vpop.f32.mrf.mxu1  ;;  %12444 = vmatmul.mubr.bf16.vlgmr.msra.gmra.mxu1 %v23439_v52  ;;  %12453 = vmatpush1.bf16.msra.mxu0 %v20513_v34  ;;  %v20525_v28 = vld [vmem:[#allocation13 + $0x170] ss:$36 sps:$4 sm:$0xff]  }
 0x4da   :  { %12484 = vmatprep.mubr.bf16.mxu0 %v23274_v24  ;;  %12494 = vmatpush1.bf16.msra.mxu1 %v20516_v37  ;;  %v12160_v1 = vpop.f32.mrf.mxu0  ;;  %v20551_v34 = vld [vmem:[#allocation13 + $0x54] ss:$36 sps:$4 sm:$0xff]   ;;  %v20557_v55 = vld [vmem:[#allocation13 + $0xc] ss:$36 sps:$4 sm:$0xff]  }
 0x4db   :  { %v23445_v29 = vadd.f32 %v12199_v61, %v12159_v16  ;;  %12525 = vmatprep.mubr.bf16.mxu1 %v23281_v50  ;;  %v12161_v2 = vadd.f32 %v12160_v1, %v23429_v32  ;;  %v12201_v3 = vpop.f32.mrf.mxu1  ;;  %12454 = vmatprep.subr.bf16.mxu0 %v20521_v44  ;;  %v20534_v32 = vld [vmem:[#allocation13 + $0x5a8] ss:$36 sps:$4 sm:$0xff]   ;;  %v20549_v37 = vld [vmem:[#allocation13 + $0x50] ss:$36 sps:$4 sm:$0xff]   ;;  %v20564_v1 = vld [vmem:[#allocation13 + $0x8c0] ss:$36 sps:$4 sm:$0xff]  }
 0x4dc   :  { %v12162_v57 = vpop.f32.mrf.mxu0  ;;  %12495 = vmatprep.subr.bf16.mxu1 %v20524_v48  ;;  %v20554_v44 = vld [vmem:[#allocation13 + $0x4d4] ss:$36 sps:$4 sm:$0xff]   ;;  %v20558_v16 = vld [vmem:[#allocation13 + $0x488] ss:$36 sps:$4 sm:$0xff]  }
 0x4dd   :  { %v23449_v60 = vadd.f32 %v12201_v3, %v12161_v2  ;;  %v12203_v6 = vpop.f32.mrf.mxu1  ;;  %12455 = vmatpush1.bf16.msra.mxu0 %v20519_v40  ;;  %v20552_v48 = vld [vmem:[#allocation13 + $0x4d0] ss:$36 sps:$4 sm:$0xff]   ;;  %v20555_v40 = vld [vmem:[#allocation13 + $0x8] ss:$36 sps:$4 sm:$0xff]   ;;  %v20569_v2 = vld [vmem:[#allocation13 + $0x3fc] ss:$36 sps:$4 sm:$0xff]  }
 0x4de   :  { %12496 = vmatpush1.bf16.msra.mxu1 %v20522_v58  ;;  %v12163_v10 = vpop.f32.mrf.mxu0  ;;  %12456 = vmatprep.subr.bf16.mxu0 %v20527_v62  ;;  %v20560_v58 = vld [vmem:[#allocation13 + $0x48c] ss:$36 sps:$4 sm:$0xff]   ;;  %v20563_v61 = vld [vmem:[#allocation13 + $0x444] ss:$36 sps:$4 sm:$0xff]   ;;  %v20567_v3 = vld [vmem:[#allocation13 + $0x3f8] ss:$36 sps:$4 sm:$0xff]  }
 0x4df   :  { %v12204_v25 = vpop.f32.mrf.mxu1  ;;  %12497 = vmatprep.subr.bf16.mxu1 %v20530_v63  ;;  %v20561_v62 = vld [vmem:[#allocation13 + $0x440] ss:$36 sps:$4 sm:$0xff]   ;;  %v20575_v6 = vld [vmem:[#allocation13 + $0x3b4] ss:$36 sps:$4 sm:$0xff]  }
 0x4e0   :  { %v20566_v63 = vld [vmem:[#allocation13 + $0x8c4] ss:$36 sps:$4 sm:$0xff]   ;;  %v20572_v57 = vld [vmem:[#allocation13 + $0x87c] ss:$36 sps:$4 sm:$0xff]   ;;  %v20576_v10 = vld [vmem:[#allocation13 + $0x830] ss:$36 sps:$4 sm:$0xff]  }
 0x4e1   :  { %12457 = vmatpush1.bf16.msra.mxu0 %v20525_v28  ;;  %v20570_v28 = vld [vmem:[#allocation13 + $0x878] ss:$36 sps:$4 sm:$0xff]   ;;  %v20581_v25 = vld [vmem:[#allocation13 + $0x36c] ss:$36 sps:$4 sm:$0xff]  }
 0x4e2   :  { %12498 = vmatpush1.bf16.msra.mxu1 %v20528_v8  ;;  %12458 = vmatprep.subr.bf16.mxu0 %v20533_v9  ;;  %v20573_v8 = vld [vmem:[#allocation13 + $0x3b0] ss:$36 sps:$4 sm:$0xff]  }
 0x4e3   :  { %12499 = vmatprep.subr.bf16.mxu1 %v20536_v47  ;;  %v20578_v9 = vld [vmem:[#allocation13 + $0x834] ss:$36 sps:$4 sm:$0xff]   ;;  %v20579_v47 = vld [vmem:[#allocation13 + $0x368] ss:$36 sps:$4 sm:$0xff]  }
 0x4e5   :  { %12459 = vmatpush1.bf16.msra.mxu0 %v20531_v12  ;;  %v20584_v12 = vld [vmem:[#allocation13 + $0x7ec] ss:$36 sps:$4 sm:$0xff]  }
 0x4e6   :  { %12500 = vmatpush1.bf16.msra.mxu1 %v20534_v32  ;;  %12460 = vmatprep.subr.bf16.mxu0 %v20539_v13  ;;  %v20582_v32 = vld [vmem:[#allocation13 + $0x7e8] ss:$36 sps:$4 sm:$0xff]  }
 0x4e7   :  { %12501 = vmatprep.subr.bf16.mxu1 %v20542_v18  ;;  %v20587_v13 = vld [vmem:[#allocation13 + $0x324] ss:$36 sps:$4 sm:$0xff]  }
 0x4e8   :  { %v20590_v18 = vld [vmem:[#allocation13 + $0x7a4] ss:$36 sps:$4 sm:$0xff]  }
 0x4e9   :  { %12461 = vmatpush1.bf16.msra.mxu0 %v20537_v59  ;;  %v20585_v59 = vld [vmem:[#allocation13 + $0x320] ss:$36 sps:$4 sm:$0xff]  }
 0x4ea   :  { %12502 = vmatpush1.bf16.msra.mxu1 %v20540_v35  ;;  %12462 = vmatprep.subr.bf16.mxu0 %v20545_v36  ;;  %v20588_v35 = vld [vmem:[#allocation13 + $0x7a0] ss:$36 sps:$4 sm:$0xff]  }
 0x4eb   :  { %12503 = vmatprep.subr.bf16.mxu1 %v20548_v21  ;;  %v20593_v36 = vld [vmem:[#allocation13 + $0x2dc] ss:$36 sps:$4 sm:$0xff]  }
 0x4ec   :  { %v20596_v21 = vld [vmem:[#allocation13 + $0x75c] ss:$36 sps:$4 sm:$0xff]  }
 0x4ed   :  { %12463 = vmatpush1.bf16.msra.mxu0 %v20543_v20  ;;  %v20591_v20 = vld [vmem:[#allocation13 + $0x2d8] ss:$36 sps:$4 sm:$0xff]  }
 0x4ee   :  { %12504 = vmatpush1.bf16.msra.mxu1 %v20546_v53  ;;  %12464 = vmatprep.subr.bf16.mxu0 %v20551_v34  ;;  %v20594_v53 = vld [vmem:[#allocation13 + $0x758] ss:$36 sps:$4 sm:$0xff]  }
 0x4ef   :  { %12505 = vmatprep.subr.bf16.mxu1 %v20554_v44  ;;  %v20599_v34 = vld [vmem:[#allocation13 + $0x294] ss:$36 sps:$4 sm:$0xff]  }
 0x4f0   :  { %v20602_v44 = vld [vmem:[#allocation13 + $0x714] ss:$36 sps:$4 sm:$0xff]  }
 0x4f1   :  { %12465 = vmatpush1.bf16.msra.mxu0 %v20549_v37  ;;  %v20597_v37 = vld [vmem:[#allocation13 + $0x290] ss:$36 sps:$4 sm:$0xff]  }
 0x4f2   :  { %12506 = vmatpush1.bf16.msra.mxu1 %v20552_v48  ;;  %12466 = vmatprep.subr.bf16.mxu0 %v20557_v55  ;;  %v20600_v48 = vld [vmem:[#allocation13 + $0x710] ss:$36 sps:$4 sm:$0xff]  }
 0x4f3   :  { %12507 = vmatprep.subr.bf16.mxu1 %v20560_v58  ;;  %v20605_v55 = vld [vmem:[#allocation13 + $0x24c] ss:$36 sps:$4 sm:$0xff]  }
 0x4f4   :  { %v20608_v58 = vld [vmem:[#allocation13 + $0x6cc] ss:$36 sps:$4 sm:$0xff]  }
 0x4f5   :  { %12467 = vmatpush1.bf16.msra.mxu0 %v20555_v40  ;;  %v20603_v40 = vld [vmem:[#allocation13 + $0x248] ss:$36 sps:$4 sm:$0xff]  }
 0x4f6   :  { %12508 = vmatpush1.bf16.msra.mxu1 %v20558_v16  ;;  %12468 = vmatprep.subr.bf16.mxu0 %v20563_v61  ;;  %v20606_v16 = vld [vmem:[#allocation13 + $0x6c8] ss:$36 sps:$4 sm:$0xff]  }
 0x4f7   :  { %12509 = vmatprep.subr.bf16.mxu1 %v20566_v63  ;;  %v20611_v61 = vld [vmem:[#allocation13 + $0xb04] ss:$36 sps:$4 sm:$0xff]  }
 0x4f8   :  { %v20609_v63 = vld [vmem:[#allocation13 + $0xb00] ss:$36 sps:$4 sm:$0xff]  }
 0x4f9   :  { %12469 = vmatpush2.bf16.msra.mxu0 %v20561_v62  ;;  %v20614_v62 = vld [vmem:[#allocation13 + $0xf84] ss:$36 sps:$4 sm:$0xff]  }
 0x4fa   :  { %12510 = vmatpush2.bf16.msra.mxu1 %v20564_v1  ;;  %12470 = vmatprep.subr.bf16.mxu0 %v20569_v2  ;;  %v20612_v1 = vld [vmem:[#allocation13 + $0xf80] ss:$36 sps:$4 sm:$0xff]  }
 0x4fb   :  { %12511 = vmatprep.subr.bf16.mxu1 %v20572_v57  ;;  %v20617_v2 = vld [vmem:[#allocation13 + $0xabc] ss:$36 sps:$4 sm:$0xff]  }
 0x4fc   :  { %v20620_v57 = vld [vmem:[#allocation13 + $0xf3c] ss:$36 sps:$4 sm:$0xff]  }
 0x4fd   :  { %12471 = vmatpush2.bf16.msra.mxu0 %v20567_v3 }
 0x4fe   :  { %12512 = vmatpush2.bf16.msra.mxu1 %v20570_v28  ;;  %12472 = vmatprep.subr.bf16.mxu0 %v20575_v6 }
 0x4ff   :  { %12513 = vmatprep.subr.bf16.mxu1 %v20578_v9 }
 0x501   :  { %12473 = vmatpush2.bf16.msra.mxu0 %v20573_v8  ;;  %v20615_v8 = vld [vmem:[#allocation13 + $0xab8] ss:$36 sps:$4 sm:$0xff]  }
 0x502   :  { %12514 = vmatpush2.bf16.msra.mxu1 %v20576_v10  ;;  %12474 = vmatprep.subr.bf16.mxu0 %v20581_v25  ;;  %v20618_v10 = vld [vmem:[#allocation13 + $0xf38] ss:$36 sps:$4 sm:$0xff]  }
 0x503   :  { %12515 = vmatprep.subr.bf16.mxu1 %v20584_v12  ;;  %v20623_v25 = vld [vmem:[#allocation13 + $0xa74] ss:$36 sps:$4 sm:$0xff]  }
 0x505   :  { %12475 = vmatpush2.bf16.msra.mxu0 %v20579_v47 }
 0x506   :  { %12516 = vmatpush2.bf16.msra.mxu1 %v20582_v32  ;;  %12476 = vmatprep.subr.bf16.mxu0 %v20587_v13 }
 0x507   :  { %12517 = vmatprep.subr.bf16.mxu1 %v20590_v18 }
 0x509   :  { %12477 = vmatpush2.bf16.msra.mxu0 %v20585_v59 }
 0x50a   :  { %12518 = vmatpush2.bf16.msra.mxu1 %v20588_v35  ;;  %12478 = vmatprep.subr.bf16.mxu0 %v20593_v36  ;;  %v20621_v35 = vld [vmem:[#allocation13 + $0xa70] ss:$36 sps:$4 sm:$0xff]  }
 0x50b   :  { %12519 = vmatprep.subr.bf16.mxu1 %v20596_v21  ;;  %v20629_v21 = vld [vmem:[#allocation13 + $0xa2c] ss:$36 sps:$4 sm:$0xff]  }
 0x50d   :  { %12479 = vmatpush2.bf16.msra.mxu0 %v20591_v20  ;;  %v20624_v20 = vld [vmem:[#allocation13 + $0xef0] ss:$36 sps:$4 sm:$0xff]  }
 0x50e   :  { %12520 = vmatpush2.bf16.msra.mxu1 %v20594_v53  ;;  %12480 = vmatprep.subr.bf16.mxu0 %v20599_v34  ;;  %v20632_v34 = vld [vmem:[#allocation13 + $0xeac] ss:$36 sps:$4 sm:$0xff]  }
 0x50f   :  { %12521 = vmatprep.subr.bf16.mxu1 %v20602_v44  ;;  %v20635_v44 = vld [vmem:[#allocation13 + $0x9e4] ss:$36 sps:$4 sm:$0xff]  }
 0x511   :  { %12481 = vmatpush2.bf16.msra.mxu0 %v20597_v37  ;;  %v20630_v37 = vld [vmem:[#allocation13 + $0xea8] ss:$36 sps:$4 sm:$0xff]  }
 0x512   :  { %12522 = vmatpush2.bf16.msra.mxu1 %v20600_v48  ;;  %12482 = vmatprep.subr.bf16.mxu0 %v20605_v55  ;;  %v20638_v48 = vld [vmem:[#allocation13 + $0xe64] ss:$36 sps:$4 sm:$0xff]  }
 0x513   :  { %12523 = vmatprep.subr.bf16.mxu1 %v20608_v58  ;;  %v20633_v55 = vld [vmem:[#allocation13 + $0x9e0] ss:$36 sps:$4 sm:$0xff]  }
 0x514   :  { %v20641_v58 = vld [vmem:[#allocation13 + $0x99c] ss:$36 sps:$4 sm:$0xff]  }
 0x515   :  { %12483 = vmatpush2.bf16.msra.mxu0 %v20603_v40  ;;  %v20636_v40 = vld [vmem:[#allocation13 + $0xe60] ss:$36 sps:$4 sm:$0xff]  }
 0x516   :  { %12524 = vmatpush2.bf16.msra.mxu1 %v20606_v16  ;;  %12534 = vmatprep.subr.bf16.mxu0 %v20611_v61  ;;  %v20644_v16 = vld [vmem:[#allocation13 + $0xe1c] ss:$36 sps:$4 sm:$0xff]  }
 0x517   :  { %12575 = vmatprep.subr.bf16.mxu1 %v20614_v62  ;;  %v20639_v61 = vld [vmem:[#allocation13 + $0x998] ss:$36 sps:$4 sm:$0xff]  }
 0x518   :  { %v12240_v3 = vpop.f32.mrf.mxu0  ;;  %12485 = vmatmul.mubr.bf16.vlgmr.msra.gmra.mxu0 %v23311_v22  ;;  %v20642_v62 = vld [vmem:[#allocation13 + $0xe18] ss:$36 sps:$4 sm:$0xff]  }
 0x519   :  { %v12241_v28 = vadd.f32 %v12240_v3, %v23445_v29  ;;  %v12281_v6 = vpop.f32.mrf.mxu1  ;;  %12526 = vmatmul.mubr.bf16.vlgmr.msra.gmra.mxu1 %v23313_v23  ;;  %12535 = vmatpush1.bf16.msra.mxu0 %v20609_v63  ;;  %v20626_v29 = vld [vmem:[#allocation13 + $0xef4] ss:$36 sps:$4 sm:$0xff]  }
 0x51a   :  { %12566 = vmatprep.mubr.bf16.mxu0 %v23315_v27  ;;  %12576 = vmatpush1.bf16.msra.mxu1 %v20612_v1  ;;  %v12242_v9 = vpop.f32.mrf.mxu0  ;;  %v20647_v63 = vld [vmem:[#allocation13 + $0x954] ss:$36 sps:$4 sm:$0xff]  }
 0x51b   :  { %v23455_v47 = vadd.f32 %v12281_v6, %v12241_v28  ;;  %12607 = vmatprep.mubr.bf16.mxu1 %v23320_v31  ;;  %v12243_v12 = vadd.f32 %v12242_v9, %v23449_v60  ;;  %v12283_v32 = vpop.f32.mrf.mxu1  ;;  %12536 = vmatprep.subr.bf16.mxu0 %v20617_v2  ;;  %v20627_v60 = vld [vmem:[#allocation13 + $0xa28] ss:$36 sps:$4 sm:$0xff]   ;;  %v20650_v1 = vld [vmem:[#allocation13 + $0xdd4] ss:$36 sps:$4 sm:$0xff]  }
 0x51c   :  { %v12244_v13 = vpop.f32.mrf.mxu0  ;;  %12577 = vmatprep.subr.bf16.mxu1 %v20620_v57  ;;  %v20645_v2 = vld [vmem:[#allocation13 + $0x950] ss:$36 sps:$4 sm:$0xff]   ;;  %v20651_v6 = vld [vmem:[#allocation13 + $0x908] ss:$36 sps:$4 sm:$0xff]  }
 0x51d   :  { %v23459_v59 = vadd.f32 %v12283_v32, %v12243_v12  ;;  %v12285_v18 = vpop.f32.mrf.mxu1  ;;  %12537 = vmatpush1.bf16.msra.mxu0 %v20615_v8  ;;  %v20648_v3 = vld [vmem:[#allocation13 + $0xdd0] ss:$36 sps:$4 sm:$0xff]   ;;  %v20654_v8 = vld [vmem:[#allocation13 + $0xd88] ss:$36 sps:$4 sm:$0xff]   ;;  %v20660_v12 = vld [vmem:[#allocation13 + $0x11c0] ss:$36 sps:$4 sm:$0xff]  }
 0x51e   :  { %12578 = vmatpush1.bf16.msra.mxu1 %v20618_v10  ;;  %v12245_v36 = vpop.f32.mrf.mxu0  ;;  %12538 = vmatprep.subr.bf16.mxu0 %v20623_v25  ;;  %v20653_v57 = vld [vmem:[#allocation13 + $0x90c] ss:$36 sps:$4 sm:$0xff]   ;;  %v20659_v9 = vld [vmem:[#allocation13 + $0xd44] ss:$36 sps:$4 sm:$0xff]   ;;  %v20665_v32 = vld [vmem:[#allocation13 + $0xcfc] ss:$36 sps:$4 sm:$0xff]  }
 0x51f   :  { %v12286_v53 = vpop.f32.mrf.mxu1  ;;  %12579 = vmatprep.subr.bf16.mxu1 %v20626_v29  ;;  %v20656_v28 = vld [vmem:[#allocation13 + $0xd8c] ss:$36 sps:$4 sm:$0xff]   ;;  %v20662_v10 = vld [vmem:[#allocation13 + $0x11c4] ss:$36 sps:$4 sm:$0xff]   ;;  %v20668_v29 = vld [vmem:[#allocation13 + $0x117c] ss:$36 sps:$4 sm:$0xff]  }
 0x520   :  { %v20657_v25 = vld [vmem:[#allocation13 + $0xd40] ss:$36 sps:$4 sm:$0xff]   ;;  %v20663_v13 = vld [vmem:[#allocation13 + $0xcf8] ss:$36 sps:$4 sm:$0xff]   ;;  %v20677_v53 = vld [vmem:[#allocation13 + $0xc6c] ss:$36 sps:$4 sm:$0xff]  }
 0x521   :  { %12539 = vmatpush1.bf16.msra.mxu0 %v20621_v35  ;;  %v20666_v18 = vld [vmem:[#allocation13 + $0x1178] ss:$36 sps:$4 sm:$0xff]  }
 0x522   :  { %12580 = vmatpush1.bf16.msra.mxu1 %v20624_v20  ;;  %12540 = vmatprep.subr.bf16.mxu0 %v20629_v21  ;;  %v20671_v35 = vld [vmem:[#allocation13 + $0xcb4] ss:$36 sps:$4 sm:$0xff]  }
 0x523   :  { %12581 = vmatprep.subr.bf16.mxu1 %v20632_v34  ;;  %v20674_v36 = vld [vmem:[#allocation13 + $0x1134] ss:$36 sps:$4 sm:$0xff]   ;;  %v20680_v34 = vld [vmem:[#allocation13 + $0x10ec] ss:$36 sps:$4 sm:$0xff]  }
 0x524   :  { %v20669_v20 = vld [vmem:[#allocation13 + $0xcb0] ss:$36 sps:$4 sm:$0xff]  }
 0x525   :  { %12541 = vmatpush1.bf16.msra.mxu0 %v20627_v60  ;;  %v20672_v21 = vld [vmem:[#allocation13 + $0x1130] ss:$36 sps:$4 sm:$0xff]   ;;  %v20675_v60 = vld [vmem:[#allocation13 + $0xc68] ss:$36 sps:$4 sm:$0xff]  }
 0x526   :  { %12582 = vmatpush1.bf16.msra.mxu1 %v20630_v37  ;;  %12542 = vmatprep.subr.bf16.mxu0 %v20635_v44  ;;  %v20678_v37 = vld [vmem:[#allocation13 + $0x10e8] ss:$36 sps:$4 sm:$0xff]  }
 0x527   :  { %12583 = vmatprep.subr.bf16.mxu1 %v20638_v48  ;;  %v20683_v44 = vld [vmem:[#allocation13 + $0xc24] ss:$36 sps:$4 sm:$0xff]  }
 0x528   :  { %v20686_v48 = vld [vmem:[#allocation13 + $0x10a4] ss:$36 sps:$4 sm:$0xff]  }
 0x529   :  { %12543 = vmatpush1.bf16.msra.mxu0 %v20633_v55  ;;  %v20681_v55 = vld [vmem:[#allocation13 + $0xc20] ss:$36 sps:$4 sm:$0xff]  }
 0x52a   :  { %12584 = vmatpush1.bf16.msra.mxu1 %v20636_v40  ;;  %12544 = vmatprep.subr.bf16.mxu0 %v20641_v58  ;;  %v20684_v40 = vld [vmem:[#allocation13 + $0x10a0] ss:$36 sps:$4 sm:$0xff]  }
 0x52b   :  { %12585 = vmatprep.subr.bf16.mxu1 %v20644_v16  ;;  %v20689_v58 = vld [vmem:[#allocation13 + $0xbdc] ss:$36 sps:$4 sm:$0xff]  }
 0x52c   :  { %v20692_v16 = vld [vmem:[#allocation13 + $0x105c] ss:$36 sps:$4 sm:$0xff]  }
 0x52d   :  { %12545 = vmatpush1.bf16.msra.mxu0 %v20639_v61  ;;  %v20687_v61 = vld [vmem:[#allocation13 + $0xbd8] ss:$36 sps:$4 sm:$0xff]  }
 0x52e   :  { %12586 = vmatpush1.bf16.msra.mxu1 %v20642_v62  ;;  %12546 = vmatprep.subr.bf16.mxu0 %v20647_v63  ;;  %v20690_v62 = vld [vmem:[#allocation13 + $0x1058] ss:$36 sps:$4 sm:$0xff]  }
 0x52f   :  { %12587 = vmatprep.subr.bf16.mxu1 %v20650_v1  ;;  %v20695_v63 = vld [vmem:[#allocation13 + $0xb94] ss:$36 sps:$4 sm:$0xff]  }
 0x530   :  { %v20698_v1 = vld [vmem:[#allocation13 + $0x1014] ss:$36 sps:$4 sm:$0xff]  }
 0x531   :  { %12547 = vmatpush1.bf16.msra.mxu0 %v20645_v2  ;;  %v20693_v2 = vld [vmem:[#allocation13 + $0xb90] ss:$36 sps:$4 sm:$0xff]  }
 0x532   :  { %12588 = vmatpush1.bf16.msra.mxu1 %v20648_v3  ;;  %12548 = vmatprep.subr.bf16.mxu0 %v20653_v57  ;;  %v20696_v3 = vld [vmem:[#allocation13 + $0x1010] ss:$36 sps:$4 sm:$0xff]  }
 0x533   :  { %12589 = vmatprep.subr.bf16.mxu1 %v20656_v28  ;;  %v20701_v57 = vld [vmem:[#allocation13 + $0xb4c] ss:$36 sps:$4 sm:$0xff]  }
 0x534   :  { %v20704_v28 = vld [vmem:[#allocation13 + $0xfcc] ss:$36 sps:$4 sm:$0xff]  }
 0x535   :  { %12549 = vmatpush1.bf16.msra.mxu0 %v20651_v6  ;;  %v20699_v6 = vld [vmem:[#allocation13 + $0xb48] ss:$36 sps:$4 sm:$0xff]  }
 0x536   :  { %12590 = vmatpush1.bf16.msra.mxu1 %v20654_v8  ;;  %12550 = vmatprep.subr.bf16.mxu0 %v20659_v9  ;;  %v20702_v8 = vld [vmem:[#allocation13 + $0xfc8] ss:$36 sps:$4 sm:$0xff]  }
 0x537   :  { %12591 = vmatprep.subr.bf16.mxu1 %v20662_v10  ;;  %v20707_v9 = vld [vmem:[#allocation13 + $0x1404] ss:$36 sps:$4 sm:$0xff]  }
 0x538   :  { %v20710_v10 = vld [vmem:[#allocation13 + $0x1884] ss:$36 sps:$4 sm:$0xff]  }
 0x539   :  { %12551 = vmatpush2.bf16.msra.mxu0 %v20657_v25  ;;  %v20705_v25 = vld [vmem:[#allocation13 + $0x1400] ss:$36 sps:$4 sm:$0xff]  }
 0x53a   :  { %12592 = vmatpush2.bf16.msra.mxu1 %v20660_v12  ;;  %12552 = vmatprep.subr.bf16.mxu0 %v20665_v32  ;;  %v20708_v12 = vld [vmem:[#allocation13 + $0x1880] ss:$36 sps:$4 sm:$0xff]  }
 0x53b   :  { %12593 = vmatprep.subr.bf16.mxu1 %v20668_v29  ;;  %v20713_v32 = vld [vmem:[#allocation13 + $0x13bc] ss:$36 sps:$4 sm:$0xff]  }
 0x53d   :  { %12553 = vmatpush2.bf16.msra.mxu0 %v20663_v13  ;;  %v20716_v13 = vld [vmem:[#allocation13 + $0x183c] ss:$36 sps:$4 sm:$0xff]  }
 0x53e   :  { %12594 = vmatpush2.bf16.msra.mxu1 %v20666_v18  ;;  %12554 = vmatprep.subr.bf16.mxu0 %v20671_v35 }
 0x53f   :  { %12595 = vmatprep.subr.bf16.mxu1 %v20674_v36  ;;  %v20711_v36 = vld [vmem:[#allocation13 + $0x13b8] ss:$36 sps:$4 sm:$0xff]  }
 0x541   :  { %12555 = vmatpush2.bf16.msra.mxu0 %v20669_v20 }
 0x542   :  { %12596 = vmatpush2.bf16.msra.mxu1 %v20672_v21  ;;  %12556 = vmatprep.subr.bf16.mxu0 %v20677_v53  ;;  %v20714_v21 = vld [vmem:[#allocation13 + $0x1838] ss:$36 sps:$4 sm:$0xff]  }
 0x543   :  { %12597 = vmatprep.subr.bf16.mxu1 %v20680_v34  ;;  %v20719_v53 = vld [vmem:[#allocation13 + $0x1374] ss:$36 sps:$4 sm:$0xff]  }
 0x545   :  { %12557 = vmatpush2.bf16.msra.mxu0 %v20675_v60 }
 0x546   :  { %12598 = vmatpush2.bf16.msra.mxu1 %v20678_v37  ;;  %12558 = vmatprep.subr.bf16.mxu0 %v20683_v44 }
 0x547   :  { %12599 = vmatprep.subr.bf16.mxu1 %v20686_v48 }
 0x549   :  { %12559 = vmatpush2.bf16.msra.mxu0 %v20681_v55 }
 0x54a   :  { %12600 = vmatpush2.bf16.msra.mxu1 %v20684_v40  ;;  %12560 = vmatprep.subr.bf16.mxu0 %v20689_v58  ;;  %v20717_v40 = vld [vmem:[#allocation13 + $0x1370] ss:$36 sps:$4 sm:$0xff]  }
 0x54b   :  { %12601 = vmatprep.subr.bf16.mxu1 %v20692_v16  ;;  %v20720_v16 = vld [vmem:[#allocation13 + $0x17f0] ss:$36 sps:$4 sm:$0xff]  }
 0x54d   :  { %12561 = vmatpush2.bf16.msra.mxu0 %v20687_v61  ;;  %v20725_v61 = vld [vmem:[#allocation13 + $0x132c] ss:$36 sps:$4 sm:$0xff]  }
 0x54e   :  { %12602 = vmatpush2.bf16.msra.mxu1 %v20690_v62  ;;  %12562 = vmatprep.subr.bf16.mxu0 %v20695_v63  ;;  %v20728_v63 = vld [vmem:[#allocation13 + $0x17ac] ss:$36 sps:$4 sm:$0xff]  }
 0x54f   :  { %12603 = vmatprep.subr.bf16.mxu1 %v20698_v1  ;;  %v20726_v1 = vld [vmem:[#allocation13 + $0x17a8] ss:$36 sps:$4 sm:$0xff]  }
 0x551   :  { %12563 = vmatpush2.bf16.msra.mxu0 %v20693_v2  ;;  %v20731_v2 = vld [vmem:[#allocation13 + $0x12e4] ss:$36 sps:$4 sm:$0xff]  }
 0x552   :  { %12604 = vmatpush2.bf16.msra.mxu1 %v20696_v3  ;;  %12564 = vmatprep.subr.bf16.mxu0 %v20701_v57  ;;  %v20734_v3 = vld [vmem:[#allocation13 + $0x1764] ss:$36 sps:$4 sm:$0xff]  }
 0x553   :  { %12605 = vmatprep.subr.bf16.mxu1 %v20704_v28  ;;  %v20729_v57 = vld [vmem:[#allocation13 + $0x12e0] ss:$36 sps:$4 sm:$0xff]  }
 0x554   :  { %v20732_v28 = vld [vmem:[#allocation13 + $0x1760] ss:$36 sps:$4 sm:$0xff]  }
 0x555   :  { %12565 = vmatpush2.bf16.msra.mxu0 %v20699_v6  ;;  %v20737_v6 = vld [vmem:[#allocation13 + $0x129c] ss:$36 sps:$4 sm:$0xff]  }
 0x556   :  { %12606 = vmatpush2.bf16.msra.mxu1 %v20702_v8  ;;  %12616 = vmatprep.subr.bf16.mxu0 %v20707_v9  ;;  %v20740_v8 = vld [vmem:[#allocation13 + $0x171c] ss:$36 sps:$4 sm:$0xff]  }
 0x557   :  { %12657 = vmatprep.subr.bf16.mxu1 %v20710_v10  ;;  %v20735_v9 = vld [vmem:[#allocation13 + $0x1298] ss:$36 sps:$4 sm:$0xff]  }
 0x558   :  { %v12322_v29 = vpop.f32.mrf.mxu0  ;;  %12567 = vmatmul.mubr.bf16.vlgmr.msra.gmra.mxu0 %v23349_v14  ;;  %v20738_v10 = vld [vmem:[#allocation13 + $0x1718] ss:$36 sps:$4 sm:$0xff]  }
 0x559   :  { %v12323_v18 = vadd.f32 %v12322_v29, %v23455_v47  ;;  %v12363_v35 = vpop.f32.mrf.mxu1  ;;  %12608 = vmatmul.mubr.bf16.vlgmr.msra.gmra.mxu1 %v23351_v19  ;;  %12617 = vmatpush1.bf16.msra.mxu0 %v20705_v25  ;;  %v20722_v47 = vld [vmem:[#allocation13 + $0x17f4] ss:$36 sps:$4 sm:$0xff]  }
 0x55a   :  { %12648 = vmatprep.mubr.bf16.mxu0 %v23353_v15  ;;  %12658 = vmatpush1.bf16.msra.mxu1 %v20708_v12  ;;  %v12324_v20 = vpop.f32.mrf.mxu0  ;;  %v20743_v25 = vld [vmem:[#allocation13 + $0x1254] ss:$36 sps:$4 sm:$0xff]  }
 0x55b   :  { %v23465_v34 = vadd.f32 %v12363_v35, %v12323_v18  ;;  %12689 = vmatprep.mubr.bf16.mxu1 %v23358_v54  ;;  %v12325_v60 = vadd.f32 %v12324_v20, %v23459_v59  ;;  %v12365_v37 = vpop.f32.mrf.mxu1  ;;  %12618 = vmatprep.subr.bf16.mxu0 %v20713_v32  ;;  %v20723_v59 = vld [vmem:[#allocation13 + $0x1328] ss:$36 sps:$4 sm:$0xff]   ;;  %v20746_v12 = vld [vmem:[#allocation13 + $0x16d4] ss:$36 sps:$4 sm:$0xff]  }
 0x55c   :  { %v12326_v44 = vpop.f32.mrf.mxu0  ;;  %12659 = vmatprep.subr.bf16.mxu1 %v20716_v13  ;;  %v20741_v32 = vld [vmem:[#allocation13 + $0x1250] ss:$36 sps:$4 sm:$0xff]   ;;  %v20747_v35 = vld [vmem:[#allocation13 + $0x1208] ss:$36 sps:$4 sm:$0xff]  }
 0x55d   :  { %v23469_v48 = vadd.f32 %v12365_v37, %v12325_v60  ;;  %v12367_v55 = vpop.f32.mrf.mxu1  ;;  %12619 = vmatpush1.bf16.msra.mxu0 %v20711_v36  ;;  %v20744_v29 = vld [vmem:[#allocation13 + $0x16d0] ss:$36 sps:$4 sm:$0xff]   ;;  %v20750_v36 = vld [vmem:[#allocation13 + $0x1688] ss:$36 sps:$4 sm:$0xff]   ;;  %v20756_v60 = vld [vmem:[#allocation13 + $0x1ac0] ss:$36 sps:$4 sm:$0xff]  }
 0x55e   :  { %12660 = vmatpush1.bf16.msra.mxu1 %v20714_v21  ;;  %v12327_v58 = vpop.f32.mrf.mxu0  ;;  %12620 = vmatprep.subr.bf16.mxu0 %v20719_v53  ;;  %v20749_v13 = vld [vmem:[#allocation13 + $0x120c] ss:$36 sps:$4 sm:$0xff]   ;;  %v20755_v20 = vld [vmem:[#allocation13 + $0x1644] ss:$36 sps:$4 sm:$0xff]   ;;  %v20761_v37 = vld [vmem:[#allocation13 + $0x15fc] ss:$36 sps:$4 sm:$0xff]  }
 0x55f   :  { %v12368_v62 = vpop.f32.mrf.mxu1  ;;  %12661 = vmatprep.subr.bf16.mxu1 %v20722_v47  ;;  %v20752_v18 = vld [vmem:[#allocation13 + $0x168c] ss:$36 sps:$4 sm:$0xff]   ;;  %v20758_v21 = vld [vmem:[#allocation13 + $0x1ac4] ss:$36 sps:$4 sm:$0xff]   ;;  %v20764_v47 = vld [vmem:[#allocation13 + $0x1a7c] ss:$36 sps:$4 sm:$0xff]  }
 0x560   :  { %v20753_v53 = vld [vmem:[#allocation13 + $0x1640] ss:$36 sps:$4 sm:$0xff]   ;;  %v20759_v44 = vld [vmem:[#allocation13 + $0x15f8] ss:$36 sps:$4 sm:$0xff]   ;;  %v20773_v62 = vld [vmem:[#allocation13 + $0x156c] ss:$36 sps:$4 sm:$0xff]  }
 0x561   :  { %12621 = vmatpush1.bf16.msra.mxu0 %v20717_v40  ;;  %v20762_v55 = vld [vmem:[#allocation13 + $0x1a78] ss:$36 sps:$4 sm:$0xff]  }
 0x562   :  { %12662 = vmatpush1.bf16.msra.mxu1 %v20720_v16  ;;  %12622 = vmatprep.subr.bf16.mxu0 %v20725_v61  ;;  %v20767_v40 = vld [vmem:[#allocation13 + $0x15b4] ss:$36 sps:$4 sm:$0xff]  }
 0x563   :  { %12663 = vmatprep.subr.bf16.mxu1 %v20728_v63  ;;  %v20770_v58 = vld [vmem:[#allocation13 + $0x1a34] ss:$36 sps:$4 sm:$0xff]   ;;  %v20776_v63 = vld [vmem:[#allocation13 + $0x19ec] ss:$36 sps:$4 sm:$0xff]  }
 0x564   :  { %v20765_v16 = vld [vmem:[#allocation13 + $0x15b0] ss:$36 sps:$4 sm:$0xff]  }
 0x565   :  { %12623 = vmatpush1.bf16.msra.mxu0 %v20723_v59  ;;  %v20768_v61 = vld [vmem:[#allocation13 + $0x1a30] ss:$36 sps:$4 sm:$0xff]   ;;  %v20771_v59 = vld [vmem:[#allocation13 + $0x1568] ss:$36 sps:$4 sm:$0xff]  }
 0x566   :  { %12664 = vmatpush1.bf16.msra.mxu1 %v20726_v1  ;;  %12624 = vmatprep.subr.bf16.mxu0 %v20731_v2  ;;  %v20774_v1 = vld [vmem:[#allocation13 + $0x19e8] ss:$36 sps:$4 sm:$0xff]  }
 0x567   :  { %12665 = vmatprep.subr.bf16.mxu1 %v20734_v3  ;;  %v20779_v2 = vld [vmem:[#allocation13 + $0x1524] ss:$36 sps:$4 sm:$0xff]  }
 0x568   :  { %v20782_v3 = vld [vmem:[#allocation13 + $0x19a4] ss:$36 sps:$4 sm:$0xff]  }
 0x569   :  { %12625 = vmatpush1.bf16.msra.mxu0 %v20729_v57  ;;  %v20777_v57 = vld [vmem:[#allocation13 + $0x1520] ss:$36 sps:$4 sm:$0xff]  }
 0x56a   :  { %12666 = vmatpush1.bf16.msra.mxu1 %v20732_v28  ;;  %12626 = vmatprep.subr.bf16.mxu0 %v20737_v6  ;;  %v20780_v28 = vld [vmem:[#allocation13 + $0x19a0] ss:$36 sps:$4 sm:$0xff]  }
 0x56b   :  { %12667 = vmatprep.subr.bf16.mxu1 %v20740_v8  ;;  %v20785_v6 = vld [vmem:[#allocation13 + $0x14dc] ss:$36 sps:$4 sm:$0xff]  }
 0x56c   :  { %v20788_v8 = vld [vmem:[#allocation13 + $0x195c] ss:$36 sps:$4 sm:$0xff]  }
 0x56d   :  { %12627 = vmatpush1.bf16.msra.mxu0 %v20735_v9  ;;  %v20783_v9 = vld [vmem:[#allocation13 + $0x14d8] ss:$36 sps:$4 sm:$0xff]  }
 0x56e   :  { %12668 = vmatpush1.bf16.msra.mxu1 %v20738_v10  ;;  %12628 = vmatprep.subr.bf16.mxu0 %v20743_v25  ;;  %v20786_v10 = vld [vmem:[#allocation13 + $0x1958] ss:$36 sps:$4 sm:$0xff]  }
 0x56f   :  { %12669 = vmatprep.subr.bf16.mxu1 %v20746_v12  ;;  %v20791_v25 = vld [vmem:[#allocation13 + $0x1494] ss:$36 sps:$4 sm:$0xff]  }
 0x570   :  { %v20794_v12 = vld [vmem:[#allocation13 + $0x1914] ss:$36 sps:$4 sm:$0xff]  }
 0x571   :  { %12629 = vmatpush1.bf16.msra.mxu0 %v20741_v32  ;;  %v20789_v32 = vld [vmem:[#allocation13 + $0x1490] ss:$36 sps:$4 sm:$0xff]  }
 0x572   :  { %12670 = vmatpush1.bf16.msra.mxu1 %v20744_v29  ;;  %12630 = vmatprep.subr.bf16.mxu0 %v20749_v13  ;;  %v20792_v29 = vld [vmem:[#allocation13 + $0x1910] ss:$36 sps:$4 sm:$0xff]  }
 0x573   :  { %12671 = vmatprep.subr.bf16.mxu1 %v20752_v18  ;;  %v20797_v13 = vld [vmem:[#allocation13 + $0x144c] ss:$36 sps:$4 sm:$0xff]  }
 0x574   :  { %v20800_v18 = vld [vmem:[#allocation13 + $0x18cc] ss:$36 sps:$4 sm:$0xff]  }
 0x575   :  { %12631 = vmatpush1.bf16.msra.mxu0 %v20747_v35  ;;  %v20795_v35 = vld [vmem:[#allocation13 + $0x1448] ss:$36 sps:$4 sm:$0xff]  }
 0x576   :  { %12672 = vmatpush1.bf16.msra.mxu1 %v20750_v36  ;;  %12632 = vmatprep.subr.bf16.mxu0 %v20755_v20  ;;  %v20798_v36 = vld [vmem:[#allocation13 + $0x18c8] ss:$36 sps:$4 sm:$0xff]  }
 0x577   :  { %12673 = vmatprep.subr.bf16.mxu1 %v20758_v21  ;;  %v20803_v20 = vld [vmem:[#allocation13 + $0x1d04] ss:$36 sps:$4 sm:$0xff]  }
 0x578   :  { %v20806_v21 = vld [vmem:[#allocation13 + $0x2184] ss:$36 sps:$4 sm:$0xff]  }
 0x579   :  { %12633 = vmatpush2.bf16.msra.mxu0 %v20753_v53  ;;  %v20801_v53 = vld [vmem:[#allocation13 + $0x1d00] ss:$36 sps:$4 sm:$0xff]  }
 0x57a   :  { %12674 = vmatpush2.bf16.msra.mxu1 %v20756_v60  ;;  %12634 = vmatprep.subr.bf16.mxu0 %v20761_v37  ;;  %v20804_v60 = vld [vmem:[#allocation13 + $0x2180] ss:$36 sps:$4 sm:$0xff]  }
 0x57b   :  { %12675 = vmatprep.subr.bf16.mxu1 %v20764_v47  ;;  %v20809_v37 = vld [vmem:[#allocation13 + $0x1cbc] ss:$36 sps:$4 sm:$0xff]  }
 0x57d   :  { %12635 = vmatpush2.bf16.msra.mxu0 %v20759_v44  ;;  %v20812_v44 = vld [vmem:[#allocation13 + $0x213c] ss:$36 sps:$4 sm:$0xff]  }
 0x57e   :  { %12676 = vmatpush2.bf16.msra.mxu1 %v20762_v55  ;;  %12636 = vmatprep.subr.bf16.mxu0 %v20767_v40 }
 0x57f   :  { %12677 = vmatprep.subr.bf16.mxu1 %v20770_v58  ;;  %v20807_v58 = vld [vmem:[#allocation13 + $0x1cb8] ss:$36 sps:$4 sm:$0xff]  }
 0x581   :  { %12637 = vmatpush2.bf16.msra.mxu0 %v20765_v16 }
 0x582   :  { %12678 = vmatpush2.bf16.msra.mxu1 %v20768_v61  ;;  %12638 = vmatprep.subr.bf16.mxu0 %v20773_v62  ;;  %v20810_v61 = vld [vmem:[#allocation13 + $0x2138] ss:$36 sps:$4 sm:$0xff]  }
 0x583   :  { %12679 = vmatprep.subr.bf16.mxu1 %v20776_v63  ;;  %v20815_v62 = vld [vmem:[#allocation13 + $0x1c74] ss:$36 sps:$4 sm:$0xff]  }
 0x585   :  { %12639 = vmatpush2.bf16.msra.mxu0 %v20771_v59 }
 0x586   :  { %12680 = vmatpush2.bf16.msra.mxu1 %v20774_v1  ;;  %12640 = vmatprep.subr.bf16.mxu0 %v20779_v2 }
 0x587   :  { %12681 = vmatprep.subr.bf16.mxu1 %v20782_v3 }
 0x589   :  { %12641 = vmatpush2.bf16.msra.mxu0 %v20777_v57 }
 0x58a   :  { %12682 = vmatpush2.bf16.msra.mxu1 %v20780_v28  ;;  %12642 = vmatprep.subr.bf16.mxu0 %v20785_v6  ;;  %v20813_v28 = vld [vmem:[#allocation13 + $0x1c70] ss:$36 sps:$4 sm:$0xff]  }
 0x58b   :  { %12683 = vmatprep.subr.bf16.mxu1 %v20788_v8  ;;  %v20816_v8 = vld [vmem:[#allocation13 + $0x20f0] ss:$36 sps:$4 sm:$0xff]  }
 0x58d   :  { %12643 = vmatpush2.bf16.msra.mxu0 %v20783_v9  ;;  %v20821_v9 = vld [vmem:[#allocation13 + $0x1c2c] ss:$36 sps:$4 sm:$0xff]  }
 0x58e   :  { %12684 = vmatpush2.bf16.msra.mxu1 %v20786_v10  ;;  %12644 = vmatprep.subr.bf16.mxu0 %v20791_v25  ;;  %v20824_v25 = vld [vmem:[#allocation13 + $0x20ac] ss:$36 sps:$4 sm:$0xff]  }
 0x58f   :  { %12685 = vmatprep.subr.bf16.mxu1 %v20794_v12  ;;  %v20822_v12 = vld [vmem:[#allocation13 + $0x20a8] ss:$36 sps:$4 sm:$0xff]  }
 0x591   :  { %12645 = vmatpush2.bf16.msra.mxu0 %v20789_v32  ;;  %v20827_v32 = vld [vmem:[#allocation13 + $0x1be4] ss:$36 sps:$4 sm:$0xff]  }
 0x592   :  { %12686 = vmatpush2.bf16.msra.mxu1 %v20792_v29  ;;  %12646 = vmatprep.subr.bf16.mxu0 %v20797_v13  ;;  %v20830_v29 = vld [vmem:[#allocation13 + $0x2064] ss:$36 sps:$4 sm:$0xff]  }
 0x593   :  { %12687 = vmatprep.subr.bf16.mxu1 %v20800_v18  ;;  %v20825_v13 = vld [vmem:[#allocation13 + $0x1be0] ss:$36 sps:$4 sm:$0xff]  }
 0x594   :  { %v20828_v18 = vld [vmem:[#allocation13 + $0x2060] ss:$36 sps:$4 sm:$0xff]  }
 0x595   :  { %12647 = vmatpush2.bf16.msra.mxu0 %v20795_v35  ;;  %v20833_v35 = vld [vmem:[#allocation13 + $0x1b9c] ss:$36 sps:$4 sm:$0xff]  }
 0x596   :  { %12688 = vmatpush2.bf16.msra.mxu1 %v20798_v36  ;;  %12698 = vmatprep.subr.bf16.mxu0 %v20803_v20  ;;  %v20836_v36 = vld [vmem:[#allocation13 + $0x201c] ss:$36 sps:$4 sm:$0xff]  }
 0x597   :  { %12739 = vmatprep.subr.bf16.mxu1 %v20806_v21  ;;  %v20831_v20 = vld [vmem:[#allocation13 + $0x1b98] ss:$36 sps:$4 sm:$0xff]  }
 0x598   :  { %v12404_v47 = vpop.f32.mrf.mxu0  ;;  %12649 = vmatmul.mubr.bf16.vlgmr.msra.gmra.mxu0 %v23381_v30  ;;  %v20834_v21 = vld [vmem:[#allocation13 + $0x2018] ss:$36 sps:$4 sm:$0xff]  }
 0x599   :  { %v12405_v55 = vadd.f32 %v12404_v47, %v23465_v34  ;;  %v12445_v40 = vpop.f32.mrf.mxu1  ;;  %12690 = vmatmul.mubr.bf16.vlgmr.msra.gmra.mxu1 %v23383_v56  ;;  %12699 = vmatpush1.bf16.msra.mxu0 %v20801_v53  ;;  %v20818_v34 = vld [vmem:[#allocation13 + $0x20f4] ss:$36 sps:$4 sm:$0xff]  }
 0x59a   :  { %12730 = vmatprep.mubr.bf16.mxu0 %v23385_v33  ;;  %12740 = vmatpush1.bf16.msra.mxu1 %v20804_v60  ;;  %v12406_v16 = vpop.f32.mrf.mxu0  ;;  %v20839_v53 = vld [vmem:[#allocation13 + $0x1b54] ss:$36 sps:$4 sm:$0xff]  }
 0x59b   :  { %v23475_v63 = vadd.f32 %v12445_v40, %v12405_v55  ;;  %12771 = vmatprep.mubr.bf16.mxu1 %v23390_v46  ;;  %v12407_v59 = vadd.f32 %v12406_v16, %v23469_v48  ;;  %v12447_v1 = vpop.f32.mrf.mxu1  ;;  %12700 = vmatprep.subr.bf16.mxu0 %v20809_v37  ;;  %v20819_v48 = vld [vmem:[#allocation13 + $0x1c28] ss:$36 sps:$4 sm:$0xff]   ;;  %v20842_v60 = vld [vmem:[#allocation13 + $0x1fd4] ss:$36 sps:$4 sm:$0xff]  }
 0x59c   :  { %v12408_v2 = vpop.f32.mrf.mxu0  ;;  %12741 = vmatprep.subr.bf16.mxu1 %v20812_v44  ;;  %v20837_v37 = vld [vmem:[#allocation13 + $0x1b50] ss:$36 sps:$4 sm:$0xff]   ;;  %v20843_v40 = vld [vmem:[#allocation13 + $0x1b08] ss:$36 sps:$4 sm:$0xff]  }
 0x59d   :  { %v23479_v3 = vadd.f32 %v12447_v1, %v12407_v59  ;;  %v12449_v57 = vpop.f32.mrf.mxu1  ;;  %12701 = vmatpush1.bf16.msra.mxu0 %v20807_v58  ;;  %v20840_v47 = vld [vmem:[#allocation13 + $0x1fd0] ss:$36 sps:$4 sm:$0xff]   ;;  %v20846_v58 = vld [vmem:[#allocation13 + $0x1f88] ss:$36 sps:$4 sm:$0xff]   ;;  %v20852_v59 = vld [vmem:[#allocation13 + $0x23c0] ss:$36 sps:$4 sm:$0xff]  }
 0x59e   :  { %12742 = vmatpush1.bf16.msra.mxu1 %v20810_v61  ;;  %v12409_v6 = vpop.f32.mrf.mxu0  ;;  %12702 = vmatprep.subr.bf16.mxu0 %v20815_v62  ;;  %v20845_v44 = vld [vmem:[#allocation13 + $0x1b0c] ss:$36 sps:$4 sm:$0xff]   ;;  %v20851_v16 = vld [vmem:[#allocation13 + $0x1f44] ss:$36 sps:$4 sm:$0xff]   ;;  %v20857_v1 = vld [vmem:[#allocation13 + $0x1efc] ss:$36 sps:$4 sm:$0xff]  }
 0x59f   :  { %v12450_v10 = vpop.f32.mrf.mxu1  ;;  %12743 = vmatprep.subr.bf16.mxu1 %v20818_v34  ;;  %v20848_v55 = vld [vmem:[#allocation13 + $0x1f8c] ss:$36 sps:$4 sm:$0xff]   ;;  %v20854_v61 = vld [vmem:[#allocation13 + $0x23c4] ss:$36 sps:$4 sm:$0xff]   ;;  %v20860_v34 = vld [vmem:[#allocation13 + $0x237c] ss:$36 sps:$4 sm:$0xff]  }
 0x5a0   :  { %v20849_v62 = vld [vmem:[#allocation13 + $0x1f40] ss:$36 sps:$4 sm:$0xff]   ;;  %v20855_v2 = vld [vmem:[#allocation13 + $0x1ef8] ss:$36 sps:$4 sm:$0xff]   ;;  %v20869_v10 = vld [vmem:[#allocation13 + $0x1e6c] ss:$36 sps:$4 sm:$0xff]  }
 0x5a1   :  { %12703 = vmatpush1.bf16.msra.mxu0 %v20813_v28  ;;  %v20858_v57 = vld [vmem:[#allocation13 + $0x2378] ss:$36 sps:$4 sm:$0xff]  }
 0x5a2   :  { %12744 = vmatpush1.bf16.msra.mxu1 %v20816_v8  ;;  %12704 = vmatprep.subr.bf16.mxu0 %v20821_v9  ;;  %v20863_v28 = vld [vmem:[#allocation13 + $0x1eb4] ss:$36 sps:$4 sm:$0xff]  }
 0x5a3   :  { %12745 = vmatprep.subr.bf16.mxu1 %v20824_v25  ;;  %v20866_v6 = vld [vmem:[#allocation13 + $0x2334] ss:$36 sps:$4 sm:$0xff]   ;;  %v20872_v25 = vld [vmem:[#allocation13 + $0x22ec] ss:$36 sps:$4 sm:$0xff]  }
 0x5a4   :  { %v20861_v8 = vld [vmem:[#allocation13 + $0x1eb0] ss:$36 sps:$4 sm:$0xff]  }
 0x5a5   :  { %12705 = vmatpush1.bf16.msra.mxu0 %v20819_v48  ;;  %v20864_v9 = vld [vmem:[#allocation13 + $0x2330] ss:$36 sps:$4 sm:$0xff]   ;;  %v20867_v48 = vld [vmem:[#allocation13 + $0x1e68] ss:$36 sps:$4 sm:$0xff]  }
 0x5a6   :  { %12746 = vmatpush1.bf16.msra.mxu1 %v20822_v12  ;;  %12706 = vmatprep.subr.bf16.mxu0 %v20827_v32  ;;  %v20870_v12 = vld [vmem:[#allocation13 + $0x22e8] ss:$36 sps:$4 sm:$0xff]  }
 0x5a7   :  { %12747 = vmatprep.subr.bf16.mxu1 %v20830_v29  ;;  %v20875_v32 = vld [vmem:[#allocation13 + $0x1e24] ss:$36 sps:$4 sm:$0xff]  }
 0x5a8   :  { %v20878_v29 = vld [vmem:[#allocation13 + $0x22a4] ss:$36 sps:$4 sm:$0xff]  }
 0x5a9   :  { %12707 = vmatpush1.bf16.msra.mxu0 %v20825_v13  ;;  %v20873_v13 = vld [vmem:[#allocation13 + $0x1e20] ss:$36 sps:$4 sm:$0xff]  }
 0x5aa   :  { %12748 = vmatpush1.bf16.msra.mxu1 %v20828_v18  ;;  %12708 = vmatprep.subr.bf16.mxu0 %v20833_v35  ;;  %v20876_v18 = vld [vmem:[#allocation13 + $0x22a0] ss:$36 sps:$4 sm:$0xff]  }
 0x5ab   :  { %12749 = vmatprep.subr.bf16.mxu1 %v20836_v36  ;;  %v20881_v35 = vld [vmem:[#allocation13 + $0x1ddc] ss:$36 sps:$4 sm:$0xff]  }
 0x5ac   :  { %v20884_v36 = vld [vmem:[#allocation13 + $0x225c] ss:$36 sps:$4 sm:$0xff]  }
 0x5ad   :  { %12709 = vmatpush1.bf16.msra.mxu0 %v20831_v20  ;;  %v20879_v20 = vld [vmem:[#allocation13 + $0x1dd8] ss:$36 sps:$4 sm:$0xff]  }
 0x5ae   :  { %12750 = vmatpush1.bf16.msra.mxu1 %v20834_v21  ;;  %12710 = vmatprep.subr.bf16.mxu0 %v20839_v53  ;;  %v20882_v21 = vld [vmem:[#allocation13 + $0x2258] ss:$36 sps:$4 sm:$0xff]  }
 0x5af   :  { %12751 = vmatprep.subr.bf16.mxu1 %v20842_v60  ;;  %v20887_v53 = vld [vmem:[#allocation13 + $0x1d94] ss:$36 sps:$4 sm:$0xff]  }
 0x5b0   :  { %v20890_v60 = vld [vmem:[#allocation13 + $0x2214] ss:$36 sps:$4 sm:$0xff]  }
 0x5b1   :  { %12711 = vmatpush1.bf16.msra.mxu0 %v20837_v37  ;;  %v20885_v37 = vld [vmem:[#allocation13 + $0x1d90] ss:$36 sps:$4 sm:$0xff]  }
 0x5b2   :  { %12752 = vmatpush1.bf16.msra.mxu1 %v20840_v47  ;;  %12712 = vmatprep.subr.bf16.mxu0 %v20845_v44  ;;  %v20888_v47 = vld [vmem:[#allocation13 + $0x2210] ss:$36 sps:$4 sm:$0xff]  }
 0x5b3   :  { %12753 = vmatprep.subr.bf16.mxu1 %v20848_v55  ;;  %v20893_v44 = vld [vmem:[#allocation13 + $0x1d4c] ss:$36 sps:$4 sm:$0xff]  }
 0x5b4   :  { %v20896_v55 = vld [vmem:[#allocation13 + $0x21cc] ss:$36 sps:$4 sm:$0xff]  }
 0x5b5   :  { %12713 = vmatpush1.bf16.msra.mxu0 %v20843_v40  ;;  %v20891_v40 = vld [vmem:[#allocation13 + $0x1d48] ss:$36 sps:$4 sm:$0xff]  }
 0x5b6   :  { %12754 = vmatpush1.bf16.msra.mxu1 %v20846_v58  ;;  %12714 = vmatprep.subr.bf16.mxu0 %v20851_v16  ;;  %v20894_v58 = vld [vmem:[#allocation13 + $0x21c8] ss:$36 sps:$4 sm:$0xff]  }
 0x5b7   :  { %12755 = vmatprep.subr.bf16.mxu1 %v20854_v61  ;;  %v20899_v16 = vld [vmem:[#allocation13 + $0x2604] ss:$36 sps:$4 sm:$0xff]  }
 0x5b8   :  { %v20902_v61 = vld [vmem:[#allocation13 + $0x2a84] ss:$36 sps:$4 sm:$0xff]  }
 0x5b9   :  { %12715 = vmatpush2.bf16.msra.mxu0 %v20849_v62  ;;  %v22603_v62 = vld [vmem:[#allocation14] sm:$0xff] }
 0x5ba   :  { %12756 = vmatpush2.bf16.msra.mxu1 %v20852_v59  ;;  %12716 = vmatprep.subr.bf16.mxu0 %v20857_v1  ;;  %v4648_v59 = vrot.slane %v22603_v62, %v23291_v41  ;;  %v20897_v1 = vld [vmem:[#allocation13 + $0x2600] ss:$36 sps:$4 sm:$0xff]  }
 0x5bb   :  { %12757 = vmatprep.subr.bf16.mxu1 %v20860_v34  ;;  %v20900_v34 = vld [vmem:[#allocation13 + $0x2a80] ss:$36 sps:$4 sm:$0xff]  }
 0x5bd   :  { %12717 = vmatpush2.bf16.msra.mxu0 %v20855_v2  ;;  %v4652_v2 = vrot.slane %v22603_v62, %v23264_v17  ;;  %v20924_v62 = vld [vmem:[#allocation13 + $0x2960] ss:$36 sps:$4 sm:$0xff]  }
 0x5be   :  { %12758 = vmatpush2.bf16.msra.mxu1 %v20858_v57  ;;  %12718 = vmatprep.subr.bf16.mxu0 %v20863_v28  ;;  %v20905_v57 = vld [vmem:[#allocation13 + $0x25bc] ss:$36 sps:$4 sm:$0xff]  }
 0x5bf   :  { %12759 = vmatprep.subr.bf16.mxu1 %v20866_v6  ;;  %v20908_v6 = vld [vmem:[#allocation13 + $0x2a3c] ss:$36 sps:$4 sm:$0xff]  }
 0x5c1   :  { %12719 = vmatpush2.bf16.msra.mxu0 %v20861_v8 }
 0x5c2   :  { %12760 = vmatpush2.bf16.msra.mxu1 %v20864_v9  ;;  %12720 = vmatprep.subr.bf16.mxu0 %v20869_v10  ;;  %v20903_v10 = vld [vmem:[#allocation13 + $0x25b8] ss:$36 sps:$4 sm:$0xff]  }
 0x5c3   :  { %12761 = vmatprep.subr.bf16.mxu1 %v20872_v25 }
 0x5c5   :  { %12721 = vmatpush2.bf16.msra.mxu0 %v20867_v48  ;;  %v20906_v48 = vld [vmem:[#allocation13 + $0x2a38] ss:$36 sps:$4 sm:$0xff]  }
 0x5c6   :  { %12762 = vmatpush2.bf16.msra.mxu1 %v20870_v12  ;;  %12722 = vmatprep.subr.bf16.mxu0 %v20875_v32  ;;  %v20911_v12 = vld [vmem:[#allocation13 + $0x2574] ss:$36 sps:$4 sm:$0xff]  }
 0x5c7   :  { %12763 = vmatprep.subr.bf16.mxu1 %v20878_v29 }
 0x5c9   :  { %12723 = vmatpush2.bf16.msra.mxu0 %v20873_v13 }
 0x5ca   :  { %12764 = vmatpush2.bf16.msra.mxu1 %v20876_v18  ;;  %12724 = vmatprep.subr.bf16.mxu0 %v20881_v35  ;;  %v20914_v18 = vld [vmem:[#allocation13 + $0x29f4] ss:$36 sps:$4 sm:$0xff]  }
 0x5cb   :  { %12765 = vmatprep.subr.bf16.mxu1 %v20884_v36 }
 0x5cd   :  { %12725 = vmatpush2.bf16.msra.mxu0 %v20879_v20 }
 0x5ce   :  { %12766 = vmatpush2.bf16.msra.mxu1 %v20882_v21  ;;  %12726 = vmatprep.subr.bf16.mxu0 %v20887_v53  ;;  %v20909_v21 = vld [vmem:[#allocation13 + $0x2570] ss:$36 sps:$4 sm:$0xff]  }
 0x5cf   :  { %12767 = vmatprep.subr.bf16.mxu1 %v20890_v60  ;;  %v20912_v60 = vld [vmem:[#allocation13 + $0x29f0] ss:$36 sps:$4 sm:$0xff]  }
 0x5d1   :  { %12727 = vmatpush2.bf16.msra.mxu0 %v20885_v37  ;;  %v20917_v37 = vld [vmem:[#allocation13 + $0x252c] ss:$36 sps:$4 sm:$0xff]  }
 0x5d2   :  { %12768 = vmatpush2.bf16.msra.mxu1 %v20888_v47  ;;  %12728 = vmatprep.subr.bf16.mxu0 %v20893_v44  ;;  %v20920_v44 = vld [vmem:[#allocation13 + $0x29ac] ss:$36 sps:$4 sm:$0xff]  }
 0x5d3   :  { %12769 = vmatprep.subr.bf16.mxu1 %v20896_v55  ;;  %v20915_v55 = vld [vmem:[#allocation13 + $0x2528] ss:$36 sps:$4 sm:$0xff]  }
 0x5d5   :  { %12729 = vmatpush2.bf16.msra.mxu0 %v20891_v40  ;;  %v20918_v40 = vld [vmem:[#allocation13 + $0x29a8] ss:$36 sps:$4 sm:$0xff]  }
 0x5d6   :  { %12770 = vmatpush2.bf16.msra.mxu1 %v20894_v58  ;;  %12780 = vmatprep.subr.bf16.mxu0 %v20899_v16  ;;  %v20923_v58 = vld [vmem:[#allocation13 + $0x24e4] ss:$36 sps:$4 sm:$0xff]  }
 0x5d7   :  { %12821 = vmatprep.subr.bf16.mxu1 %v20902_v61  ;;  %v20926_v16 = vld [vmem:[#allocation13 + $0x2964] ss:$36 sps:$4 sm:$0xff]  }
 0x5d8   :  { %v12486_v28 = vpop.f32.mrf.mxu0  ;;  %12731 = vmatmul.mubr.bf16.vlgmr.msra.gmra.mxu0 %v23414_v4  ;;  %v20921_v61 = vld [vmem:[#allocation13 + $0x24e0] ss:$36 sps:$4 sm:$0xff]  }
 0x5d9   :  { %v12487_v8 = vadd.f32 %v12486_v28, %v4648_v59  ;;  %v12527_v9 = vpop.f32.mrf.mxu1  ;;  %12772 = vmatmul.mubr.bf16.vlgmr.msra.gmra.mxu1 %v23416_v5  ;;  %12781 = vmatpush1.bf16.msra.mxu0 %v20897_v1  ;;  %v20929_v59 = vld [vmem:[#allocation13 + $0x249c] ss:$36 sps:$4 sm:$0xff]   ;;  %v20938_v28 = vld [vmem:[#allocation13 + $0x28d4] ss:$36 sps:$4 sm:$0xff]  }
 0x5da   :  { %12812 = vmatprep.mubr.bf16.mxu0 %v23419_v7  ;;  %12822 = vmatpush1.bf16.msra.mxu1 %v20900_v34  ;;  %v12488_v25 = vpop.f32.mrf.mxu0  ;;  %v20932_v1 = vld [vmem:[#allocation13 + $0x291c] ss:$36 sps:$4 sm:$0xff]  }
 0x5db   :  { %v23486_v32 = vadd.f32 %v12527_v9, %v12487_v8  ;;  %12853 = vmatprep.mubr.bf16.mxu1 %v23422_v11  ;;  %v12489_v29 = vadd.f32 %v12488_v25, %v4652_v2  ;;  %v12529_v13 = vpop.f32.mrf.mxu1  ;;  %12782 = vmatprep.subr.bf16.mxu0 %v20905_v57  ;;  %v20927_v34 = vld [vmem:[#allocation13 + $0x2498] ss:$36 sps:$4 sm:$0xff]   ;;  %v20936_v8 = vld [vmem:[#allocation13 + $0x28d0] ss:$36 sps:$4 sm:$0xff]   ;;  %v20939_v25 = vld [vmem:[#allocation13 + $0x2408] ss:$36 sps:$4 sm:$0xff]  }
 0x5dc   :  { %v12490_v35 = vpop.f32.mrf.mxu0  ;;  %12823 = vmatprep.subr.bf16.mxu1 %v20908_v6  ;;  %v20930_v2 = vld [vmem:[#allocation13 + $0x2918] ss:$36 sps:$4 sm:$0xff]   ;;  %v20933_v6 = vld [vmem:[#allocation13 + $0x2450] ss:$36 sps:$4 sm:$0xff]  }
 0x5dd   :  { %v23489_v36 = vadd.f32 %v12529_v13, %v12489_v29  ;;  %v12531_v20 = vpop.f32.mrf.mxu1  ;;  %12783 = vmatpush1.bf16.msra.mxu0 %v20903_v10  ;;  %v20935_v57 = vld [vmem:[#allocation13 + $0x2454] ss:$36 sps:$4 sm:$0xff]   ;;  %v20941_v9 = vld [vmem:[#allocation13 + $0x240c] ss:$36 sps:$4 sm:$0xff]   ;;  %v20950_v29 = vld [vmem:[#allocation13 + $0x2cc4] ss:$36 sps:$4 sm:$0xff]  }
 0x5de   :  { %12824 = vmatpush1.bf16.msra.mxu1 %v20906_v48  ;;  %v12491_v53 = vpop.f32.mrf.mxu0  ;;  %12784 = vmatprep.subr.bf16.mxu0 %v20911_v12  ;;  %v20944_v10 = vld [vmem:[#allocation13 + $0x288c] ss:$36 sps:$4 sm:$0xff]   ;;  %v20947_v12 = vld [vmem:[#allocation13 + $0x2844] ss:$36 sps:$4 sm:$0xff]   ;;  %v20953_v35 = vld [vmem:[#allocation13 + $0x27fc] ss:$36 sps:$4 sm:$0xff]  }
 0x5df   :  { %v12532_v47 = vpop.f32.mrf.mxu1  ;;  %12825 = vmatprep.subr.bf16.mxu1 %v20914_v18  ;;  %v20942_v48 = vld [vmem:[#allocation13 + $0x2888] ss:$36 sps:$4 sm:$0xff]   ;;  %v20945_v13 = vld [vmem:[#allocation13 + $0x2840] ss:$36 sps:$4 sm:$0xff]   ;;  %v20954_v53 = vld [vmem:[#allocation13 + $0x2c78] ss:$36 sps:$4 sm:$0xff]  }
 0x5e0   :  { %v20948_v18 = vld [vmem:[#allocation13 + $0x2cc0] ss:$36 sps:$4 sm:$0xff]   ;;  %v20957_v47 = vld [vmem:[#allocation13 + $0x27b0] ss:$36 sps:$4 sm:$0xff]  }
 0x5e1   :  { %12785 = vmatpush1.bf16.msra.mxu0 %v20909_v21  ;;  %v20956_v20 = vld [vmem:[#allocation13 + $0x2c7c] ss:$36 sps:$4 sm:$0xff]  }
 0x5e2   :  { %12826 = vmatpush1.bf16.msra.mxu1 %v20912_v60  ;;  %12786 = vmatprep.subr.bf16.mxu0 %v20917_v37  ;;  %v20951_v21 = vld [vmem:[#allocation13 + $0x27f8] ss:$36 sps:$4 sm:$0xff]  }
 0x5e3   :  { %12827 = vmatprep.subr.bf16.mxu1 %v20920_v44  ;;  %v20959_v60 = vld [vmem:[#allocation13 + $0x27b4] ss:$36 sps:$4 sm:$0xff]  }
 0x5e4   :  { %v20962_v37 = vld [vmem:[#allocation13 + $0x2c34] ss:$36 sps:$4 sm:$0xff]  }
 0x5e5   :  { %12787 = vmatpush1.bf16.msra.mxu0 %v20915_v55  ;;  %v20960_v44 = vld [vmem:[#allocation13 + $0x2c30] ss:$36 sps:$4 sm:$0xff]  }
 0x5e6   :  { %12828 = vmatpush1.bf16.msra.mxu1 %v20918_v40  ;;  %12788 = vmatprep.subr.bf16.mxu0 %v20923_v58  ;;  %v20965_v55 = vld [vmem:[#allocation13 + $0x276c] ss:$36 sps:$4 sm:$0xff]  }
 0x5e7   :  { %12829 = vmatprep.subr.bf16.mxu1 %v20926_v16  ;;  %v20968_v40 = vld [vmem:[#allocation13 + $0x2bec] ss:$36 sps:$4 sm:$0xff]  }
 0x5e8   :  { %v20963_v58 = vld [vmem:[#allocation13 + $0x2768] ss:$36 sps:$4 sm:$0xff]  }
 0x5e9   :  { %12789 = vmatpush1.bf16.msra.mxu0 %v20921_v61  ;;  %v20966_v16 = vld [vmem:[#allocation13 + $0x2be8] ss:$36 sps:$4 sm:$0xff]  }
 0x5ea   :  { %12830 = vmatpush1.bf16.msra.mxu1 %v20924_v62  ;;  %12790 = vmatprep.subr.bf16.mxu0 %v20929_v59  ;;  %v20971_v61 = vld [vmem:[#allocation13 + $0x2724] ss:$36 sps:$4 sm:$0xff]  }
 0x5eb   :  { %12831 = vmatprep.subr.bf16.mxu1 %v20932_v1  ;;  %v20974_v62 = vld [vmem:[#allocation13 + $0x2ba4] ss:$36 sps:$4 sm:$0xff]  }
 0x5ec   :  { %v20969_v59 = vld [vmem:[#allocation13 + $0x2720] ss:$36 sps:$4 sm:$0xff]  }
 0x5ed   :  { %12791 = vmatpush1.bf16.msra.mxu0 %v20927_v34  ;;  %v20972_v1 = vld [vmem:[#allocation13 + $0x2ba0] ss:$36 sps:$4 sm:$0xff]  }
 0x5ee   :  { %12832 = vmatpush1.bf16.msra.mxu1 %v20930_v2  ;;  %12792 = vmatprep.subr.bf16.mxu0 %v20935_v57  ;;  %v20977_v34 = vld [vmem:[#allocation13 + $0x26dc] ss:$36 sps:$4 sm:$0xff]  }
 0x5ef   :  { %12833 = vmatprep.subr.bf16.mxu1 %v20938_v28  ;;  %v20980_v2 = vld [vmem:[#allocation13 + $0x2b5c] ss:$36 sps:$4 sm:$0xff]  }
 0x5f0   :  { %v20975_v57 = vld [vmem:[#allocation13 + $0x26d8] ss:$36 sps:$4 sm:$0xff]  }
 0x5f1   :  { %12793 = vmatpush1.bf16.msra.mxu0 %v20933_v6  ;;  %v20978_v28 = vld [vmem:[#allocation13 + $0x2b58] ss:$36 sps:$4 sm:$0xff]  }
 0x5f2   :  { %12834 = vmatpush1.bf16.msra.mxu1 %v20936_v8  ;;  %12794 = vmatprep.subr.bf16.mxu0 %v20941_v9  ;;  %v20983_v6 = vld [vmem:[#allocation13 + $0x2694] ss:$36 sps:$4 sm:$0xff]  }
 0x5f3   :  { %12835 = vmatprep.subr.bf16.mxu1 %v20944_v10  ;;  %v20986_v8 = vld [vmem:[#allocation13 + $0x2b14] ss:$36 sps:$4 sm:$0xff]  }
 0x5f4   :  { %v20981_v9 = vld [vmem:[#allocation13 + $0x2690] ss:$36 sps:$4 sm:$0xff]  }
 0x5f5   :  { %12795 = vmatpush1.bf16.msra.mxu0 %v20939_v25  ;;  %v20984_v10 = vld [vmem:[#allocation13 + $0x2b10] ss:$36 sps:$4 sm:$0xff]  }
 0x5f6   :  { %12836 = vmatpush1.bf16.msra.mxu1 %v20942_v48  ;;  %12796 = vmatprep.subr.bf16.mxu0 %v20947_v12  ;;  %v20989_v25 = vld [vmem:[#allocation13 + $0x264c] ss:$36 sps:$4 sm:$0xff]  }
 0x5f7   :  { %12837 = vmatprep.subr.bf16.mxu1 %v20950_v29  ;;  %v20992_v48 = vld [vmem:[#allocation13 + $0x2acc] ss:$36 sps:$4 sm:$0xff]  }
 0x5f8   :  { %v20987_v12 = vld [vmem:[#allocation13 + $0x2648] ss:$36 sps:$4 sm:$0xff]  }
 0x5f9   :  { %12797 = vmatpush2.bf16.msra.mxu0 %v20945_v13  ;;  %v20990_v29 = vld [vmem:[#allocation13 + $0x2ac8] ss:$36 sps:$4 sm:$0xff]  }
 0x5fa   :  { %12838 = vmatpush2.bf16.msra.mxu1 %v20948_v18  ;;  %12798 = vmatprep.subr.bf16.mxu0 %v20953_v35  ;;  %v20995_v13 = vld [vmem:[#allocation13 + $0x20c] ss:$36 sps:$4 sm:$0xff]  }
 0x5fb   :  { %12839 = vmatprep.subr.bf16.mxu1 %v20956_v20  ;;  %v20998_v18 = vld [vmem:[#allocation13 + $0x68c] ss:$36 sps:$4 sm:$0xff]  }
 0x5fc   :  { %v20993_v35 = vld [vmem:[#allocation13 + $0x208] ss:$36 sps:$4 sm:$0xff]  }
 0x5fd   :  { %12799 = vmatpush2.bf16.msra.mxu0 %v20951_v21  ;;  %v20996_v20 = vld [vmem:[#allocation13 + $0x688] ss:$36 sps:$4 sm:$0xff]  }
 0x5fe   :  { %12840 = vmatpush2.bf16.msra.mxu1 %v20954_v53  ;;  %12800 = vmatprep.subr.bf16.mxu0 %v20959_v60  ;;  %v21001_v21 = vld [vmem:[#allocation13 + $0x1c4] ss:$36 sps:$4 sm:$0xff]  }
 0x5ff   :  { %12841 = vmatprep.subr.bf16.mxu1 %v20962_v37  ;;  %v21004_v60 = vld [vmem:[#allocation13 + $0x644] ss:$36 sps:$4 sm:$0xff]  }
 0x601   :  { %12801 = vmatpush2.bf16.msra.mxu0 %v20957_v47 }
 0x602   :  { %12842 = vmatpush2.bf16.msra.mxu1 %v20960_v44  ;;  %12802 = vmatprep.subr.bf16.mxu0 %v20965_v55  ;;  %v20999_v44 = vld [vmem:[#allocation13 + $0x1c0] ss:$36 sps:$4 sm:$0xff]  }
 0x603   :  { %12843 = vmatprep.subr.bf16.mxu1 %v20968_v40  ;;  %v21002_v40 = vld [vmem:[#allocation13 + $0x640] ss:$36 sps:$4 sm:$0xff]  }
 0x605   :  { %12803 = vmatpush2.bf16.msra.mxu0 %v20963_v58  ;;  %v21007_v58 = vld [vmem:[#allocation13 + $0x17c] ss:$36 sps:$4 sm:$0xff]  }
 0x606   :  { %12844 = vmatpush2.bf16.msra.mxu1 %v20966_v16  ;;  %12804 = vmatprep.subr.bf16.mxu0 %v20971_v61 }
 0x607   :  { %12845 = vmatprep.subr.bf16.mxu1 %v20974_v62 }
 0x609   :  { %12805 = vmatpush2.bf16.msra.mxu0 %v20969_v59 }
 0x60a   :  { %12846 = vmatpush2.bf16.msra.mxu1 %v20972_v1  ;;  %12806 = vmatprep.subr.bf16.mxu0 %v20977_v34 }
 0x60b   :  { %12847 = vmatprep.subr.bf16.mxu1 %v20980_v2  ;;  %v21005_v2 = vld [vmem:[#allocation13 + $0x178] ss:$36 sps:$4 sm:$0xff]  }
 0x60d   :  { %12807 = vmatpush2.bf16.msra.mxu0 %v20975_v57 }
 0x60e   :  { %12848 = vmatpush2.bf16.msra.mxu1 %v20978_v28  ;;  %12808 = vmatprep.subr.bf16.mxu0 %v20983_v6  ;;  %v21008_v28 = vld [vmem:[#allocation13 + $0x5f8] ss:$36 sps:$4 sm:$0xff]  }
 0x60f   :  { %12849 = vmatprep.subr.bf16.mxu1 %v20986_v8  ;;  %v21013_v6 = vld [vmem:[#allocation13 + $0x134] ss:$36 sps:$4 sm:$0xff]  }
 0x611   :  { %12809 = vmatpush2.bf16.msra.mxu0 %v20981_v9  ;;  %v21016_v9 = vld [vmem:[#allocation13 + $0x5b4] ss:$36 sps:$4 sm:$0xff]  }
 0x612   :  { %12850 = vmatpush2.bf16.msra.mxu1 %v20984_v10  ;;  %12810 = vmatprep.subr.bf16.mxu0 %v20989_v25  ;;  %v21014_v10 = vld [vmem:[#allocation13 + $0x5b0] ss:$36 sps:$4 sm:$0xff]  }
 0x613   :  { %12851 = vmatprep.subr.bf16.mxu1 %v20992_v48  ;;  %v21019_v25 = vld [vmem:[#allocation13 + $0xec] ss:$36 sps:$4 sm:$0xff]  }
 0x614   :  { %v21022_v48 = vld [vmem:[#allocation13 + $0x56c] ss:$36 sps:$4 sm:$0xff]  }
 0x615   :  { %12811 = vmatpush2.bf16.msra.mxu0 %v20987_v12  ;;  %v21017_v12 = vld [vmem:[#allocation13 + $0xe8] ss:$36 sps:$4 sm:$0xff]  }
 0x616   :  { %12852 = vmatpush2.bf16.msra.mxu1 %v20990_v29  ;;  %12862 = vmatprep.subr.bf16.mxu0 %v20995_v13  ;;  %v21020_v29 = vld [vmem:[#allocation13 + $0x568] ss:$36 sps:$4 sm:$0xff]  }
 0x617   :  { %12903 = vmatprep.subr.bf16.mxu1 %v20998_v18  ;;  %v21025_v13 = vld [vmem:[#allocation13 + $0xa4] ss:$36 sps:$4 sm:$0xff]  }
 0x618   :  { %v12568_v53 = vpop.f32.mrf.mxu0  ;;  %12813 = vmatmul.mubr.bf16.vlgmr.msra.gmra.mxu0 %v23437_v45  ;;  %v21028_v18 = vld [vmem:[#allocation13 + $0x524] ss:$36 sps:$4 sm:$0xff]  }
 0x619   :  { %v12569_v37 = vadd.f32 %v12568_v53, %v23486_v32  ;;  %v12609_v47 = vpop.f32.mrf.mxu1  ;;  %12854 = vmatmul.mubr.bf16.vlgmr.msra.gmra.mxu1 %v23439_v52  ;;  %12863 = vmatpush1.bf16.msra.mxu0 %v20993_v35  ;;  %v21010_v32 = vld [vmem:[#allocation13 + $0x5fc] ss:$36 sps:$4 sm:$0xff]  }
 0x61a   :  { %12894 = vmatprep.mubr.bf16.mxu0 %v23274_v24  ;;  %12904 = vmatpush1.bf16.msra.mxu1 %v20996_v20  ;;  %v12570_v55 = vpop.f32.mrf.mxu0  ;;  %v21023_v35 = vld [vmem:[#allocation13 + $0xa0] ss:$36 sps:$4 sm:$0xff]  }
 0x61b   :  { %v23495_v16 = vadd.f32 %v12609_v47, %v12569_v37  ;;  %12935 = vmatprep.mubr.bf16.mxu1 %v23281_v50  ;;  %v12571_v61 = vadd.f32 %v12570_v55, %v23489_v36  ;;  %v12611_v62 = vpop.f32.mrf.mxu1  ;;  %12864 = vmatprep.subr.bf16.mxu0 %v21001_v21  ;;  %v21011_v36 = vld [vmem:[#allocation13 + $0x130] ss:$36 sps:$4 sm:$0xff]   ;;  %v21026_v20 = vld [vmem:[#allocation13 + $0x520] ss:$36 sps:$4 sm:$0xff]   ;;  %v21032_v37 = vld [vmem:[#allocation13 + $0x4d8] ss:$36 sps:$4 sm:$0xff]  }
 0x61c   :  { %v12572_v59 = vpop.f32.mrf.mxu0  ;;  %12905 = vmatprep.subr.bf16.mxu1 %v21004_v60  ;;  %v21031_v21 = vld [vmem:[#allocation13 + $0x5c] ss:$36 sps:$4 sm:$0xff]   ;;  %v21037_v47 = vld [vmem:[#allocation13 + $0x14] ss:$36 sps:$4 sm:$0xff]  }
 0x61d   :  { %v23499_v1 = vadd.f32 %v12611_v62, %v12571_v61  ;;  %v12613_v34 = vpop.f32.mrf.mxu1  ;;  %12865 = vmatpush1.bf16.msra.mxu0 %v20999_v44  ;;  %v21034_v53 = vld [vmem:[#allocation13 + $0x4dc] ss:$36 sps:$4 sm:$0xff]   ;;  %v21040_v44 = vld [vmem:[#allocation13 + $0x494] ss:$36 sps:$4 sm:$0xff]   ;;  %v21046_v61 = vld [vmem:[#allocation13 + $0x8cc] ss:$36 sps:$4 sm:$0xff]  }
 0x61e   :  { %12906 = vmatpush1.bf16.msra.mxu1 %v21002_v40  ;;  %v12573_v57 = vpop.f32.mrf.mxu0  ;;  %12866 = vmatprep.subr.bf16.mxu0 %v21007_v58  ;;  %v21029_v60 = vld [vmem:[#allocation13 + $0x58] ss:$36 sps:$4 sm:$0xff]   ;;  %v21035_v55 = vld [vmem:[#allocation13 + $0x10] ss:$36 sps:$4 sm:$0xff]   ;;  %v21041_v62 = vld [vmem:[#allocation13 + $0x448] ss:$36 sps:$4 sm:$0xff]  }
 0x61f   :  { %v12614_v8 = vpop.f32.mrf.mxu1  ;;  %12907 = vmatprep.subr.bf16.mxu1 %v21010_v32  ;;  %v21038_v40 = vld [vmem:[#allocation13 + $0x490] ss:$36 sps:$4 sm:$0xff]   ;;  %v21044_v32 = vld [vmem:[#allocation13 + $0x8c8] ss:$36 sps:$4 sm:$0xff]   ;;  %v21050_v57 = vld [vmem:[#allocation13 + $0x880] ss:$36 sps:$4 sm:$0xff]  }
 0x620   :  { %v21043_v58 = vld [vmem:[#allocation13 + $0x44c] ss:$36 sps:$4 sm:$0xff]   ;;  %v21049_v59 = vld [vmem:[#allocation13 + $0x404] ss:$36 sps:$4 sm:$0xff]   ;;  %v21053_v8 = vld [vmem:[#allocation13 + $0x3b8] ss:$36 sps:$4 sm:$0xff]  }
 0x621   :  { %12867 = vmatpush1.bf16.msra.mxu0 %v21005_v2  ;;  %v21052_v34 = vld [vmem:[#allocation13 + $0x884] ss:$36 sps:$4 sm:$0xff]  }
 0x622   :  { %12908 = vmatpush1.bf16.msra.mxu1 %v21008_v28  ;;  %12868 = vmatprep.subr.bf16.mxu0 %v21013_v6  ;;  %v21047_v2 = vld [vmem:[#allocation13 + $0x400] ss:$36 sps:$4 sm:$0xff]  }
 0x623   :  { %12909 = vmatprep.subr.bf16.mxu1 %v21016_v9  ;;  %v21055_v28 = vld [vmem:[#allocation13 + $0x3bc] ss:$36 sps:$4 sm:$0xff]  }
 0x624   :  { %v21058_v6 = vld [vmem:[#allocation13 + $0x83c] ss:$36 sps:$4 sm:$0xff]  }
 0x625   :  { %12869 = vmatpush1.bf16.msra.mxu0 %v21011_v36  ;;  %v21056_v9 = vld [vmem:[#allocation13 + $0x838] ss:$36 sps:$4 sm:$0xff]  }
 0x626   :  { %12910 = vmatpush1.bf16.msra.mxu1 %v21014_v10  ;;  %12870 = vmatprep.subr.bf16.mxu0 %v21019_v25  ;;  %v21061_v36 = vld [vmem:[#allocation13 + $0x374] ss:$36 sps:$4 sm:$0xff]  }
 0x627   :  { %12911 = vmatprep.subr.bf16.mxu1 %v21022_v48  ;;  %v21064_v10 = vld [vmem:[#allocation13 + $0x7f4] ss:$36 sps:$4 sm:$0xff]  }
 0x628   :  { %v21059_v25 = vld [vmem:[#allocation13 + $0x370] ss:$36 sps:$4 sm:$0xff]  }
 0x629   :  { %12871 = vmatpush1.bf16.msra.mxu0 %v21017_v12  ;;  %v21062_v48 = vld [vmem:[#allocation13 + $0x7f0] ss:$36 sps:$4 sm:$0xff]  }
 0x62a   :  { %12912 = vmatpush1.bf16.msra.mxu1 %v21020_v29  ;;  %12872 = vmatprep.subr.bf16.mxu0 %v21025_v13  ;;  %v21067_v12 = vld [vmem:[#allocation13 + $0x32c] ss:$36 sps:$4 sm:$0xff]  }
 0x62b   :  { %12913 = vmatprep.subr.bf16.mxu1 %v21028_v18  ;;  %v21070_v29 = vld [vmem:[#allocation13 + $0x7ac] ss:$36 sps:$4 sm:$0xff]  }
 0x62c   :  { %v21065_v13 = vld [vmem:[#allocation13 + $0x328] ss:$36 sps:$4 sm:$0xff]  }
 0x62d   :  { %12873 = vmatpush1.bf16.msra.mxu0 %v21023_v35  ;;  %v21068_v18 = vld [vmem:[#allocation13 + $0x7a8] ss:$36 sps:$4 sm:$0xff]  }
 0x62e   :  { %12914 = vmatpush1.bf16.msra.mxu1 %v21026_v20  ;;  %12874 = vmatprep.subr.bf16.mxu0 %v21031_v21  ;;  %v21073_v35 = vld [vmem:[#allocation13 + $0x2e4] ss:$36 sps:$4 sm:$0xff]  }
 0x62f   :  { %12915 = vmatprep.subr.bf16.mxu1 %v21034_v53  ;;  %v21076_v20 = vld [vmem:[#allocation13 + $0x764] ss:$36 sps:$4 sm:$0xff]  }
 0x630   :  { %v21071_v21 = vld [vmem:[#allocation13 + $0x2e0] ss:$36 sps:$4 sm:$0xff]  }
 0x631   :  { %12875 = vmatpush1.bf16.msra.mxu0 %v21029_v60  ;;  %v21074_v53 = vld [vmem:[#allocation13 + $0x760] ss:$36 sps:$4 sm:$0xff]  }
 0x632   :  { %12916 = vmatpush1.bf16.msra.mxu1 %v21032_v37  ;;  %12876 = vmatprep.subr.bf16.mxu0 %v21037_v47  ;;  %v21079_v60 = vld [vmem:[#allocation13 + $0x29c] ss:$36 sps:$4 sm:$0xff]  }
 0x633   :  { %12917 = vmatprep.subr.bf16.mxu1 %v21040_v44  ;;  %v21082_v37 = vld [vmem:[#allocation13 + $0x71c] ss:$36 sps:$4 sm:$0xff]  }
 0x634   :  { %v21077_v47 = vld [vmem:[#allocation13 + $0x298] ss:$36 sps:$4 sm:$0xff]  }
 0x635   :  { %12877 = vmatpush1.bf16.msra.mxu0 %v21035_v55  ;;  %v21080_v44 = vld [vmem:[#allocation13 + $0x718] ss:$36 sps:$4 sm:$0xff]  }
 0x636   :  { %12918 = vmatpush1.bf16.msra.mxu1 %v21038_v40  ;;  %12878 = vmatprep.subr.bf16.mxu0 %v21043_v58  ;;  %v21085_v55 = vld [vmem:[#allocation13 + $0x254] ss:$36 sps:$4 sm:$0xff]  }
 0x637   :  { %12919 = vmatprep.subr.bf16.mxu1 %v21046_v61  ;;  %v21088_v40 = vld [vmem:[#allocation13 + $0x6d4] ss:$36 sps:$4 sm:$0xff]  }
 0x638   :  { %v21083_v58 = vld [vmem:[#allocation13 + $0x250] ss:$36 sps:$4 sm:$0xff]  }
 0x639   :  { %12879 = vmatpush2.bf16.msra.mxu0 %v21041_v62  ;;  %v21086_v61 = vld [vmem:[#allocation13 + $0x6d0] ss:$36 sps:$4 sm:$0xff]  }
 0x63a   :  { %12920 = vmatpush2.bf16.msra.mxu1 %v21044_v32  ;;  %12880 = vmatprep.subr.bf16.mxu0 %v21049_v59  ;;  %v21091_v62 = vld [vmem:[#allocation13 + $0xb0c] ss:$36 sps:$4 sm:$0xff]  }
 0x63b   :  { %12921 = vmatprep.subr.bf16.mxu1 %v21052_v34  ;;  %v21094_v32 = vld [vmem:[#allocation13 + $0xf8c] ss:$36 sps:$4 sm:$0xff]  }
 0x63c   :  { %v21089_v59 = vld [vmem:[#allocation13 + $0xb08] ss:$36 sps:$4 sm:$0xff]  }
 0x63d   :  { %12881 = vmatpush2.bf16.msra.mxu0 %v21047_v2  ;;  %v21092_v34 = vld [vmem:[#allocation13 + $0xf88] ss:$36 sps:$4 sm:$0xff]  }
 0x63e   :  { %12922 = vmatpush2.bf16.msra.mxu1 %v21050_v57  ;;  %12882 = vmatprep.subr.bf16.mxu0 %v21055_v28  ;;  %v21097_v2 = vld [vmem:[#allocation13 + $0xac4] ss:$36 sps:$4 sm:$0xff]  }
 0x63f   :  { %12923 = vmatprep.subr.bf16.mxu1 %v21058_v6  ;;  %v21100_v28 = vld [vmem:[#allocation13 + $0xf44] ss:$36 sps:$4 sm:$0xff]  }
 0x641   :  { %12883 = vmatpush2.bf16.msra.mxu0 %v21053_v8 }
 0x642   :  { %12924 = vmatpush2.bf16.msra.mxu1 %v21056_v9  ;;  %12884 = vmatprep.subr.bf16.mxu0 %v21061_v36  ;;  %v21095_v9 = vld [vmem:[#allocation13 + $0xac0] ss:$36 sps:$4 sm:$0xff]  }
 0x643   :  { %12925 = vmatprep.subr.bf16.mxu1 %v21064_v10  ;;  %v21098_v10 = vld [vmem:[#allocation13 + $0xf40] ss:$36 sps:$4 sm:$0xff]  }
 0x645   :  { %12885 = vmatpush2.bf16.msra.mxu0 %v21059_v25  ;;  %v21103_v25 = vld [vmem:[#allocation13 + $0xa7c] ss:$36 sps:$4 sm:$0xff]  }
 0x646   :  { %12926 = vmatpush2.bf16.msra.mxu1 %v21062_v48  ;;  %12886 = vmatprep.subr.bf16.mxu0 %v21067_v12 }
 0x647   :  { %12927 = vmatprep.subr.bf16.mxu1 %v21070_v29 }
 0x649   :  { %12887 = vmatpush2.bf16.msra.mxu0 %v21065_v13 }
 0x64a   :  { %12928 = vmatpush2.bf16.msra.mxu1 %v21068_v18  ;;  %12888 = vmatprep.subr.bf16.mxu0 %v21073_v35 }
 0x64b   :  { %12929 = vmatprep.subr.bf16.mxu1 %v21076_v20  ;;  %v21101_v20 = vld [vmem:[#allocation13 + $0xa78] ss:$36 sps:$4 sm:$0xff]  }
 0x64d   :  { %12889 = vmatpush2.bf16.msra.mxu0 %v21071_v21 }
 0x64e   :  { %12930 = vmatpush2.bf16.msra.mxu1 %v21074_v53  ;;  %12890 = vmatprep.subr.bf16.mxu0 %v21079_v60  ;;  %v21104_v53 = vld [vmem:[#allocation13 + $0xef8] ss:$36 sps:$4 sm:$0xff]  }
 0x64f   :  { %12931 = vmatprep.subr.bf16.mxu1 %v21082_v37  ;;  %v21109_v60 = vld [vmem:[#allocation13 + $0xa34] ss:$36 sps:$4 sm:$0xff]  }
 0x651   :  { %12891 = vmatpush2.bf16.msra.mxu0 %v21077_v47  ;;  %v21112_v47 = vld [vmem:[#allocation13 + $0xeb4] ss:$36 sps:$4 sm:$0xff]  }
 0x652   :  { %12932 = vmatpush2.bf16.msra.mxu1 %v21080_v44  ;;  %12892 = vmatprep.subr.bf16.mxu0 %v21085_v55  ;;  %v21110_v44 = vld [vmem:[#allocation13 + $0xeb0] ss:$36 sps:$4 sm:$0xff]  }
 0x653   :  { %12933 = vmatprep.subr.bf16.mxu1 %v21088_v40  ;;  %v21115_v55 = vld [vmem:[#allocation13 + $0x9ec] ss:$36 sps:$4 sm:$0xff]  }
 0x654   :  { %v21118_v40 = vld [vmem:[#allocation13 + $0xe6c] ss:$36 sps:$4 sm:$0xff]  }
 0x655   :  { %12893 = vmatpush2.bf16.msra.mxu0 %v21083_v58  ;;  %v21113_v58 = vld [vmem:[#allocation13 + $0x9e8] ss:$36 sps:$4 sm:$0xff]  }
 0x656   :  { %12934 = vmatpush2.bf16.msra.mxu1 %v21086_v61  ;;  %12944 = vmatprep.subr.bf16.mxu0 %v21091_v62  ;;  %v21116_v61 = vld [vmem:[#allocation13 + $0xe68] ss:$36 sps:$4 sm:$0xff]  }
 0x657   :  { %12985 = vmatprep.subr.bf16.mxu1 %v21094_v32  ;;  %v21121_v62 = vld [vmem:[#allocation13 + $0x9a4] ss:$36 sps:$4 sm:$0xff]  }
 0x658   :  { %v12650_v57 = vpop.f32.mrf.mxu0  ;;  %12895 = vmatmul.mubr.bf16.vlgmr.msra.gmra.mxu0 %v23311_v22  ;;  %v21124_v32 = vld [vmem:[#allocation13 + $0xe24] ss:$36 sps:$4 sm:$0xff]  }
 0x659   :  { %v12651_v6 = vadd.f32 %v12650_v57, %v23495_v16  ;;  %v12691_v8 = vpop.f32.mrf.mxu1  ;;  %12936 = vmatmul.mubr.bf16.vlgmr.msra.gmra.mxu1 %v23313_v23  ;;  %12945 = vmatpush1.bf16.msra.mxu0 %v21089_v59  ;;  %v21106_v16 = vld [vmem:[#allocation13 + $0xefc] ss:$36 sps:$4 sm:$0xff]  }
 0x65a   :  { %12976 = vmatprep.mubr.bf16.mxu0 %v23315_v27  ;;  %12986 = vmatpush1.bf16.msra.mxu1 %v21092_v34  ;;  %v12652_v36 = vpop.f32.mrf.mxu0  ;;  %v21119_v59 = vld [vmem:[#allocation13 + $0x9a0] ss:$36 sps:$4 sm:$0xff]  }
 0x65b   :  { %v23505_v48 = vadd.f32 %v12691_v8, %v12651_v6  ;;  %13017 = vmatprep.mubr.bf16.mxu1 %v23320_v31  ;;  %v12653_v12 = vadd.f32 %v12652_v36, %v23499_v1  ;;  %v12693_v29 = vpop.f32.mrf.mxu1  ;;  %12946 = vmatprep.subr.bf16.mxu0 %v21097_v2  ;;  %v21107_v1 = vld [vmem:[#allocation13 + $0xa30] ss:$36 sps:$4 sm:$0xff]   ;;  %v21122_v34 = vld [vmem:[#allocation13 + $0xe20] ss:$36 sps:$4 sm:$0xff]   ;;  %v21128_v6 = vld [vmem:[#allocation13 + $0xdd8] ss:$36 sps:$4 sm:$0xff]  }
 0x65c   :  { %v12654_v13 = vpop.f32.mrf.mxu0  ;;  %12987 = vmatprep.subr.bf16.mxu1 %v21100_v28  ;;  %v21127_v2 = vld [vmem:[#allocation13 + $0x95c] ss:$36 sps:$4 sm:$0xff]   ;;  %v21133_v8 = vld [vmem:[#allocation13 + $0x914] ss:$36 sps:$4 sm:$0xff]  }
 0x65d   :  { %v23509_v18 = vadd.f32 %v12693_v29, %v12653_v12  ;;  %v12695_v35 = vpop.f32.mrf.mxu1  ;;  %12947 = vmatpush1.bf16.msra.mxu0 %v21095_v9  ;;  %v21130_v57 = vld [vmem:[#allocation13 + $0xddc] ss:$36 sps:$4 sm:$0xff]   ;;  %v21136_v9 = vld [vmem:[#allocation13 + $0xd94] ss:$36 sps:$4 sm:$0xff]   ;;  %v21142_v12 = vld [vmem:[#allocation13 + $0x11cc] ss:$36 sps:$4 sm:$0xff]  }
 0x65e   :  { %12988 = vmatpush1.bf16.msra.mxu1 %v21098_v10  ;;  %v12655_v21 = vpop.f32.mrf.mxu0  ;;  %12948 = vmatprep.subr.bf16.mxu0 %v21103_v25  ;;  %v21125_v28 = vld [vmem:[#allocation13 + $0x958] ss:$36 sps:$4 sm:$0xff]   ;;  %v21131_v36 = vld [vmem:[#allocation13 + $0x910] ss:$36 sps:$4 sm:$0xff]   ;;  %v21137_v29 = vld [vmem:[#allocation13 + $0xd48] ss:$36 sps:$4 sm:$0xff]  }
 0x65f   :  { %v12696_v37 = vpop.f32.mrf.mxu1  ;;  %12989 = vmatprep.subr.bf16.mxu1 %v21106_v16  ;;  %v21134_v10 = vld [vmem:[#allocation13 + $0xd90] ss:$36 sps:$4 sm:$0xff]   ;;  %v21140_v16 = vld [vmem:[#allocation13 + $0x11c8] ss:$36 sps:$4 sm:$0xff]   ;;  %v21146_v21 = vld [vmem:[#allocation13 + $0x1180] ss:$36 sps:$4 sm:$0xff]  }
 0x660   :  { %v21139_v25 = vld [vmem:[#allocation13 + $0xd4c] ss:$36 sps:$4 sm:$0xff]   ;;  %v21145_v13 = vld [vmem:[#allocation13 + $0xd04] ss:$36 sps:$4 sm:$0xff]   ;;  %v21149_v37 = vld [vmem:[#allocation13 + $0xcb8] ss:$36 sps:$4 sm:$0xff]  }
 0x661   :  { %12949 = vmatpush1.bf16.msra.mxu0 %v21101_v20  ;;  %v21148_v35 = vld [vmem:[#allocation13 + $0x1184] ss:$36 sps:$4 sm:$0xff]  }
 0x662   :  { %12990 = vmatpush1.bf16.msra.mxu1 %v21104_v53  ;;  %12950 = vmatprep.subr.bf16.mxu0 %v21109_v60  ;;  %v21143_v20 = vld [vmem:[#allocation13 + $0xd00] ss:$36 sps:$4 sm:$0xff]  }
 0x663   :  { %12991 = vmatprep.subr.bf16.mxu1 %v21112_v47  ;;  %v21151_v53 = vld [vmem:[#allocation13 + $0xcbc] ss:$36 sps:$4 sm:$0xff]  }
 0x664   :  { %v21154_v60 = vld [vmem:[#allocation13 + $0x113c] ss:$36 sps:$4 sm:$0xff]  }
 0x665   :  { %12951 = vmatpush1.bf16.msra.mxu0 %v21107_v1  ;;  %v21152_v47 = vld [vmem:[#allocation13 + $0x1138] ss:$36 sps:$4 sm:$0xff]  }
 0x666   :  { %12992 = vmatpush1.bf16.msra.mxu1 %v21110_v44  ;;  %12952 = vmatprep.subr.bf16.mxu0 %v21115_v55  ;;  %v21157_v1 = vld [vmem:[#allocation13 + $0xc74] ss:$36 sps:$4 sm:$0xff]  }
 0x667   :  { %12993 = vmatprep.subr.bf16.mxu1 %v21118_v40  ;;  %v21160_v44 = vld [vmem:[#allocation13 + $0x10f4] ss:$36 sps:$4 sm:$0xff]  }
 0x668   :  { %v21155_v55 = vld [vmem:[#allocation13 + $0xc70] ss:$36 sps:$4 sm:$0xff]  }
 0x669   :  { %12953 = vmatpush1.bf16.msra.mxu0 %v21113_v58  ;;  %v21158_v40 = vld [vmem:[#allocation13 + $0x10f0] ss:$36 sps:$4 sm:$0xff]  }
 0x66a   :  { %12994 = vmatpush1.bf16.msra.mxu1 %v21116_v61  ;;  %12954 = vmatprep.subr.bf16.mxu0 %v21121_v62  ;;  %v21163_v58 = vld [vmem:[#allocation13 + $0xc2c] ss:$36 sps:$4 sm:$0xff]  }
 0x66b   :  { %12995 = vmatprep.subr.bf16.mxu1 %v21124_v32  ;;  %v21166_v61 = vld [vmem:[#allocation13 + $0x10ac] ss:$36 sps:$4 sm:$0xff]  }
 0x66c   :  { %v21161_v62 = vld [vmem:[#allocation13 + $0xc28] ss:$36 sps:$4 sm:$0xff]  }
 0x66d   :  { %12955 = vmatpush1.bf16.msra.mxu0 %v21119_v59  ;;  %v21164_v32 = vld [vmem:[#allocation13 + $0x10a8] ss:$36 sps:$4 sm:$0xff]  }
 0x66e   :  { %12996 = vmatpush1.bf16.msra.mxu1 %v21122_v34  ;;  %12956 = vmatprep.subr.bf16.mxu0 %v21127_v2  ;;  %v21169_v59 = vld [vmem:[#allocation13 + $0xbe4] ss:$36 sps:$4 sm:$0xff]  }
 0x66f   :  { %12997 = vmatprep.subr.bf16.mxu1 %v21130_v57  ;;  %v21172_v34 = vld [vmem:[#allocation13 + $0x1064] ss:$36 sps:$4 sm:$0xff]  }
 0x670   :  { %v21167_v2 = vld [vmem:[#allocation13 + $0xbe0] ss:$36 sps:$4 sm:$0xff]  }
 0x671   :  { %12957 = vmatpush1.bf16.msra.mxu0 %v21125_v28  ;;  %v21170_v57 = vld [vmem:[#allocation13 + $0x1060] ss:$36 sps:$4 sm:$0xff]  }
 0x672   :  { %12998 = vmatpush1.bf16.msra.mxu1 %v21128_v6  ;;  %12958 = vmatprep.subr.bf16.mxu0 %v21133_v8  ;;  %v21175_v28 = vld [vmem:[#allocation13 + $0xb9c] ss:$36 sps:$4 sm:$0xff]  }
 0x673   :  { %12999 = vmatprep.subr.bf16.mxu1 %v21136_v9  ;;  %v21178_v6 = vld [vmem:[#allocation13 + $0x101c] ss:$36 sps:$4 sm:$0xff]  }
 0x674   :  { %v21173_v8 = vld [vmem:[#allocation13 + $0xb98] ss:$36 sps:$4 sm:$0xff]  }
 0x675   :  { %12959 = vmatpush1.bf16.msra.mxu0 %v21131_v36  ;;  %v21176_v9 = vld [vmem:[#allocation13 + $0x1018] ss:$36 sps:$4 sm:$0xff]  }
 0x676   :  { %13000 = vmatpush1.bf16.msra.mxu1 %v21134_v10  ;;  %12960 = vmatprep.subr.bf16.mxu0 %v21139_v25  ;;  %v21181_v36 = vld [vmem:[#allocation13 + $0xb54] ss:$36 sps:$4 sm:$0xff]  }
 0x677   :  { %13001 = vmatprep.subr.bf16.mxu1 %v21142_v12  ;;  %v21184_v10 = vld [vmem:[#allocation13 + $0xfd4] ss:$36 sps:$4 sm:$0xff]  }
 0x678   :  { %v21179_v25 = vld [vmem:[#allocation13 + $0xb50] ss:$36 sps:$4 sm:$0xff]  }
 0x679   :  { %12961 = vmatpush2.bf16.msra.mxu0 %v21137_v29  ;;  %v21182_v12 = vld [vmem:[#allocation13 + $0xfd0] ss:$36 sps:$4 sm:$0xff]  }
 0x67a   :  { %13002 = vmatpush2.bf16.msra.mxu1 %v21140_v16  ;;  %12962 = vmatprep.subr.bf16.mxu0 %v21145_v13  ;;  %v21187_v29 = vld [vmem:[#allocation13 + $0x140c] ss:$36 sps:$4 sm:$0xff]  }
 0x67b   :  { %13003 = vmatprep.subr.bf16.mxu1 %v21148_v35  ;;  %v21190_v16 = vld [vmem:[#allocation13 + $0x188c] ss:$36 sps:$4 sm:$0xff]  }
 0x67c   :  { %v21185_v13 = vld [vmem:[#allocation13 + $0x1408] ss:$36 sps:$4 sm:$0xff]  }
 0x67d   :  { %12963 = vmatpush2.bf16.msra.mxu0 %v21143_v20  ;;  %v21188_v35 = vld [vmem:[#allocation13 + $0x1888] ss:$36 sps:$4 sm:$0xff]  }
 0x67e   :  { %13004 = vmatpush2.bf16.msra.mxu1 %v21146_v21  ;;  %12964 = vmatprep.subr.bf16.mxu0 %v21151_v53  ;;  %v21193_v20 = vld [vmem:[#allocation13 + $0x13c4] ss:$36 sps:$4 sm:$0xff]  }
 0x67f   :  { %13005 = vmatprep.subr.bf16.mxu1 %v21154_v60  ;;  %v21196_v53 = vld [vmem:[#allocation13 + $0x1844] ss:$36 sps:$4 sm:$0xff]  }
 0x681   :  { %12965 = vmatpush2.bf16.msra.mxu0 %v21149_v37 }
 0x682   :  { %13006 = vmatpush2.bf16.msra.mxu1 %v21152_v47  ;;  %12966 = vmatprep.subr.bf16.mxu0 %v21157_v1  ;;  %v21191_v47 = vld [vmem:[#allocation13 + $0x13c0] ss:$36 sps:$4 sm:$0xff]  }
 0x683   :  { %13007 = vmatprep.subr.bf16.mxu1 %v21160_v44  ;;  %v21194_v44 = vld [vmem:[#allocation13 + $0x1840] ss:$36 sps:$4 sm:$0xff]  }
 0x685   :  { %12967 = vmatpush2.bf16.msra.mxu0 %v21155_v55  ;;  %v21199_v55 = vld [vmem:[#allocation13 + $0x137c] ss:$36 sps:$4 sm:$0xff]  }
 0x686   :  { %13008 = vmatpush2.bf16.msra.mxu1 %v21158_v40  ;;  %12968 = vmatprep.subr.bf16.mxu0 %v21163_v58 }
 0x687   :  { %13009 = vmatprep.subr.bf16.mxu1 %v21166_v61 }
 0x689   :  { %12969 = vmatpush2.bf16.msra.mxu0 %v21161_v62 }
 0x68a   :  { %13010 = vmatpush2.bf16.msra.mxu1 %v21164_v32  ;;  %12970 = vmatprep.subr.bf16.mxu0 %v21169_v59 }
 0x68b   :  { %13011 = vmatprep.subr.bf16.mxu1 %v21172_v34  ;;  %v21197_v34 = vld [vmem:[#allocation13 + $0x1378] ss:$36 sps:$4 sm:$0xff]  }
 0x68d   :  { %12971 = vmatpush2.bf16.msra.mxu0 %v21167_v2 }
 0x68e   :  { %13012 = vmatpush2.bf16.msra.mxu1 %v21170_v57  ;;  %12972 = vmatprep.subr.bf16.mxu0 %v21175_v28  ;;  %v21200_v57 = vld [vmem:[#allocation13 + $0x17f8] ss:$36 sps:$4 sm:$0xff]  }
 0x68f   :  { %13013 = vmatprep.subr.bf16.mxu1 %v21178_v6  ;;  %v21205_v28 = vld [vmem:[#allocation13 + $0x1334] ss:$36 sps:$4 sm:$0xff]  }
 0x691   :  { %12973 = vmatpush2.bf16.msra.mxu0 %v21173_v8  ;;  %v21208_v8 = vld [vmem:[#allocation13 + $0x17b4] ss:$36 sps:$4 sm:$0xff]  }
 0x692   :  { %13014 = vmatpush2.bf16.msra.mxu1 %v21176_v9  ;;  %12974 = vmatprep.subr.bf16.mxu0 %v21181_v36  ;;  %v21206_v9 = vld [vmem:[#allocation13 + $0x17b0] ss:$36 sps:$4 sm:$0xff]  }
 0x693   :  { %13015 = vmatprep.subr.bf16.mxu1 %v21184_v10  ;;  %v21211_v36 = vld [vmem:[#allocation13 + $0x12ec] ss:$36 sps:$4 sm:$0xff]  }
 0x694   :  { %v21214_v10 = vld [vmem:[#allocation13 + $0x176c] ss:$36 sps:$4 sm:$0xff]  }
 0x695   :  { %12975 = vmatpush2.bf16.msra.mxu0 %v21179_v25  ;;  %v21209_v25 = vld [vmem:[#allocation13 + $0x12e8] ss:$36 sps:$4 sm:$0xff]  }
 0x696   :  { %13016 = vmatpush2.bf16.msra.mxu1 %v21182_v12  ;;  %13026 = vmatprep.subr.bf16.mxu0 %v21187_v29  ;;  %v21212_v12 = vld [vmem:[#allocation13 + $0x1768] ss:$36 sps:$4 sm:$0xff]  }
 0x697   :  { %13067 = vmatprep.subr.bf16.mxu1 %v21190_v16  ;;  %v21217_v29 = vld [vmem:[#allocation13 + $0x12a4] ss:$36 sps:$4 sm:$0xff]  }
 0x698   :  { %v12732_v21 = vpop.f32.mrf.mxu0  ;;  %12977 = vmatmul.mubr.bf16.vlgmr.msra.gmra.mxu0 %v23349_v14  ;;  %v21220_v16 = vld [vmem:[#allocation13 + $0x1724] ss:$36 sps:$4 sm:$0xff]  }
 0x699   :  { %v12733_v60 = vadd.f32 %v12732_v21, %v23505_v48  ;;  %v12773_v37 = vpop.f32.mrf.mxu1  ;;  %13018 = vmatmul.mubr.bf16.vlgmr.msra.gmra.mxu1 %v23351_v19  ;;  %13027 = vmatpush1.bf16.msra.mxu0 %v21185_v13  ;;  %v21202_v48 = vld [vmem:[#allocation13 + $0x17fc] ss:$36 sps:$4 sm:$0xff]  }
 0x69a   :  { %13058 = vmatprep.mubr.bf16.mxu0 %v23353_v15  ;;  %13068 = vmatpush1.bf16.msra.mxu1 %v21188_v35  ;;  %v12734_v1 = vpop.f32.mrf.mxu0  ;;  %v21215_v13 = vld [vmem:[#allocation13 + $0x12a0] ss:$36 sps:$4 sm:$0xff]  }
 0x69b   :  { %v23515_v40 = vadd.f32 %v12773_v37, %v12733_v60  ;;  %13099 = vmatprep.mubr.bf16.mxu1 %v23358_v54  ;;  %v12735_v58 = vadd.f32 %v12734_v1, %v23509_v18  ;;  %v12775_v61 = vpop.f32.mrf.mxu1  ;;  %13028 = vmatprep.subr.bf16.mxu0 %v21193_v20  ;;  %v21203_v18 = vld [vmem:[#allocation13 + $0x1330] ss:$36 sps:$4 sm:$0xff]   ;;  %v21218_v35 = vld [vmem:[#allocation13 + $0x1720] ss:$36 sps:$4 sm:$0xff]   ;;  %v21224_v60 = vld [vmem:[#allocation13 + $0x16d8] ss:$36 sps:$4 sm:$0xff]  }
 0x69c   :  { %v12736_v62 = vpop.f32.mrf.mxu0  ;;  %13069 = vmatprep.subr.bf16.mxu1 %v21196_v53  ;;  %v21223_v20 = vld [vmem:[#allocation13 + $0x125c] ss:$36 sps:$4 sm:$0xff]   ;;  %v21229_v37 = vld [vmem:[#allocation13 + $0x1214] ss:$36 sps:$4 sm:$0xff]  }
 0x69d   :  { %v23519_v32 = vadd.f32 %v12775_v61, %v12735_v58  ;;  %v12777_v59 = vpop.f32.mrf.mxu1  ;;  %13029 = vmatpush1.bf16.msra.mxu0 %v21191_v47  ;;  %v21226_v21 = vld [vmem:[#allocation13 + $0x16dc] ss:$36 sps:$4 sm:$0xff]   ;;  %v21232_v47 = vld [vmem:[#allocation13 + $0x1694] ss:$36 sps:$4 sm:$0xff]   ;;  %v21238_v58 = vld [vmem:[#allocation13 + $0x1acc] ss:$36 sps:$4 sm:$0xff]  }
 0x69e   :  { %13070 = vmatpush1.bf16.msra.mxu1 %v21194_v44  ;;  %v12737_v2 = vpop.f32.mrf.mxu0  ;;  %13030 = vmatprep.subr.bf16.mxu0 %v21199_v55  ;;  %v21221_v53 = vld [vmem:[#allocation13 + $0x1258] ss:$36 sps:$4 sm:$0xff]   ;;  %v21227_v1 = vld [vmem:[#allocation13 + $0x1210] ss:$36 sps:$4 sm:$0xff]   ;;  %v21233_v61 = vld [vmem:[#allocation13 + $0x1648] ss:$36 sps:$4 sm:$0xff]  }
 0x69f   :  { %v12778_v6 = vpop.f32.mrf.mxu1  ;;  %13071 = vmatprep.subr.bf16.mxu1 %v21202_v48  ;;  %v21230_v44 = vld [vmem:[#allocation13 + $0x1690] ss:$36 sps:$4 sm:$0xff]   ;;  %v21236_v48 = vld [vmem:[#allocation13 + $0x1ac8] ss:$36 sps:$4 sm:$0xff]   ;;  %v21242_v2 = vld [vmem:[#allocation13 + $0x1a80] ss:$36 sps:$4 sm:$0xff]  }
 0x6a0   :  { %v21235_v55 = vld [vmem:[#allocation13 + $0x164c] ss:$36 sps:$4 sm:$0xff]   ;;  %v21241_v62 = vld [vmem:[#allocation13 + $0x1604] ss:$36 sps:$4 sm:$0xff]   ;;  %v21245_v6 = vld [vmem:[#allocation13 + $0x15b8] ss:$36 sps:$4 sm:$0xff]  }
 0x6a1   :  { %13031 = vmatpush1.bf16.msra.mxu0 %v21197_v34  ;;  %v21244_v59 = vld [vmem:[#allocation13 + $0x1a84] ss:$36 sps:$4 sm:$0xff]  }
 0x6a2   :  { %13072 = vmatpush1.bf16.msra.mxu1 %v21200_v57  ;;  %13032 = vmatprep.subr.bf16.mxu0 %v21205_v28  ;;  %v21239_v34 = vld [vmem:[#allocation13 + $0x1600] ss:$36 sps:$4 sm:$0xff]  }
 0x6a3   :  { %13073 = vmatprep.subr.bf16.mxu1 %v21208_v8  ;;  %v21247_v57 = vld [vmem:[#allocation13 + $0x15bc] ss:$36 sps:$4 sm:$0xff]  }
 0x6a4   :  { %v21250_v28 = vld [vmem:[#allocation13 + $0x1a3c] ss:$36 sps:$4 sm:$0xff]  }
 0x6a5   :  { %13033 = vmatpush1.bf16.msra.mxu0 %v21203_v18  ;;  %v21248_v8 = vld [vmem:[#allocation13 + $0x1a38] ss:$36 sps:$4 sm:$0xff]  }
 0x6a6   :  { %13074 = vmatpush1.bf16.msra.mxu1 %v21206_v9  ;;  %13034 = vmatprep.subr.bf16.mxu0 %v21211_v36  ;;  %v21253_v18 = vld [vmem:[#allocation13 + $0x1574] ss:$36 sps:$4 sm:$0xff]  }
 0x6a7   :  { %13075 = vmatprep.subr.bf16.mxu1 %v21214_v10  ;;  %v21256_v9 = vld [vmem:[#allocation13 + $0x19f4] ss:$36 sps:$4 sm:$0xff]  }
 0x6a8   :  { %v21251_v36 = vld [vmem:[#allocation13 + $0x1570] ss:$36 sps:$4 sm:$0xff]  }
 0x6a9   :  { %13035 = vmatpush1.bf16.msra.mxu0 %v21209_v25  ;;  %v21254_v10 = vld [vmem:[#allocation13 + $0x19f0] ss:$36 sps:$4 sm:$0xff]  }
 0x6aa   :  { %13076 = vmatpush1.bf16.msra.mxu1 %v21212_v12  ;;  %13036 = vmatprep.subr.bf16.mxu0 %v21217_v29  ;;  %v21259_v25 = vld [vmem:[#allocation13 + $0x152c] ss:$36 sps:$4 sm:$0xff]  }
 0x6ab   :  { %13077 = vmatprep.subr.bf16.mxu1 %v21220_v16  ;;  %v21262_v12 = vld [vmem:[#allocation13 + $0x19ac] ss:$36 sps:$4 sm:$0xff]  }
 0x6ac   :  { %v21257_v29 = vld [vmem:[#allocation13 + $0x1528] ss:$36 sps:$4 sm:$0xff]  }
 0x6ad   :  { %13037 = vmatpush1.bf16.msra.mxu0 %v21215_v13  ;;  %v21260_v16 = vld [vmem:[#allocation13 + $0x19a8] ss:$36 sps:$4 sm:$0xff]  }
 0x6ae   :  { %13078 = vmatpush1.bf16.msra.mxu1 %v21218_v35  ;;  %13038 = vmatprep.subr.bf16.mxu0 %v21223_v20  ;;  %v21265_v13 = vld [vmem:[#allocation13 + $0x14e4] ss:$36 sps:$4 sm:$0xff]  }
 0x6af   :  { %13079 = vmatprep.subr.bf16.mxu1 %v21226_v21  ;;  %v21268_v35 = vld [vmem:[#allocation13 + $0x1964] ss:$36 sps:$4 sm:$0xff]  }
 0x6b0   :  { %v21263_v20 = vld [vmem:[#allocation13 + $0x14e0] ss:$36 sps:$4 sm:$0xff]  }
 0x6b1   :  { %13039 = vmatpush1.bf16.msra.mxu0 %v21221_v53  ;;  %v21266_v21 = vld [vmem:[#allocation13 + $0x1960] ss:$36 sps:$4 sm:$0xff]  }
 0x6b2   :  { %13080 = vmatpush1.bf16.msra.mxu1 %v21224_v60  ;;  %13040 = vmatprep.subr.bf16.mxu0 %v21229_v37  ;;  %v21271_v53 = vld [vmem:[#allocation13 + $0x149c] ss:$36 sps:$4 sm:$0xff]  }
 0x6b3   :  { %13081 = vmatprep.subr.bf16.mxu1 %v21232_v47  ;;  %v21274_v60 = vld [vmem:[#allocation13 + $0x191c] ss:$36 sps:$4 sm:$0xff]  }
 0x6b4   :  { %v21269_v37 = vld [vmem:[#allocation13 + $0x1498] ss:$36 sps:$4 sm:$0xff]  }
 0x6b5   :  { %13041 = vmatpush1.bf16.msra.mxu0 %v21227_v1  ;;  %v21272_v47 = vld [vmem:[#allocation13 + $0x1918] ss:$36 sps:$4 sm:$0xff]  }
 0x6b6   :  { %13082 = vmatpush1.bf16.msra.mxu1 %v21230_v44  ;;  %13042 = vmatprep.subr.bf16.mxu0 %v21235_v55  ;;  %v21277_v1 = vld [vmem:[#allocation13 + $0x1454] ss:$36 sps:$4 sm:$0xff]  }
 0x6b7   :  { %13083 = vmatprep.subr.bf16.mxu1 %v21238_v58  ;;  %v21280_v44 = vld [vmem:[#allocation13 + $0x18d4] ss:$36 sps:$4 sm:$0xff]  }
 0x6b8   :  { %v21275_v55 = vld [vmem:[#allocation13 + $0x1450] ss:$36 sps:$4 sm:$0xff]  }
 0x6b9   :  { %13043 = vmatpush2.bf16.msra.mxu0 %v21233_v61  ;;  %v21278_v58 = vld [vmem:[#allocation13 + $0x18d0] ss:$36 sps:$4 sm:$0xff]  }
 0x6ba   :  { %13084 = vmatpush2.bf16.msra.mxu1 %v21236_v48  ;;  %13044 = vmatprep.subr.bf16.mxu0 %v21241_v62  ;;  %v21283_v61 = vld [vmem:[#allocation13 + $0x1d0c] ss:$36 sps:$4 sm:$0xff]  }
 0x6bb   :  { %13085 = vmatprep.subr.bf16.mxu1 %v21244_v59  ;;  %v21286_v48 = vld [vmem:[#allocation13 + $0x218c] ss:$36 sps:$4 sm:$0xff]  }
 0x6bc   :  { %v21281_v62 = vld [vmem:[#allocation13 + $0x1d08] ss:$36 sps:$4 sm:$0xff]  }
 0x6bd   :  { %13045 = vmatpush2.bf16.msra.mxu0 %v21239_v34  ;;  %v21284_v59 = vld [vmem:[#allocation13 + $0x2188] ss:$36 sps:$4 sm:$0xff]  }
 0x6be   :  { %13086 = vmatpush2.bf16.msra.mxu1 %v21242_v2  ;;  %13046 = vmatprep.subr.bf16.mxu0 %v21247_v57  ;;  %v21289_v34 = vld [vmem:[#allocation13 + $0x1cc4] ss:$36 sps:$4 sm:$0xff]  }
 0x6bf   :  { %13087 = vmatprep.subr.bf16.mxu1 %v21250_v28  ;;  %v21292_v57 = vld [vmem:[#allocation13 + $0x2144] ss:$36 sps:$4 sm:$0xff]  }
 0x6c1   :  { %13047 = vmatpush2.bf16.msra.mxu0 %v21245_v6 }
 0x6c2   :  { %13088 = vmatpush2.bf16.msra.mxu1 %v21248_v8  ;;  %13048 = vmatprep.subr.bf16.mxu0 %v21253_v18  ;;  %v21287_v8 = vld [vmem:[#allocation13 + $0x1cc0] ss:$36 sps:$4 sm:$0xff]  }
 0x6c3   :  { %13089 = vmatprep.subr.bf16.mxu1 %v21256_v9  ;;  %v21290_v9 = vld [vmem:[#allocation13 + $0x2140] ss:$36 sps:$4 sm:$0xff]  }
 0x6c5   :  { %13049 = vmatpush2.bf16.msra.mxu0 %v21251_v36  ;;  %v21295_v36 = vld [vmem:[#allocation13 + $0x1c7c] ss:$36 sps:$4 sm:$0xff]  }
 0x6c6   :  { %13090 = vmatpush2.bf16.msra.mxu1 %v21254_v10  ;;  %13050 = vmatprep.subr.bf16.mxu0 %v21259_v25 }
 0x6c7   :  { %13091 = vmatprep.subr.bf16.mxu1 %v21262_v12 }
 0x6c9   :  { %13051 = vmatpush2.bf16.msra.mxu0 %v21257_v29 }
 0x6ca   :  { %13092 = vmatpush2.bf16.msra.mxu1 %v21260_v16  ;;  %13052 = vmatprep.subr.bf16.mxu0 %v21265_v13 }
 0x6cb   :  { %13093 = vmatprep.subr.bf16.mxu1 %v21268_v35  ;;  %v21293_v35 = vld [vmem:[#allocation13 + $0x1c78] ss:$36 sps:$4 sm:$0xff]  }
 0x6cd   :  { %13053 = vmatpush2.bf16.msra.mxu0 %v21263_v20 }
 0x6ce   :  { %13094 = vmatpush2.bf16.msra.mxu1 %v21266_v21  ;;  %13054 = vmatprep.subr.bf16.mxu0 %v21271_v53  ;;  %v21296_v21 = vld [vmem:[#allocation13 + $0x20f8] ss:$36 sps:$4 sm:$0xff]  }
 0x6cf   :  { %13095 = vmatprep.subr.bf16.mxu1 %v21274_v60  ;;  %v21301_v53 = vld [vmem:[#allocation13 + $0x1c34] ss:$36 sps:$4 sm:$0xff]  }
 0x6d1   :  { %13055 = vmatpush2.bf16.msra.mxu0 %v21269_v37  ;;  %v21304_v37 = vld [vmem:[#allocation13 + $0x20b4] ss:$36 sps:$4 sm:$0xff]  }
 0x6d2   :  { %13096 = vmatpush2.bf16.msra.mxu1 %v21272_v47  ;;  %13056 = vmatprep.subr.bf16.mxu0 %v21277_v1  ;;  %v21302_v47 = vld [vmem:[#allocation13 + $0x20b0] ss:$36 sps:$4 sm:$0xff]  }
 0x6d3   :  { %13097 = vmatprep.subr.bf16.mxu1 %v21280_v44  ;;  %v21307_v1 = vld [vmem:[#allocation13 + $0x1bec] ss:$36 sps:$4 sm:$0xff]  }
 0x6d4   :  { %v21310_v44 = vld [vmem:[#allocation13 + $0x206c] ss:$36 sps:$4 sm:$0xff]  }
 0x6d5   :  { %13057 = vmatpush2.bf16.msra.mxu0 %v21275_v55  ;;  %v21305_v55 = vld [vmem:[#allocation13 + $0x1be8] ss:$36 sps:$4 sm:$0xff]  }
 0x6d6   :  { %13098 = vmatpush2.bf16.msra.mxu1 %v21278_v58  ;;  %13108 = vmatprep.subr.bf16.mxu0 %v21283_v61  ;;  %v21308_v58 = vld [vmem:[#allocation13 + $0x2068] ss:$36 sps:$4 sm:$0xff]  }
 0x6d7   :  { %13149 = vmatprep.subr.bf16.mxu1 %v21286_v48  ;;  %v21313_v61 = vld [vmem:[#allocation13 + $0x1ba4] ss:$36 sps:$4 sm:$0xff]  }
 0x6d8   :  { %v12814_v2 = vpop.f32.mrf.mxu0  ;;  %13059 = vmatmul.mubr.bf16.vlgmr.msra.gmra.mxu0 %v23381_v30  ;;  %v21316_v48 = vld [vmem:[#allocation13 + $0x2024] ss:$36 sps:$4 sm:$0xff]  }
 0x6d9   :  { %v12815_v28 = vadd.f32 %v12814_v2, %v23515_v40  ;;  %v12855_v6 = vpop.f32.mrf.mxu1  ;;  %13100 = vmatmul.mubr.bf16.vlgmr.msra.gmra.mxu1 %v23383_v56  ;;  %13109 = vmatpush1.bf16.msra.mxu0 %v21281_v62  ;;  %v21298_v40 = vld [vmem:[#allocation13 + $0x20fc] ss:$36 sps:$4 sm:$0xff]  }
 0x6da   :  { %13140 = vmatprep.mubr.bf16.mxu0 %v23385_v33  ;;  %13150 = vmatpush1.bf16.msra.mxu1 %v21284_v59  ;;  %v12816_v18 = vpop.f32.mrf.mxu0  ;;  %v21311_v62 = vld [vmem:[#allocation13 + $0x1ba0] ss:$36 sps:$4 sm:$0xff]  }
 0x6db   :  { %v23525_v10 = vadd.f32 %v12855_v6, %v12815_v28  ;;  %13181 = vmatprep.mubr.bf16.mxu1 %v23390_v46  ;;  %v12817_v25 = vadd.f32 %v12816_v18, %v23519_v32  ;;  %v12857_v12 = vpop.f32.mrf.mxu1  ;;  %13110 = vmatprep.subr.bf16.mxu0 %v21289_v34  ;;  %v21299_v32 = vld [vmem:[#allocation13 + $0x1c30] ss:$36 sps:$4 sm:$0xff]   ;;  %v21314_v59 = vld [vmem:[#allocation13 + $0x2020] ss:$36 sps:$4 sm:$0xff]   ;;  %v21320_v28 = vld [vmem:[#allocation13 + $0x1fd8] ss:$36 sps:$4 sm:$0xff]  }
 0x6dc   :  { %v12818_v29 = vpop.f32.mrf.mxu0  ;;  %13151 = vmatprep.subr.bf16.mxu1 %v21292_v57  ;;  %v21319_v34 = vld [vmem:[#allocation13 + $0x1b5c] ss:$36 sps:$4 sm:$0xff]   ;;  %v21325_v6 = vld [vmem:[#allocation13 + $0x1b14] ss:$36 sps:$4 sm:$0xff]  }
 0x6dd   :  { %v23529_v16 = vadd.f32 %v12857_v12, %v12817_v25  ;;  %v12859_v13 = vpop.f32.mrf.mxu1  ;;  %13111 = vmatpush1.bf16.msra.mxu0 %v21287_v8  ;;  %v21322_v2 = vld [vmem:[#allocation13 + $0x1fdc] ss:$36 sps:$4 sm:$0xff]   ;;  %v21328_v8 = vld [vmem:[#allocation13 + $0x1f94] ss:$36 sps:$4 sm:$0xff]   ;;  %v21334_v25 = vld [vmem:[#allocation13 + $0x23cc] ss:$36 sps:$4 sm:$0xff]  }
 0x6de   :  { %13152 = vmatpush1.bf16.msra.mxu1 %v21290_v9  ;;  %v12819_v20 = vpop.f32.mrf.mxu0  ;;  %13112 = vmatprep.subr.bf16.mxu0 %v21295_v36  ;;  %v21317_v57 = vld [vmem:[#allocation13 + $0x1b58] ss:$36 sps:$4 sm:$0xff]   ;;  %v21323_v18 = vld [vmem:[#allocation13 + $0x1b10] ss:$36 sps:$4 sm:$0xff]   ;;  %v21329_v12 = vld [vmem:[#allocation13 + $0x1f48] ss:$36 sps:$4 sm:$0xff]  }
 0x6df   :  { %v12860_v60 = vpop.f32.mrf.mxu1  ;;  %13153 = vmatprep.subr.bf16.mxu1 %v21298_v40  ;;  %v21326_v9 = vld [vmem:[#allocation13 + $0x1f90] ss:$36 sps:$4 sm:$0xff]   ;;  %v21332_v40 = vld [vmem:[#allocation13 + $0x23c8] ss:$36 sps:$4 sm:$0xff]   ;;  %v21338_v20 = vld [vmem:[#allocation13 + $0x2380] ss:$36 sps:$4 sm:$0xff]  }
 0x6e0   :  { %v21331_v36 = vld [vmem:[#allocation13 + $0x1f4c] ss:$36 sps:$4 sm:$0xff]   ;;  %v21337_v29 = vld [vmem:[#allocation13 + $0x1f04] ss:$36 sps:$4 sm:$0xff]   ;;  %v21341_v60 = vld [vmem:[#allocation13 + $0x1eb8] ss:$36 sps:$4 sm:$0xff]  }
 0x6e1   :  { %13113 = vmatpush1.bf16.msra.mxu0 %v21293_v35  ;;  %v21340_v13 = vld [vmem:[#allocation13 + $0x2384] ss:$36 sps:$4 sm:$0xff]  }
 0x6e2   :  { %13154 = vmatpush1.bf16.msra.mxu1 %v21296_v21  ;;  %13114 = vmatprep.subr.bf16.mxu0 %v21301_v53  ;;  %v21335_v35 = vld [vmem:[#allocation13 + $0x1f00] ss:$36 sps:$4 sm:$0xff]  }
 0x6e3   :  { %13155 = vmatprep.subr.bf16.mxu1 %v21304_v37  ;;  %v21343_v21 = vld [vmem:[#allocation13 + $0x1ebc] ss:$36 sps:$4 sm:$0xff]  }
 0x6e4   :  { %v21346_v53 = vld [vmem:[#allocation13 + $0x233c] ss:$36 sps:$4 sm:$0xff]  }
 0x6e5   :  { %13115 = vmatpush1.bf16.msra.mxu0 %v21299_v32  ;;  %v21344_v37 = vld [vmem:[#allocation13 + $0x2338] ss:$36 sps:$4 sm:$0xff]  }
 0x6e6   :  { %13156 = vmatpush1.bf16.msra.mxu1 %v21302_v47  ;;  %13116 = vmatprep.subr.bf16.mxu0 %v21307_v1  ;;  %v21349_v32 = vld [vmem:[#allocation13 + $0x1e74] ss:$36 sps:$4 sm:$0xff]  }
 0x6e7   :  { %13157 = vmatprep.subr.bf16.mxu1 %v21310_v44  ;;  %v21352_v47 = vld [vmem:[#allocation13 + $0x22f4] ss:$36 sps:$4 sm:$0xff]  }
 0x6e8   :  { %v21347_v1 = vld [vmem:[#allocation13 + $0x1e70] ss:$36 sps:$4 sm:$0xff]  }
 0x6e9   :  { %13117 = vmatpush1.bf16.msra.mxu0 %v21305_v55  ;;  %v21350_v44 = vld [vmem:[#allocation13 + $0x22f0] ss:$36 sps:$4 sm:$0xff]  }
 0x6ea   :  { %13158 = vmatpush1.bf16.msra.mxu1 %v21308_v58  ;;  %13118 = vmatprep.subr.bf16.mxu0 %v21313_v61  ;;  %v21355_v55 = vld [vmem:[#allocation13 + $0x1e2c] ss:$36 sps:$4 sm:$0xff]  }
 0x6eb   :  { %13159 = vmatprep.subr.bf16.mxu1 %v21316_v48  ;;  %v21358_v58 = vld [vmem:[#allocation13 + $0x22ac] ss:$36 sps:$4 sm:$0xff]  }
 0x6ec   :  { %v21353_v61 = vld [vmem:[#allocation13 + $0x1e28] ss:$36 sps:$4 sm:$0xff]  }
 0x6ed   :  { %13119 = vmatpush1.bf16.msra.mxu0 %v21311_v62  ;;  %v21356_v48 = vld [vmem:[#allocation13 + $0x22a8] ss:$36 sps:$4 sm:$0xff]  }
 0x6ee   :  { %13160 = vmatpush1.bf16.msra.mxu1 %v21314_v59  ;;  %13120 = vmatprep.subr.bf16.mxu0 %v21319_v34  ;;  %v21361_v62 = vld [vmem:[#allocation13 + $0x1de4] ss:$36 sps:$4 sm:$0xff]  }
 0x6ef   :  { %13161 = vmatprep.subr.bf16.mxu1 %v21322_v2  ;;  %v21364_v59 = vld [vmem:[#allocation13 + $0x2264] ss:$36 sps:$4 sm:$0xff]  }
 0x6f0   :  { %v21359_v34 = vld [vmem:[#allocation13 + $0x1de0] ss:$36 sps:$4 sm:$0xff]  }
 0x6f1   :  { %13121 = vmatpush1.bf16.msra.mxu0 %v21317_v57  ;;  %v21362_v2 = vld [vmem:[#allocation13 + $0x2260] ss:$36 sps:$4 sm:$0xff]  }
 0x6f2   :  { %13162 = vmatpush1.bf16.msra.mxu1 %v21320_v28  ;;  %13122 = vmatprep.subr.bf16.mxu0 %v21325_v6  ;;  %v21367_v57 = vld [vmem:[#allocation13 + $0x1d9c] ss:$36 sps:$4 sm:$0xff]  }
 0x6f3   :  { %13163 = vmatprep.subr.bf16.mxu1 %v21328_v8  ;;  %v21370_v28 = vld [vmem:[#allocation13 + $0x221c] ss:$36 sps:$4 sm:$0xff]  }
 0x6f4   :  { %v21365_v6 = vld [vmem:[#allocation13 + $0x1d98] ss:$36 sps:$4 sm:$0xff]  }
 0x6f5   :  { %13123 = vmatpush1.bf16.msra.mxu0 %v21323_v18  ;;  %v21368_v8 = vld [vmem:[#allocation13 + $0x2218] ss:$36 sps:$4 sm:$0xff]  }
 0x6f6   :  { %13164 = vmatpush1.bf16.msra.mxu1 %v21326_v9  ;;  %13124 = vmatprep.subr.bf16.mxu0 %v21331_v36  ;;  %v21373_v18 = vld [vmem:[#allocation13 + $0x1d54] ss:$36 sps:$4 sm:$0xff]  }
 0x6f7   :  { %13165 = vmatprep.subr.bf16.mxu1 %v21334_v25  ;;  %v21376_v9 = vld [vmem:[#allocation13 + $0x21d4] ss:$36 sps:$4 sm:$0xff]  }
 0x6f8   :  { %v21371_v36 = vld [vmem:[#allocation13 + $0x1d50] ss:$36 sps:$4 sm:$0xff]  }
 0x6f9   :  { %13125 = vmatpush2.bf16.msra.mxu0 %v21329_v12  ;;  %v21374_v25 = vld [vmem:[#allocation13 + $0x21d0] ss:$36 sps:$4 sm:$0xff]  }
 0x6fa   :  { %13166 = vmatpush2.bf16.msra.mxu1 %v21332_v40  ;;  %13126 = vmatprep.subr.bf16.mxu0 %v21337_v29  ;;  %v21379_v12 = vld [vmem:[#allocation13 + $0x260c] ss:$36 sps:$4 sm:$0xff]   ;;  %v22604_v29 = vld [vmem:[#allocation14] sm:$0xff] }
 0x6fb   :  { %13167 = vmatprep.subr.bf16.mxu1 %v21340_v13  ;;  %v21382_v40 = vld [vmem:[#allocation13 + $0x2a8c] ss:$36 sps:$4 sm:$0xff]   ;;  %v4656_v13 = vrot.slane %v22604_v29, %v23332_v38 }
 0x6fd   :  { %13127 = vmatpush2.bf16.msra.mxu0 %v21335_v35  ;;  %v21377_v35 = vld [vmem:[#allocation13 + $0x2608] ss:$36 sps:$4 sm:$0xff]  }
 0x6fe   :  { %13168 = vmatpush2.bf16.msra.mxu1 %v21338_v20  ;;  %13128 = vmatprep.subr.bf16.mxu0 %v21343_v21  ;;  %v21380_v20 = vld [vmem:[#allocation13 + $0x2a88] ss:$36 sps:$4 sm:$0xff]   ;;  %v4660_v21 = vrot.slane %v22604_v29, %v23294_v49 }
 0x6ff   :  { %13169 = vmatprep.subr.bf16.mxu1 %v21346_v53  ;;  %v21385_v53 = vld [vmem:[#allocation13 + $0x25c4] ss:$36 sps:$4 sm:$0xff]  }
 0x700   :  { %v21404_v29 = vld [vmem:[#allocation13 + $0x2968] ss:$36 sps:$4 sm:$0xff]  }
 0x701   :  { %13129 = vmatpush2.bf16.msra.mxu0 %v21341_v60 }
 0x702   :  { %13170 = vmatpush2.bf16.msra.mxu1 %v21344_v37  ;;  %13130 = vmatprep.subr.bf16.mxu0 %v21349_v32  ;;  %v21388_v37 = vld [vmem:[#allocation13 + $0x2a44] ss:$36 sps:$4 sm:$0xff]  }
 0x703   :  { %13171 = vmatprep.subr.bf16.mxu1 %v21352_v47 }
 0x705   :  { %13131 = vmatpush2.bf16.msra.mxu0 %v21347_v1  ;;  %v21383_v1 = vld [vmem:[#allocation13 + $0x25c0] ss:$36 sps:$4 sm:$0xff]  }
 0x706   :  { %13172 = vmatpush2.bf16.msra.mxu1 %v21350_v44  ;;  %13132 = vmatprep.subr.bf16.mxu0 %v21355_v55  ;;  %v21386_v44 = vld [vmem:[#allocation13 + $0x2a40] ss:$36 sps:$4 sm:$0xff]  }
 0x707   :  { %13173 = vmatprep.subr.bf16.mxu1 %v21358_v58  ;;  %v21391_v55 = vld [vmem:[#allocation13 + $0x257c] ss:$36 sps:$4 sm:$0xff]  }
 0x709   :  { %13133 = vmatpush2.bf16.msra.mxu0 %v21353_v61 }
 0x70a   :  { %13174 = vmatpush2.bf16.msra.mxu1 %v21356_v48  ;;  %13134 = vmatprep.subr.bf16.mxu0 %v21361_v62  ;;  %v21394_v48 = vld [vmem:[#allocation13 + $0x29fc] ss:$36 sps:$4 sm:$0xff]  }
 0x70b   :  { %13175 = vmatprep.subr.bf16.mxu1 %v21364_v59 }
 0x70d   :  { %13135 = vmatpush2.bf16.msra.mxu0 %v21359_v34 }
 0x70e   :  { %13176 = vmatpush2.bf16.msra.mxu1 %v21362_v2  ;;  %13136 = vmatprep.subr.bf16.mxu0 %v21367_v57  ;;  %v21389_v2 = vld [vmem:[#allocation13 + $0x2578] ss:$36 sps:$4 sm:$0xff]  }
 0x70f   :  { %13177 = vmatprep.subr.bf16.mxu1 %v21370_v28  ;;  %v21392_v28 = vld [vmem:[#allocation13 + $0x29f8] ss:$36 sps:$4 sm:$0xff]  }
 0x711   :  { %13137 = vmatpush2.bf16.msra.mxu0 %v21365_v6  ;;  %v21397_v6 = vld [vmem:[#allocation13 + $0x2534] ss:$36 sps:$4 sm:$0xff]  }
 0x712   :  { %13178 = vmatpush2.bf16.msra.mxu1 %v21368_v8  ;;  %13138 = vmatprep.subr.bf16.mxu0 %v21373_v18  ;;  %v21400_v18 = vld [vmem:[#allocation13 + $0x29b4] ss:$36 sps:$4 sm:$0xff]  }
 0x713   :  { %13179 = vmatprep.subr.bf16.mxu1 %v21376_v9  ;;  %v21395_v9 = vld [vmem:[#allocation13 + $0x2530] ss:$36 sps:$4 sm:$0xff]  }
 0x715   :  { %13139 = vmatpush2.bf16.msra.mxu0 %v21371_v36  ;;  %v21398_v36 = vld [vmem:[#allocation13 + $0x29b0] ss:$36 sps:$4 sm:$0xff]  }
 0x716   :  { %13180 = vmatpush2.bf16.msra.mxu1 %v21374_v25  ;;  %13190 = vmatprep.subr.bf16.mxu0 %v21379_v12  ;;  %v21403_v25 = vld [vmem:[#allocation13 + $0x24ec] ss:$36 sps:$4 sm:$0xff]  }
 0x717   :  { %13231 = vmatprep.subr.bf16.mxu1 %v21382_v40  ;;  %v21406_v12 = vld [vmem:[#allocation13 + $0x296c] ss:$36 sps:$4 sm:$0xff]  }
 0x718   :  { %v12896_v60 = vpop.f32.mrf.mxu0  ;;  %13141 = vmatmul.mubr.bf16.vlgmr.msra.gmra.mxu0 %v23414_v4  ;;  %v21401_v40 = vld [vmem:[#allocation13 + $0x24e8] ss:$36 sps:$4 sm:$0xff]  }
 0x719   :  { %v12897_v32 = vadd.f32 %v12896_v60, %v4656_v13  ;;  %v12937_v47 = vpop.f32.mrf.mxu1  ;;  %13182 = vmatmul.mubr.bf16.vlgmr.msra.gmra.mxu1 %v23416_v5  ;;  %13191 = vmatpush1.bf16.msra.mxu0 %v21377_v35  ;;  %v21409_v13 = vld [vmem:[#allocation13 + $0x24a4] ss:$36 sps:$4 sm:$0xff]   ;;  %v21418_v60 = vld [vmem:[#allocation13 + $0x28dc] ss:$36 sps:$4 sm:$0xff]  }
 0x71a   :  { %13222 = vmatprep.mubr.bf16.mxu0 %v23419_v7  ;;  %13232 = vmatpush1.bf16.msra.mxu1 %v21380_v20  ;;  %v12898_v38 = vpop.f32.mrf.mxu0  ;;  %v21412_v35 = vld [vmem:[#allocation13 + $0x2924] ss:$36 sps:$4 sm:$0xff]  }
 0x71b   :  { %v23536_v58 = vadd.f32 %v12937_v47, %v12897_v32  ;;  %13263 = vmatprep.mubr.bf16.mxu1 %v23422_v11  ;;  %v12899_v49 = vadd.f32 %v12898_v38, %v4660_v21  ;;  %v12939_v61 = vpop.f32.mrf.mxu1  ;;  %13192 = vmatprep.subr.bf16.mxu0 %v21385_v53  ;;  %v21407_v20 = vld [vmem:[#allocation13 + $0x24a0] ss:$36 sps:$4 sm:$0xff]   ;;  %v21416_v32 = vld [vmem:[#allocation13 + $0x28d8] ss:$36 sps:$4 sm:$0xff]   ;;  %v21419_v38 = vld [vmem:[#allocation13 + $0x2410] ss:$36 sps:$4 sm:$0xff]  }
 0x71c   :  { %v12900_v62 = vpop.f32.mrf.mxu0  ;;  %13233 = vmatprep.subr.bf16.mxu1 %v21388_v37  ;;  %v21410_v21 = vld [vmem:[#allocation13 + $0x2920] ss:$36 sps:$4 sm:$0xff]   ;;  %v21413_v37 = vld [vmem:[#allocation13 + $0x2458] ss:$36 sps:$4 sm:$0xff]  }
 0x71d   :  { %v23539_v59 = vadd.f32 %v12939_v61, %v12899_v49  ;;  %v12941_v34 = vpop.f32.mrf.mxu1  ;;  %13193 = vmatpush1.bf16.msra.mxu0 %v21383_v1  ;;  %v21415_v53 = vld [vmem:[#allocation13 + $0x245c] ss:$36 sps:$4 sm:$0xff]   ;;  %v21421_v47 = vld [vmem:[#allocation13 + $0x2414] ss:$36 sps:$4 sm:$0xff]   ;;  %v21430_v49 = vld [vmem:[#allocation13 + $0x2ccc] ss:$36 sps:$4 sm:$0xff]  }
 0x71e   :  { %13234 = vmatpush1.bf16.msra.mxu1 %v21386_v44  ;;  %v12901_v57 = vpop.f32.mrf.mxu0  ;;  %13194 = vmatprep.subr.bf16.mxu0 %v21391_v55  ;;  %v21424_v1 = vld [vmem:[#allocation13 + $0x2894] ss:$36 sps:$4 sm:$0xff]   ;;  %v21427_v55 = vld [vmem:[#allocation13 + $0x284c] ss:$36 sps:$4 sm:$0xff]   ;;  %v21433_v62 = vld [vmem:[#allocation13 + $0x2804] ss:$36 sps:$4 sm:$0xff]  }
 0x71f   :  { %v12942_v8 = vpop.f32.mrf.mxu1  ;;  %13235 = vmatprep.subr.bf16.mxu1 %v21394_v48  ;;  %v21422_v44 = vld [vmem:[#allocation13 + $0x2890] ss:$36 sps:$4 sm:$0xff]   ;;  %v21425_v61 = vld [vmem:[#allocation13 + $0x2848] ss:$36 sps:$4 sm:$0xff]   ;;  %v21434_v57 = vld [vmem:[#allocation13 + $0x2c80] ss:$36 sps:$4 sm:$0xff]  }
 0x720   :  { %v21428_v48 = vld [vmem:[#allocation13 + $0x2cc8] ss:$36 sps:$4 sm:$0xff]   ;;  %v21437_v8 = vld [vmem:[#allocation13 + $0x27b8] ss:$36 sps:$4 sm:$0xff]  }
 0x721   :  { %13195 = vmatpush1.bf16.msra.mxu0 %v21389_v2  ;;  %v21436_v34 = vld [vmem:[#allocation13 + $0x2c84] ss:$36 sps:$4 sm:$0xff]  }
 0x722   :  { %13236 = vmatpush1.bf16.msra.mxu1 %v21392_v28  ;;  %13196 = vmatprep.subr.bf16.mxu0 %v21397_v6  ;;  %v21431_v2 = vld [vmem:[#allocation13 + $0x2800] ss:$36 sps:$4 sm:$0xff]  }
 0x723   :  { %13237 = vmatprep.subr.bf16.mxu1 %v21400_v18  ;;  %v21439_v28 = vld [vmem:[#allocation13 + $0x27bc] ss:$36 sps:$4 sm:$0xff]  }
 0x724   :  { %v21442_v6 = vld [vmem:[#allocation13 + $0x2c3c] ss:$36 sps:$4 sm:$0xff]  }
 0x725   :  { %13197 = vmatpush1.bf16.msra.mxu0 %v21395_v9  ;;  %v21440_v18 = vld [vmem:[#allocation13 + $0x2c38] ss:$36 sps:$4 sm:$0xff]  }
 0x726   :  { %13238 = vmatpush1.bf16.msra.mxu1 %v21398_v36  ;;  %13198 = vmatprep.subr.bf16.mxu0 %v21403_v25  ;;  %v21445_v9 = vld [vmem:[#allocation13 + $0x2774] ss:$36 sps:$4 sm:$0xff]  }
 0x727   :  { %13239 = vmatprep.subr.bf16.mxu1 %v21406_v12  ;;  %v21448_v36 = vld [vmem:[#allocation13 + $0x2bf4] ss:$36 sps:$4 sm:$0xff]  }
 0x728   :  { %v21443_v25 = vld [vmem:[#allocation13 + $0x2770] ss:$36 sps:$4 sm:$0xff]  }
 0x729   :  { %13199 = vmatpush1.bf16.msra.mxu0 %v21401_v40  ;;  %v21446_v12 = vld [vmem:[#allocation13 + $0x2bf0] ss:$36 sps:$4 sm:$0xff]  }
 0x72a   :  { %13240 = vmatpush1.bf16.msra.mxu1 %v21404_v29  ;;  %13200 = vmatprep.subr.bf16.mxu0 %v21409_v13  ;;  %v21451_v40 = vld [vmem:[#allocation13 + $0x272c] ss:$36 sps:$4 sm:$0xff]  }
 0x72b   :  { %13241 = vmatprep.subr.bf16.mxu1 %v21412_v35  ;;  %v21454_v29 = vld [vmem:[#allocation13 + $0x2bac] ss:$36 sps:$4 sm:$0xff]  }
 0x72c   :  { %v21449_v13 = vld [vmem:[#allocation13 + $0x2728] ss:$36 sps:$4 sm:$0xff]  }
 0x72d   :  { %13201 = vmatpush1.bf16.msra.mxu0 %v21407_v20  ;;  %v21452_v35 = vld [vmem:[#allocation13 + $0x2ba8] ss:$36 sps:$4 sm:$0xff]  }
 0x72e   :  { %13242 = vmatpush1.bf16.msra.mxu1 %v21410_v21  ;;  %13202 = vmatprep.subr.bf16.mxu0 %v21415_v53  ;;  %v21457_v20 = vld [vmem:[#allocation13 + $0x26e4] ss:$36 sps:$4 sm:$0xff]  }
 0x72f   :  { %13243 = vmatprep.subr.bf16.mxu1 %v21418_v60  ;;  %v21460_v21 = vld [vmem:[#allocation13 + $0x2b64] ss:$36 sps:$4 sm:$0xff]  }
 0x730   :  { %v21455_v53 = vld [vmem:[#allocation13 + $0x26e0] ss:$36 sps:$4 sm:$0xff]  }
 0x731   :  { %13203 = vmatpush1.bf16.msra.mxu0 %v21413_v37  ;;  %v21458_v60 = vld [vmem:[#allocation13 + $0x2b60] ss:$36 sps:$4 sm:$0xff]  }
 0x732   :  { %13244 = vmatpush1.bf16.msra.mxu1 %v21416_v32  ;;  %13204 = vmatprep.subr.bf16.mxu0 %v21421_v47  ;;  %v21463_v37 = vld [vmem:[#allocation13 + $0x269c] ss:$36 sps:$4 sm:$0xff]  }
 0x733   :  { %13245 = vmatprep.subr.bf16.mxu1 %v21424_v1  ;;  %v21466_v32 = vld [vmem:[#allocation13 + $0x2b1c] ss:$36 sps:$4 sm:$0xff]  }
 0x734   :  { %v21461_v47 = vld [vmem:[#allocation13 + $0x2698] ss:$36 sps:$4 sm:$0xff]  }
 0x735   :  { %13205 = vmatpush1.bf16.msra.mxu0 %v21419_v38  ;;  %v21464_v1 = vld [vmem:[#allocation13 + $0x2b18] ss:$36 sps:$4 sm:$0xff]  }
 0x736   :  { %13246 = vmatpush1.bf16.msra.mxu1 %v21422_v44  ;;  %13206 = vmatprep.subr.bf16.mxu0 %v21427_v55  ;;  %v21469_v38 = vld [vmem:[#allocation13 + $0x2654] ss:$36 sps:$4 sm:$0xff]  }
 0x737   :  { %13247 = vmatprep.subr.bf16.mxu1 %v21430_v49  ;;  %v21472_v44 = vld [vmem:[#allocation13 + $0x2ad4] ss:$36 sps:$4 sm:$0xff]  }
 0x738   :  { %v21467_v55 = vld [vmem:[#allocation13 + $0x2650] ss:$36 sps:$4 sm:$0xff]  }
 0x739   :  { %13207 = vmatpush2.bf16.msra.mxu0 %v21425_v61  ;;  %v21470_v49 = vld [vmem:[#allocation13 + $0x2ad0] ss:$36 sps:$4 sm:$0xff]  }
 0x73a   :  { %13248 = vmatpush2.bf16.msra.mxu1 %v21428_v48  ;;  %13208 = vmatprep.subr.bf16.mxu0 %v21433_v62  ;;  %v21475_v61 = vld [vmem:[#allocation13 + $0x214] ss:$36 sps:$4 sm:$0xff]  }
 0x73b   :  { %13249 = vmatprep.subr.bf16.mxu1 %v21436_v34  ;;  %v21478_v48 = vld [vmem:[#allocation13 + $0x694] ss:$36 sps:$4 sm:$0xff]  }
 0x73c   :  { %v21473_v62 = vld [vmem:[#allocation13 + $0x210] ss:$36 sps:$4 sm:$0xff]  }
 0x73d   :  { %13209 = vmatpush2.bf16.msra.mxu0 %v21431_v2  ;;  %v21476_v34 = vld [vmem:[#allocation13 + $0x690] ss:$36 sps:$4 sm:$0xff]  }
 0x73e   :  { %13250 = vmatpush2.bf16.msra.mxu1 %v21434_v57  ;;  %13210 = vmatprep.subr.bf16.mxu0 %v21439_v28  ;;  %v21481_v2 = vld [vmem:[#allocation13 + $0x1cc] ss:$36 sps:$4 sm:$0xff]  }
 0x73f   :  { %13251 = vmatprep.subr.bf16.mxu1 %v21442_v6  ;;  %v21484_v28 = vld [vmem:[#allocation13 + $0x64c] ss:$36 sps:$4 sm:$0xff]  }
 0x741   :  { %13211 = vmatpush2.bf16.msra.mxu0 %v21437_v8 }
 0x742   :  { %13252 = vmatpush2.bf16.msra.mxu1 %v21440_v18  ;;  %13212 = vmatprep.subr.bf16.mxu0 %v21445_v9  ;;  %v21479_v18 = vld [vmem:[#allocation13 + $0x1c8] ss:$36 sps:$4 sm:$0xff]  }
 0x743   :  { %13253 = vmatprep.subr.bf16.mxu1 %v21448_v36  ;;  %v21482_v36 = vld [vmem:[#allocation13 + $0x648] ss:$36 sps:$4 sm:$0xff]  }
 0x745   :  { %13213 = vmatpush2.bf16.msra.mxu0 %v21443_v25  ;;  %v21487_v25 = vld [vmem:[#allocation13 + $0x184] ss:$36 sps:$4 sm:$0xff]  }
 0x746   :  { %13254 = vmatpush2.bf16.msra.mxu1 %v21446_v12  ;;  %13214 = vmatprep.subr.bf16.mxu0 %v21451_v40 }
 0x747   :  { %13255 = vmatprep.subr.bf16.mxu1 %v21454_v29 }
 0x749   :  { %13215 = vmatpush2.bf16.msra.mxu0 %v21449_v13 }
 0x74a   :  { %13256 = vmatpush2.bf16.msra.mxu1 %v21452_v35  ;;  %13216 = vmatprep.subr.bf16.mxu0 %v21457_v20 }
 0x74b   :  { %13257 = vmatprep.subr.bf16.mxu1 %v21460_v21  ;;  %v21485_v21 = vld [vmem:[#allocation13 + $0x180] ss:$36 sps:$4 sm:$0xff]  }
 0x74d   :  { %13217 = vmatpush2.bf16.msra.mxu0 %v21455_v53 }
 0x74e   :  { %13258 = vmatpush2.bf16.msra.mxu1 %v21458_v60  ;;  %13218 = vmatprep.subr.bf16.mxu0 %v21463_v37  ;;  %v21488_v60 = vld [vmem:[#allocation13 + $0x600] ss:$36 sps:$4 sm:$0xff]  }
 0x74f   :  { %13259 = vmatprep.subr.bf16.mxu1 %v21466_v32  ;;  %v21493_v37 = vld [vmem:[#allocation13 + $0x13c] ss:$36 sps:$4 sm:$0xff]  }
 0x751   :  { %13219 = vmatpush2.bf16.msra.mxu0 %v21461_v47  ;;  %v21496_v47 = vld [vmem:[#allocation13 + $0x5bc] ss:$36 sps:$4 sm:$0xff]  }
 0x752   :  { %13260 = vmatpush2.bf16.msra.mxu1 %v21464_v1  ;;  %13220 = vmatprep.subr.bf16.mxu0 %v21469_v38  ;;  %v21494_v1 = vld [vmem:[#allocation13 + $0x5b8] ss:$36 sps:$4 sm:$0xff]  }
 0x753   :  { %13261 = vmatprep.subr.bf16.mxu1 %v21472_v44  ;;  %v21499_v38 = vld [vmem:[#allocation13 + $0xf4] ss:$36 sps:$4 sm:$0xff]  }
 0x754   :  { %v21502_v44 = vld [vmem:[#allocation13 + $0x574] ss:$36 sps:$4 sm:$0xff]  }
 0x755   :  { %13221 = vmatpush2.bf16.msra.mxu0 %v21467_v55  ;;  %v21497_v55 = vld [vmem:[#allocation13 + $0xf0] ss:$36 sps:$4 sm:$0xff]  }
 0x756   :  { %13262 = vmatpush2.bf16.msra.mxu1 %v21470_v49  ;;  %13272 = vmatprep.subr.bf16.mxu0 %v21475_v61  ;;  %v21500_v49 = vld [vmem:[#allocation13 + $0x570] ss:$36 sps:$4 sm:$0xff]  }
 0x757   :  { %13313 = vmatprep.subr.bf16.mxu1 %v21478_v48  ;;  %v21505_v61 = vld [vmem:[#allocation13 + $0xac] ss:$36 sps:$4 sm:$0xff]  }
 0x758   :  { %v12978_v57 = vpop.f32.mrf.mxu0  ;;  %13223 = vmatmul.mubr.bf16.vlgmr.msra.gmra.mxu0 %v23437_v45  ;;  %v21508_v48 = vld [vmem:[#allocation13 + $0x52c] ss:$36 sps:$4 sm:$0xff]  }
 0x759   :  { %v12979_v6 = vadd.f32 %v12978_v57, %v23536_v58  ;;  %v13019_v8 = vpop.f32.mrf.mxu1  ;;  %13264 = vmatmul.mubr.bf16.vlgmr.msra.gmra.mxu1 %v23439_v52  ;;  %13273 = vmatpush1.bf16.msra.mxu0 %v21473_v62  ;;  %v21490_v58 = vld [vmem:[#allocation13 + $0x604] ss:$36 sps:$4 sm:$0xff]  }
 0x75a   :  { %13304 = vmatprep.mubr.bf16.mxu0 %v23274_v24  ;;  %13314 = vmatpush1.bf16.msra.mxu1 %v21476_v34  ;;  %v12980_v9 = vpop.f32.mrf.mxu0  ;;  %v21503_v62 = vld [vmem:[#allocation13 + $0xa8] ss:$36 sps:$4 sm:$0xff]  }
 0x75b   :  { %v23545_v12 = vadd.f32 %v13019_v8, %v12979_v6  ;;  %13345 = vmatprep.mubr.bf16.mxu1 %v23281_v50  ;;  %v12981_v40 = vadd.f32 %v12980_v9, %v23539_v59  ;;  %v13021_v29 = vpop.f32.mrf.mxu1  ;;  %13274 = vmatprep.subr.bf16.mxu0 %v21481_v2  ;;  %v21491_v59 = vld [vmem:[#allocation13 + $0x138] ss:$36 sps:$4 sm:$0xff]   ;;  %v21506_v34 = vld [vmem:[#allocation13 + $0x528] ss:$36 sps:$4 sm:$0xff]   ;;  %v21512_v6 = vld [vmem:[#allocation13 + $0x4e0] ss:$36 sps:$4 sm:$0xff]  }
 0x75c   :  { %v12982_v13 = vpop.f32.mrf.mxu0  ;;  %13315 = vmatprep.subr.bf16.mxu1 %v21484_v28  ;;  %v21511_v2 = vld [vmem:[#allocation13 + $0x64] ss:$36 sps:$4 sm:$0xff]   ;;  %v21517_v8 = vld [vmem:[#allocation13 + $0x1c] ss:$36 sps:$4 sm:$0xff]  }
 0x75d   :  { %v23549_v35 = vadd.f32 %v13021_v29, %v12981_v40  ;;  %v13023_v20 = vpop.f32.mrf.mxu1  ;;  %13275 = vmatpush1.bf16.msra.mxu0 %v21479_v18  ;;  %v21514_v57 = vld [vmem:[#allocation13 + $0x4e4] ss:$36 sps:$4 sm:$0xff]   ;;  %v21520_v18 = vld [vmem:[#allocation13 + $0x49c] ss:$36 sps:$4 sm:$0xff]   ;;  %v21526_v40 = vld [vmem:[#allocation13 + $0x8d4] ss:$36 sps:$4 sm:$0xff]  }
 0x75e   :  { %13316 = vmatpush1.bf16.msra.mxu1 %v21482_v36  ;;  %v12983_v53 = vpop.f32.mrf.mxu0  ;;  %13276 = vmatprep.subr.bf16.mxu0 %v21487_v25  ;;  %v21509_v28 = vld [vmem:[#allocation13 + $0x60] ss:$36 sps:$4 sm:$0xff]   ;;  %v21515_v9 = vld [vmem:[#allocation13 + $0x18] ss:$36 sps:$4 sm:$0xff]   ;;  %v21521_v29 = vld [vmem:[#allocation13 + $0x450] ss:$36 sps:$4 sm:$0xff]  }
 0x75f   :  { %v13024_v32 = vpop.f32.mrf.mxu1  ;;  %13317 = vmatprep.subr.bf16.mxu1 %v21490_v58  ;;  %v21518_v36 = vld [vmem:[#allocation13 + $0x498] ss:$36 sps:$4 sm:$0xff]   ;;  %v21524_v58 = vld [vmem:[#allocation13 + $0x8d0] ss:$36 sps:$4 sm:$0xff]   ;;  %v21530_v53 = vld [vmem:[#allocation13 + $0x888] ss:$36 sps:$4 sm:$0xff]  }
 0x760   :  { %v21523_v25 = vld [vmem:[#allocation13 + $0x454] ss:$36 sps:$4 sm:$0xff]   ;;  %v21529_v13 = vld [vmem:[#allocation13 + $0x40c] ss:$36 sps:$4 sm:$0xff]   ;;  %v21533_v32 = vld [vmem:[#allocation13 + $0x3c0] ss:$36 sps:$4 sm:$0xff]  }
 0x761   :  { %13277 = vmatpush1.bf16.msra.mxu0 %v21485_v21  ;;  %v21532_v20 = vld [vmem:[#allocation13 + $0x88c] ss:$36 sps:$4 sm:$0xff]  }
 0x762   :  { %13318 = vmatpush1.bf16.msra.mxu1 %v21488_v60  ;;  %13278 = vmatprep.subr.bf16.mxu0 %v21493_v37  ;;  %v21527_v21 = vld [vmem:[#allocation13 + $0x408] ss:$36 sps:$4 sm:$0xff]  }
 0x763   :  { %13319 = vmatprep.subr.bf16.mxu1 %v21496_v47  ;;  %v21535_v60 = vld [vmem:[#allocation13 + $0x3c4] ss:$36 sps:$4 sm:$0xff]  }
 0x764   :  { %v21538_v37 = vld [vmem:[#allocation13 + $0x844] ss:$36 sps:$4 sm:$0xff]  }
 0x765   :  { %13279 = vmatpush1.bf16.msra.mxu0 %v21491_v59  ;;  %v21536_v47 = vld [vmem:[#allocation13 + $0x840] ss:$36 sps:$4 sm:$0xff]  }
 0x766   :  { %13320 = vmatpush1.bf16.msra.mxu1 %v21494_v1  ;;  %13280 = vmatprep.subr.bf16.mxu0 %v21499_v38  ;;  %v21541_v59 = vld [vmem:[#allocation13 + $0x37c] ss:$36 sps:$4 sm:$0xff]  }
 0x767   :  { %13321 = vmatprep.subr.bf16.mxu1 %v21502_v44  ;;  %v21544_v1 = vld [vmem:[#allocation13 + $0x7fc] ss:$36 sps:$4 sm:$0xff]  }
 0x768   :  { %v21539_v38 = vld [vmem:[#allocation13 + $0x378] ss:$36 sps:$4 sm:$0xff]  }
 0x769   :  { %13281 = vmatpush1.bf16.msra.mxu0 %v21497_v55  ;;  %v21542_v44 = vld [vmem:[#allocation13 + $0x7f8] ss:$36 sps:$4 sm:$0xff]  }
 0x76a   :  { %13322 = vmatpush1.bf16.msra.mxu1 %v21500_v49  ;;  %13282 = vmatprep.subr.bf16.mxu0 %v21505_v61  ;;  %v21547_v55 = vld [vmem:[#allocation13 + $0x334] ss:$36 sps:$4 sm:$0xff]  }
 0x76b   :  { %13323 = vmatprep.subr.bf16.mxu1 %v21508_v48  ;;  %v21550_v49 = vld [vmem:[#allocation13 + $0x7b4] ss:$36 sps:$4 sm:$0xff]  }
 0x76c   :  { %v21545_v61 = vld [vmem:[#allocation13 + $0x330] ss:$36 sps:$4 sm:$0xff]  }
 0x76d   :  { %13283 = vmatpush1.bf16.msra.mxu0 %v21503_v62  ;;  %v21548_v48 = vld [vmem:[#allocation13 + $0x7b0] ss:$36 sps:$4 sm:$0xff]  }
 0x76e   :  { %13324 = vmatpush1.bf16.msra.mxu1 %v21506_v34  ;;  %13284 = vmatprep.subr.bf16.mxu0 %v21511_v2  ;;  %v21553_v62 = vld [vmem:[#allocation13 + $0x2ec] ss:$36 sps:$4 sm:$0xff]  }
 0x76f   :  { %13325 = vmatprep.subr.bf16.mxu1 %v21514_v57  ;;  %v21556_v34 = vld [vmem:[#allocation13 + $0x76c] ss:$36 sps:$4 sm:$0xff]  }
 0x770   :  { %v21551_v2 = vld [vmem:[#allocation13 + $0x2e8] ss:$36 sps:$4 sm:$0xff]  }
 0x771   :  { %13285 = vmatpush1.bf16.msra.mxu0 %v21509_v28  ;;  %v21554_v57 = vld [vmem:[#allocation13 + $0x768] ss:$36 sps:$4 sm:$0xff]  }
 0x772   :  { %13326 = vmatpush1.bf16.msra.mxu1 %v21512_v6  ;;  %13286 = vmatprep.subr.bf16.mxu0 %v21517_v8  ;;  %v21559_v28 = vld [vmem:[#allocation13 + $0x2a4] ss:$36 sps:$4 sm:$0xff]  }
 0x773   :  { %13327 = vmatprep.subr.bf16.mxu1 %v21520_v18  ;;  %v21562_v6 = vld [vmem:[#allocation13 + $0x724] ss:$36 sps:$4 sm:$0xff]  }
 0x774   :  { %v21557_v8 = vld [vmem:[#allocation13 + $0x2a0] ss:$36 sps:$4 sm:$0xff]  }
 0x775   :  { %13287 = vmatpush1.bf16.msra.mxu0 %v21515_v9  ;;  %v21560_v18 = vld [vmem:[#allocation13 + $0x720] ss:$36 sps:$4 sm:$0xff]  }
 0x776   :  { %13328 = vmatpush1.bf16.msra.mxu1 %v21518_v36  ;;  %13288 = vmatprep.subr.bf16.mxu0 %v21523_v25  ;;  %v21565_v9 = vld [vmem:[#allocation13 + $0x25c] ss:$36 sps:$4 sm:$0xff]  }
 0x777   :  { %13329 = vmatprep.subr.bf16.mxu1 %v21526_v40  ;;  %v21568_v36 = vld [vmem:[#allocation13 + $0x6dc] ss:$36 sps:$4 sm:$0xff]  }
 0x778   :  { %v21563_v25 = vld [vmem:[#allocation13 + $0x258] ss:$36 sps:$4 sm:$0xff]  }
 0x779   :  { %13289 = vmatpush2.bf16.msra.mxu0 %v21521_v29  ;;  %v21566_v40 = vld [vmem:[#allocation13 + $0x6d8] ss:$36 sps:$4 sm:$0xff]  }
 0x77a   :  { %13330 = vmatpush2.bf16.msra.mxu1 %v21524_v58  ;;  %13290 = vmatprep.subr.bf16.mxu0 %v21529_v13  ;;  %v21571_v29 = vld [vmem:[#allocation13 + $0xb14] ss:$36 sps:$4 sm:$0xff]  }
 0x77b   :  { %13331 = vmatprep.subr.bf16.mxu1 %v21532_v20  ;;  %v21574_v58 = vld [vmem:[#allocation13 + $0xf94] ss:$36 sps:$4 sm:$0xff]  }
 0x77c   :  { %v21569_v13 = vld [vmem:[#allocation13 + $0xb10] ss:$36 sps:$4 sm:$0xff]  }
 0x77d   :  { %13291 = vmatpush2.bf16.msra.mxu0 %v21527_v21  ;;  %v21572_v20 = vld [vmem:[#allocation13 + $0xf90] ss:$36 sps:$4 sm:$0xff]  }
 0x77e   :  { %13332 = vmatpush2.bf16.msra.mxu1 %v21530_v53  ;;  %13292 = vmatprep.subr.bf16.mxu0 %v21535_v60  ;;  %v21577_v21 = vld [vmem:[#allocation13 + $0xacc] ss:$36 sps:$4 sm:$0xff]  }
 0x77f   :  { %13333 = vmatprep.subr.bf16.mxu1 %v21538_v37  ;;  %v21580_v60 = vld [vmem:[#allocation13 + $0xf4c] ss:$36 sps:$4 sm:$0xff]  }
 0x781   :  { %13293 = vmatpush2.bf16.msra.mxu0 %v21533_v32 }
 0x782   :  { %13334 = vmatpush2.bf16.msra.mxu1 %v21536_v47  ;;  %13294 = vmatprep.subr.bf16.mxu0 %v21541_v59  ;;  %v21575_v47 = vld [vmem:[#allocation13 + $0xac8] ss:$36 sps:$4 sm:$0xff]  }
 0x783   :  { %13335 = vmatprep.subr.bf16.mxu1 %v21544_v1  ;;  %v21578_v1 = vld [vmem:[#allocation13 + $0xf48] ss:$36 sps:$4 sm:$0xff]  }
 0x785   :  { %13295 = vmatpush2.bf16.msra.mxu0 %v21539_v38  ;;  %v21583_v38 = vld [vmem:[#allocation13 + $0xa84] ss:$36 sps:$4 sm:$0xff]  }
 0x786   :  { %13336 = vmatpush2.bf16.msra.mxu1 %v21542_v44  ;;  %13296 = vmatprep.subr.bf16.mxu0 %v21547_v55 }
 0x787   :  { %13337 = vmatprep.subr.bf16.mxu1 %v21550_v49 }
 0x789   :  { %13297 = vmatpush2.bf16.msra.mxu0 %v21545_v61 }
 0x78a   :  { %13338 = vmatpush2.bf16.msra.mxu1 %v21548_v48  ;;  %13298 = vmatprep.subr.bf16.mxu0 %v21553_v62 }
 0x78b   :  { %13339 = vmatprep.subr.bf16.mxu1 %v21556_v34  ;;  %v21581_v34 = vld [vmem:[#allocation13 + $0xa80] ss:$36 sps:$4 sm:$0xff]  }
 0x78d   :  { %13299 = vmatpush2.bf16.msra.mxu0 %v21551_v2 }
 0x78e   :  { %13340 = vmatpush2.bf16.msra.mxu1 %v21554_v57  ;;  %13300 = vmatprep.subr.bf16.mxu0 %v21559_v28  ;;  %v21584_v57 = vld [vmem:[#allocation13 + $0xf00] ss:$36 sps:$4 sm:$0xff]  }
 0x78f   :  { %13341 = vmatprep.subr.bf16.mxu1 %v21562_v6  ;;  %v21589_v28 = vld [vmem:[#allocation13 + $0xa3c] ss:$36 sps:$4 sm:$0xff]  }
 0x791   :  { %13301 = vmatpush2.bf16.msra.mxu0 %v21557_v8  ;;  %v21592_v8 = vld [vmem:[#allocation13 + $0xebc] ss:$36 sps:$4 sm:$0xff]  }
 0x792   :  { %13342 = vmatpush2.bf16.msra.mxu1 %v21560_v18  ;;  %13302 = vmatprep.subr.bf16.mxu0 %v21565_v9  ;;  %v21590_v18 = vld [vmem:[#allocation13 + $0xeb8] ss:$36 sps:$4 sm:$0xff]  }
 0x793   :  { %13343 = vmatprep.subr.bf16.mxu1 %v21568_v36  ;;  %v21595_v9 = vld [vmem:[#allocation13 + $0x9f4] ss:$36 sps:$4 sm:$0xff]  }
 0x794   :  { %v21598_v36 = vld [vmem:[#allocation13 + $0xe74] ss:$36 sps:$4 sm:$0xff]  }
 0x795   :  { %13303 = vmatpush2.bf16.msra.mxu0 %v21563_v25  ;;  %v21593_v25 = vld [vmem:[#allocation13 + $0x9f0] ss:$36 sps:$4 sm:$0xff]  }
 0x796   :  { %13344 = vmatpush2.bf16.msra.mxu1 %v21566_v40  ;;  %13354 = vmatprep.subr.bf16.mxu0 %v21571_v29  ;;  %v21596_v40 = vld [vmem:[#allocation13 + $0xe70] ss:$36 sps:$4 sm:$0xff]  }
 0x797   :  { %13395 = vmatprep.subr.bf16.mxu1 %v21574_v58  ;;  %v21601_v29 = vld [vmem:[#allocation13 + $0x9ac] ss:$36 sps:$4 sm:$0xff]  }
 0x798   :  { %v13060_v53 = vpop.f32.mrf.mxu0  ;;  %13305 = vmatmul.mubr.bf16.vlgmr.msra.gmra.mxu0 %v23311_v22  ;;  %v21604_v58 = vld [vmem:[#allocation13 + $0xe2c] ss:$36 sps:$4 sm:$0xff]  }
 0x799   :  { %v13061_v37 = vadd.f32 %v13060_v53, %v23545_v12  ;;  %v13101_v32 = vpop.f32.mrf.mxu1  ;;  %13346 = vmatmul.mubr.bf16.vlgmr.msra.gmra.mxu1 %v23313_v23  ;;  %13355 = vmatpush1.bf16.msra.mxu0 %v21569_v13  ;;  %v21586_v12 = vld [vmem:[#allocation13 + $0xf04] ss:$36 sps:$4 sm:$0xff]  }
 0x79a   :  { %13386 = vmatprep.mubr.bf16.mxu0 %v23315_v27  ;;  %13396 = vmatpush1.bf16.msra.mxu1 %v21572_v20  ;;  %v13062_v59 = vpop.f32.mrf.mxu0  ;;  %v21599_v13 = vld [vmem:[#allocation13 + $0x9a8] ss:$36 sps:$4 sm:$0xff]  }
 0x79b   :  { %v23555_v44 = vadd.f32 %v13101_v32, %v13061_v37  ;;  %13427 = vmatprep.mubr.bf16.mxu1 %v23320_v31  ;;  %v13063_v55 = vadd.f32 %v13062_v59, %v23549_v35  ;;  %v13103_v49 = vpop.f32.mrf.mxu1  ;;  %13356 = vmatprep.subr.bf16.mxu0 %v21577_v21  ;;  %v21587_v35 = vld [vmem:[#allocation13 + $0xa38] ss:$36 sps:$4 sm:$0xff]   ;;  %v21602_v20 = vld [vmem:[#allocation13 + $0xe28] ss:$36 sps:$4 sm:$0xff]   ;;  %v21608_v37 = vld [vmem:[#allocation13 + $0xde0] ss:$36 sps:$4 sm:$0xff]  }
 0x79c   :  { %v13064_v61 = vpop.f32.mrf.mxu0  ;;  %13397 = vmatprep.subr.bf16.mxu1 %v21580_v60  ;;  %v21607_v21 = vld [vmem:[#allocation13 + $0x964] ss:$36 sps:$4 sm:$0xff]   ;;  %v21613_v32 = vld [vmem:[#allocation13 + $0x91c] ss:$36 sps:$4 sm:$0xff]  }
 0x79d   :  { %v23559_v48 = vadd.f32 %v13103_v49, %v13063_v55  ;;  %v13105_v62 = vpop.f32.mrf.mxu1  ;;  %13357 = vmatpush1.bf16.msra.mxu0 %v21575_v47  ;;  %v21610_v53 = vld [vmem:[#allocation13 + $0xde4] ss:$36 sps:$4 sm:$0xff]   ;;  %v21616_v47 = vld [vmem:[#allocation13 + $0xd9c] ss:$36 sps:$4 sm:$0xff]   ;;  %v21622_v55 = vld [vmem:[#allocation13 + $0x11d4] ss:$36 sps:$4 sm:$0xff]  }
 0x79e   :  { %13398 = vmatpush1.bf16.msra.mxu1 %v21578_v1  ;;  %v13065_v2 = vpop.f32.mrf.mxu0  ;;  %13358 = vmatprep.subr.bf16.mxu0 %v21583_v38  ;;  %v21605_v60 = vld [vmem:[#allocation13 + $0x960] ss:$36 sps:$4 sm:$0xff]   ;;  %v21611_v59 = vld [vmem:[#allocation13 + $0x918] ss:$36 sps:$4 sm:$0xff]   ;;  %v21617_v49 = vld [vmem:[#allocation13 + $0xd50] ss:$36 sps:$4 sm:$0xff]  }
 0x79f   :  { %v13106_v6 = vpop.f32.mrf.mxu1  ;;  %13399 = vmatprep.subr.bf16.mxu1 %v21586_v12  ;;  %v21614_v1 = vld [vmem:[#allocation13 + $0xd98] ss:$36 sps:$4 sm:$0xff]   ;;  %v21620_v12 = vld [vmem:[#allocation13 + $0x11d0] ss:$36 sps:$4 sm:$0xff]   ;;  %v21626_v2 = vld [vmem:[#allocation13 + $0x1188] ss:$36 sps:$4 sm:$0xff]  }
 0x7a0   :  { %v21619_v38 = vld [vmem:[#allocation13 + $0xd54] ss:$36 sps:$4 sm:$0xff]   ;;  %v21625_v61 = vld [vmem:[#allocation13 + $0xd0c] ss:$36 sps:$4 sm:$0xff]   ;;  %v21629_v6 = vld [vmem:[#allocation13 + $0xcc0] ss:$36 sps:$4 sm:$0xff]  }
 0x7a1   :  { %13359 = vmatpush1.bf16.msra.mxu0 %v21581_v34  ;;  %v21628_v62 = vld [vmem:[#allocation13 + $0x118c] ss:$36 sps:$4 sm:$0xff]  }
 0x7a2   :  { %13400 = vmatpush1.bf16.msra.mxu1 %v21584_v57  ;;  %13360 = vmatprep.subr.bf16.mxu0 %v21589_v28  ;;  %v21623_v34 = vld [vmem:[#allocation13 + $0xd08] ss:$36 sps:$4 sm:$0xff]  }
 0x7a3   :  { %13401 = vmatprep.subr.bf16.mxu1 %v21592_v8  ;;  %v21631_v57 = vld [vmem:[#allocation13 + $0xcc4] ss:$36 sps:$4 sm:$0xff]  }
 0x7a4   :  { %v21634_v28 = vld [vmem:[#allocation13 + $0x1144] ss:$36 sps:$4 sm:$0xff]  }
 0x7a5   :  { %13361 = vmatpush1.bf16.msra.mxu0 %v21587_v35  ;;  %v21632_v8 = vld [vmem:[#allocation13 + $0x1140] ss:$36 sps:$4 sm:$0xff]  }
 0x7a6   :  { %13402 = vmatpush1.bf16.msra.mxu1 %v21590_v18  ;;  %13362 = vmatprep.subr.bf16.mxu0 %v21595_v9  ;;  %v21637_v35 = vld [vmem:[#allocation13 + $0xc7c] ss:$36 sps:$4 sm:$0xff]  }
 0x7a7   :  { %13403 = vmatprep.subr.bf16.mxu1 %v21598_v36  ;;  %v21640_v18 = vld [vmem:[#allocation13 + $0x10fc] ss:$36 sps:$4 sm:$0xff]  }
 0x7a8   :  { %v21635_v9 = vld [vmem:[#allocation13 + $0xc78] ss:$36 sps:$4 sm:$0xff]  }
 0x7a9   :  { %13363 = vmatpush1.bf16.msra.mxu0 %v21593_v25  ;;  %v21638_v36 = vld [vmem:[#allocation13 + $0x10f8] ss:$36 sps:$4 sm:$0xff]  }
 0x7aa   :  { %13404 = vmatpush1.bf16.msra.mxu1 %v21596_v40  ;;  %13364 = vmatprep.subr.bf16.mxu0 %v21601_v29  ;;  %v21643_v25 = vld [vmem:[#allocation13 + $0xc34] ss:$36 sps:$4 sm:$0xff]  }
 0x7ab   :  { %13405 = vmatprep.subr.bf16.mxu1 %v21604_v58  ;;  %v21646_v40 = vld [vmem:[#allocation13 + $0x10b4] ss:$36 sps:$4 sm:$0xff]  }
 0x7ac   :  { %v21641_v29 = vld [vmem:[#allocation13 + $0xc30] ss:$36 sps:$4 sm:$0xff]  }
 0x7ad   :  { %13365 = vmatpush1.bf16.msra.mxu0 %v21599_v13  ;;  %v21644_v58 = vld [vmem:[#allocation13 + $0x10b0] ss:$36 sps:$4 sm:$0xff]  }
 0x7ae   :  { %13406 = vmatpush1.bf16.msra.mxu1 %v21602_v20  ;;  %13366 = vmatprep.subr.bf16.mxu0 %v21607_v21  ;;  %v21649_v13 = vld [vmem:[#allocation13 + $0xbec] ss:$36 sps:$4 sm:$0xff]  }
 0x7af   :  { %13407 = vmatprep.subr.bf16.mxu1 %v21610_v53  ;;  %v21652_v20 = vld [vmem:[#allocation13 + $0x106c] ss:$36 sps:$4 sm:$0xff]  }
 0x7b0   :  { %v21647_v21 = vld [vmem:[#allocation13 + $0xbe8] ss:$36 sps:$4 sm:$0xff]  }
 0x7b1   :  { %13367 = vmatpush1.bf16.msra.mxu0 %v21605_v60  ;;  %v21650_v53 = vld [vmem:[#allocation13 + $0x1068] ss:$36 sps:$4 sm:$0xff]  }
 0x7b2   :  { %13408 = vmatpush1.bf16.msra.mxu1 %v21608_v37  ;;  %13368 = vmatprep.subr.bf16.mxu0 %v21613_v32  ;;  %v21655_v60 = vld [vmem:[#allocation13 + $0xba4] ss:$36 sps:$4 sm:$0xff]  }
 0x7b3   :  { %13409 = vmatprep.subr.bf16.mxu1 %v21616_v47  ;;  %v21658_v37 = vld [vmem:[#allocation13 + $0x1024] ss:$36 sps:$4 sm:$0xff]  }
 0x7b4   :  { %v21653_v32 = vld [vmem:[#allocation13 + $0xba0] ss:$36 sps:$4 sm:$0xff]  }
 0x7b5   :  { %13369 = vmatpush1.bf16.msra.mxu0 %v21611_v59  ;;  %v21656_v47 = vld [vmem:[#allocation13 + $0x1020] ss:$36 sps:$4 sm:$0xff]  }
 0x7b6   :  { %13410 = vmatpush1.bf16.msra.mxu1 %v21614_v1  ;;  %13370 = vmatprep.subr.bf16.mxu0 %v21619_v38  ;;  %v21661_v59 = vld [vmem:[#allocation13 + $0xb5c] ss:$36 sps:$4 sm:$0xff]  }
 0x7b7   :  { %13411 = vmatprep.subr.bf16.mxu1 %v21622_v55  ;;  %v21664_v1 = vld [vmem:[#allocation13 + $0xfdc] ss:$36 sps:$4 sm:$0xff]  }
 0x7b8   :  { %v21659_v38 = vld [vmem:[#allocation13 + $0xb58] ss:$36 sps:$4 sm:$0xff]  }
 0x7b9   :  { %13371 = vmatpush2.bf16.msra.mxu0 %v21617_v49  ;;  %v21662_v55 = vld [vmem:[#allocation13 + $0xfd8] ss:$36 sps:$4 sm:$0xff]  }
 0x7ba   :  { %13412 = vmatpush2.bf16.msra.mxu1 %v21620_v12  ;;  %13372 = vmatprep.subr.bf16.mxu0 %v21625_v61  ;;  %v21667_v49 = vld [vmem:[#allocation13 + $0x1414] ss:$36 sps:$4 sm:$0xff]  }
 0x7bb   :  { %13413 = vmatprep.subr.bf16.mxu1 %v21628_v62  ;;  %v21670_v12 = vld [vmem:[#allocation13 + $0x1894] ss:$36 sps:$4 sm:$0xff]  }
 0x7bc   :  { %v21665_v61 = vld [vmem:[#allocation13 + $0x1410] ss:$36 sps:$4 sm:$0xff]  }
 0x7bd   :  { %13373 = vmatpush2.bf16.msra.mxu0 %v21623_v34  ;;  %v21668_v62 = vld [vmem:[#allocation13 + $0x1890] ss:$36 sps:$4 sm:$0xff]  }
 0x7be   :  { %13414 = vmatpush2.bf16.msra.mxu1 %v21626_v2  ;;  %13374 = vmatprep.subr.bf16.mxu0 %v21631_v57  ;;  %v21673_v34 = vld [vmem:[#allocation13 + $0x13cc] ss:$36 sps:$4 sm:$0xff]  }
 0x7bf   :  { %13415 = vmatprep.subr.bf16.mxu1 %v21634_v28  ;;  %v21676_v57 = vld [vmem:[#allocation13 + $0x184c] ss:$36 sps:$4 sm:$0xff]  }
 0x7c1   :  { %13375 = vmatpush2.bf16.msra.mxu0 %v21629_v6 }
 0x7c2   :  { %13416 = vmatpush2.bf16.msra.mxu1 %v21632_v8  ;;  %13376 = vmatprep.subr.bf16.mxu0 %v21637_v35  ;;  %v21671_v8 = vld [vmem:[#allocation13 + $0x13c8] ss:$36 sps:$4 sm:$0xff]  }
 0x7c3   :  { %13417 = vmatprep.subr.bf16.mxu1 %v21640_v18  ;;  %v21674_v18 = vld [vmem:[#allocation13 + $0x1848] ss:$36 sps:$4 sm:$0xff]  }
 0x7c5   :  { %13377 = vmatpush2.bf16.msra.mxu0 %v21635_v9  ;;  %v21679_v9 = vld [vmem:[#allocation13 + $0x1384] ss:$36 sps:$4 sm:$0xff]  }
 0x7c6   :  { %13418 = vmatpush2.bf16.msra.mxu1 %v21638_v36  ;;  %13378 = vmatprep.subr.bf16.mxu0 %v21643_v25 }
 0x7c7   :  { %13419 = vmatprep.subr.bf16.mxu1 %v21646_v40 }
 0x7c9   :  { %13379 = vmatpush2.bf16.msra.mxu0 %v21641_v29 }
 0x7ca   :  { %13420 = vmatpush2.bf16.msra.mxu1 %v21644_v58  ;;  %13380 = vmatprep.subr.bf16.mxu0 %v21649_v13 }
 0x7cb   :  { %13421 = vmatprep.subr.bf16.mxu1 %v21652_v20  ;;  %v21677_v20 = vld [vmem:[#allocation13 + $0x1380] ss:$36 sps:$4 sm:$0xff]  }
 0x7cd   :  { %13381 = vmatpush2.bf16.msra.mxu0 %v21647_v21 }
 0x7ce   :  { %13422 = vmatpush2.bf16.msra.mxu1 %v21650_v53  ;;  %13382 = vmatprep.subr.bf16.mxu0 %v21655_v60  ;;  %v21680_v53 = vld [vmem:[#allocation13 + $0x1800] ss:$36 sps:$4 sm:$0xff]  }
 0x7cf   :  { %13423 = vmatprep.subr.bf16.mxu1 %v21658_v37  ;;  %v21685_v60 = vld [vmem:[#allocation13 + $0x133c] ss:$36 sps:$4 sm:$0xff]  }
 0x7d1   :  { %13383 = vmatpush2.bf16.msra.mxu0 %v21653_v32  ;;  %v21688_v32 = vld [vmem:[#allocation13 + $0x17bc] ss:$36 sps:$4 sm:$0xff]  }
 0x7d2   :  { %13424 = vmatpush2.bf16.msra.mxu1 %v21656_v47  ;;  %13384 = vmatprep.subr.bf16.mxu0 %v21661_v59  ;;  %v21686_v47 = vld [vmem:[#allocation13 + $0x17b8] ss:$36 sps:$4 sm:$0xff]  }
 0x7d3   :  { %13425 = vmatprep.subr.bf16.mxu1 %v21664_v1  ;;  %v21691_v59 = vld [vmem:[#allocation13 + $0x12f4] ss:$36 sps:$4 sm:$0xff]  }
 0x7d4   :  { %v21694_v1 = vld [vmem:[#allocation13 + $0x1774] ss:$36 sps:$4 sm:$0xff]  }
 0x7d5   :  { %13385 = vmatpush2.bf16.msra.mxu0 %v21659_v38  ;;  %v21689_v38 = vld [vmem:[#allocation13 + $0x12f0] ss:$36 sps:$4 sm:$0xff]  }
 0x7d6   :  { %13426 = vmatpush2.bf16.msra.mxu1 %v21662_v55  ;;  %13436 = vmatprep.subr.bf16.mxu0 %v21667_v49  ;;  %v21692_v55 = vld [vmem:[#allocation13 + $0x1770] ss:$36 sps:$4 sm:$0xff]  }
 0x7d7   :  { %13477 = vmatprep.subr.bf16.mxu1 %v21670_v12  ;;  %v21697_v49 = vld [vmem:[#allocation13 + $0x12ac] ss:$36 sps:$4 sm:$0xff]  }
 0x7d8   :  { %v13142_v2 = vpop.f32.mrf.mxu0  ;;  %13387 = vmatmul.mubr.bf16.vlgmr.msra.gmra.mxu0 %v23349_v14  ;;  %v21700_v12 = vld [vmem:[#allocation13 + $0x172c] ss:$36 sps:$4 sm:$0xff]  }
 0x7d9   :  { %v13143_v28 = vadd.f32 %v13142_v2, %v23555_v44  ;;  %v13183_v6 = vpop.f32.mrf.mxu1  ;;  %13428 = vmatmul.mubr.bf16.vlgmr.msra.gmra.mxu1 %v23351_v19  ;;  %13437 = vmatpush1.bf16.msra.mxu0 %v21665_v61  ;;  %v21682_v44 = vld [vmem:[#allocation13 + $0x1804] ss:$36 sps:$4 sm:$0xff]  }
 0x7da   :  { %13468 = vmatprep.mubr.bf16.mxu0 %v23353_v15  ;;  %13478 = vmatpush1.bf16.msra.mxu1 %v21668_v62  ;;  %v13144_v35 = vpop.f32.mrf.mxu0  ;;  %v21695_v61 = vld [vmem:[#allocation13 + $0x12a8] ss:$36 sps:$4 sm:$0xff]  }
 0x7db   :  { %v23565_v36 = vadd.f32 %v13183_v6, %v13143_v28  ;;  %13509 = vmatprep.mubr.bf16.mxu1 %v23358_v54  ;;  %v13145_v25 = vadd.f32 %v13144_v35, %v23559_v48  ;;  %v13185_v40 = vpop.f32.mrf.mxu1  ;;  %13438 = vmatprep.subr.bf16.mxu0 %v21673_v34  ;;  %v21683_v48 = vld [vmem:[#allocation13 + $0x1338] ss:$36 sps:$4 sm:$0xff]   ;;  %v21698_v62 = vld [vmem:[#allocation13 + $0x1728] ss:$36 sps:$4 sm:$0xff]   ;;  %v21704_v28 = vld [vmem:[#allocation13 + $0x16e0] ss:$36 sps:$4 sm:$0xff]  }
 0x7dc   :  { %v13146_v29 = vpop.f32.mrf.mxu0  ;;  %13479 = vmatprep.subr.bf16.mxu1 %v21676_v57  ;;  %v21703_v34 = vld [vmem:[#allocation13 + $0x1264] ss:$36 sps:$4 sm:$0xff]   ;;  %v21709_v6 = vld [vmem:[#allocation13 + $0x121c] ss:$36 sps:$4 sm:$0xff]  }
 0x7dd   :  { %v23569_v58 = vadd.f32 %v13185_v40, %v13145_v25  ;;  %v13187_v13 = vpop.f32.mrf.mxu1  ;;  %13439 = vmatpush1.bf16.msra.mxu0 %v21671_v8  ;;  %v21706_v2 = vld [vmem:[#allocation13 + $0x16e4] ss:$36 sps:$4 sm:$0xff]   ;;  %v21712_v8 = vld [vmem:[#allocation13 + $0x169c] ss:$36 sps:$4 sm:$0xff]   ;;  %v21718_v25 = vld [vmem:[#allocation13 + $0x1ad4] ss:$36 sps:$4 sm:$0xff]  }
 0x7de   :  { %13480 = vmatpush1.bf16.msra.mxu1 %v21674_v18  ;;  %v13147_v21 = vpop.f32.mrf.mxu0  ;;  %13440 = vmatprep.subr.bf16.mxu0 %v21679_v9  ;;  %v21701_v57 = vld [vmem:[#allocation13 + $0x1260] ss:$36 sps:$4 sm:$0xff]   ;;  %v21707_v35 = vld [vmem:[#allocation13 + $0x1218] ss:$36 sps:$4 sm:$0xff]   ;;  %v21713_v40 = vld [vmem:[#allocation13 + $0x1650] ss:$36 sps:$4 sm:$0xff]  }
 0x7df   :  { %v13188_v37 = vpop.f32.mrf.mxu1  ;;  %13481 = vmatprep.subr.bf16.mxu1 %v21682_v44  ;;  %v21710_v18 = vld [vmem:[#allocation13 + $0x1698] ss:$36 sps:$4 sm:$0xff]   ;;  %v21716_v44 = vld [vmem:[#allocation13 + $0x1ad0] ss:$36 sps:$4 sm:$0xff]   ;;  %v21722_v21 = vld [vmem:[#allocation13 + $0x1a88] ss:$36 sps:$4 sm:$0xff]  }
 0x7e0   :  { %v21715_v9 = vld [vmem:[#allocation13 + $0x1654] ss:$36 sps:$4 sm:$0xff]   ;;  %v21721_v29 = vld [vmem:[#allocation13 + $0x160c] ss:$36 sps:$4 sm:$0xff]   ;;  %v21725_v37 = vld [vmem:[#allocation13 + $0x15c0] ss:$36 sps:$4 sm:$0xff]  }
 0x7e1   :  { %13441 = vmatpush1.bf16.msra.mxu0 %v21677_v20  ;;  %v21724_v13 = vld [vmem:[#allocation13 + $0x1a8c] ss:$36 sps:$4 sm:$0xff]  }
 0x7e2   :  { %13482 = vmatpush1.bf16.msra.mxu1 %v21680_v53  ;;  %13442 = vmatprep.subr.bf16.mxu0 %v21685_v60  ;;  %v21719_v20 = vld [vmem:[#allocation13 + $0x1608] ss:$36 sps:$4 sm:$0xff]  }
 0x7e3   :  { %13483 = vmatprep.subr.bf16.mxu1 %v21688_v32  ;;  %v21727_v53 = vld [vmem:[#allocation13 + $0x15c4] ss:$36 sps:$4 sm:$0xff]  }
 0x7e4   :  { %v21730_v60 = vld [vmem:[#allocation13 + $0x1a44] ss:$36 sps:$4 sm:$0xff]  }
 0x7e5   :  { %13443 = vmatpush1.bf16.msra.mxu0 %v21683_v48  ;;  %v21728_v32 = vld [vmem:[#allocation13 + $0x1a40] ss:$36 sps:$4 sm:$0xff]  }
 0x7e6   :  { %13484 = vmatpush1.bf16.msra.mxu1 %v21686_v47  ;;  %13444 = vmatprep.subr.bf16.mxu0 %v21691_v59  ;;  %v21733_v48 = vld [vmem:[#allocation13 + $0x157c] ss:$36 sps:$4 sm:$0xff]  }
 0x7e7   :  { %13485 = vmatprep.subr.bf16.mxu1 %v21694_v1  ;;  %v21736_v47 = vld [vmem:[#allocation13 + $0x19fc] ss:$36 sps:$4 sm:$0xff]  }
 0x7e8   :  { %v21731_v59 = vld [vmem:[#allocation13 + $0x1578] ss:$36 sps:$4 sm:$0xff]  }
 0x7e9   :  { %13445 = vmatpush1.bf16.msra.mxu0 %v21689_v38  ;;  %v21734_v1 = vld [vmem:[#allocation13 + $0x19f8] ss:$36 sps:$4 sm:$0xff]  }
 0x7ea   :  { %13486 = vmatpush1.bf16.msra.mxu1 %v21692_v55  ;;  %13446 = vmatprep.subr.bf16.mxu0 %v21697_v49  ;;  %v21739_v38 = vld [vmem:[#allocation13 + $0x1534] ss:$36 sps:$4 sm:$0xff]  }
 0x7eb   :  { %13487 = vmatprep.subr.bf16.mxu1 %v21700_v12  ;;  %v21742_v55 = vld [vmem:[#allocation13 + $0x19b4] ss:$36 sps:$4 sm:$0xff]  }
 0x7ec   :  { %v21737_v49 = vld [vmem:[#allocation13 + $0x1530] ss:$36 sps:$4 sm:$0xff]  }
 0x7ed   :  { %13447 = vmatpush1.bf16.msra.mxu0 %v21695_v61  ;;  %v21740_v12 = vld [vmem:[#allocation13 + $0x19b0] ss:$36 sps:$4 sm:$0xff]  }
 0x7ee   :  { %13488 = vmatpush1.bf16.msra.mxu1 %v21698_v62  ;;  %13448 = vmatprep.subr.bf16.mxu0 %v21703_v34  ;;  %v21745_v61 = vld [vmem:[#allocation13 + $0x14ec] ss:$36 sps:$4 sm:$0xff]  }
 0x7ef   :  { %13489 = vmatprep.subr.bf16.mxu1 %v21706_v2  ;;  %v21748_v62 = vld [vmem:[#allocation13 + $0x196c] ss:$36 sps:$4 sm:$0xff]  }
 0x7f0   :  { %v21743_v34 = vld [vmem:[#allocation13 + $0x14e8] ss:$36 sps:$4 sm:$0xff]  }
 0x7f1   :  { %13449 = vmatpush1.bf16.msra.mxu0 %v21701_v57  ;;  %v21746_v2 = vld [vmem:[#allocation13 + $0x1968] ss:$36 sps:$4 sm:$0xff]  }
 0x7f2   :  { %13490 = vmatpush1.bf16.msra.mxu1 %v21704_v28  ;;  %13450 = vmatprep.subr.bf16.mxu0 %v21709_v6  ;;  %v21751_v57 = vld [vmem:[#allocation13 + $0x14a4] ss:$36 sps:$4 sm:$0xff]  }
 0x7f3   :  { %13491 = vmatprep.subr.bf16.mxu1 %v21712_v8  ;;  %v21754_v28 = vld [vmem:[#allocation13 + $0x1924] ss:$36 sps:$4 sm:$0xff]  }
 0x7f4   :  { %v21749_v6 = vld [vmem:[#allocation13 + $0x14a0] ss:$36 sps:$4 sm:$0xff]  }
 0x7f5   :  { %13451 = vmatpush1.bf16.msra.mxu0 %v21707_v35  ;;  %v21752_v8 = vld [vmem:[#allocation13 + $0x1920] ss:$36 sps:$4 sm:$0xff]  }
 0x7f6   :  { %13492 = vmatpush1.bf16.msra.mxu1 %v21710_v18  ;;  %13452 = vmatprep.subr.bf16.mxu0 %v21715_v9  ;;  %v21757_v35 = vld [vmem:[#allocation13 + $0x145c] ss:$36 sps:$4 sm:$0xff]  }
 0x7f7   :  { %13493 = vmatprep.subr.bf16.mxu1 %v21718_v25  ;;  %v21760_v18 = vld [vmem:[#allocation13 + $0x18dc] ss:$36 sps:$4 sm:$0xff]  }
 0x7f8   :  { %v21755_v9 = vld [vmem:[#allocation13 + $0x1458] ss:$36 sps:$4 sm:$0xff]  }
 0x7f9   :  { %13453 = vmatpush2.bf16.msra.mxu0 %v21713_v40  ;;  %v21758_v25 = vld [vmem:[#allocation13 + $0x18d8] ss:$36 sps:$4 sm:$0xff]  }
 0x7fa   :  { %13494 = vmatpush2.bf16.msra.mxu1 %v21716_v44  ;;  %13454 = vmatprep.subr.bf16.mxu0 %v21721_v29  ;;  %v21763_v40 = vld [vmem:[#allocation13 + $0x1d14] ss:$36 sps:$4 sm:$0xff]  }
 0x7fb   :  { %13495 = vmatprep.subr.bf16.mxu1 %v21724_v13  ;;  %v21766_v44 = vld [vmem:[#allocation13 + $0x2194] ss:$36 sps:$4 sm:$0xff]  }
 0x7fc   :  { %v21761_v29 = vld [vmem:[#allocation13 + $0x1d10] ss:$36 sps:$4 sm:$0xff]  }
 0x7fd   :  { %13455 = vmatpush2.bf16.msra.mxu0 %v21719_v20  ;;  %v21764_v13 = vld [vmem:[#allocation13 + $0x2190] ss:$36 sps:$4 sm:$0xff]  }
 0x7fe   :  { %13496 = vmatpush2.bf16.msra.mxu1 %v21722_v21  ;;  %13456 = vmatprep.subr.bf16.mxu0 %v21727_v53  ;;  %v21769_v20 = vld [vmem:[#allocation13 + $0x1ccc] ss:$36 sps:$4 sm:$0xff]  }
 0x7ff   :  { %13497 = vmatprep.subr.bf16.mxu1 %v21730_v60  ;;  %v21772_v53 = vld [vmem:[#allocation13 + $0x214c] ss:$36 sps:$4 sm:$0xff]  }
 0x801   :  { %13457 = vmatpush2.bf16.msra.mxu0 %v21725_v37 }
 0x802   :  { %13498 = vmatpush2.bf16.msra.mxu1 %v21728_v32  ;;  %13458 = vmatprep.subr.bf16.mxu0 %v21733_v48  ;;  %v21767_v32 = vld [vmem:[#allocation13 + $0x1cc8] ss:$36 sps:$4 sm:$0xff]  }
 0x803   :  { %13499 = vmatprep.subr.bf16.mxu1 %v21736_v47  ;;  %v21770_v47 = vld [vmem:[#allocation13 + $0x2148] ss:$36 sps:$4 sm:$0xff]  }
 0x805   :  { %13459 = vmatpush2.bf16.msra.mxu0 %v21731_v59  ;;  %v21775_v59 = vld [vmem:[#allocation13 + $0x1c84] ss:$36 sps:$4 sm:$0xff]  }
 0x806   :  { %13500 = vmatpush2.bf16.msra.mxu1 %v21734_v1  ;;  %13460 = vmatprep.subr.bf16.mxu0 %v21739_v38 }
 0x807   :  { %13501 = vmatprep.subr.bf16.mxu1 %v21742_v55 }
 0x809   :  { %13461 = vmatpush2.bf16.msra.mxu0 %v21737_v49 }
 0x80a   :  { %13502 = vmatpush2.bf16.msra.mxu1 %v21740_v12  ;;  %13462 = vmatprep.subr.bf16.mxu0 %v21745_v61 }
 0x80b   :  { %13503 = vmatprep.subr.bf16.mxu1 %v21748_v62  ;;  %v21773_v62 = vld [vmem:[#allocation13 + $0x1c80] ss:$36 sps:$4 sm:$0xff]  }
 0x80d   :  { %13463 = vmatpush2.bf16.msra.mxu0 %v21743_v34 }
 0x80e   :  { %13504 = vmatpush2.bf16.msra.mxu1 %v21746_v2  ;;  %13464 = vmatprep.subr.bf16.mxu0 %v21751_v57  ;;  %v21776_v2 = vld [vmem:[#allocation13 + $0x2100] ss:$36 sps:$4 sm:$0xff]  }
 0x80f   :  { %13505 = vmatprep.subr.bf16.mxu1 %v21754_v28  ;;  %v21781_v57 = vld [vmem:[#allocation13 + $0x1c3c] ss:$36 sps:$4 sm:$0xff]  }
 0x811   :  { %13465 = vmatpush2.bf16.msra.mxu0 %v21749_v6  ;;  %v21784_v6 = vld [vmem:[#allocation13 + $0x20bc] ss:$36 sps:$4 sm:$0xff]  }
 0x812   :  { %13506 = vmatpush2.bf16.msra.mxu1 %v21752_v8  ;;  %13466 = vmatprep.subr.bf16.mxu0 %v21757_v35  ;;  %v21782_v8 = vld [vmem:[#allocation13 + $0x20b8] ss:$36 sps:$4 sm:$0xff]  }
 0x813   :  { %13507 = vmatprep.subr.bf16.mxu1 %v21760_v18  ;;  %v21787_v35 = vld [vmem:[#allocation13 + $0x1bf4] ss:$36 sps:$4 sm:$0xff]  }
 0x814   :  { %v21790_v18 = vld [vmem:[#allocation13 + $0x2074] ss:$36 sps:$4 sm:$0xff]  }
 0x815   :  { %13467 = vmatpush2.bf16.msra.mxu0 %v21755_v9  ;;  %v21785_v9 = vld [vmem:[#allocation13 + $0x1bf0] ss:$36 sps:$4 sm:$0xff]  }
 0x816   :  { %13508 = vmatpush2.bf16.msra.mxu1 %v21758_v25  ;;  %13518 = vmatprep.subr.bf16.mxu0 %v21763_v40  ;;  %v21788_v25 = vld [vmem:[#allocation13 + $0x2070] ss:$36 sps:$4 sm:$0xff]  }
 0x817   :  { %13559 = vmatprep.subr.bf16.mxu1 %v21766_v44  ;;  %v21793_v40 = vld [vmem:[#allocation13 + $0x1bac] ss:$36 sps:$4 sm:$0xff]  }
 0x818   :  { %v13224_v21 = vpop.f32.mrf.mxu0  ;;  %13469 = vmatmul.mubr.bf16.vlgmr.msra.gmra.mxu0 %v23381_v30  ;;  %v21796_v44 = vld [vmem:[#allocation13 + $0x202c] ss:$36 sps:$4 sm:$0xff]  }
 0x819   :  { %v13225_v60 = vadd.f32 %v13224_v21, %v23565_v36  ;;  %v13265_v37 = vpop.f32.mrf.mxu1  ;;  %13510 = vmatmul.mubr.bf16.vlgmr.msra.gmra.mxu1 %v23383_v56  ;;  %13519 = vmatpush1.bf16.msra.mxu0 %v21761_v29  ;;  %v21778_v36 = vld [vmem:[#allocation13 + $0x2104] ss:$36 sps:$4 sm:$0xff]  }
 0x81a   :  { %13550 = vmatprep.mubr.bf16.mxu0 %v23385_v33  ;;  %13560 = vmatpush1.bf16.msra.mxu1 %v21764_v13  ;;  %v13226_v48 = vpop.f32.mrf.mxu0  ;;  %v21791_v29 = vld [vmem:[#allocation13 + $0x1ba8] ss:$36 sps:$4 sm:$0xff]  }
 0x81b   :  { %v23575_v1 = vadd.f32 %v13265_v37, %v13225_v60  ;;  %13591 = vmatprep.mubr.bf16.mxu1 %v23390_v46  ;;  %v13227_v38 = vadd.f32 %v13226_v48, %v23569_v58  ;;  %v13267_v55 = vpop.f32.mrf.mxu1  ;;  %13520 = vmatprep.subr.bf16.mxu0 %v21769_v20  ;;  %v21779_v58 = vld [vmem:[#allocation13 + $0x1c38] ss:$36 sps:$4 sm:$0xff]   ;;  %v21794_v13 = vld [vmem:[#allocation13 + $0x2028] ss:$36 sps:$4 sm:$0xff]   ;;  %v21800_v60 = vld [vmem:[#allocation13 + $0x1fe0] ss:$36 sps:$4 sm:$0xff]  }
 0x81c   :  { %v13228_v49 = vpop.f32.mrf.mxu0  ;;  %13561 = vmatprep.subr.bf16.mxu1 %v21772_v53  ;;  %v21799_v20 = vld [vmem:[#allocation13 + $0x1b64] ss:$36 sps:$4 sm:$0xff]   ;;  %v21805_v37 = vld [vmem:[#allocation13 + $0x1b1c] ss:$36 sps:$4 sm:$0xff]  }
 0x81d   :  { %v23579_v12 = vadd.f32 %v13267_v55, %v13227_v38  ;;  %v13269_v61 = vpop.f32.mrf.mxu1  ;;  %13521 = vmatpush1.bf16.msra.mxu0 %v21767_v32  ;;  %v21802_v21 = vld [vmem:[#allocation13 + $0x1fe4] ss:$36 sps:$4 sm:$0xff]   ;;  %v21808_v32 = vld [vmem:[#allocation13 + $0x1f9c] ss:$36 sps:$4 sm:$0xff]   ;;  %v21814_v38 = vld [vmem:[#allocation13 + $0x23d4] ss:$36 sps:$4 sm:$0xff]  }
 0x81e   :  { %13562 = vmatpush1.bf16.msra.mxu1 %v21770_v47  ;;  %v13229_v34 = vpop.f32.mrf.mxu0  ;;  %13522 = vmatprep.subr.bf16.mxu0 %v21775_v59  ;;  %v21797_v53 = vld [vmem:[#allocation13 + $0x1b60] ss:$36 sps:$4 sm:$0xff]   ;;  %v21803_v48 = vld [vmem:[#allocation13 + $0x1b18] ss:$36 sps:$4 sm:$0xff]   ;;  %v21809_v55 = vld [vmem:[#allocation13 + $0x1f50] ss:$36 sps:$4 sm:$0xff]  }
 0x81f   :  { %v13270_v28 = vpop.f32.mrf.mxu1  ;;  %13563 = vmatprep.subr.bf16.mxu1 %v21778_v36  ;;  %v21806_v47 = vld [vmem:[#allocation13 + $0x1f98] ss:$36 sps:$4 sm:$0xff]   ;;  %v21812_v36 = vld [vmem:[#allocation13 + $0x23d0] ss:$36 sps:$4 sm:$0xff]   ;;  %v21818_v34 = vld [vmem:[#allocation13 + $0x2388] ss:$36 sps:$4 sm:$0xff]  }
 0x820   :  { %v21811_v59 = vld [vmem:[#allocation13 + $0x1f54] ss:$36 sps:$4 sm:$0xff]   ;;  %v21817_v49 = vld [vmem:[#allocation13 + $0x1f0c] ss:$36 sps:$4 sm:$0xff]   ;;  %v21821_v28 = vld [vmem:[#allocation13 + $0x1ec0] ss:$36 sps:$4 sm:$0xff]  }
 0x821   :  { %13523 = vmatpush1.bf16.msra.mxu0 %v21773_v62  ;;  %v21820_v61 = vld [vmem:[#allocation13 + $0x238c] ss:$36 sps:$4 sm:$0xff]  }
 0x822   :  { %13564 = vmatpush1.bf16.msra.mxu1 %v21776_v2  ;;  %13524 = vmatprep.subr.bf16.mxu0 %v21781_v57  ;;  %v21815_v62 = vld [vmem:[#allocation13 + $0x1f08] ss:$36 sps:$4 sm:$0xff]  }
 0x823   :  { %13565 = vmatprep.subr.bf16.mxu1 %v21784_v6  ;;  %v21823_v2 = vld [vmem:[#allocation13 + $0x1ec4] ss:$36 sps:$4 sm:$0xff]  }
 0x824   :  { %v21826_v57 = vld [vmem:[#allocation13 + $0x2344] ss:$36 sps:$4 sm:$0xff]  }
 0x825   :  { %13525 = vmatpush1.bf16.msra.mxu0 %v21779_v58  ;;  %v21824_v6 = vld [vmem:[#allocation13 + $0x2340] ss:$36 sps:$4 sm:$0xff]  }
 0x826   :  { %13566 = vmatpush1.bf16.msra.mxu1 %v21782_v8  ;;  %13526 = vmatprep.subr.bf16.mxu0 %v21787_v35  ;;  %v21829_v58 = vld [vmem:[#allocation13 + $0x1e7c] ss:$36 sps:$4 sm:$0xff]  }
 0x827   :  { %13567 = vmatprep.subr.bf16.mxu1 %v21790_v18  ;;  %v21832_v8 = vld [vmem:[#allocation13 + $0x22fc] ss:$36 sps:$4 sm:$0xff]  }
 0x828   :  { %v21827_v35 = vld [vmem:[#allocation13 + $0x1e78] ss:$36 sps:$4 sm:$0xff]  }
 0x829   :  { %13527 = vmatpush1.bf16.msra.mxu0 %v21785_v9  ;;  %v21830_v18 = vld [vmem:[#allocation13 + $0x22f8] ss:$36 sps:$4 sm:$0xff]  }
 0x82a   :  { %13568 = vmatpush1.bf16.msra.mxu1 %v21788_v25  ;;  %13528 = vmatprep.subr.bf16.mxu0 %v21793_v40  ;;  %v21835_v9 = vld [vmem:[#allocation13 + $0x1e34] ss:$36 sps:$4 sm:$0xff]  }
 0x82b   :  { %13569 = vmatprep.subr.bf16.mxu1 %v21796_v44  ;;  %v21838_v25 = vld [vmem:[#allocation13 + $0x22b4] ss:$36 sps:$4 sm:$0xff]  }
 0x82c   :  { %v21833_v40 = vld [vmem:[#allocation13 + $0x1e30] ss:$36 sps:$4 sm:$0xff]  }
 0x82d   :  { %13529 = vmatpush1.bf16.msra.mxu0 %v21791_v29  ;;  %v21836_v44 = vld [vmem:[#allocation13 + $0x22b0] ss:$36 sps:$4 sm:$0xff]  }
 0x82e   :  { %13570 = vmatpush1.bf16.msra.mxu1 %v21794_v13  ;;  %13530 = vmatprep.subr.bf16.mxu0 %v21799_v20  ;;  %v21841_v29 = vld [vmem:[#allocation13 + $0x1dec] ss:$36 sps:$4 sm:$0xff]  }
 0x82f   :  { %13571 = vmatprep.subr.bf16.mxu1 %v21802_v21  ;;  %v21844_v13 = vld [vmem:[#allocation13 + $0x226c] ss:$36 sps:$4 sm:$0xff]  }
 0x830   :  { %v21839_v20 = vld [vmem:[#allocation13 + $0x1de8] ss:$36 sps:$4 sm:$0xff]  }
 0x831   :  { %13531 = vmatpush1.bf16.msra.mxu0 %v21797_v53  ;;  %v21842_v21 = vld [vmem:[#allocation13 + $0x2268] ss:$36 sps:$4 sm:$0xff]  }
 0x832   :  { %13572 = vmatpush1.bf16.msra.mxu1 %v21800_v60  ;;  %13532 = vmatprep.subr.bf16.mxu0 %v21805_v37  ;;  %v21847_v53 = vld [vmem:[#allocation13 + $0x1da4] ss:$36 sps:$4 sm:$0xff]  }
 0x833   :  { %13573 = vmatprep.subr.bf16.mxu1 %v21808_v32  ;;  %v21850_v60 = vld [vmem:[#allocation13 + $0x2224] ss:$36 sps:$4 sm:$0xff]  }
 0x834   :  { %v21845_v37 = vld [vmem:[#allocation13 + $0x1da0] ss:$36 sps:$4 sm:$0xff]  }
 0x835   :  { %13533 = vmatpush1.bf16.msra.mxu0 %v21803_v48  ;;  %v21848_v32 = vld [vmem:[#allocation13 + $0x2220] ss:$36 sps:$4 sm:$0xff]  }
 0x836   :  { %13574 = vmatpush1.bf16.msra.mxu1 %v21806_v47  ;;  %13534 = vmatprep.subr.bf16.mxu0 %v21811_v59  ;;  %v21853_v48 = vld [vmem:[#allocation13 + $0x1d5c] ss:$36 sps:$4 sm:$0xff]  }
 0x837   :  { %13575 = vmatprep.subr.bf16.mxu1 %v21814_v38  ;;  %v21856_v47 = vld [vmem:[#allocation13 + $0x21dc] ss:$36 sps:$4 sm:$0xff]  }
 0x838   :  { %v21851_v59 = vld [vmem:[#allocation13 + $0x1d58] ss:$36 sps:$4 sm:$0xff]  }
 0x839   :  { %13535 = vmatpush2.bf16.msra.mxu0 %v21809_v55  ;;  %v21854_v38 = vld [vmem:[#allocation13 + $0x21d8] ss:$36 sps:$4 sm:$0xff]  }
 0x83a   :  { %13576 = vmatpush2.bf16.msra.mxu1 %v21812_v36  ;;  %13536 = vmatprep.subr.bf16.mxu0 %v21817_v49  ;;  %v21859_v55 = vld [vmem:[#allocation13 + $0x2614] ss:$36 sps:$4 sm:$0xff]   ;;  %v22605_v49 = vld [vmem:[#allocation14] sm:$0xff] }
 0x83b   :  { %13577 = vmatprep.subr.bf16.mxu1 %v21820_v61  ;;  %v21862_v36 = vld [vmem:[#allocation13 + $0x2a94] ss:$36 sps:$4 sm:$0xff]   ;;  %v4664_v61 = vrot.slane %v22605_v49, %v23335_v39 }
 0x83d   :  { %13537 = vmatpush2.bf16.msra.mxu0 %v21815_v62  ;;  %v21857_v62 = vld [vmem:[#allocation13 + $0x2610] ss:$36 sps:$4 sm:$0xff]  }
 0x83e   :  { %13578 = vmatpush2.bf16.msra.mxu1 %v21818_v34  ;;  %13538 = vmatprep.subr.bf16.mxu0 %v21823_v2  ;;  %v21860_v34 = vld [vmem:[#allocation13 + $0x2a90] ss:$36 sps:$4 sm:$0xff]   ;;  %v4668_v2 = vrot.slane %v22605_v49, %v23297_v51 }
 0x83f   :  { %13579 = vmatprep.subr.bf16.mxu1 %v21826_v57  ;;  %v21865_v57 = vld [vmem:[#allocation13 + $0x25cc] ss:$36 sps:$4 sm:$0xff]  }
 0x840   :  { %v21884_v49 = vld [vmem:[#allocation13 + $0x2970] ss:$36 sps:$4 sm:$0xff]  }
 0x841   :  { %13539 = vmatpush2.bf16.msra.mxu0 %v21821_v28 }
 0x842   :  { %13580 = vmatpush2.bf16.msra.mxu1 %v21824_v6  ;;  %13540 = vmatprep.subr.bf16.mxu0 %v21829_v58  ;;  %v21868_v6 = vld [vmem:[#allocation13 + $0x2a4c] ss:$36 sps:$4 sm:$0xff]  }
 0x843   :  { %13581 = vmatprep.subr.bf16.mxu1 %v21832_v8 }
 0x845   :  { %13541 = vmatpush2.bf16.msra.mxu0 %v21827_v35  ;;  %v21863_v35 = vld [vmem:[#allocation13 + $0x25c8] ss:$36 sps:$4 sm:$0xff]  }
 0x846   :  { %13582 = vmatpush2.bf16.msra.mxu1 %v21830_v18  ;;  %13542 = vmatprep.subr.bf16.mxu0 %v21835_v9  ;;  %v21866_v18 = vld [vmem:[#allocation13 + $0x2a48] ss:$36 sps:$4 sm:$0xff]  }
 0x847   :  { %13583 = vmatprep.subr.bf16.mxu1 %v21838_v25  ;;  %v21871_v9 = vld [vmem:[#allocation13 + $0x2584] ss:$36 sps:$4 sm:$0xff]  }
 0x849   :  { %13543 = vmatpush2.bf16.msra.mxu0 %v21833_v40 }
 0x84a   :  { %13584 = vmatpush2.bf16.msra.mxu1 %v21836_v44  ;;  %13544 = vmatprep.subr.bf16.mxu0 %v21841_v29  ;;  %v21874_v44 = vld [vmem:[#allocation13 + $0x2a04] ss:$36 sps:$4 sm:$0xff]  }
 0x84b   :  { %13585 = vmatprep.subr.bf16.mxu1 %v21844_v13 }
 0x84d   :  { %13545 = vmatpush2.bf16.msra.mxu0 %v21839_v20 }
 0x84e   :  { %13586 = vmatpush2.bf16.msra.mxu1 %v21842_v21  ;;  %13546 = vmatprep.subr.bf16.mxu0 %v21847_v53  ;;  %v21869_v21 = vld [vmem:[#allocation13 + $0x2580] ss:$36 sps:$4 sm:$0xff]  }
 0x84f   :  { %13587 = vmatprep.subr.bf16.mxu1 %v21850_v60  ;;  %v21872_v60 = vld [vmem:[#allocation13 + $0x2a00] ss:$36 sps:$4 sm:$0xff]  }
 0x851   :  { %13547 = vmatpush2.bf16.msra.mxu0 %v21845_v37  ;;  %v21877_v37 = vld [vmem:[#allocation13 + $0x253c] ss:$36 sps:$4 sm:$0xff]  }
 0x852   :  { %13588 = vmatpush2.bf16.msra.mxu1 %v21848_v32  ;;  %13548 = vmatprep.subr.bf16.mxu0 %v21853_v48  ;;  %v21880_v48 = vld [vmem:[#allocation13 + $0x29bc] ss:$36 sps:$4 sm:$0xff]  }
 0x853   :  { %13589 = vmatprep.subr.bf16.mxu1 %v21856_v47  ;;  %v21875_v47 = vld [vmem:[#allocation13 + $0x2538] ss:$36 sps:$4 sm:$0xff]  }
 0x855   :  { %13549 = vmatpush2.bf16.msra.mxu0 %v21851_v59  ;;  %v21878_v59 = vld [vmem:[#allocation13 + $0x29b8] ss:$36 sps:$4 sm:$0xff]  }
 0x856   :  { %13590 = vmatpush2.bf16.msra.mxu1 %v21854_v38  ;;  %13600 = vmatprep.subr.bf16.mxu0 %v21859_v55  ;;  %v21883_v38 = vld [vmem:[#allocation13 + $0x24f4] ss:$36 sps:$4 sm:$0xff]  }
 0x857   :  { %13641 = vmatprep.subr.bf16.mxu1 %v21862_v36  ;;  %v21886_v55 = vld [vmem:[#allocation13 + $0x2974] ss:$36 sps:$4 sm:$0xff]  }
 0x858   :  { %v13306_v28 = vpop.f32.mrf.mxu0  ;;  %13551 = vmatmul.mubr.bf16.vlgmr.msra.gmra.mxu0 %v23414_v4  ;;  %v21881_v36 = vld [vmem:[#allocation13 + $0x24f0] ss:$36 sps:$4 sm:$0xff]  }
 0x859   :  { %v13307_v58 = vadd.f32 %v13306_v28, %v4664_v61  ;;  %v13347_v8 = vpop.f32.mrf.mxu1  ;;  %13592 = vmatmul.mubr.bf16.vlgmr.msra.gmra.mxu1 %v23416_v5  ;;  %13601 = vmatpush1.bf16.msra.mxu0 %v21857_v62  ;;  %v21889_v61 = vld [vmem:[#allocation13 + $0x24ac] ss:$36 sps:$4 sm:$0xff]   ;;  %v21898_v28 = vld [vmem:[#allocation13 + $0x28e4] ss:$36 sps:$4 sm:$0xff]  }
 0x85a   :  { %13632 = vmatprep.mubr.bf16.mxu0 %v23419_v7  ;;  %13642 = vmatpush1.bf16.msra.mxu1 %v21860_v34  ;;  %v13308_v39 = vpop.f32.mrf.mxu0  ;;  %v21892_v62 = vld [vmem:[#allocation13 + $0x292c] ss:$36 sps:$4 sm:$0xff]  }
 0x85b   :  { %v23586_v25 = vadd.f32 %v13347_v8, %v13307_v58  ;;  %13673 = vmatprep.mubr.bf16.mxu1 %v23422_v11  ;;  %v13309_v51 = vadd.f32 %v13308_v39, %v4668_v2  ;;  %v13349_v40 = vpop.f32.mrf.mxu1  ;;  %13602 = vmatprep.subr.bf16.mxu0 %v21865_v57  ;;  %v21887_v34 = vld [vmem:[#allocation13 + $0x24a8] ss:$36 sps:$4 sm:$0xff]   ;;  %v21896_v58 = vld [vmem:[#allocation13 + $0x28e0] ss:$36 sps:$4 sm:$0xff]   ;;  %v21899_v39 = vld [vmem:[#allocation13 + $0x2418] ss:$36 sps:$4 sm:$0xff]  }
 0x85c   :  { %v13310_v29 = vpop.f32.mrf.mxu0  ;;  %13643 = vmatprep.subr.bf16.mxu1 %v21868_v6  ;;  %v21890_v2 = vld [vmem:[#allocation13 + $0x2928] ss:$36 sps:$4 sm:$0xff]   ;;  %v21893_v6 = vld [vmem:[#allocation13 + $0x2460] ss:$36 sps:$4 sm:$0xff]  }
 0x85d   :  { %v23589_v13 = vadd.f32 %v13349_v40, %v13309_v51  ;;  %v13351_v20 = vpop.f32.mrf.mxu1  ;;  %13603 = vmatpush1.bf16.msra.mxu0 %v21863_v35  ;;  %v21895_v57 = vld [vmem:[#allocation13 + $0x2464] ss:$36 sps:$4 sm:$0xff]   ;;  %v21901_v8 = vld [vmem:[#allocation13 + $0x241c] ss:$36 sps:$4 sm:$0xff]   ;;  %v21910_v51 = vld [vmem:[#allocation13 + $0x2cd4] ss:$36 sps:$4 sm:$0xff]  }
 0x85e   :  { %13644 = vmatpush1.bf16.msra.mxu1 %v21866_v18  ;;  %v13311_v53 = vpop.f32.mrf.mxu0  ;;  %13604 = vmatprep.subr.bf16.mxu0 %v21871_v9  ;;  %v21904_v35 = vld [vmem:[#allocation13 + $0x289c] ss:$36 sps:$4 sm:$0xff]   ;;  %v21907_v9 = vld [vmem:[#allocation13 + $0x2854] ss:$36 sps:$4 sm:$0xff]   ;;  %v21913_v29 = vld [vmem:[#allocation13 + $0x280c] ss:$36 sps:$4 sm:$0xff]  }
 0x85f   :  { %v13352_v32 = vpop.f32.mrf.mxu1  ;;  %13645 = vmatprep.subr.bf16.mxu1 %v21874_v44  ;;  %v21902_v18 = vld [vmem:[#allocation13 + $0x2898] ss:$36 sps:$4 sm:$0xff]   ;;  %v21905_v40 = vld [vmem:[#allocation13 + $0x2850] ss:$36 sps:$4 sm:$0xff]   ;;  %v21914_v53 = vld [vmem:[#allocation13 + $0x2c88] ss:$36 sps:$4 sm:$0xff]  }
 0x860   :  { %v21908_v44 = vld [vmem:[#allocation13 + $0x2cd0] ss:$36 sps:$4 sm:$0xff]   ;;  %v21917_v32 = vld [vmem:[#allocation13 + $0x27c0] ss:$36 sps:$4 sm:$0xff]  }
 0x861   :  { %13605 = vmatpush1.bf16.msra.mxu0 %v21869_v21  ;;  %v21916_v20 = vld [vmem:[#allocation13 + $0x2c8c] ss:$36 sps:$4 sm:$0xff]  }
 0x862   :  { %13646 = vmatpush1.bf16.msra.mxu1 %v21872_v60  ;;  %13606 = vmatprep.subr.bf16.mxu0 %v21877_v37  ;;  %v21911_v21 = vld [vmem:[#allocation13 + $0x2808] ss:$36 sps:$4 sm:$0xff]  }
 0x863   :  { %13647 = vmatprep.subr.bf16.mxu1 %v21880_v48  ;;  %v21919_v60 = vld [vmem:[#allocation13 + $0x27c4] ss:$36 sps:$4 sm:$0xff]  }
 0x864   :  { %v21922_v37 = vld [vmem:[#allocation13 + $0x2c44] ss:$36 sps:$4 sm:$0xff]  }
 0x865   :  { %13607 = vmatpush1.bf16.msra.mxu0 %v21875_v47  ;;  %v21920_v48 = vld [vmem:[#allocation13 + $0x2c40] ss:$36 sps:$4 sm:$0xff]  }
 0x866   :  { %13648 = vmatpush1.bf16.msra.mxu1 %v21878_v59  ;;  %13608 = vmatprep.subr.bf16.mxu0 %v21883_v38  ;;  %v21925_v47 = vld [vmem:[#allocation13 + $0x277c] ss:$36 sps:$4 sm:$0xff]  }
 0x867   :  { %13649 = vmatprep.subr.bf16.mxu1 %v21886_v55  ;;  %v21928_v59 = vld [vmem:[#allocation13 + $0x2bfc] ss:$36 sps:$4 sm:$0xff]  }
 0x868   :  { %v21923_v38 = vld [vmem:[#allocation13 + $0x2778] ss:$36 sps:$4 sm:$0xff]  }
 0x869   :  { %13609 = vmatpush1.bf16.msra.mxu0 %v21881_v36  ;;  %v21926_v55 = vld [vmem:[#allocation13 + $0x2bf8] ss:$36 sps:$4 sm:$0xff]  }
 0x86a   :  { %13650 = vmatpush1.bf16.msra.mxu1 %v21884_v49  ;;  %13610 = vmatprep.subr.bf16.mxu0 %v21889_v61  ;;  %v21931_v36 = vld [vmem:[#allocation13 + $0x2734] ss:$36 sps:$4 sm:$0xff]  }
 0x86b   :  { %13651 = vmatprep.subr.bf16.mxu1 %v21892_v62  ;;  %v21934_v49 = vld [vmem:[#allocation13 + $0x2bb4] ss:$36 sps:$4 sm:$0xff]  }
 0x86c   :  { %v21929_v61 = vld [vmem:[#allocation13 + $0x2730] ss:$36 sps:$4 sm:$0xff]  }
 0x86d   :  { %13611 = vmatpush1.bf16.msra.mxu0 %v21887_v34  ;;  %v21932_v62 = vld [vmem:[#allocation13 + $0x2bb0] ss:$36 sps:$4 sm:$0xff]  }
 0x86e   :  { %13652 = vmatpush1.bf16.msra.mxu1 %v21890_v2  ;;  %13612 = vmatprep.subr.bf16.mxu0 %v21895_v57  ;;  %v21937_v34 = vld [vmem:[#allocation13 + $0x26ec] ss:$36 sps:$4 sm:$0xff]  }
 0x86f   :  { %13653 = vmatprep.subr.bf16.mxu1 %v21898_v28  ;;  %v21940_v2 = vld [vmem:[#allocation13 + $0x2b6c] ss:$36 sps:$4 sm:$0xff]  }
 0x870   :  { %v21935_v57 = vld [vmem:[#allocation13 + $0x26e8] ss:$36 sps:$4 sm:$0xff]  }
 0x871   :  { %13613 = vmatpush1.bf16.msra.mxu0 %v21893_v6  ;;  %v21938_v28 = vld [vmem:[#allocation13 + $0x2b68] ss:$36 sps:$4 sm:$0xff]  }
 0x872   :  { %13654 = vmatpush1.bf16.msra.mxu1 %v21896_v58  ;;  %13614 = vmatprep.subr.bf16.mxu0 %v21901_v8  ;;  %v21943_v6 = vld [vmem:[#allocation13 + $0x26a4] ss:$36 sps:$4 sm:$0xff]  }
 0x873   :  { %13655 = vmatprep.subr.bf16.mxu1 %v21904_v35  ;;  %v21946_v58 = vld [vmem:[#allocation13 + $0x2b24] ss:$36 sps:$4 sm:$0xff]  }
 0x874   :  { %v21941_v8 = vld [vmem:[#allocation13 + $0x26a0] ss:$36 sps:$4 sm:$0xff]  }
 0x875   :  { %13615 = vmatpush1.bf16.msra.mxu0 %v21899_v39  ;;  %v21944_v35 = vld [vmem:[#allocation13 + $0x2b20] ss:$36 sps:$4 sm:$0xff]  }
 0x876   :  { %13656 = vmatpush1.bf16.msra.mxu1 %v21902_v18  ;;  %13616 = vmatprep.subr.bf16.mxu0 %v21907_v9  ;;  %v21949_v39 = vld [vmem:[#allocation13 + $0x265c] ss:$36 sps:$4 sm:$0xff]  }
 0x877   :  { %13657 = vmatprep.subr.bf16.mxu1 %v21910_v51  ;;  %v21952_v18 = vld [vmem:[#allocation13 + $0x2adc] ss:$36 sps:$4 sm:$0xff]  }
 0x878   :  { %v21947_v9 = vld [vmem:[#allocation13 + $0x2658] ss:$36 sps:$4 sm:$0xff]  }
 0x879   :  { %13617 = vmatpush2.bf16.msra.mxu0 %v21905_v40  ;;  %v21950_v51 = vld [vmem:[#allocation13 + $0x2ad8] ss:$36 sps:$4 sm:$0xff]  }
 0x87a   :  { %13658 = vmatpush2.bf16.msra.mxu1 %v21908_v44  ;;  %13618 = vmatprep.subr.bf16.mxu0 %v21913_v29  ;;  %v21953_v40 = vld [vmem:[#allocation13 + $0x458] ss:$36 sps:$4 sm:$0xff]  }
 0x87b   :  { %13659 = vmatprep.subr.bf16.mxu1 %v21916_v20  ;;  %v21954_v44 = vld [vmem:[#allocation13 + $0x8d8] ss:$36 sps:$4 sm:$0xff]  }
 0x87c   :  { %v21955_v29 = vld [vmem:[#allocation13 + $0x218] ss:$36 sps:$4 sm:$0xff]  }
 0x87d   :  { %13619 = vmatpush2.bf16.msra.mxu0 %v21911_v21  ;;  %v21956_v20 = vld [vmem:[#allocation13 + $0x698] ss:$36 sps:$4 sm:$0xff]   ;;  %v21957_v21 = vld [vmem:[#allocation13 + $0x410] ss:$36 sps:$4 sm:$0xff]  }
 0x87e   :  { %13660 = vmatpush2.bf16.msra.mxu1 %v21914_v53  ;;  %13620 = vmatprep.subr.bf16.mxu0 %v21919_v60  ;;  %v21958_v60 = vld [vmem:[#allocation13 + $0x890] ss:$36 sps:$4 sm:$0xff]  }
 0x87f   :  { %13661 = vmatprep.subr.bf16.mxu1 %v21922_v37 }
 0x881   :  { %13621 = vmatpush2.bf16.msra.mxu0 %v21917_v32 }
 0x882   :  { %13662 = vmatpush2.bf16.msra.mxu1 %v21920_v48  ;;  %13622 = vmatprep.subr.bf16.mxu0 %v21925_v47  ;;  %v21959_v48 = vld [vmem:[#allocation13 + $0x1d0] ss:$36 sps:$4 sm:$0xff]  }
 0x883   :  { %13663 = vmatprep.subr.bf16.mxu1 %v21928_v59  ;;  %v21960_v59 = vld [vmem:[#allocation13 + $0x650] ss:$36 sps:$4 sm:$0xff]  }
 0x885   :  { %13623 = vmatpush2.bf16.msra.mxu0 %v21923_v38  ;;  %v21961_v38 = vld [vmem:[#allocation13 + $0x3c8] ss:$36 sps:$4 sm:$0xff]  }
 0x886   :  { %13664 = vmatpush2.bf16.msra.mxu1 %v21926_v55  ;;  %13624 = vmatprep.subr.bf16.mxu0 %v21931_v36 }
 0x887   :  { %13665 = vmatprep.subr.bf16.mxu1 %v21934_v49 }
 0x889   :  { %13625 = vmatpush2.bf16.msra.mxu0 %v21929_v61 }
 0x88a   :  { %13666 = vmatpush2.bf16.msra.mxu1 %v21932_v62  ;;  %13626 = vmatprep.subr.bf16.mxu0 %v21937_v34 }
 0x88b   :  { %13667 = vmatprep.subr.bf16.mxu1 %v21940_v2 }
 0x88d   :  { %13627 = vmatpush2.bf16.msra.mxu0 %v21935_v57  ;;  %v21964_v57 = vld [vmem:[#allocation13 + $0x608] ss:$36 sps:$4 sm:$0xff]  }
 0x88e   :  { %13668 = vmatpush2.bf16.msra.mxu1 %v21938_v28  ;;  %13628 = vmatprep.subr.bf16.mxu0 %v21943_v6  ;;  %v21965_v28 = vld [vmem:[#allocation13 + $0x380] ss:$36 sps:$4 sm:$0xff]  }
 0x88f   :  { %13669 = vmatprep.subr.bf16.mxu1 %v21946_v58  ;;  %v21968_v58 = vld [vmem:[#allocation13 + $0x5c0] ss:$36 sps:$4 sm:$0xff]  }
 0x891   :  { %13629 = vmatpush2.bf16.msra.mxu0 %v21941_v8  ;;  %v21969_v8 = vld [vmem:[#allocation13 + $0x338] ss:$36 sps:$4 sm:$0xff]  }
 0x892   :  { %13670 = vmatpush2.bf16.msra.mxu1 %v21944_v35  ;;  %13630 = vmatprep.subr.bf16.mxu0 %v21949_v39  ;;  %v21970_v35 = vld [vmem:[#allocation13 + $0x7b8] ss:$36 sps:$4 sm:$0xff]  }
 0x893   :  { %13671 = vmatprep.subr.bf16.mxu1 %v21952_v18  ;;  %v21971_v39 = vld [vmem:[#allocation13 + $0xf8] ss:$36 sps:$4 sm:$0xff]  }
 0x894   :  { %v21972_v18 = vld [vmem:[#allocation13 + $0x578] ss:$36 sps:$4 sm:$0xff]  }
 0x895   :  { %13631 = vmatpush2.bf16.msra.mxu0 %v21947_v9  ;;  %v21973_v9 = vld [vmem:[#allocation13 + $0x2f0] ss:$36 sps:$4 sm:$0xff]  }
 0x896   :  { %13672 = vmatpush2.bf16.msra.mxu1 %v21950_v51  ;;  %19118 = vmatprep.subr.bf16.mxu0 %v21953_v40  ;;  %v21974_v51 = vld [vmem:[#allocation13 + $0x770] ss:$36 sps:$4 sm:$0xff]  }
 0x897   :  { %19140 = vmatprep.subr.bf16.mxu1 %v21954_v44  ;;  %v21975_v40 = vld [vmem:[#allocation13 + $0xb0] ss:$36 sps:$4 sm:$0xff]  }
 0x898   :  { %v13388_v53 = vpop.f32.mrf.mxu0  ;;  %13633 = vmatmul.mubr.bf16.vlgmr.msra.gmra.mxu0 %v23437_v45  ;;  %v21976_v44 = vld [vmem:[#allocation13 + $0x530] ss:$36 sps:$4 sm:$0xff]  }
 0x899   :  { %v13389_v37 = vadd.f32 %v13388_v53, %v23586_v25  ;;  %v13429_v32 = vpop.f32.mrf.mxu1  ;;  %13674 = vmatmul.mubr.bf16.vlgmr.msra.gmra.mxu1 %v23439_v52  ;;  %19119 = vmatpush3.bf16.msra.mxu0 %v21955_v29  ;;  %v21962_v25 = vld [vmem:[#allocation13 + $0x848] ss:$36 sps:$4 sm:$0xff]  }
 0x89a   :  { %13714 = vmatprep.mubr.bf16.mxu0 %v23274_v24  ;;  %19141 = vmatpush3.bf16.msra.mxu1 %v21956_v20  ;;  %v13390_v47 = vpop.f32.mrf.mxu0  ;;  %v21963_v24 = vld [vmem:[#allocation13 + $0x188] ss:$36 sps:$4 sm:$0xff]  }
 0x89b   :  { %v23595_v55 = vadd.f32 %v13429_v32, %v13389_v37  ;;  %13754 = vmatprep.mubr.bf16.mxu1 %v23281_v50  ;;  %v13391_v36 = vadd.f32 %v13390_v47, %v23589_v13  ;;  %v13431_v49 = vpop.f32.mrf.mxu1  ;;  %19120 = vmatprep.subr.bf16.mxu0 %v21957_v21  ;;  %v21966_v50 = vld [vmem:[#allocation13 + $0x800] ss:$36 sps:$4 sm:$0xff]   ;;  %v21977_v29 = vld [vmem:[#allocation13 + $0x2a8] ss:$36 sps:$4 sm:$0xff]   ;;  %v21985_v47 = vld [vmem:[#allocation13 + $0xd58] ss:$36 sps:$4 sm:$0xff]  }
 0x89c   :  { %v13392_v61 = vpop.f32.mrf.mxu0  ;;  %19142 = vmatprep.subr.bf16.mxu1 %v21958_v60  ;;  %v21967_v13 = vld [vmem:[#allocation13 + $0x140] ss:$36 sps:$4 sm:$0xff]   ;;  %v21978_v20 = vld [vmem:[#allocation13 + $0x728] ss:$36 sps:$4 sm:$0xff]  }
 0x89d   :  { %v23599_v62 = vadd.f32 %v13431_v49, %v13391_v36  ;;  %v13433_v34 = vpop.f32.mrf.mxu1  ;;  %19121 = vmatpush3.bf16.msra.mxu0 %v21959_v48  ;;  %v21979_v21 = vld [vmem:[#allocation13 + $0x68] ss:$36 sps:$4 sm:$0xff]   ;;  %v21981_v60 = vld [vmem:[#allocation13 + $0x260] ss:$36 sps:$4 sm:$0xff]   ;;  %v21988_v36 = vld [vmem:[#allocation13 + $0xf98] ss:$36 sps:$4 sm:$0xff]  }
 0x89e   :  { %19143 = vmatpush3.bf16.msra.mxu1 %v21960_v59  ;;  %v13393_v2 = vpop.f32.mrf.mxu0  ;;  %19122 = vmatprep.subr.bf16.mxu0 %v21961_v38  ;;  %v21980_v53 = vld [vmem:[#allocation13 + $0x4e8] ss:$36 sps:$4 sm:$0xff]   ;;  %v21982_v37 = vld [vmem:[#allocation13 + $0x6e0] ss:$36 sps:$4 sm:$0xff]   ;;  %v21986_v59 = vld [vmem:[#allocation13 + $0x11d8] ss:$36 sps:$4 sm:$0xff]  }
 0x89f   :  { %v13434_v6 = vpop.f32.mrf.mxu1  ;;  %19144 = vmatprep.subr.bf16.mxu1 %v21962_v25  ;;  %v21983_v32 = vld [vmem:[#allocation13 + $0x20] ss:$36 sps:$4 sm:$0xff]   ;;  %v21987_v38 = vld [vmem:[#allocation13 + $0xb18] ss:$36 sps:$4 sm:$0xff]   ;;  %v21989_v49 = vld [vmem:[#allocation13 + $0xd10] ss:$36 sps:$4 sm:$0xff]  }
 0x8a0   :  { %v21984_v48 = vld [vmem:[#allocation13 + $0x4a0] ss:$36 sps:$4 sm:$0xff]   ;;  %v21990_v25 = vld [vmem:[#allocation13 + $0x1190] ss:$36 sps:$4 sm:$0xff]   ;;  %v21994_v2 = vld [vmem:[#allocation13 + $0x1148] ss:$36 sps:$4 sm:$0xff]  }
 0x8a1   :  { %19123 = vmatpush3.bf16.msra.mxu0 %v21963_v24  ;;  %v21991_v61 = vld [vmem:[#allocation13 + $0xad0] ss:$36 sps:$4 sm:$0xff]   ;;  %v21993_v24 = vld [vmem:[#allocation13 + $0xcc8] ss:$36 sps:$4 sm:$0xff]   ;;  %v21999_v6 = vld [vmem:[#allocation13 + $0xa40] ss:$36 sps:$4 sm:$0xff]  }
 0x8a2   :  { %19145 = vmatpush3.bf16.msra.mxu1 %v21964_v57  ;;  %19124 = vmatprep.subr.bf16.mxu0 %v21965_v28  ;;  %v21992_v34 = vld [vmem:[#allocation13 + $0xf50] ss:$36 sps:$4 sm:$0xff]   ;;  %v21995_v57 = vld [vmem:[#allocation13 + $0xa88] ss:$36 sps:$4 sm:$0xff]   ;;  %v21997_v28 = vld [vmem:[#allocation13 + $0xc80] ss:$36 sps:$4 sm:$0xff]  }
 0x8a3   :  { %19146 = vmatprep.subr.bf16.mxu1 %v21966_v50  ;;  %v22001_v50 = vld [vmem:[#allocation13 + $0xc38] ss:$36 sps:$4 sm:$0xff]  }
 0x8a5   :  { %19125 = vmatpush3.bf16.msra.mxu0 %v21967_v13  ;;  %v22002_v13 = vld [vmem:[#allocation13 + $0x10b8] ss:$36 sps:$4 sm:$0xff]  }
 0x8a6   :  { %19147 = vmatpush3.bf16.msra.mxu1 %v21968_v58  ;;  %19126 = vmatprep.subr.bf16.mxu0 %v21969_v8  ;;  %v22004_v58 = vld [vmem:[#allocation13 + $0xe78] ss:$36 sps:$4 sm:$0xff]   ;;  %v22005_v8 = vld [vmem:[#allocation13 + $0xbf0] ss:$36 sps:$4 sm:$0xff]  }
 0x8a7   :  { %19148 = vmatprep.subr.bf16.mxu1 %v21970_v35  ;;  %v22006_v35 = vld [vmem:[#allocation13 + $0x1070] ss:$36 sps:$4 sm:$0xff]  }
 0x8a9   :  { %19127 = vmatpush3.bf16.msra.mxu0 %v21971_v39  ;;  %v22007_v39 = vld [vmem:[#allocation13 + $0x9b0] ss:$36 sps:$4 sm:$0xff]  }
 0x8aa   :  { %19149 = vmatpush3.bf16.msra.mxu1 %v21972_v18  ;;  %19128 = vmatprep.subr.bf16.mxu0 %v21973_v9  ;;  %v22008_v18 = vld [vmem:[#allocation13 + $0xe30] ss:$36 sps:$4 sm:$0xff]   ;;  %v22009_v9 = vld [vmem:[#allocation13 + $0xba8] ss:$36 sps:$4 sm:$0xff]  }
 0x8ab   :  { %19150 = vmatprep.subr.bf16.mxu1 %v21974_v51  ;;  %v22010_v51 = vld [vmem:[#allocation13 + $0x1028] ss:$36 sps:$4 sm:$0xff]  }
 0x8ad   :  { %19129 = vmatpush3.bf16.msra.mxu0 %v21975_v40  ;;  %v22011_v40 = vld [vmem:[#allocation13 + $0x968] ss:$36 sps:$4 sm:$0xff]  }
 0x8ae   :  { %19151 = vmatpush3.bf16.msra.mxu1 %v21976_v44  ;;  %19130 = vmatprep.subr.bf16.mxu0 %v21977_v29  ;;  %v22012_v44 = vld [vmem:[#allocation13 + $0xde8] ss:$36 sps:$4 sm:$0xff]   ;;  %v22013_v29 = vld [vmem:[#allocation13 + $0xb60] ss:$36 sps:$4 sm:$0xff]  }
 0x8af   :  { %19152 = vmatprep.subr.bf16.mxu1 %v21978_v20  ;;  %v22014_v20 = vld [vmem:[#allocation13 + $0xfe0] ss:$36 sps:$4 sm:$0xff]  }
 0x8b1   :  { %19131 = vmatpush3.bf16.msra.mxu0 %v21979_v21  ;;  %v22015_v21 = vld [vmem:[#allocation13 + $0x920] ss:$36 sps:$4 sm:$0xff]  }
 0x8b2   :  { %19153 = vmatpush3.bf16.msra.mxu1 %v21980_v53  ;;  %19132 = vmatprep.subr.bf16.mxu0 %v21981_v60  ;;  %v22016_v53 = vld [vmem:[#allocation13 + $0xda0] ss:$36 sps:$4 sm:$0xff]   ;;  %v22017_v60 = vld [vmem:[#allocation13 + $0x1658] ss:$36 sps:$4 sm:$0xff]  }
 0x8b3   :  { %19154 = vmatprep.subr.bf16.mxu1 %v21982_v37  ;;  %v22018_v37 = vld [vmem:[#allocation13 + $0x1ad8] ss:$36 sps:$4 sm:$0xff]  }
 0x8b5   :  { %19133 = vmatpush3.bf16.msra.mxu0 %v21983_v32  ;;  %v22019_v32 = vld [vmem:[#allocation13 + $0x1418] ss:$36 sps:$4 sm:$0xff]  }
 0x8b6   :  { %19155 = vmatpush3.bf16.msra.mxu1 %v21984_v48  ;;  %19162 = vmatprep.subr.bf16.mxu0 %v21985_v47  ;;  %v22020_v48 = vld [vmem:[#allocation13 + $0x1898] ss:$36 sps:$4 sm:$0xff]   ;;  %v22021_v47 = vld [vmem:[#allocation13 + $0x1610] ss:$36 sps:$4 sm:$0xff]  }
 0x8b7   :  { %19184 = vmatprep.subr.bf16.mxu1 %v21986_v59 }
 0x8b8   :  { %13715 = vmatmul.mubr.bf16.vlgmr.msra.gmra.mxu0 %v23311_v22  ;;  %v21996_v22 = vld [vmem:[#allocation13 + $0xf08] ss:$36 sps:$4 sm:$0xff]  }
 0x8b9   :  { %13755 = vmatmul.mubr.bf16.vlgmr.msra.gmra.mxu1 %v23313_v23  ;;  %19163 = vmatpush3.bf16.msra.mxu0 %v21987_v38  ;;  %v21998_v23 = vld [vmem:[#allocation13 + $0x1100] ss:$36 sps:$4 sm:$0xff]   ;;  %v22022_v38 = vld [vmem:[#allocation13 + $0x1a90] ss:$36 sps:$4 sm:$0xff]  }
 0x8ba   :  { %13794 = vmatprep.mubr.bf16.mxu0 %v23315_v27  ;;  %19185 = vmatpush3.bf16.msra.mxu1 %v21988_v36  ;;  %v22000_v27 = vld [vmem:[#allocation13 + $0xec0] ss:$36 sps:$4 sm:$0xff]  }
 0x8bb   :  { %13834 = vmatprep.mubr.bf16.mxu1 %v23320_v31  ;;  %19164 = vmatprep.subr.bf16.mxu0 %v21989_v49  ;;  %v22003_v31 = vld [vmem:[#allocation13 + $0x9f8] ss:$36 sps:$4 sm:$0xff]  }
 0x8bc   :  { %19186 = vmatprep.subr.bf16.mxu1 %v21990_v25  ;;  %v22023_v25 = vld [vmem:[#allocation13 + $0x13d0] ss:$36 sps:$4 sm:$0xff]  }
 0x8bd   :  { %19165 = vmatpush3.bf16.msra.mxu0 %v21991_v61 }
 0x8be   :  { %19187 = vmatpush3.bf16.msra.mxu1 %v21992_v34  ;;  %19166 = vmatprep.subr.bf16.mxu0 %v21993_v24  ;;  %v22024_v34 = vld [vmem:[#allocation13 + $0x1850] ss:$36 sps:$4 sm:$0xff]   ;;  %v22025_v24 = vld [vmem:[#allocation13 + $0x15c8] ss:$36 sps:$4 sm:$0xff]  }
 0x8bf   :  { %19188 = vmatprep.subr.bf16.mxu1 %v21994_v2 }
 0x8c1   :  { %19167 = vmatpush3.bf16.msra.mxu0 %v21995_v57 }
 0x8c2   :  { %19189 = vmatpush3.bf16.msra.mxu1 %v21996_v22  ;;  %19168 = vmatprep.subr.bf16.mxu0 %v21997_v28 }
 0x8c3   :  { %19190 = vmatprep.subr.bf16.mxu1 %v21998_v23 }
 0x8c5   :  { %19169 = vmatpush3.bf16.msra.mxu0 %v21999_v6  ;;  %v22028_v6 = vld [vmem:[#allocation13 + $0x1808] ss:$36 sps:$4 sm:$0xff]  }
 0x8c6   :  { %19191 = vmatpush3.bf16.msra.mxu1 %v22000_v27  ;;  %19170 = vmatprep.subr.bf16.mxu0 %v22001_v50  ;;  %v22029_v27 = vld [vmem:[#allocation13 + $0x1580] ss:$36 sps:$4 sm:$0xff]  }
 0x8c7   :  { %19192 = vmatprep.subr.bf16.mxu1 %v22002_v13  ;;  %v22032_v13 = vld [vmem:[#allocation13 + $0x17c0] ss:$36 sps:$4 sm:$0xff]  }
 0x8c9   :  { %19171 = vmatpush3.bf16.msra.mxu0 %v22003_v31  ;;  %v22033_v31 = vld [vmem:[#allocation13 + $0x1538] ss:$36 sps:$4 sm:$0xff]  }
 0x8ca   :  { %19193 = vmatpush3.bf16.msra.mxu1 %v22004_v58  ;;  %19172 = vmatprep.subr.bf16.mxu0 %v22005_v8  ;;  %v22034_v58 = vld [vmem:[#allocation13 + $0x19b8] ss:$36 sps:$4 sm:$0xff]  }
 0x8cb   :  { %19194 = vmatprep.subr.bf16.mxu1 %v22006_v35  ;;  %v22035_v8 = vld [vmem:[#allocation13 + $0x12f8] ss:$36 sps:$4 sm:$0xff]  }
 0x8cc   :  { %v22036_v35 = vld [vmem:[#allocation13 + $0x1778] ss:$36 sps:$4 sm:$0xff]  }
 0x8cd   :  { %19173 = vmatpush3.bf16.msra.mxu0 %v22007_v39  ;;  %v22037_v39 = vld [vmem:[#allocation13 + $0x14f0] ss:$36 sps:$4 sm:$0xff]  }
 0x8ce   :  { %19195 = vmatpush3.bf16.msra.mxu1 %v22008_v18  ;;  %19174 = vmatprep.subr.bf16.mxu0 %v22009_v9  ;;  %v22038_v18 = vld [vmem:[#allocation13 + $0x1970] ss:$36 sps:$4 sm:$0xff]  }
 0x8cf   :  { %19196 = vmatprep.subr.bf16.mxu1 %v22010_v51  ;;  %v22039_v9 = vld [vmem:[#allocation13 + $0x12b0] ss:$36 sps:$4 sm:$0xff]  }
 0x8d0   :  { %v22040_v51 = vld [vmem:[#allocation13 + $0x1730] ss:$36 sps:$4 sm:$0xff]  }
 0x8d1   :  { %19175 = vmatpush3.bf16.msra.mxu0 %v22011_v40  ;;  %v22041_v40 = vld [vmem:[#allocation13 + $0x14a8] ss:$36 sps:$4 sm:$0xff]  }
 0x8d2   :  { %19197 = vmatpush3.bf16.msra.mxu1 %v22012_v44  ;;  %19176 = vmatprep.subr.bf16.mxu0 %v22013_v29  ;;  %v22042_v44 = vld [vmem:[#allocation13 + $0x1928] ss:$36 sps:$4 sm:$0xff]  }
 0x8d3   :  { %19198 = vmatprep.subr.bf16.mxu1 %v22014_v20  ;;  %v22043_v29 = vld [vmem:[#allocation13 + $0x1268] ss:$36 sps:$4 sm:$0xff]  }
 0x8d4   :  { %v22044_v20 = vld [vmem:[#allocation13 + $0x16e8] ss:$36 sps:$4 sm:$0xff]  }
 0x8d5   :  { %19177 = vmatpush3.bf16.msra.mxu0 %v22015_v21  ;;  %v22045_v21 = vld [vmem:[#allocation13 + $0x1460] ss:$36 sps:$4 sm:$0xff]  }
 0x8d6   :  { %19199 = vmatpush3.bf16.msra.mxu1 %v22016_v53  ;;  %19206 = vmatprep.subr.bf16.mxu0 %v22017_v60  ;;  %v22046_v53 = vld [vmem:[#allocation13 + $0x18e0] ss:$36 sps:$4 sm:$0xff]  }
 0x8d7   :  { %19228 = vmatprep.subr.bf16.mxu1 %v22018_v37  ;;  %v22047_v60 = vld [vmem:[#allocation13 + $0x1220] ss:$36 sps:$4 sm:$0xff]  }
 0x8d8   :  { %v13470_v59 = vpop.f32.mrf.mxu0  ;;  %13795 = vmatmul.mubr.bf16.vlgmr.msra.gmra.mxu0 %v23349_v14  ;;  %v22048_v37 = vld [vmem:[#allocation13 + $0x16a0] ss:$36 sps:$4 sm:$0xff]  }
 0x8d9   :  { %v13471_v36 = vadd.f32 %v13470_v59, %v23595_v55  ;;  %v13511_v49 = vpop.f32.mrf.mxu1  ;;  %13835 = vmatmul.mubr.bf16.vlgmr.msra.gmra.mxu1 %v23351_v19  ;;  %19207 = vmatpush3.bf16.msra.mxu0 %v22019_v32  ;;  %v22026_v55 = vld [vmem:[#allocation13 + $0x1a48] ss:$36 sps:$4 sm:$0xff]   ;;  %v22049_v32 = vld [vmem:[#allocation13 + $0x1f58] ss:$36 sps:$4 sm:$0xff]  }
 0x8da   :  { %13874 = vmatprep.mubr.bf16.mxu0 %v23353_v15  ;;  %19229 = vmatpush3.bf16.msra.mxu1 %v22020_v48  ;;  %v13472_v61 = vpop.f32.mrf.mxu0  ;;  %v22027_v15 = vld [vmem:[#allocation13 + $0x1388] ss:$36 sps:$4 sm:$0xff]   ;;  %v22050_v48 = vld [vmem:[#allocation13 + $0x23d8] ss:$36 sps:$4 sm:$0xff]  }
 0x8db   :  { %v23609_v2 = vadd.f32 %v13511_v49, %v13471_v36  ;;  %13914 = vmatprep.mubr.bf16.mxu1 %v23358_v54  ;;  %v13473_v14 = vadd.f32 %v13472_v61, %v23599_v62  ;;  %v13513_v57 = vpop.f32.mrf.mxu1  ;;  %19208 = vmatprep.subr.bf16.mxu0 %v22021_v47  ;;  %v22030_v54 = vld [vmem:[#allocation13 + $0x1a00] ss:$36 sps:$4 sm:$0xff]   ;;  %v22051_v47 = vld [vmem:[#allocation13 + $0x1d18] ss:$36 sps:$4 sm:$0xff]   ;;  %v22054_v36 = vld [vmem:[#allocation13 + $0x2390] ss:$36 sps:$4 sm:$0xff]  }
 0x8dc   :  { %v13474_v22 = vpop.f32.mrf.mxu0  ;;  %19230 = vmatprep.subr.bf16.mxu1 %v22022_v38  ;;  %v22031_v62 = vld [vmem:[#allocation13 + $0x1340] ss:$36 sps:$4 sm:$0xff]   ;;  %v22052_v59 = vld [vmem:[#allocation13 + $0x2198] ss:$36 sps:$4 sm:$0xff]   ;;  %v22053_v38 = vld [vmem:[#allocation13 + $0x1f10] ss:$36 sps:$4 sm:$0xff]  }
 0x8dd   :  { %v23613_v19 = vadd.f32 %v13513_v57, %v13473_v14  ;;  %v13515_v28 = vpop.f32.mrf.mxu1  ;;  %19209 = vmatpush3.bf16.msra.mxu0 %v22023_v25  ;;  %v22055_v49 = vld [vmem:[#allocation13 + $0x1cd0] ss:$36 sps:$4 sm:$0xff]   ;;  %v22057_v61 = vld [vmem:[#allocation13 + $0x1ec8] ss:$36 sps:$4 sm:$0xff]   ;;  %v22061_v14 = vld [vmem:[#allocation13 + $0x1e80] ss:$36 sps:$4 sm:$0xff]  }
 0x8de   :  { %19231 = vmatpush3.bf16.msra.mxu1 %v22024_v34  ;;  %v13475_v23 = vpop.f32.mrf.mxu0  ;;  %19210 = vmatprep.subr.bf16.mxu0 %v22025_v24  ;;  %v22056_v25 = vld [vmem:[#allocation13 + $0x2150] ss:$36 sps:$4 sm:$0xff]   ;;  %v22058_v34 = vld [vmem:[#allocation13 + $0x2348] ss:$36 sps:$4 sm:$0xff]   ;;  %v22063_v57 = vld [vmem:[#allocation13 + $0x1c40] ss:$36 sps:$4 sm:$0xff]  }
 0x8df   :  { %v13516_v50 = vpop.f32.mrf.mxu1  ;;  %19232 = vmatprep.subr.bf16.mxu1 %v22026_v55  ;;  %v22059_v24 = vld [vmem:[#allocation13 + $0x1c88] ss:$36 sps:$4 sm:$0xff]   ;;  %v22065_v55 = vld [vmem:[#allocation13 + $0x1e38] ss:$36 sps:$4 sm:$0xff]   ;;  %v22070_v23 = vld [vmem:[#allocation13 + $0x2270] ss:$36 sps:$4 sm:$0xff]  }
 0x8e0   :  { %v22066_v22 = vld [vmem:[#allocation13 + $0x22b8] ss:$36 sps:$4 sm:$0xff]   ;;  %v22073_v50 = vld [vmem:[#allocation13 + $0x1da8] ss:$36 sps:$4 sm:$0xff]  }
 0x8e1   :  { %19211 = vmatpush3.bf16.msra.mxu0 %v22027_v15  ;;  %v22068_v28 = vld [vmem:[#allocation13 + $0x2078] ss:$36 sps:$4 sm:$0xff]   ;;  %v22069_v15 = vld [vmem:[#allocation13 + $0x1df0] ss:$36 sps:$4 sm:$0xff]  }
 0x8e2   :  { %19233 = vmatpush3.bf16.msra.mxu1 %v22028_v6  ;;  %19212 = vmatprep.subr.bf16.mxu0 %v22029_v27  ;;  %v22071_v6 = vld [vmem:[#allocation13 + $0x1bb0] ss:$36 sps:$4 sm:$0xff]  }
 0x8e3   :  { %19234 = vmatprep.subr.bf16.mxu1 %v22030_v54  ;;  %v22072_v27 = vld [vmem:[#allocation13 + $0x2030] ss:$36 sps:$4 sm:$0xff]   ;;  %v22074_v54 = vld [vmem:[#allocation13 + $0x2228] ss:$36 sps:$4 sm:$0xff]  }
 0x8e5   :  { %19213 = vmatpush3.bf16.msra.mxu0 %v22031_v62  ;;  %v22075_v62 = vld [vmem:[#allocation13 + $0x1b68] ss:$36 sps:$4 sm:$0xff]  }
 0x8e6   :  { %19235 = vmatpush3.bf16.msra.mxu1 %v22032_v13  ;;  %19214 = vmatprep.subr.bf16.mxu0 %v22033_v31  ;;  %v22076_v13 = vld [vmem:[#allocation13 + $0x1fe8] ss:$36 sps:$4 sm:$0xff]   ;;  %v22077_v31 = vld [vmem:[#allocation13 + $0x1d60] ss:$36 sps:$4 sm:$0xff]  }
 0x8e7   :  { %19236 = vmatprep.subr.bf16.mxu1 %v22034_v58  ;;  %v22078_v58 = vld [vmem:[#allocation13 + $0x21e0] ss:$36 sps:$4 sm:$0xff]  }
 0x8e9   :  { %19215 = vmatpush3.bf16.msra.mxu0 %v22035_v8  ;;  %v22079_v8 = vld [vmem:[#allocation13 + $0x1b20] ss:$36 sps:$4 sm:$0xff]  }
 0x8ea   :  { %19237 = vmatpush3.bf16.msra.mxu1 %v22036_v35  ;;  %19216 = vmatprep.subr.bf16.mxu0 %v22037_v39  ;;  %v22080_v35 = vld [vmem:[#allocation13 + $0x1fa0] ss:$36 sps:$4 sm:$0xff]   ;;  %v22081_v39 = vld [vmem:[#allocation13 + $0x2858] ss:$36 sps:$4 sm:$0xff]  }
 0x8eb   :  { %19238 = vmatprep.subr.bf16.mxu1 %v22038_v18  ;;  %v22082_v18 = vld [vmem:[#allocation13 + $0x2cd8] ss:$36 sps:$4 sm:$0xff]  }
 0x8ed   :  { %19217 = vmatpush3.bf16.msra.mxu0 %v22039_v9  ;;  %v22083_v9 = vld [vmem:[#allocation13 + $0x2618] ss:$36 sps:$4 sm:$0xff]  }
 0x8ee   :  { %19239 = vmatpush3.bf16.msra.mxu1 %v22040_v51  ;;  %19218 = vmatprep.subr.bf16.mxu0 %v22041_v40  ;;  %v22084_v51 = vld [vmem:[#allocation13 + $0x2a98] ss:$36 sps:$4 sm:$0xff]   ;;  %v22085_v40 = vld [vmem:[#allocation13 + $0x2810] ss:$36 sps:$4 sm:$0xff]  }
 0x8ef   :  { %19240 = vmatprep.subr.bf16.mxu1 %v22042_v44 }
 0x8f1   :  { %19219 = vmatpush3.bf16.msra.mxu0 %v22043_v29  ;;  %v22086_v29 = vld [vmem:[#allocation13 + $0x2c90] ss:$36 sps:$4 sm:$0xff]  }
 0x8f2   :  { %19241 = vmatpush3.bf16.msra.mxu1 %v22044_v20  ;;  %19220 = vmatprep.subr.bf16.mxu0 %v22045_v21 }
 0x8f3   :  { %19242 = vmatprep.subr.bf16.mxu1 %v22046_v53  ;;  %v22087_v53 = vld [vmem:[#allocation13 + $0x25d0] ss:$36 sps:$4 sm:$0xff]  }
 0x8f5   :  { %19221 = vmatpush3.bf16.msra.mxu0 %v22047_v60 }
 0x8f6   :  { %19243 = vmatpush3.bf16.msra.mxu1 %v22048_v37  ;;  %19250 = vmatprep.subr.bf16.mxu0 %v22049_v32  ;;  %v22088_v37 = vld [vmem:[#allocation13 + $0x2a50] ss:$36 sps:$4 sm:$0xff]   ;;  %v22089_v32 = vld [vmem:[#allocation13 + $0x27c8] ss:$36 sps:$4 sm:$0xff]  }
 0x8f7   :  { %19272 = vmatprep.subr.bf16.mxu1 %v22050_v48 }
 0x8f8   :  { %13875 = vmatmul.mubr.bf16.vlgmr.msra.gmra.mxu0 %v23381_v30  ;;  %v22060_v30 = vld [vmem:[#allocation13 + $0x2108] ss:$36 sps:$4 sm:$0xff]  }
 0x8f9   :  { %13915 = vmatmul.mubr.bf16.vlgmr.msra.gmra.mxu1 %v23383_v56  ;;  %19251 = vmatpush3.bf16.msra.mxu0 %v22051_v47  ;;  %v22062_v56 = vld [vmem:[#allocation13 + $0x2300] ss:$36 sps:$4 sm:$0xff]  }
 0x8fa   :  { %13954 = vmatprep.mubr.bf16.mxu0 %v23385_v33  ;;  %19273 = vmatpush3.bf16.msra.mxu1 %v22052_v59  ;;  %v22064_v33 = vld [vmem:[#allocation13 + $0x20c0] ss:$36 sps:$4 sm:$0xff]  }
 0x8fb   :  { %13994 = vmatprep.mubr.bf16.mxu1 %v23390_v46  ;;  %19252 = vmatprep.subr.bf16.mxu0 %v22053_v38  ;;  %v22067_v46 = vld [vmem:[#allocation13 + $0x1bf8] ss:$36 sps:$4 sm:$0xff]  }
 0x8fc   :  { %19274 = vmatprep.subr.bf16.mxu1 %v22054_v36 }
 0x8fd   :  { %19253 = vmatpush3.bf16.msra.mxu0 %v22055_v49  ;;  %v22092_v49 = vld [vmem:[#allocation13 + $0x2a08] ss:$36 sps:$4 sm:$0xff]  }
 0x8fe   :  { %19275 = vmatpush3.bf16.msra.mxu1 %v22056_v25  ;;  %19254 = vmatprep.subr.bf16.mxu0 %v22057_v61  ;;  %v22093_v25 = vld [vmem:[#allocation13 + $0x2780] ss:$36 sps:$4 sm:$0xff]  }
 0x8ff   :  { %19276 = vmatprep.subr.bf16.mxu1 %v22058_v34  ;;  %v22096_v34 = vld [vmem:[#allocation13 + $0x29c0] ss:$36 sps:$4 sm:$0xff]  }
 0x901   :  { %19255 = vmatpush3.bf16.msra.mxu0 %v22059_v24  ;;  %v22097_v24 = vld [vmem:[#allocation13 + $0x2738] ss:$36 sps:$4 sm:$0xff]  }
 0x902   :  { %19277 = vmatpush3.bf16.msra.mxu1 %v22060_v30  ;;  %19256 = vmatprep.subr.bf16.mxu0 %v22061_v14  ;;  %v22098_v30 = vld [vmem:[#allocation13 + $0x2bb8] ss:$36 sps:$4 sm:$0xff]  }
 0x903   :  { %19278 = vmatprep.subr.bf16.mxu1 %v22062_v56  ;;  %v22099_v14 = vld [vmem:[#allocation13 + $0x24f8] ss:$36 sps:$4 sm:$0xff]  }
 0x904   :  { %v22100_v56 = vld [vmem:[#allocation13 + $0x2978] ss:$36 sps:$4 sm:$0xff]  }
 0x905   :  { %19257 = vmatpush3.bf16.msra.mxu0 %v22063_v57  ;;  %v22101_v57 = vld [vmem:[#allocation13 + $0x26f0] ss:$36 sps:$4 sm:$0xff]  }
 0x906   :  { %19279 = vmatpush3.bf16.msra.mxu1 %v22064_v33  ;;  %19258 = vmatprep.subr.bf16.mxu0 %v22065_v55  ;;  %v22102_v33 = vld [vmem:[#allocation13 + $0x2b70] ss:$36 sps:$4 sm:$0xff]  }
 0x907   :  { %19280 = vmatprep.subr.bf16.mxu1 %v22066_v22  ;;  %v22103_v55 = vld [vmem:[#allocation13 + $0x24b0] ss:$36 sps:$4 sm:$0xff]  }
 0x908   :  { %v22104_v22 = vld [vmem:[#allocation13 + $0x2930] ss:$36 sps:$4 sm:$0xff]  }
 0x909   :  { %19259 = vmatpush3.bf16.msra.mxu0 %v22067_v46  ;;  %v22105_v46 = vld [vmem:[#allocation13 + $0x26a8] ss:$36 sps:$4 sm:$0xff]  }
 0x90a   :  { %19281 = vmatpush3.bf16.msra.mxu1 %v22068_v28  ;;  %19260 = vmatprep.subr.bf16.mxu0 %v22069_v15  ;;  %v22106_v28 = vld [vmem:[#allocation13 + $0x2b28] ss:$36 sps:$4 sm:$0xff]  }
 0x90b   :  { %19282 = vmatprep.subr.bf16.mxu1 %v22070_v23  ;;  %v22107_v15 = vld [vmem:[#allocation13 + $0x2468] ss:$36 sps:$4 sm:$0xff]  }
 0x90c   :  { %v22108_v23 = vld [vmem:[#allocation13 + $0x28e8] ss:$36 sps:$4 sm:$0xff]  }
 0x90d   :  { %19261 = vmatpush3.bf16.msra.mxu0 %v22071_v6  ;;  %v22109_v6 = vld [vmem:[#allocation13 + $0x2660] ss:$36 sps:$4 sm:$0xff]  }
 0x90e   :  { %19283 = vmatpush3.bf16.msra.mxu1 %v22072_v27  ;;  %19262 = vmatprep.subr.bf16.mxu0 %v22073_v50  ;;  %v22110_v27 = vld [vmem:[#allocation13 + $0x2ae0] ss:$36 sps:$4 sm:$0xff]  }
 0x90f   :  { %19284 = vmatprep.subr.bf16.mxu1 %v22074_v54  ;;  %v22111_v50 = vld [vmem:[#allocation13 + $0x2420] ss:$36 sps:$4 sm:$0xff]  }
 0x910   :  { %v22112_v54 = vld [vmem:[#allocation13 + $0x28a0] ss:$36 sps:$4 sm:$0xff]  }
 0x911   :  { %19263 = vmatpush3.bf16.msra.mxu0 %v22075_v62  ;;  %v22115_v62 = vld [vmem:[#allocation16 + $0xe4] ss:$16 sps:$4 sm:$0xff]  }
 0x912   :  { %19285 = vmatpush3.bf16.msra.mxu1 %v22076_v13  ;;  %19264 = vmatprep.subr.bf16.mxu0 %v22077_v31  ;;  %v22118_v13 = vld [vmem:[#allocation16 + $0x2e4] ss:$16 sps:$4 sm:$0xff]   ;;  %v14083_v31 = vmax.f32 %v23479_v3, 0.0  ;;  %v22119_v3 = vld [vmem:[#allocation16 + $0xc0] ss:$16 sps:$4 sm:$0xff]  }
 0x913   :  { %19286 = vmatprep.subr.bf16.mxu1 %v22078_v58  ;;  %v14085_v58 = vmax.f32 %v23529_v16, 0.0  ;;  %v22122_v16 = vld [vmem:[#allocation16 + $0x2c0] ss:$16 sps:$4 sm:$0xff]  }
 0x915   :  { %19265 = vmatpush3.bf16.msra.mxu0 %v22079_v8  ;;  %v22113_v8 = vld [vmem:[#allocation16 + $0xe0] ss:$16 sps:$4 sm:$0xff]  }
 0x916   :  { %19287 = vmatpush3.bf16.msra.mxu1 %v22080_v35  ;;  %19294 = vmatprep.subr.bf16.mxu0 %v22081_v39  ;;  %v22116_v35 = vld [vmem:[#allocation16 + $0x2e0] ss:$16 sps:$4 sm:$0xff]   ;;  %v22121_v39 = vld [vmem:[#allocation16 + $0xc4] ss:$16 sps:$4 sm:$0xff]  }
 0x917   :  { %19316 = vmatprep.subr.bf16.mxu1 %v22082_v18  ;;  %v23631_v18 = vpack.c.bf16 %v14083_v31, %v14083_v31  ;;  %v22173_v31 = vld [vmem:[#allocation16 + $0x1a0] ss:$16 sps:$4 sm:$0xff]  }
 0x918   :  { %v13552_v44 = vpop.f32.mrf.mxu0  ;;  %13955 = vmatmul.mubr.bf16.vlgmr.msra.gmra.mxu0 %v23414_v4 }
 0x919   :  { %v13553_v20 = vadd.f32 %v13552_v44, %v23609_v2  ;;  %v13593_v21 = vpop.f32.mrf.mxu1  ;;  %13995 = vmatmul.mubr.bf16.vlgmr.msra.gmra.mxu1 %v23416_v5  ;;  %19295 = vmatpush3.bf16.msra.mxu0 %v22083_v9  ;;  %v22090_v2 = vld [vmem:[#allocation13 + $0x2c48] ss:$36 sps:$4 sm:$0xff]  }
 0x91a   :  { %14034 = vmatprep.mubr.bf16.mxu0 %v23419_v7  ;;  %19317 = vmatpush3.bf16.msra.mxu1 %v22084_v51  ;;  %v13554_v60 = vpop.f32.mrf.mxu0  ;;  %v22091_v7 = vld [vmem:[#allocation13 + $0x2588] ss:$36 sps:$4 sm:$0xff]   ;;  %v23634_v51 = vpack.c.bf16 %v14085_v58, %v14085_v58 }
 0x91b   :  { %v23623_v48 = vadd.f32 %v13593_v21, %v13553_v20  ;;  %14074 = vmatprep.mubr.bf16.mxu1 %v23422_v11  ;;  %v13555_v4 = vadd.f32 %v13554_v60, %v23613_v19  ;;  %v13595_v47 = vpop.f32.mrf.mxu1  ;;  %19296 = vmatprep.subr.bf16.mxu0 %v22085_v40  ;;  %v22094_v11 = vld [vmem:[#allocation13 + $0x2c00] ss:$36 sps:$4 sm:$0xff]   ;;  %v22131_v21 = vld [vmem:[#allocation16 + $0x80] ss:$16 sps:$4 sm:$0xff]  }
 0x91c   :  { %v13556_v59 = vpop.f32.mrf.mxu0  ;;  %19318 = vmatprep.subr.bf16.mxu1 %v22086_v29  ;;  %v22095_v19 = vld [vmem:[#allocation13 + $0x2540] ss:$36 sps:$4 sm:$0xff]   ;;  %v22125_v29 = vld [vmem:[#allocation16 + $0xa0] ss:$16 sps:$4 sm:$0xff]  }
 0x91d   :  { %v23627_v5 = vadd.f32 %v13595_v47, %v13555_v4  ;;  %v13597_v38 = vpop.f32.mrf.mxu1  ;;  %19297 = vmatpush3.bf16.msra.mxu0 %v22087_v53  ;;  %v22124_v9 = vld [vmem:[#allocation16 + $0x2c4] ss:$16 sps:$4 sm:$0xff]   ;;  %v22134_v53 = vld [vmem:[#allocation16 + $0x280] ss:$16 sps:$4 sm:$0xff]  }
 0x91e   :  { %19319 = vmatpush3.bf16.msra.mxu1 %v22088_v37  ;;  %v13557_v36 = vpop.f32.mrf.mxu0  ;;  %19298 = vmatprep.subr.bf16.mxu0 %v22089_v32  ;;  %v22127_v40 = vld [vmem:[#allocation16 + $0xa4] ss:$16 sps:$4 sm:$0xff]   ;;  %v22137_v32 = vld [vmem:[#allocation16 + $0x60] ss:$16 sps:$4 sm:$0xff]  }
 0x91f   :  { %v13598_v61 = vpop.f32.mrf.mxu1  ;;  %19320 = vmatprep.subr.bf16.mxu1 %v22090_v2  ;;  %v22130_v44 = vld [vmem:[#allocation16 + $0x2a4] ss:$16 sps:$4 sm:$0xff]   ;;  %v22140_v4 = vld [vmem:[#allocation16 + $0x260] ss:$16 sps:$4 sm:$0xff]  }
 0x920   :  { %v22133_v20 = vld [vmem:[#allocation16 + $0x84] ss:$16 sps:$4 sm:$0xff]   ;;  %v22143_v59 = vld [vmem:[#allocation16 + $0x40] ss:$16 sps:$4 sm:$0xff]  }
 0x921   :  { %19299 = vmatpush3.bf16.msra.mxu0 %v22091_v7  ;;  %v22139_v60 = vld [vmem:[#allocation16 + $0x64] ss:$16 sps:$4 sm:$0xff]   ;;  %v22146_v38 = vld [vmem:[#allocation16 + $0x240] ss:$16 sps:$4 sm:$0xff]  }
 0x922   :  { %19321 = vmatpush3.bf16.msra.mxu1 %v22092_v49  ;;  %19300 = vmatprep.subr.bf16.mxu0 %v22093_v25  ;;  %v22142_v37 = vld [vmem:[#allocation16 + $0x264] ss:$16 sps:$4 sm:$0xff]   ;;  %v22149_v49 = vld [vmem:[#allocation16 + $0x20] ss:$16 sps:$4 sm:$0xff]  }
 0x923   :  { %19322 = vmatprep.subr.bf16.mxu1 %v22094_v11  ;;  %v22145_v47 = vld [vmem:[#allocation16 + $0x44] ss:$16 sps:$4 sm:$0xff]   ;;  %v22152_v25 = vld [vmem:[#allocation16 + $0x220] ss:$16 sps:$4 sm:$0xff]  }
 0x924   :  { %v22148_v2 = vld [vmem:[#allocation16 + $0x244] ss:$16 sps:$4 sm:$0xff]  }
 0x925   :  { %19301 = vmatpush3.bf16.msra.mxu0 %v22095_v19  ;;  %v22151_v7 = vld [vmem:[#allocation16 + $0x24] ss:$16 sps:$4 sm:$0xff]   ;;  %v22155_v19 = vld [vmem:[#allocation16] ss:$16 sps:$4 sm:$0xff]  }
 0x926   :  { %19323 = vmatpush3.bf16.msra.mxu1 %v22096_v34  ;;  %19302 = vmatprep.subr.bf16.mxu0 %v22097_v24  ;;  %v22154_v36 = vld [vmem:[#allocation16 + $0x224] ss:$16 sps:$4 sm:$0xff]   ;;  %v22158_v34 = vld [vmem:[#allocation16 + $0x200] ss:$16 sps:$4 sm:$0xff]  }
 0x927   :  { %19324 = vmatprep.subr.bf16.mxu1 %v22098_v30  ;;  %v22157_v61 = vld [vmem:[#allocation16 + $0x4] ss:$16 sps:$4 sm:$0xff]  }
 0x928   :  { %v22160_v11 = vld [vmem:[#allocation16 + $0x204] ss:$16 sps:$4 sm:$0xff]  }
 0x929   :  { %19303 = vmatpush3.bf16.msra.mxu0 %v22099_v14  ;;  %v22163_v24 = vld [vmem:[#allocation16 + $0x1e4] ss:$16 sps:$4 sm:$0xff]   ;;  %v22161_v14 = vld [vmem:[#allocation16 + $0x1e0] ss:$16 sps:$4 sm:$0xff]  }
 0x92a   :  { %19325 = vmatpush3.bf16.msra.mxu1 %v22100_v56  ;;  %19304 = vmatprep.subr.bf16.mxu0 %v22101_v57  ;;  %v22166_v30 = vld [vmem:[#allocation16 + $0x3e4] ss:$16 sps:$4 sm:$0xff]   ;;  %v22164_v56 = vld [vmem:[#allocation16 + $0x3e0] ss:$16 sps:$4 sm:$0xff]  }
 0x92b   :  { %19326 = vmatprep.subr.bf16.mxu1 %v22102_v33  ;;  %v22169_v57 = vld [vmem:[#allocation16 + $0x1c4] ss:$16 sps:$4 sm:$0xff]  }
 0x92c   :  { %v22172_v33 = vld [vmem:[#allocation16 + $0x3c4] ss:$16 sps:$4 sm:$0xff]  }
 0x92d   :  { %19305 = vmatpush3.bf16.msra.mxu0 %v22103_v55 }
 0x92e   :  { %19327 = vmatpush3.bf16.msra.mxu1 %v22104_v22  ;;  %19306 = vmatprep.subr.bf16.mxu0 %v22105_v46 }
 0x92f   :  { %19328 = vmatprep.subr.bf16.mxu1 %v22106_v28  ;;  %v22167_v28 = vld [vmem:[#allocation16 + $0x1c0] ss:$16 sps:$4 sm:$0xff]  }
 0x931   :  { %19307 = vmatpush3.bf16.msra.mxu0 %v22107_v15 }
 0x932   :  { %19329 = vmatpush3.bf16.msra.mxu1 %v22108_v23  ;;  %19308 = vmatprep.subr.bf16.mxu0 %v22109_v6  ;;  %v22170_v23 = vld [vmem:[#allocation16 + $0x3c0] ss:$16 sps:$4 sm:$0xff]   ;;  %v22175_v6 = vld [vmem:[#allocation16 + $0x1a4] ss:$16 sps:$4 sm:$0xff]  }
 0x933   :  { %19330 = vmatprep.subr.bf16.mxu1 %v22110_v27 }
 0x935   :  { %19309 = vmatpush3.bf16.msra.mxu0 %v22111_v50 }
 0x936   :  { %19331 = vmatpush3.bf16.msra.mxu1 %v22112_v54  ;;  %15850 = vmatprep.subr.bf16.mxu0 %v22115_v62  ;;  %v22178_v54 = vld [vmem:[#allocation16 + $0x3a4] ss:$16 sps:$4 sm:$0xff]  }
 0x937   :  { %15891 = vmatprep.subr.bf16.mxu1 %v22118_v13 }
 0x938   :  { %14035 = vmatmul.mubr.bf16.vlgmr.msra.gmra.mxu0 %v23437_v45  ;;  %v22128_v45 = vld [vmem:[#allocation16 + $0x2a0] ss:$16 sps:$4 sm:$0xff]  }
 0x939   :  { %14075 = vmatmul.mubr.bf16.vlgmr.msra.gmra.mxu1 %v23439_v52  ;;  %15851 = vmatpush1.bf16.msra.mxu0 %v22113_v8  ;;  %v22136_v52 = vld [vmem:[#allocation16 + $0x284] ss:$16 sps:$4 sm:$0xff]  }
 0x93a   :  { %15882 = vmatprep.mubr.bf16.mxu0 %v23631_v18  ;;  %15892 = vmatpush1.bf16.msra.mxu1 %v22116_v35  ;;  %v22181_v8 = vld [vmem:[#allocation16 + $0x184] ss:$16 sps:$4 sm:$0xff]  }
 0x93b   :  { %15923 = vmatprep.mubr.bf16.mxu1 %v23634_v51  ;;  %15852 = vmatprep.subr.bf16.mxu0 %v22121_v39  ;;  %v22184_v39 = vld [vmem:[#allocation16 + $0x384] ss:$16 sps:$4 sm:$0xff]  }
 0x93c   :  { %15893 = vmatprep.subr.bf16.mxu1 %v22124_v9  ;;  %v22179_v9 = vld [vmem:[#allocation16 + $0x180] ss:$16 sps:$4 sm:$0xff]  }
 0x93d   :  { %15853 = vmatpush1.bf16.msra.mxu0 %v22119_v3  ;;  %v22182_v3 = vld [vmem:[#allocation16 + $0x380] ss:$16 sps:$4 sm:$0xff]  }
 0x93e   :  { %15894 = vmatpush1.bf16.msra.mxu1 %v22122_v16  ;;  %15854 = vmatprep.subr.bf16.mxu0 %v22127_v40  ;;  %v22187_v16 = vld [vmem:[#allocation16 + $0x164] ss:$16 sps:$4 sm:$0xff]  }
 0x93f   :  { %15895 = vmatprep.subr.bf16.mxu1 %v22130_v44  ;;  %v22190_v40 = vld [vmem:[#allocation16 + $0x364] ss:$16 sps:$4 sm:$0xff]   ;;  %v22185_v44 = vld [vmem:[#allocation16 + $0x160] ss:$16 sps:$4 sm:$0xff]  }
 0x941   :  { %15855 = vmatpush1.bf16.msra.mxu0 %v22125_v29  ;;  %v22188_v29 = vld [vmem:[#allocation16 + $0x360] ss:$16 sps:$4 sm:$0xff]  }
 0x942   :  { %15896 = vmatpush1.bf16.msra.mxu1 %v22128_v45  ;;  %15856 = vmatprep.subr.bf16.mxu0 %v22133_v20  ;;  %v22193_v45 = vld [vmem:[#allocation16 + $0x144] ss:$16 sps:$4 sm:$0xff]  }
 0x943   :  { %15897 = vmatprep.subr.bf16.mxu1 %v22136_v52  ;;  %v22196_v20 = vld [vmem:[#allocation16 + $0x344] ss:$16 sps:$4 sm:$0xff]   ;;  %v22191_v52 = vld [vmem:[#allocation16 + $0x140] ss:$16 sps:$4 sm:$0xff]  }
 0x945   :  { %15857 = vmatpush1.bf16.msra.mxu0 %v22131_v21  ;;  %v22194_v21 = vld [vmem:[#allocation16 + $0x340] ss:$16 sps:$4 sm:$0xff]  }
 0x946   :  { %15898 = vmatpush1.bf16.msra.mxu1 %v22134_v53  ;;  %15858 = vmatprep.subr.bf16.mxu0 %v22139_v60  ;;  %v22199_v53 = vld [vmem:[#allocation16 + $0x124] ss:$16 sps:$4 sm:$0xff]  }
 0x947   :  { %15899 = vmatprep.subr.bf16.mxu1 %v22142_v37  ;;  %v22202_v60 = vld [vmem:[#allocation16 + $0x324] ss:$16 sps:$4 sm:$0xff]  }
 0x949   :  { %15859 = vmatpush1.bf16.msra.mxu0 %v22137_v32  ;;  %v22197_v32 = vld [vmem:[#allocation16 + $0x120] ss:$16 sps:$4 sm:$0xff]  }
 0x94a   :  { %15900 = vmatpush1.bf16.msra.mxu1 %v22140_v4  ;;  %15860 = vmatprep.subr.bf16.mxu0 %v22145_v47  ;;  %v22200_v4 = vld [vmem:[#allocation16 + $0x320] ss:$16 sps:$4 sm:$0xff]   ;;  %v22205_v47 = vld [vmem:[#allocation16 + $0x104] ss:$16 sps:$4 sm:$0xff]  }
 0x94b   :  { %15901 = vmatprep.subr.bf16.mxu1 %v22148_v2  ;;  %v22208_v2 = vld [vmem:[#allocation16 + $0x304] ss:$16 sps:$4 sm:$0xff]  }
 0x94d   :  { %15861 = vmatpush1.bf16.msra.mxu0 %v22143_v59 }
 0x94e   :  { %15902 = vmatpush1.bf16.msra.mxu1 %v22146_v38  ;;  %15862 = vmatprep.subr.bf16.mxu0 %v22151_v7  ;;  %v22203_v38 = vld [vmem:[#allocation16 + $0x100] ss:$16 sps:$4 sm:$0xff]   ;;  %v14082_v7 = vmax.f32 %v23475_v63, 0.0  ;;  %v22217_v63 = vld [vmem:[#allocation16 + $0x4c4] ss:$16 sps:$4 sm:$0xff]  }
 0x94f   :  { %15903 = vmatprep.subr.bf16.mxu1 %v22154_v36  ;;  %v22206_v36 = vld [vmem:[#allocation16 + $0x300] ss:$16 sps:$4 sm:$0xff]  }
 0x951   :  { %15863 = vmatpush1.bf16.msra.mxu0 %v22149_v49  ;;  %v22211_v49 = vld [vmem:[#allocation16 + $0x4e4] ss:$16 sps:$4 sm:$0xff]  }
 0x952   :  { %15904 = vmatpush1.bf16.msra.mxu1 %v22152_v25  ;;  %15864 = vmatprep.subr.bf16.mxu0 %v22157_v61  ;;  %v14084_v25 = vmax.f32 %v23525_v10, 0.0  ;;  %v14087_v61 = vmax.f32 %v23579_v12, 0.0  ;;  %v22220_v10 = vld [vmem:[#allocation16 + $0x6c4] ss:$16 sps:$4 sm:$0xff]  }
 0x953   :  { %15905 = vmatprep.subr.bf16.mxu1 %v22160_v11 }
 0x955   :  { %15865 = vmatpush1.bf16.msra.mxu0 %v22155_v19  ;;  %v22209_v19 = vld [vmem:[#allocation16 + $0x4e0] ss:$16 sps:$4 sm:$0xff]  }
 0x956   :  { %15906 = vmatpush1.bf16.msra.mxu1 %v22158_v34  ;;  %15866 = vmatprep.subr.bf16.mxu0 %v22163_v24  ;;  %v23646_v34 = vpack.c.bf16 %v14082_v7, %v14082_v7  ;;  %v22212_v24 = vld [vmem:[#allocation16 + $0x6e0] ss:$16 sps:$4 sm:$0xff]   ;;  %v22259_v7 = vld [vmem:[#allocation16 + $0x5e4] ss:$16 sps:$4 sm:$0xff]  }
 0x957   :  { %15907 = vmatprep.subr.bf16.mxu1 %v22166_v30  ;;  %v23648_v30 = vpack.c.bf16 %v14084_v25, %v14084_v25  ;;  %v22260_v25 = vld [vmem:[#allocation16 + $0x7e0] ss:$16 sps:$4 sm:$0xff]  }
 0x958   :  { %v13634_v55 = vpop.f32.mrf.mxu0 }
 0x959   :  { %v13635_v22 = vadd.f32 %v13634_v55, %v23623_v48  ;;  %v13675_v46 = vpop.f32.mrf.mxu1  ;;  %15867 = vmatpush2.bf16.msra.mxu0 %v22161_v14  ;;  %v22176_v48 = vld [vmem:[#allocation16 + $0x3a0] ss:$16 sps:$4 sm:$0xff]   ;;  %v23650_v14 = vpack.c.bf16 %v14087_v61, %v14087_v61  ;;  %v17320_v55 = vld [vmem:[#allocation14 + $0x8] ss:$0 sm:$0xff]  ;;  %v22268_v61 = vld [vmem:[#allocation16 + $0x7c4] ss:$16 sps:$4 sm:$0xff]  }
 0x95a   :  { %15908 = vmatpush2.bf16.msra.mxu1 %v22164_v56  ;;  %v13636_v15 = vpop.f32.mrf.mxu0  ;;  %15868 = vmatprep.subr.bf16.mxu0 %v22169_v57 }
 0x95b   :  { %v23640_v27 = vadd.f32 %v13675_v46, %v13635_v22  ;;  %v13677_v50 = vpop.f32.mrf.mxu1  ;;  %15909 = vmatprep.subr.bf16.mxu1 %v22172_v33  ;;  %v13637_v37 = vadd.f32 %v13636_v15, %v23627_v5  ;;  %v22214_v5 = vld [vmem:[#allocation16 + $0x6e4] ss:$16 sps:$4 sm:$0xff]   ;;  %v22215_v33 = vld [vmem:[#allocation16 + $0x4c0] ss:$16 sps:$4 sm:$0xff]  }
 0x95c   :  { %v13638_v62 = vpop.f32.mrf.mxu0  ;;  %v22218_v46 = vld [vmem:[#allocation16 + $0x6c0] ss:$16 sps:$4 sm:$0xff]  }
 0x95d   :  { %v13679_v13 = vpop.f32.mrf.mxu1  ;;  %15869 = vmatpush2.bf16.msra.mxu0 %v22167_v28  ;;  %v13678_v59 = vadd.f32 %v13677_v50, %v13637_v37  ;;  %v22223_v28 = vld [vmem:[#allocation16 + $0x4a4] ss:$16 sps:$4 sm:$0xff]  }
 0x95e   :  { %15910 = vmatpush2.bf16.msra.mxu1 %v22170_v23  ;;  %v13639_v58 = vpop.f32.mrf.mxu0  ;;  %15870 = vmatprep.subr.bf16.mxu0 %v22175_v6  ;;  %v22226_v6 = vld [vmem:[#allocation16 + $0x6a4] ss:$16 sps:$4 sm:$0xff]  }
 0x95f   :  { %v13680_v35 = vpop.f32.mrf.mxu1  ;;  %15911 = vmatprep.subr.bf16.mxu1 %v22178_v54  ;;  %v14089_v11 = vmax.f32 %v13678_v59, 0.0  ;;  %v22250_v37 = vld [vmem:[#allocation16 + $0x624] ss:$16 sps:$4 sm:$0xff]   ;;  %v22251_v59 = vld [vmem:[#allocation16 + $0x400] ss:$16 sps:$4 sm:$0xff]  }
 0x961   :  { %15871 = vmatpush2.bf16.msra.mxu0 %v22173_v31  ;;  %v23653_v57 = vpack.c.bf16 %v14089_v11, %v14089_v11  ;;  %v22221_v31 = vld [vmem:[#allocation16 + $0x4a0] ss:$16 sps:$4 sm:$0xff]  }
 0x962   :  { %15912 = vmatpush2.bf16.msra.mxu1 %v22176_v48  ;;  %15872 = vmatprep.subr.bf16.mxu0 %v22181_v8  ;;  %v22224_v48 = vld [vmem:[#allocation16 + $0x6a0] ss:$16 sps:$4 sm:$0xff]   ;;  %v22229_v8 = vld [vmem:[#allocation16 + $0x484] ss:$16 sps:$4 sm:$0xff]  }
 0x963   :  { %15913 = vmatprep.subr.bf16.mxu1 %v22184_v39 }
 0x965   :  { %15873 = vmatpush2.bf16.msra.mxu0 %v22179_v9  ;;  %v22232_v9 = vld [vmem:[#allocation16 + $0x684] ss:$16 sps:$4 sm:$0xff]  }
 0x966   :  { %15914 = vmatpush2.bf16.msra.mxu1 %v22182_v3  ;;  %15874 = vmatprep.subr.bf16.mxu0 %v22187_v16  ;;  %v22227_v3 = vld [vmem:[#allocation16 + $0x480] ss:$16 sps:$4 sm:$0xff]  }
 0x967   :  { %15915 = vmatprep.subr.bf16.mxu1 %v22190_v40  ;;  %v22230_v16 = vld [vmem:[#allocation16 + $0x680] ss:$16 sps:$4 sm:$0xff]   ;;  %v22235_v40 = vld [vmem:[#allocation16 + $0x464] ss:$16 sps:$4 sm:$0xff]  }
 0x969   :  { %15875 = vmatpush2.bf16.msra.mxu0 %v22185_v44  ;;  %v22238_v44 = vld [vmem:[#allocation16 + $0x664] ss:$16 sps:$4 sm:$0xff]  }
 0x96a   :  { %15916 = vmatpush2.bf16.msra.mxu1 %v22188_v29  ;;  %15876 = vmatprep.subr.bf16.mxu0 %v22193_v45  ;;  %v22233_v29 = vld [vmem:[#allocation16 + $0x460] ss:$16 sps:$4 sm:$0xff]  }
 0x96b   :  { %15917 = vmatprep.subr.bf16.mxu1 %v22196_v20  ;;  %v22236_v45 = vld [vmem:[#allocation16 + $0x660] ss:$16 sps:$4 sm:$0xff]   ;;  %v22241_v20 = vld [vmem:[#allocation16 + $0x444] ss:$16 sps:$4 sm:$0xff]  }
 0x96d   :  { %15877 = vmatpush2.bf16.msra.mxu0 %v22191_v52  ;;  %v22244_v52 = vld [vmem:[#allocation16 + $0x644] ss:$16 sps:$4 sm:$0xff]  }
 0x96e   :  { %15918 = vmatpush2.bf16.msra.mxu1 %v22194_v21  ;;  %15878 = vmatprep.subr.bf16.mxu0 %v22199_v53  ;;  %v22239_v21 = vld [vmem:[#allocation16 + $0x440] ss:$16 sps:$4 sm:$0xff]  }
 0x96f   :  { %15919 = vmatprep.subr.bf16.mxu1 %v22202_v60  ;;  %v22242_v53 = vld [vmem:[#allocation16 + $0x640] ss:$16 sps:$4 sm:$0xff]   ;;  %v22247_v60 = vld [vmem:[#allocation16 + $0x424] ss:$16 sps:$4 sm:$0xff]  }
 0x971   :  { %15879 = vmatpush2.bf16.msra.mxu0 %v22197_v32  ;;  %v22245_v32 = vld [vmem:[#allocation16 + $0x420] ss:$16 sps:$4 sm:$0xff]  }
 0x972   :  { %15920 = vmatpush2.bf16.msra.mxu1 %v22200_v4  ;;  %15880 = vmatprep.subr.bf16.mxu0 %v22205_v47  ;;  %v22248_v4 = vld [vmem:[#allocation16 + $0x620] ss:$16 sps:$4 sm:$0xff]   ;;  %v22253_v47 = vld [vmem:[#allocation16 + $0x404] ss:$16 sps:$4 sm:$0xff]  }
 0x973   :  { %15921 = vmatprep.subr.bf16.mxu1 %v22208_v2  ;;  %v22256_v2 = vld [vmem:[#allocation16 + $0x604] ss:$16 sps:$4 sm:$0xff]  }
 0x975   :  { %15881 = vmatpush2.bf16.msra.mxu0 %v22203_v38  ;;  %v22254_v38 = vld [vmem:[#allocation16 + $0x600] ss:$16 sps:$4 sm:$0xff]  }
 0x976   :  { %15922 = vmatpush2.bf16.msra.mxu1 %v22206_v36  ;;  %15932 = vmatprep.subr.bf16.mxu0 %v22211_v49  ;;  %v22262_v36 = vld [vmem:[#allocation16 + $0x7e4] ss:$16 sps:$4 sm:$0xff]   ;;  %v22257_v49 = vld [vmem:[#allocation16 + $0x5e0] ss:$16 sps:$4 sm:$0xff]  }
 0x977   :  { %15973 = vmatprep.subr.bf16.mxu1 %v22214_v5  ;;  %v22265_v5 = vld [vmem:[#allocation16 + $0x5c4] ss:$16 sps:$4 sm:$0xff]  }
 0x978   :  { %v19134_v56 = vpop.f32.mrf.mxu0  ;;  %15883 = vmatmul.mubr.bf16.vlgmr.msra.gmra.mxu0 %v23646_v34 }
 0x979   :  { %v19156_v12 = vpop.f32.mrf.mxu1  ;;  %15924 = vmatmul.mubr.bf16.vlgmr.msra.gmra.mxu1 %v23648_v30  ;;  %15933 = vmatpush1.bf16.msra.mxu0 %v22209_v19 }
 0x97a   :  { %15964 = vmatprep.mubr.bf16.mxu0 %v23650_v14  ;;  %15974 = vmatpush1.bf16.msra.mxu1 %v22212_v24  ;;  %v19135_v22 = vpop.f32.mrf.mxu0  ;;  %v22263_v24 = vld [vmem:[#allocation16 + $0x5c0] ss:$16 sps:$4 sm:$0xff]  }
 0x97b   :  { %16005 = vmatprep.mubr.bf16.mxu1 %v23653_v57  ;;  %v19136_v15 = vadd.f32 %v19135_v22, %v19134_v56  ;;  %v19157_v23 = vpop.f32.mrf.mxu1  ;;  %15934 = vmatprep.subr.bf16.mxu0 %v22217_v63  ;;  %v22266_v56 = vld [vmem:[#allocation16 + $0x7c0] ss:$16 sps:$4 sm:$0xff]  }
 0x97c   :  { %v19158_v50 = vadd.f32 %v19157_v23, %v19156_v12  ;;  %v19137_v54 = vpop.f32.mrf.mxu0  ;;  %15975 = vmatprep.subr.bf16.mxu1 %v22220_v10  ;;  %v22271_v10 = vld [vmem:[#allocation16 + $0x5a4] ss:$16 sps:$4 sm:$0xff]   ;;  %v22269_v23 = vld [vmem:[#allocation16 + $0x5a0] ss:$16 sps:$4 sm:$0xff]  }
 0x97d   :  { %v13717_v62 = vadd.f32 %v19136_v15, %v17320_v55  ;;  %v19159_v13 = vpop.f32.mrf.mxu1  ;;  %15935 = vmatpush1.bf16.msra.mxu0 %v22215_v33  ;;  %v22274_v55 = vld [vmem:[#allocation16 + $0x7a4] ss:$16 sps:$4 sm:$0xff]  }
 0x97e   :  { %15976 = vmatpush1.bf16.msra.mxu1 %v22218_v46  ;;  %v19138_v58 = vpop.f32.mrf.mxu0  ;;  %15936 = vmatprep.subr.bf16.mxu0 %v22223_v28  ;;  %v22277_v54 = vld [vmem:[#allocation16 + $0x584] ss:$16 sps:$4 sm:$0xff]  }
 0x97f   :  { %v23658_v35 = vadd.f32 %v19158_v50, %v13717_v62  ;;  %v19160_v39 = vpop.f32.mrf.mxu1  ;;  %15977 = vmatprep.subr.bf16.mxu1 %v22226_v6  ;;  %v22272_v50 = vld [vmem:[#allocation16 + $0x7a0] ss:$16 sps:$4 sm:$0xff]  }
 0x980   :  { %v22275_v58 = vld [vmem:[#allocation16 + $0x580] ss:$16 sps:$4 sm:$0xff]  }
 0x981   :  { %15937 = vmatpush1.bf16.msra.mxu0 %v22221_v31  ;;  %v22280_v31 = vld [vmem:[#allocation16 + $0x784] ss:$16 sps:$4 sm:$0xff]   ;;  %v22281_v39 = vld [vmem:[#allocation16 + $0x560] ss:$16 sps:$4 sm:$0xff]  }
 0x982   :  { %15978 = vmatpush1.bf16.msra.mxu1 %v22224_v48  ;;  %15938 = vmatprep.subr.bf16.mxu0 %v22229_v8  ;;  %v22278_v48 = vld [vmem:[#allocation16 + $0x780] ss:$16 sps:$4 sm:$0xff]   ;;  %v22283_v8 = vld [vmem:[#allocation16 + $0x564] ss:$16 sps:$4 sm:$0xff]  }
 0x983   :  { %15979 = vmatprep.subr.bf16.mxu1 %v22232_v9  ;;  %v22284_v9 = vld [vmem:[#allocation16 + $0x760] ss:$16 sps:$4 sm:$0xff]  }
 0x985   :  { %15939 = vmatpush1.bf16.msra.mxu0 %v22227_v3  ;;  %v22289_v3 = vld [vmem:[#allocation16 + $0x544] ss:$16 sps:$4 sm:$0xff]  }
 0x986   :  { %15980 = vmatpush1.bf16.msra.mxu1 %v22230_v16  ;;  %15940 = vmatprep.subr.bf16.mxu0 %v22235_v40  ;;  %v22292_v16 = vld [vmem:[#allocation16 + $0x744] ss:$16 sps:$4 sm:$0xff]   ;;  %v22287_v40 = vld [vmem:[#allocation16 + $0x540] ss:$16 sps:$4 sm:$0xff]  }
 0x987   :  { %15981 = vmatprep.subr.bf16.mxu1 %v22238_v44  ;;  %v22290_v44 = vld [vmem:[#allocation16 + $0x740] ss:$16 sps:$4 sm:$0xff]  }
 0x989   :  { %15941 = vmatpush1.bf16.msra.mxu0 %v22233_v29  ;;  %v22295_v29 = vld [vmem:[#allocation16 + $0x524] ss:$16 sps:$4 sm:$0xff]  }
 0x98a   :  { %15982 = vmatpush1.bf16.msra.mxu1 %v22236_v45  ;;  %15942 = vmatprep.subr.bf16.mxu0 %v22241_v20  ;;  %v22298_v45 = vld [vmem:[#allocation16 + $0x724] ss:$16 sps:$4 sm:$0xff]   ;;  %v22293_v20 = vld [vmem:[#allocation16 + $0x520] ss:$16 sps:$4 sm:$0xff]  }
 0x98b   :  { %15983 = vmatprep.subr.bf16.mxu1 %v22244_v52  ;;  %v22296_v52 = vld [vmem:[#allocation16 + $0x720] ss:$16 sps:$4 sm:$0xff]  }
 0x98d   :  { %15943 = vmatpush1.bf16.msra.mxu0 %v22239_v21  ;;  %v22301_v21 = vld [vmem:[#allocation16 + $0x504] ss:$16 sps:$4 sm:$0xff]  }
 0x98e   :  { %15984 = vmatpush1.bf16.msra.mxu1 %v22242_v53  ;;  %15944 = vmatprep.subr.bf16.mxu0 %v22247_v60  ;;  %v22304_v53 = vld [vmem:[#allocation16 + $0x704] ss:$16 sps:$4 sm:$0xff]   ;;  %v22299_v60 = vld [vmem:[#allocation16 + $0x500] ss:$16 sps:$4 sm:$0xff]  }
 0x98f   :  { %15985 = vmatprep.subr.bf16.mxu1 %v22250_v37  ;;  %v14086_v37 = vmax.f32 %v23575_v1, 0.0  ;;  %v22346_v1 = vld [vmem:[#allocation16 + $0x8c4] ss:$16 sps:$4 sm:$0xff]  }
 0x991   :  { %15945 = vmatpush1.bf16.msra.mxu0 %v22245_v32  ;;  %v22302_v32 = vld [vmem:[#allocation16 + $0x700] ss:$16 sps:$4 sm:$0xff]  }
 0x992   :  { %15986 = vmatpush1.bf16.msra.mxu1 %v22248_v4  ;;  %15946 = vmatprep.subr.bf16.mxu0 %v22253_v47  ;;  %v22340_v4 = vld [vmem:[#allocation16 + $0x8e4] ss:$16 sps:$4 sm:$0xff]   ;;  %v14088_v47 = vmax.f32 %v23640_v27, 0.0  ;;  %v22344_v27 = vld [vmem:[#allocation16 + $0x8c0] ss:$16 sps:$4 sm:$0xff]  }
 0x993   :  { %15987 = vmatprep.subr.bf16.mxu1 %v22256_v2  ;;  %v22307_v2 = vld [vmem:[#allocation16 + $0xec] ss:$16 sps:$4 sm:$0xff]  }
 0x995   :  { %15947 = vmatpush1.bf16.msra.mxu0 %v22251_v59  ;;  %v22338_v59 = vld [vmem:[#allocation16 + $0x8e0] ss:$16 sps:$4 sm:$0xff]  }
 0x996   :  { %15988 = vmatpush1.bf16.msra.mxu1 %v22254_v38  ;;  %15948 = vmatprep.subr.bf16.mxu0 %v22259_v7  ;;  %v23665_v38 = vpack.c.bf16 %v14086_v37, %v14086_v37  ;;  %v22305_v7 = vld [vmem:[#allocation16 + $0xe8] ss:$16 sps:$4 sm:$0xff]  }
 0x997   :  { %15989 = vmatprep.subr.bf16.mxu1 %v22262_v36  ;;  %v23667_v36 = vpack.c.bf16 %v14088_v47, %v14088_v47  ;;  %v22332_v37 = vld [vmem:[#allocation16 + $0x1c8] ss:$16 sps:$4 sm:$0xff]  }
 0x998   :  { %v19178_v11 = vpop.f32.mrf.mxu0 }
 0x999   :  { %v19200_v19 = vpop.f32.mrf.mxu1  ;;  %15949 = vmatpush2.bf16.msra.mxu0 %v22257_v49  ;;  %v22310_v49 = vld [vmem:[#allocation16 + $0xcc] ss:$16 sps:$4 sm:$0xff]  }
 0x99a   :  { %15990 = vmatpush2.bf16.msra.mxu1 %v22260_v25  ;;  %v19179_v63 = vpop.f32.mrf.mxu0  ;;  %15950 = vmatprep.subr.bf16.mxu0 %v22265_v5 }
 0x99b   :  { %v19180_v12 = vadd.f32 %v19179_v63, %v19178_v11  ;;  %v19201_v33 = vpop.f32.mrf.mxu1  ;;  %15991 = vmatprep.subr.bf16.mxu1 %v22268_v61  ;;  %v22308_v11 = vld [vmem:[#allocation16 + $0xc8] ss:$16 sps:$4 sm:$0xff]   ;;  %v22313_v63 = vld [vmem:[#allocation16 + $0xac] ss:$16 sps:$4 sm:$0xff]  }
 0x99c   :  { %v19202_v22 = vadd.f32 %v19201_v33, %v19200_v19  ;;  %v19181_v46 = vpop.f32.mrf.mxu0  ;;  %v22352_v19 = vld [vmem:[#allocation16 + $0x8a4] ss:$16 sps:$4 sm:$0xff]  }
 0x99d   :  { %v13797_v28 = vadd.f32 %v19180_v12, %v23658_v35  ;;  %v19203_v15 = vpop.f32.mrf.mxu1  ;;  %15951 = vmatpush2.bf16.msra.mxu0 %v22263_v24  ;;  %v22286_v35 = vld [vmem:[#allocation16 + $0x764] ss:$16 sps:$4 sm:$0xff]   ;;  %v22350_v12 = vld [vmem:[#allocation16 + $0x8a0] ss:$16 sps:$4 sm:$0xff]   ;;  %v22316_v46 = vld [vmem:[#allocation16 + $0x8c] ss:$16 sps:$4 sm:$0xff]  }
 0x99e   :  { %15992 = vmatpush2.bf16.msra.mxu1 %v22266_v56  ;;  %v19182_v6 = vpop.f32.mrf.mxu0  ;;  %15952 = vmatprep.subr.bf16.mxu0 %v22271_v10  ;;  %v22314_v15 = vld [vmem:[#allocation16 + $0x88] ss:$16 sps:$4 sm:$0xff]  }
 0x99f   :  { %v23661_v62 = vadd.f32 %v19202_v22, %v13797_v28  ;;  %v19204_v13 = vpop.f32.mrf.mxu1  ;;  %15993 = vmatprep.subr.bf16.mxu1 %v22274_v55  ;;  %v22311_v55 = vld [vmem:[#allocation16 + $0xa8] ss:$16 sps:$4 sm:$0xff]   ;;  %v22356_v28 = vld [vmem:[#allocation16 + $0x880] ss:$16 sps:$4 sm:$0xff]   ;;  %v22319_v6 = vld [vmem:[#allocation16 + $0x6c] ss:$16 sps:$4 sm:$0xff]  }
 0x9a0   :  { %v22370_v13 = vld [vmem:[#allocation16 + $0x844] ss:$16 sps:$4 sm:$0xff]  }
 0x9a1   :  { %15953 = vmatpush2.bf16.msra.mxu0 %v22269_v23  ;;  %v22364_v23 = vld [vmem:[#allocation16 + $0x864] ss:$16 sps:$4 sm:$0xff]  }
 0x9a2   :  { %15994 = vmatpush2.bf16.msra.mxu1 %v22272_v50  ;;  %15954 = vmatprep.subr.bf16.mxu0 %v22277_v54  ;;  %v22362_v50 = vld [vmem:[#allocation16 + $0x860] ss:$16 sps:$4 sm:$0xff]   ;;  %v22317_v54 = vld [vmem:[#allocation16 + $0x68] ss:$16 sps:$4 sm:$0xff]  }
 0x9a3   :  { %15995 = vmatprep.subr.bf16.mxu1 %v22280_v31  ;;  %v22322_v31 = vld [vmem:[#allocation16 + $0x4c] ss:$16 sps:$4 sm:$0xff]  }
 0x9a5   :  { %15955 = vmatpush2.bf16.msra.mxu0 %v22275_v58  ;;  %v22368_v58 = vld [vmem:[#allocation16 + $0x840] ss:$16 sps:$4 sm:$0xff]  }
 0x9a6   :  { %15996 = vmatpush2.bf16.msra.mxu1 %v22278_v48  ;;  %15956 = vmatprep.subr.bf16.mxu0 %v22283_v8  ;;  %v22320_v48 = vld [vmem:[#allocation16 + $0x48] ss:$16 sps:$4 sm:$0xff]   ;;  %v22376_v8 = vld [vmem:[#allocation16 + $0x824] ss:$16 sps:$4 sm:$0xff]  }
 0x9a7   :  { %15997 = vmatprep.subr.bf16.mxu1 %v22286_v35  ;;  %v22325_v35 = vld [vmem:[#allocation16 + $0x2c] ss:$16 sps:$4 sm:$0xff]  }
 0x9a9   :  { %15957 = vmatpush2.bf16.msra.mxu0 %v22281_v39  ;;  %v22374_v39 = vld [vmem:[#allocation16 + $0x820] ss:$16 sps:$4 sm:$0xff]  }
 0x9aa   :  { %15998 = vmatpush2.bf16.msra.mxu1 %v22284_v9  ;;  %15958 = vmatprep.subr.bf16.mxu0 %v22289_v3  ;;  %v22323_v9 = vld [vmem:[#allocation16 + $0x28] ss:$16 sps:$4 sm:$0xff]   ;;  %v22382_v3 = vld [vmem:[#allocation16 + $0x804] ss:$16 sps:$4 sm:$0xff]  }
 0x9ab   :  { %15999 = vmatprep.subr.bf16.mxu1 %v22292_v16  ;;  %v22328_v16 = vld [vmem:[#allocation16 + $0xc] ss:$16 sps:$4 sm:$0xff]  }
 0x9ad   :  { %15959 = vmatpush2.bf16.msra.mxu0 %v22287_v40  ;;  %v22380_v40 = vld [vmem:[#allocation16 + $0x800] ss:$16 sps:$4 sm:$0xff]  }
 0x9ae   :  { %16000 = vmatpush2.bf16.msra.mxu1 %v22290_v44  ;;  %15960 = vmatprep.subr.bf16.mxu0 %v22295_v29  ;;  %v22326_v44 = vld [vmem:[#allocation16 + $0x8] ss:$16 sps:$4 sm:$0xff]   ;;  %v22388_v29 = vld [vmem:[#allocation16 + $0x2ec] ss:$16 sps:$4 sm:$0xff]  }
 0x9af   :  { %16001 = vmatprep.subr.bf16.mxu1 %v22298_v45  ;;  %v22331_v45 = vld [vmem:[#allocation16 + $0x1ec] ss:$16 sps:$4 sm:$0xff]  }
 0x9b1   :  { %15961 = vmatpush2.bf16.msra.mxu0 %v22293_v20  ;;  %v22329_v20 = vld [vmem:[#allocation16 + $0x1e8] ss:$16 sps:$4 sm:$0xff]  }
 0x9b2   :  { %16002 = vmatpush2.bf16.msra.mxu1 %v22296_v52  ;;  %15962 = vmatprep.subr.bf16.mxu0 %v22301_v21  ;;  %v22334_v52 = vld [vmem:[#allocation16 + $0x1cc] ss:$16 sps:$4 sm:$0xff]  }
 0x9b3   :  { %16003 = vmatprep.subr.bf16.mxu1 %v22304_v53 }
 0x9b5   :  { %15963 = vmatpush2.bf16.msra.mxu0 %v22299_v60 }
 0x9b6   :  { %16004 = vmatpush2.bf16.msra.mxu1 %v22302_v32  ;;  %16014 = vmatprep.subr.bf16.mxu0 %v22340_v4  ;;  %v22337_v4 = vld [vmem:[#allocation16 + $0x1ac] ss:$16 sps:$4 sm:$0xff]  }
 0x9b7   :  { %16055 = vmatprep.subr.bf16.mxu1 %v22307_v2 }
 0x9b8   :  { %v23669_v25 = vpop.f32.mrf.mxu0  ;;  %15965 = vmatmul.mubr.bf16.vlgmr.msra.gmra.mxu0 %v23665_v38 }
 0x9b9   :  { %v23672_v5 = vpop.f32.mrf.mxu1  ;;  %16006 = vmatmul.mubr.bf16.vlgmr.msra.gmra.mxu1 %v23667_v36  ;;  %16015 = vmatpush1.bf16.msra.mxu0 %v22338_v59 }
 0x9ba   :  { %16056 = vmatpush1.bf16.msra.mxu1 %v22305_v7  ;;  %16087 = vmatprep.mubr.bf16.mxu1 %v23631_v18  ;;  %v23676_v61 = vpop.f32.mrf.mxu0  ;;  %v22358_v18 = vld [vmem:[#allocation16 + $0x884] ss:$16 sps:$4 sm:$0xff]   ;;  %v22335_v7 = vld [vmem:[#allocation16 + $0x1a8] ss:$16 sps:$4 sm:$0xff]  }
 0x9bb   :  { %v23678_v24 = vpop.f32.mrf.mxu1  ;;  %16057 = vmatprep.subr.bf16.mxu1 %v22310_v49  ;;  %16016 = vmatprep.subr.bf16.mxu0 %v22346_v1  ;;  %v22343_v1 = vld [vmem:[#allocation16 + $0x18c] ss:$16 sps:$4 sm:$0xff]  }
 0x9bc   :  { %v19225_v56 = vpop.f32.mrf.mxu0  ;;  %16046 = vmatprep.mubr.bf16.mxu0 %v23038_v26 }
 0x9bd   :  { %v19247_v10 = vpop.f32.mrf.mxu1  ;;  %16017 = vmatpush1.bf16.msra.mxu0 %v22344_v27  ;;  %v22341_v27 = vld [vmem:[#allocation16 + $0x188] ss:$16 sps:$4 sm:$0xff]  }
 0x9be   :  { %16058 = vmatpush1.bf16.msra.mxu1 %v22308_v11  ;;  %v19226_v33 = vpop.f32.mrf.mxu0  ;;  %16018 = vmatprep.subr.bf16.mxu0 %v22352_v19  ;;  %v22349_v11 = vld [vmem:[#allocation16 + $0x16c] ss:$16 sps:$4 sm:$0xff]   ;;  %v22347_v19 = vld [vmem:[#allocation16 + $0x168] ss:$16 sps:$4 sm:$0xff]  }
 0x9bf   :  { %v19248_v22 = vpop.f32.mrf.mxu1  ;;  %16059 = vmatprep.subr.bf16.mxu1 %v22313_v63  ;;  %v22355_v63 = vld [vmem:[#allocation16 + $0x14c] ss:$16 sps:$4 sm:$0xff]   ;;  %v22353_v56 = vld [vmem:[#allocation16 + $0x148] ss:$16 sps:$4 sm:$0xff]  }
 0x9c0   :  { %v22361_v10 = vld [vmem:[#allocation16 + $0x12c] ss:$16 sps:$4 sm:$0xff]   ;;  %v22359_v33 = vld [vmem:[#allocation16 + $0x128] ss:$16 sps:$4 sm:$0xff]  }
 0x9c1   :  { %16019 = vmatpush1.bf16.msra.mxu0 %v22350_v12  ;;  %v19224_v12 = vadd.f32 %v23676_v61, %v23669_v25  ;;  %v22365_v22 = vld [vmem:[#allocation16 + $0x108] ss:$16 sps:$4 sm:$0xff]   ;;  %v22379_v25 = vld [vmem:[#allocation16 + $0x4cc] ss:$16 sps:$4 sm:$0xff]  }
 0x9c2   :  { %16060 = vmatpush1.bf16.msra.mxu1 %v22311_v55  ;;  %16020 = vmatprep.subr.bf16.mxu0 %v22358_v18  ;;  %v22367_v55 = vld [vmem:[#allocation16 + $0x10c] ss:$16 sps:$4 sm:$0xff]  }
 0x9c3   :  { %16061 = vmatprep.subr.bf16.mxu1 %v22316_v46  ;;  %v13877_v18 = vadd.f32 %v19224_v12, %v23661_v62  ;;  %v19246_v46 = vadd.f32 %v23678_v24, %v23672_v5  ;;  %v22424_v12 = vld [vmem:[#allocation16 + $0x22c] ss:$16 sps:$4 sm:$0xff]  }
 0x9c5   :  { %16021 = vmatpush1.bf16.msra.mxu0 %v22356_v28 }
 0x9c6   :  { %16062 = vmatpush1.bf16.msra.mxu1 %v22314_v15  ;;  %16022 = vmatprep.subr.bf16.mxu0 %v22364_v23  ;;  %v22373_v15 = vld [vmem:[#allocation16 + $0x4ec] ss:$16 sps:$4 sm:$0xff]   ;;  %v13917_v23 = vadd.f32 %v19246_v46, %v13877_v18  ;;  %v22425_v18 = vld [vmem:[#allocation16 + $0x5c8] ss:$16 sps:$4 sm:$0xff]  }
 0x9c7   :  { %16063 = vmatprep.subr.bf16.mxu1 %v22319_v6  ;;  %v22371_v6 = vld [vmem:[#allocation16 + $0x4e8] ss:$16 sps:$4 sm:$0xff]   ;;  %v22433_v46 = vld [vmem:[#allocation16 + $0x5ac] ss:$16 sps:$4 sm:$0xff]  }
 0x9c9   :  { %16023 = vmatpush1.bf16.msra.mxu0 %v22362_v50 }
 0x9ca   :  { %16064 = vmatpush1.bf16.msra.mxu1 %v22317_v54  ;;  %16024 = vmatprep.subr.bf16.mxu0 %v22370_v13 }
 0x9cb   :  { %16065 = vmatprep.subr.bf16.mxu1 %v22322_v31  ;;  %v22377_v31 = vld [vmem:[#allocation16 + $0x4c8] ss:$16 sps:$4 sm:$0xff]  }
 0x9cd   :  { %16025 = vmatpush1.bf16.msra.mxu0 %v22368_v58 }
 0x9ce   :  { %16066 = vmatpush1.bf16.msra.mxu1 %v22320_v48  ;;  %16026 = vmatprep.subr.bf16.mxu0 %v22376_v8  ;;  %v22385_v48 = vld [vmem:[#allocation16 + $0x4ac] ss:$16 sps:$4 sm:$0xff]  }
 0x9cf   :  { %16067 = vmatprep.subr.bf16.mxu1 %v22325_v35 }
 0x9d1   :  { %16027 = vmatpush1.bf16.msra.mxu0 %v22374_v39 }
 0x9d2   :  { %16068 = vmatpush1.bf16.msra.mxu1 %v22323_v9  ;;  %16028 = vmatprep.subr.bf16.mxu0 %v22382_v3 }
 0x9d3   :  { %16069 = vmatprep.subr.bf16.mxu1 %v22328_v16  ;;  %v22383_v16 = vld [vmem:[#allocation16 + $0x4a8] ss:$16 sps:$4 sm:$0xff]  }
 0x9d5   :  { %16029 = vmatpush1.bf16.msra.mxu0 %v22380_v40 }
 0x9d6   :  { %16070 = vmatpush1.bf16.msra.mxu1 %v22326_v44  ;;  %16096 = vmatprep.subr.bf16.mxu0 %v22388_v29 }
 0x9d7   :  { %16071 = vmatprep.subr.bf16.mxu1 %v22331_v45  ;;  %v22389_v45 = vld [vmem:[#allocation16 + $0x488] ss:$16 sps:$4 sm:$0xff]  }
 0x9d8   :  { %v19266_v21 = vpop.f32.mrf.mxu0 }
 0x9d9   :  { %v19288_v53 = vpop.f32.mrf.mxu1 }
 0x9da   :  { %16072 = vmatpush2.bf16.msra.mxu1 %v22329_v20  ;;  %v19267_v60 = vpop.f32.mrf.mxu0 }
 0x9db   :  { %v19289_v32 = vpop.f32.mrf.mxu1  ;;  %16073 = vmatprep.subr.bf16.mxu1 %v22334_v52  ;;  %v19268_v28 = vadd.f32 %v19267_v60, %v19266_v21  ;;  %v22394_v52 = vld [vmem:[#allocation16 + $0x2cc] ss:$16 sps:$4 sm:$0xff]   ;;  %v22395_v60 = vld [vmem:[#allocation16 + $0x468] ss:$16 sps:$4 sm:$0xff]  }
 0x9dc   :  { %v19269_v47 = vpop.f32.mrf.mxu0  ;;  %v19290_v54 = vadd.f32 %v19289_v32, %v19288_v53  ;;  %v22397_v21 = vld [vmem:[#allocation16 + $0x46c] ss:$16 sps:$4 sm:$0xff]   ;;  %v22392_v53 = vld [vmem:[#allocation16 + $0x2c8] ss:$16 sps:$4 sm:$0xff]  }
 0x9dd   :  { %v19291_v2 = vpop.f32.mrf.mxu1  ;;  %v13957_v50 = vadd.f32 %v19268_v28, %v13917_v23  ;;  %v22403_v32 = vld [vmem:[#allocation16 + $0x44c] ss:$16 sps:$4 sm:$0xff]   ;;  %v22401_v47 = vld [vmem:[#allocation16 + $0x448] ss:$16 sps:$4 sm:$0xff]  }
 0x9de   :  { %16074 = vmatpush2.bf16.msra.mxu1 %v22332_v37  ;;  %v19270_v59 = vpop.f32.mrf.mxu0  ;;  %v22400_v37 = vld [vmem:[#allocation16 + $0x2ac] ss:$16 sps:$4 sm:$0xff]   ;;  %v22428_v28 = vld [vmem:[#allocation16 + $0x208] ss:$16 sps:$4 sm:$0xff]  }
 0x9df   :  { %v19292_v49 = vpop.f32.mrf.mxu1  ;;  %16075 = vmatprep.subr.bf16.mxu1 %v22337_v4  ;;  %v13997_v5 = vadd.f32 %v19290_v54, %v13957_v50  ;;  %v22398_v4 = vld [vmem:[#allocation16 + $0x2a8] ss:$16 sps:$4 sm:$0xff]   ;;  %v22406_v2 = vld [vmem:[#allocation16 + $0x28c] ss:$16 sps:$4 sm:$0xff]  }
 0x9e0   :  { %v22409_v59 = vld [vmem:[#allocation16 + $0x42c] ss:$16 sps:$4 sm:$0xff]   ;;  %v22407_v49 = vld [vmem:[#allocation16 + $0x428] ss:$16 sps:$4 sm:$0xff]  }
 0x9e1   :  { %v22436_v23 = vld [vmem:[#allocation16 + $0x3ec] ss:$16 sps:$4 sm:$0xff]   ;;  %v22434_v50 = vld [vmem:[#allocation16 + $0x3e8] ss:$16 sps:$4 sm:$0xff]  }
 0x9e2   :  { %16076 = vmatpush2.bf16.msra.mxu1 %v22335_v7  ;;  %v22404_v7 = vld [vmem:[#allocation16 + $0x288] ss:$16 sps:$4 sm:$0xff]   ;;  %v22445_v54 = vld [vmem:[#allocation16 + $0x56c] ss:$16 sps:$4 sm:$0xff]  }
 0x9e3   :  { %16077 = vmatprep.subr.bf16.mxu1 %v22343_v1  ;;  %v22412_v1 = vld [vmem:[#allocation16 + $0x26c] ss:$16 sps:$4 sm:$0xff]  }
 0x9e6   :  { %16078 = vmatpush2.bf16.msra.mxu1 %v22341_v27  ;;  %v22410_v27 = vld [vmem:[#allocation16 + $0x268] ss:$16 sps:$4 sm:$0xff]  }
 0x9e7   :  { %16079 = vmatprep.subr.bf16.mxu1 %v22349_v11  ;;  %v22413_v11 = vld [vmem:[#allocation16 + $0x408] ss:$16 sps:$4 sm:$0xff]  }
 0x9ea   :  { %16080 = vmatpush2.bf16.msra.mxu1 %v22347_v19  ;;  %v22418_v19 = vld [vmem:[#allocation16 + $0x24c] ss:$16 sps:$4 sm:$0xff]  }
 0x9eb   :  { %16081 = vmatprep.subr.bf16.mxu1 %v22355_v63  ;;  %v22421_v63 = vld [vmem:[#allocation16 + $0x5ec] ss:$16 sps:$4 sm:$0xff]  }
 0x9ee   :  { %16082 = vmatpush2.bf16.msra.mxu1 %v22353_v56  ;;  %v22416_v56 = vld [vmem:[#allocation16 + $0x248] ss:$16 sps:$4 sm:$0xff]  }
 0x9ef   :  { %16083 = vmatprep.subr.bf16.mxu1 %v22361_v10  ;;  %v22419_v10 = vld [vmem:[#allocation16 + $0x5e8] ss:$16 sps:$4 sm:$0xff]  }
 0x9f2   :  { %16084 = vmatpush2.bf16.msra.mxu1 %v22359_v33  ;;  %v22427_v33 = vld [vmem:[#allocation16 + $0x5cc] ss:$16 sps:$4 sm:$0xff]  }
 0x9f3   :  { %16085 = vmatprep.subr.bf16.mxu1 %v22367_v55  ;;  %v22422_v55 = vld [vmem:[#allocation16 + $0x228] ss:$16 sps:$4 sm:$0xff]  }
 0x9f6   :  { %16086 = vmatpush2.bf16.msra.mxu1 %v22365_v22  ;;  %v22430_v22 = vld [vmem:[#allocation16 + $0x20c] ss:$16 sps:$4 sm:$0xff]  }
 0x9f7   :  { %16137 = vmatprep.subr.bf16.mxu1 %v22373_v15  ;;  %v22431_v15 = vld [vmem:[#allocation16 + $0x5a8] ss:$16 sps:$4 sm:$0xff]  }
 0x9f8   :  { %v19310_v61 = vpop.f32.mrf.mxu0 }
 0x9f9   :  { %v19332_v13 = vpop.f32.mrf.mxu1  ;;  %16088 = vmatmul.mubr.bf16.vlgmr.msra.gmra.mxu1 %v23646_v34  ;;  %v22391_v34 = vld [vmem:[#allocation16 + $0x48c] ss:$16 sps:$4 sm:$0xff]  }
 0x9fa   :  { %16138 = vmatpush1.bf16.msra.mxu1 %v22371_v6  ;;  %16169 = vmatprep.mubr.bf16.mxu1 %v23650_v14  ;;  %v19311_v62 = vpop.f32.mrf.mxu0  ;;  %v22386_v14 = vld [vmem:[#allocation16 + $0x2e8] ss:$16 sps:$4 sm:$0xff]   ;;  %v22439_v6 = vld [vmem:[#allocation16 + $0x58c] ss:$16 sps:$4 sm:$0xff]  }
 0x9fb   :  { %v19312_v24 = vadd.f32 %v19311_v62, %v19310_v61  ;;  %v19333_v58 = vpop.f32.mrf.mxu1  ;;  %16139 = vmatprep.subr.bf16.mxu1 %v22379_v25  ;;  %v22437_v25 = vld [vmem:[#allocation16 + $0x588] ss:$16 sps:$4 sm:$0xff]   ;;  %v22442_v61 = vld [vmem:[#allocation16 + $0x3cc] ss:$16 sps:$4 sm:$0xff]  }
 0x9fc   :  { %v19313_v8 = vpop.f32.mrf.mxu0  ;;  %v19334_v39 = vadd.f32 %v19333_v58, %v19332_v13  ;;  %v22440_v13 = vld [vmem:[#allocation16 + $0x3c8] ss:$16 sps:$4 sm:$0xff]  }
 0x9fd   :  { %v14037_v35 = vadd.f32 %v19312_v24, %v13997_v5  ;;  %v19335_v9 = vpop.f32.mrf.mxu1  ;;  %v22443_v62 = vld [vmem:[#allocation16 + $0x568] ss:$16 sps:$4 sm:$0xff]   ;;  %v22451_v5 = vld [vmem:[#allocation16 + $0x54c] ss:$16 sps:$4 sm:$0xff]  }
 0x9fe   :  { %16140 = vmatpush1.bf16.msra.mxu1 %v22377_v31  ;;  %v19314_v3 = vpop.f32.mrf.mxu0  ;;  %v22448_v31 = vld [vmem:[#allocation16 + $0x3ac] ss:$16 sps:$4 sm:$0xff]   ;;  %v22446_v24 = vld [vmem:[#allocation16 + $0x3a8] ss:$16 sps:$4 sm:$0xff]  }
 0x9ff   :  { %v14077_v40 = vadd.f32 %v19334_v39, %v14037_v35  ;;  %v19336_v44 = vpop.f32.mrf.mxu1  ;;  %16141 = vmatprep.subr.bf16.mxu1 %v22385_v48  ;;  %v22449_v58 = vld [vmem:[#allocation16 + $0x548] ss:$16 sps:$4 sm:$0xff]   ;;  %v22454_v48 = vld [vmem:[#allocation16 + $0x38c] ss:$16 sps:$4 sm:$0xff]  }
 0xa00   :  { %v22457_v8 = vld [vmem:[#allocation16 + $0x52c] ss:$16 sps:$4 sm:$0xff]   ;;  %v22452_v35 = vld [vmem:[#allocation16 + $0x388] ss:$16 sps:$4 sm:$0xff]   ;;  %v23692_v44 = vld [vmem:[#allocation17] sm:$0xf] }
 0xa01   :  { %v14090_v29 = vmax.f32 %v14077_v40, 0.0  ;;  %v22455_v39 = vld [vmem:[#allocation16 + $0x528] ss:$16 sps:$4 sm:$0xff]   ;;  %v22460_v9 = vld [vmem:[#allocation16 + $0x36c] ss:$16 sps:$4 sm:$0xff]  }
 0xa02   :  { %16142 = vmatpush1.bf16.msra.mxu1 %v22383_v16  ;;  %v22463_v3 = vld [vmem:[#allocation16 + $0x50c] ss:$16 sps:$4 sm:$0xff]   ;;  %v22458_v16 = vld [vmem:[#allocation16 + $0x368] ss:$16 sps:$4 sm:$0xff]  }
 0xa03   :  { %v23688_v20 = vpack.c.bf16 %v14090_v29, %v14090_v29  ;;  %16143 = vmatprep.subr.bf16.mxu1 %v22391_v34  ;;  %v22461_v40 = vld [vmem:[#allocation16 + $0x508] ss:$16 sps:$4 sm:$0xff]   ;;  %v22466_v34 = vld [vmem:[#allocation16 + $0x34c] ss:$16 sps:$4 sm:$0xff]  }
 0xa04   :  { %v22469_v29 = vld [vmem:[#allocation16 + $0x8ec] ss:$16 sps:$4 sm:$0xff]  }
 0xa05   :  { %16047 = vmatmul.mubr.bf16.vlgmr.msra.gmra.mxu0 %v23688_v20 }
 0xa06   :  { %16097 = vmatpush1.bf16.msra.mxu0 %v22386_v14  ;;  %16144 = vmatpush1.bf16.msra.mxu1 %v22389_v45  ;;  %v14393_v14 = vrot.slane %v23692_v44, %v23226_v42  ;;  %v22464_v45 = vld [vmem:[#allocation16 + $0x348] ss:$16 sps:$4 sm:$0xff]  }
 0xa07   :  { %16128 = vmatprep.mubr.bf16.mxu0 %v23634_v51  ;;  %16098 = vmatprep.subr.bf16.mxu0 %v22394_v52  ;;  %v22415_v51 = vld [vmem:[#allocation16 + $0x40c] ss:$16 sps:$4 sm:$0xff]   ;;  %v22467_v52 = vld [vmem:[#allocation16 + $0x8e8] ss:$16 sps:$4 sm:$0xff]  }
 0xa08   :  { %16145 = vmatprep.subr.bf16.mxu1 %v22397_v21  ;;  %v14397_v21 = vrot.slane %v23692_v44, %v23229_v43  ;;  %v22470_v42 = vld [vmem:[#allocation16 + $0x328] ss:$16 sps:$4 sm:$0xff]   ;;  %v22481_v43 = vld [vmem:[#allocation16 + $0x8ac] ss:$16 sps:$4 sm:$0xff]  }
 0xa0a   :  { %16099 = vmatpush1.bf16.msra.mxu0 %v22392_v53  ;;  %16146 = vmatpush1.bf16.msra.mxu1 %v22395_v60  ;;  %v22472_v53 = vld [vmem:[#allocation16 + $0x32c] ss:$16 sps:$4 sm:$0xff]  }
 0xa0b   :  { %16100 = vmatprep.subr.bf16.mxu0 %v22400_v37  ;;  %16147 = vmatprep.subr.bf16.mxu1 %v22403_v32  ;;  %v22475_v60 = vld [vmem:[#allocation16 + $0x8cc] ss:$16 sps:$4 sm:$0xff]  }
 0xa0e   :  { %16101 = vmatpush1.bf16.msra.mxu0 %v22398_v4  ;;  %16148 = vmatpush1.bf16.msra.mxu1 %v22401_v47 }
 0xa0f   :  { %16102 = vmatprep.subr.bf16.mxu0 %v22406_v2  ;;  %16149 = vmatprep.subr.bf16.mxu1 %v22409_v59  ;;  %v22473_v2 = vld [vmem:[#allocation16 + $0x8c8] ss:$16 sps:$4 sm:$0xff]  }
 0xa12   :  { %16103 = vmatpush1.bf16.msra.mxu0 %v22404_v7  ;;  %16150 = vmatpush1.bf16.msra.mxu1 %v22407_v49 }
 0xa13   :  { %16104 = vmatprep.subr.bf16.mxu0 %v22412_v1  ;;  %16151 = vmatprep.subr.bf16.mxu1 %v22415_v51  ;;  %v22478_v1 = vld [vmem:[#allocation16 + $0x30c] ss:$16 sps:$4 sm:$0xff]  }
 0xa16   :  { %16105 = vmatpush1.bf16.msra.mxu0 %v22410_v27  ;;  %16152 = vmatpush1.bf16.msra.mxu1 %v22413_v11 }
 0xa17   :  { %16106 = vmatprep.subr.bf16.mxu0 %v22418_v19  ;;  %16153 = vmatprep.subr.bf16.mxu1 %v22421_v63  ;;  %v22476_v19 = vld [vmem:[#allocation16 + $0x308] ss:$16 sps:$4 sm:$0xff]  }
 0xa18   :  { %v22479_v63 = vld [vmem:[#allocation16 + $0x8a8] ss:$16 sps:$4 sm:$0xff]  }
 0xa1a   :  { %16107 = vmatpush1.bf16.msra.mxu0 %v22416_v56  ;;  %16154 = vmatpush2.bf16.msra.mxu1 %v22419_v10  ;;  %v22484_v10 = vld [vmem:[#allocation16 + $0x6ec] ss:$16 sps:$4 sm:$0xff]  }
 0xa1b   :  { %16108 = vmatprep.subr.bf16.mxu0 %v22424_v12  ;;  %16155 = vmatprep.subr.bf16.mxu1 %v22427_v33  ;;  %v22487_v12 = vld [vmem:[#allocation16 + $0x88c] ss:$16 sps:$4 sm:$0xff]   ;;  %v22482_v33 = vld [vmem:[#allocation16 + $0x6e8] ss:$16 sps:$4 sm:$0xff]  }
 0xa1e   :  { %16109 = vmatpush1.bf16.msra.mxu0 %v22422_v55  ;;  %16156 = vmatpush2.bf16.msra.mxu1 %v22425_v18  ;;  %v22485_v55 = vld [vmem:[#allocation16 + $0x888] ss:$16 sps:$4 sm:$0xff]   ;;  %v22493_v18 = vld [vmem:[#allocation16 + $0x86c] ss:$16 sps:$4 sm:$0xff]  }
 0xa1f   :  { %16110 = vmatprep.subr.bf16.mxu0 %v22430_v22  ;;  %16157 = vmatprep.subr.bf16.mxu1 %v22433_v46  ;;  %v22488_v22 = vld [vmem:[#allocation16 + $0x6c8] ss:$16 sps:$4 sm:$0xff]  }
 0xa20   :  { %v22491_v46 = vld [vmem:[#allocation16 + $0x868] ss:$16 sps:$4 sm:$0xff]  }
 0xa22   :  { %16111 = vmatpush1.bf16.msra.mxu0 %v22428_v28  ;;  %16158 = vmatpush2.bf16.msra.mxu1 %v22431_v15  ;;  %v22496_v28 = vld [vmem:[#allocation16 + $0x6ac] ss:$16 sps:$4 sm:$0xff]  }
 0xa23   :  { %16112 = vmatprep.subr.bf16.mxu0 %v22436_v23  ;;  %16159 = vmatprep.subr.bf16.mxu1 %v22439_v6  ;;  %v22499_v15 = vld [vmem:[#allocation16 + $0x84c] ss:$16 sps:$4 sm:$0xff]   ;;  %v22494_v23 = vld [vmem:[#allocation16 + $0x6a8] ss:$16 sps:$4 sm:$0xff]  }
 0xa24   :  { %v22497_v6 = vld [vmem:[#allocation16 + $0x848] ss:$16 sps:$4 sm:$0xff]  }
 0xa26   :  { %16113 = vmatpush2.bf16.msra.mxu0 %v22434_v50  ;;  %16160 = vmatpush2.bf16.msra.mxu1 %v22437_v25  ;;  %v22502_v50 = vld [vmem:[#allocation16 + $0x68c] ss:$16 sps:$4 sm:$0xff]  }
 0xa27   :  { %16114 = vmatprep.subr.bf16.mxu0 %v22442_v61  ;;  %16161 = vmatprep.subr.bf16.mxu1 %v22445_v54  ;;  %v22505_v25 = vld [vmem:[#allocation16 + $0x82c] ss:$16 sps:$4 sm:$0xff]  }
 0xa28   :  { %v22508_v61 = vld [vmem:[#allocation16 + $0x66c] ss:$16 sps:$4 sm:$0xff]  }
 0xa29   :  { %v22511_v54 = vld [vmem:[#allocation16 + $0x80c] ss:$16 sps:$4 sm:$0xff]  }
 0xa2a   :  { %16115 = vmatpush2.bf16.msra.mxu0 %v22440_v13  ;;  %16162 = vmatpush2.bf16.msra.mxu1 %v22443_v62  ;;  %v22506_v13 = vld [vmem:[#allocation16 + $0x668] ss:$16 sps:$4 sm:$0xff]  }
 0xa2b   :  { %16116 = vmatprep.subr.bf16.mxu0 %v22448_v31  ;;  %16163 = vmatprep.subr.bf16.mxu1 %v22451_v5  ;;  %v22509_v62 = vld [vmem:[#allocation16 + $0x808] ss:$16 sps:$4 sm:$0xff]   ;;  %v22514_v31 = vld [vmem:[#allocation16 + $0x64c] ss:$16 sps:$4 sm:$0xff]  }
 0xa2c   :  { %v22512_v5 = vld [vmem:[#allocation16 + $0x648] ss:$16 sps:$4 sm:$0xff]  }
 0xa2e   :  { %16117 = vmatpush2.bf16.msra.mxu0 %v22446_v24  ;;  %16164 = vmatpush2.bf16.msra.mxu1 %v22449_v58  ;;  %v22517_v24 = vld [vmem:[#allocation16 + $0x62c] ss:$16 sps:$4 sm:$0xff]   ;;  %v22515_v58 = vld [vmem:[#allocation16 + $0x628] ss:$16 sps:$4 sm:$0xff]  }
 0xa2f   :  { %16118 = vmatprep.subr.bf16.mxu0 %v22454_v48  ;;  %16165 = vmatprep.subr.bf16.mxu1 %v22457_v8  ;;  %v22520_v48 = vld [vmem:[#allocation16 + $0x60c] ss:$16 sps:$4 sm:$0xff]   ;;  %v22518_v8 = vld [vmem:[#allocation16 + $0x608] ss:$16 sps:$4 sm:$0xff]  }
 0xa32   :  { %16119 = vmatpush2.bf16.msra.mxu0 %v22452_v35  ;;  %16166 = vmatpush2.bf16.msra.mxu1 %v22455_v39  ;;  %v22523_v35 = vld [vmem:[#allocation16 + $0x7ec] ss:$16 sps:$4 sm:$0xff]   ;;  %v22521_v39 = vld [vmem:[#allocation16 + $0x7e8] ss:$16 sps:$4 sm:$0xff]  }
 0xa33   :  { %16120 = vmatprep.subr.bf16.mxu0 %v22460_v9  ;;  %16167 = vmatprep.subr.bf16.mxu1 %v22463_v3  ;;  %v22526_v9 = vld [vmem:[#allocation16 + $0x7cc] ss:$16 sps:$4 sm:$0xff]   ;;  %v22524_v3 = vld [vmem:[#allocation16 + $0x7c8] ss:$16 sps:$4 sm:$0xff]  }
 0xa36   :  { %16121 = vmatpush2.bf16.msra.mxu0 %v22458_v16  ;;  %16168 = vmatpush2.bf16.msra.mxu1 %v22461_v40  ;;  %v22529_v16 = vld [vmem:[#allocation16 + $0x7ac] ss:$16 sps:$4 sm:$0xff]   ;;  %v22527_v40 = vld [vmem:[#allocation16 + $0x7a8] ss:$16 sps:$4 sm:$0xff]  }
 0xa37   :  { %16122 = vmatprep.subr.bf16.mxu0 %v22466_v34  ;;  %16219 = vmatprep.subr.bf16.mxu1 %v22469_v29  ;;  %v22530_v34 = vld [vmem:[#allocation16 + $0x788] ss:$16 sps:$4 sm:$0xff]   ;;  %v22535_v29 = vld [vmem:[#allocation16 + $0x76c] ss:$16 sps:$4 sm:$0xff]  }
 0xa38   :  { %v15884_v37 = vpop.f32.mrf.mxu0 }
 0xa39   :  { %v15885_v32 = vadd.f32 %v15884_v37, %v14393_v14  ;;  %v15925_v4 = vpop.f32.mrf.mxu1  ;;  %16170 = vmatmul.mubr.bf16.vlgmr.msra.gmra.mxu1 %v23665_v38  ;;  %v22533_v14 = vld [vmem:[#allocation16 + $0x768] ss:$16 sps:$4 sm:$0xff]  }
 0xa3a   :  { %16123 = vmatpush2.bf16.msra.mxu0 %v22464_v45  ;;  %16220 = vmatpush1.bf16.msra.mxu1 %v22467_v52  ;;  %v15886_v47 = vpop.f32.mrf.mxu0  ;;  %v22538_v45 = vld [vmem:[#allocation16 + $0x74c] ss:$16 sps:$4 sm:$0xff]   ;;  %v22536_v52 = vld [vmem:[#allocation16 + $0x748] ss:$16 sps:$4 sm:$0xff]  }
 0xa3b   :  { %v23699_v59 = vadd.f32 %v15925_v4, %v15885_v32  ;;  %v15887_v7 = vadd.f32 %v15886_v47, %v14397_v21  ;;  %v15927_v49 = vpop.f32.mrf.mxu1  ;;  %16124 = vmatprep.subr.bf16.mxu0 %v22472_v53  ;;  %16221 = vmatprep.subr.bf16.mxu1 %v22475_v60  ;;  %v22541_v21 = vld [vmem:[#allocation16 + $0x72c] ss:$16 sps:$4 sm:$0xff]   ;;  %v22539_v4 = vld [vmem:[#allocation16 + $0x728] ss:$16 sps:$4 sm:$0xff]  }
 0xa3c   :  { %v15888_v51 = vpop.f32.mrf.mxu0  ;;  %16251 = vmatprep.mubr.bf16.mxu1 %v23038_v26  ;;  %v22490_v26 = vld [vmem:[#allocation16 + $0x6cc] ss:$16 sps:$4 sm:$0xff]  }
 0xa3d   :  { %v23702_v27 = vadd.f32 %v15927_v49, %v15887_v7  ;;  %v15929_v11 = vpop.f32.mrf.mxu1  ;;  %v22544_v7 = vld [vmem:[#allocation16 + $0x70c] ss:$16 sps:$4 sm:$0xff]  }
 0xa3e   :  { %16125 = vmatpush2.bf16.msra.mxu0 %v22470_v42  ;;  %16222 = vmatpush1.bf16.msra.mxu1 %v22473_v2  ;;  %v15889_v38 = vpop.f32.mrf.mxu0  ;;  %v22542_v11 = vld [vmem:[#allocation16 + $0x708] ss:$16 sps:$4 sm:$0xff]  }
 0xa3f   :  { %v15930_v56 = vpop.f32.mrf.mxu1  ;;  %16126 = vmatprep.subr.bf16.mxu0 %v22478_v1  ;;  %16223 = vmatprep.subr.bf16.mxu1 %v22481_v43 }
 0xa40   :  { %v22549_v56 = vld [vmem:[#allocation19 + $0x68] sm:$0xff]  }
 0xa42   :  { %16127 = vmatpush2.bf16.msra.mxu0 %v22476_v19  ;;  %16224 = vmatpush1.bf16.msra.mxu1 %v22479_v63  ;;  %v22546_v19 = vld [vmem:[#allocation19 + $0x38] sm:$0xff]   ;;  %v22547_v63 = vld [vmem:[#allocation19 + $0x70] sm:$0xff]  }
 0xa43   :  { %16178 = vmatprep.subr.bf16.mxu0 %v22484_v10  ;;  %16225 = vmatprep.subr.bf16.mxu1 %v22487_v12  ;;  %v22550_v10 = vld [vmem:[#allocation19 + $0x28] sm:$0xff]   ;;  %v22551_v12 = vld [vmem:[#allocation19 + $0x60] sm:$0xff]  }
 0xa45   :  { %16129 = vmatmul.mubr.bf16.vlgmr.msra.gmra.mxu0 %v23648_v30  ;;  %v22500_v30 = vld [vmem:[#allocation16 + $0x688] ss:$16 sps:$4 sm:$0xff]  }
 0xa46   :  { %16179 = vmatpush1.bf16.msra.mxu0 %v22482_v33  ;;  %16210 = vmatprep.mubr.bf16.mxu0 %v23653_v57  ;;  %v22503_v57 = vld [vmem:[#allocation16 + $0x828] ss:$16 sps:$4 sm:$0xff]  }
 0xa47   :  { %16226 = vmatpush1.bf16.msra.mxu1 %v22485_v55  ;;  %16180 = vmatprep.subr.bf16.mxu0 %v22490_v26  ;;  %v22552_v33 = vld [vmem:[#allocation19 + $0x20] sm:$0xff]   ;;  %v22553_v55 = vld [vmem:[#allocation19 + $0x58] sm:$0xff]  }
 0xa48   :  { %16227 = vmatprep.subr.bf16.mxu1 %v22493_v18  ;;  %v22554_v26 = vld [vmem:[#allocation19 + $0x18] sm:$0xff]   ;;  %v22555_v18 = vld [vmem:[#allocation19 + $0x50] sm:$0xff]  }
 0xa4a   :  { %16181 = vmatpush1.bf16.msra.mxu0 %v22488_v22  ;;  %v22556_v22 = vld [vmem:[#allocation19 + $0x10] sm:$0xff]  }
 0xa4b   :  { %16228 = vmatpush1.bf16.msra.mxu1 %v22491_v46  ;;  %16182 = vmatprep.subr.bf16.mxu0 %v22496_v28  ;;  %v22558_v46 = vld [vmem:[#allocation19 + $0x8] sm:$0xff]   ;;  %v22559_v28 = vld [vmem:[#allocation19 + $0x40] sm:$0xff]  }
 0xa4c   :  { %16229 = vmatprep.subr.bf16.mxu1 %v22499_v15  ;;  %v22560_v15 = vld [vmem:[#allocation19] sm:$0xff]  }
 0xa4e   :  { %16183 = vmatpush1.bf16.msra.mxu0 %v22494_v23  ;;  %v22561_v23 = vld [vmem:[#allocation19 + $0xf8] sm:$0xff]  }
 0xa4f   :  { %16230 = vmatpush1.bf16.msra.mxu1 %v22497_v6  ;;  %16184 = vmatprep.subr.bf16.mxu0 %v22502_v50  ;;  %v22562_v6 = vld [vmem:[#allocation19 + $0xb8] sm:$0xff]   ;;  %v22563_v50 = vld [vmem:[#allocation19 + $0xf0] sm:$0xff]  }
 0xa50   :  { %16231 = vmatprep.subr.bf16.mxu1 %v22505_v25  ;;  %v22564_v25 = vld [vmem:[#allocation19 + $0xb0] sm:$0xff]  }
 0xa52   :  { %16185 = vmatpush1.bf16.msra.mxu0 %v22500_v30  ;;  %v22565_v30 = vld [vmem:[#allocation19 + $0xe8] sm:$0xff]  }
 0xa53   :  { %16232 = vmatpush1.bf16.msra.mxu1 %v22503_v57  ;;  %16186 = vmatprep.subr.bf16.mxu0 %v22508_v61  ;;  %v22566_v57 = vld [vmem:[#allocation19 + $0xa8] sm:$0xff]   ;;  %v22567_v61 = vld [vmem:[#allocation19 + $0xe0] sm:$0xff]  }
 0xa54   :  { %16233 = vmatprep.subr.bf16.mxu1 %v22511_v54  ;;  %v22568_v54 = vld [vmem:[#allocation19 + $0xa0] sm:$0xff]  }
 0xa56   :  { %16187 = vmatpush1.bf16.msra.mxu0 %v22506_v13  ;;  %v22569_v13 = vld [vmem:[#allocation19 + $0xd8] sm:$0xff]  }
 0xa57   :  { %16234 = vmatpush1.bf16.msra.mxu1 %v22509_v62  ;;  %16188 = vmatprep.subr.bf16.mxu0 %v22514_v31  ;;  %v22570_v62 = vld [vmem:[#allocation19 + $0x98] sm:$0xff]  }
 0xa58   :  { %19360 = vmatprep.subr.bf16.mxu1 %v22561_v23 }
 0xa5a   :  { %16252 = vmatmul.mubr.bf16.vlgmr.msra.gmra.mxu1 %v23688_v20  ;;  %16189 = vmatpush1.bf16.msra.mxu0 %v22512_v5  ;;  %v22532_v20 = vld [vmem:[#allocation16 + $0x78c] ss:$16 sps:$4 sm:$0xff]  }
 0xa5b   :  { %16190 = vmatprep.subr.bf16.mxu0 %v22517_v24  ;;  %19361 = vmatpush3.bf16.msra.mxu1 %v22562_v6 }
 0xa5c   :  { %19362 = vmatprep.subr.bf16.mxu1 %v22563_v50 }
 0xa5e   :  { %16191 = vmatpush1.bf16.msra.mxu0 %v22515_v58 }
 0xa5f   :  { %16192 = vmatprep.subr.bf16.mxu0 %v22520_v48  ;;  %19363 = vmatpush3.bf16.msra.mxu1 %v22564_v25  ;;  %v22571_v48 = vld [vmem:[#allocation19 + $0xd0] sm:$0xff]  }
 0xa60   :  { %19364 = vmatprep.subr.bf16.mxu1 %v22565_v30 }
 0xa62   :  { %16193 = vmatpush1.bf16.msra.mxu0 %v22518_v8 }
 0xa63   :  { %16194 = vmatprep.subr.bf16.mxu0 %v22523_v35  ;;  %19365 = vmatpush3.bf16.msra.mxu1 %v22566_v57  ;;  %v22572_v35 = vld [vmem:[#allocation19 + $0x90] sm:$0xff]  }
 0xa64   :  { %19366 = vmatprep.subr.bf16.mxu1 %v22567_v61  ;;  %v22582_v57 = vld [vmem:[#allocation22 + $0x10] sm:$0xff]  }
 0xa66   :  { %16195 = vmatpush2.bf16.msra.mxu0 %v22521_v39 }
 0xa67   :  { %16196 = vmatprep.subr.bf16.mxu0 %v22526_v9  ;;  %19367 = vmatpush3.bf16.msra.mxu1 %v22568_v54 }
 0xa68   :  { %19368 = vmatprep.subr.bf16.mxu1 %v22569_v13 }
 0xa6a   :  { %16197 = vmatpush2.bf16.msra.mxu0 %v22524_v3 }
 0xa6b   :  { %16198 = vmatprep.subr.bf16.mxu0 %v22529_v16  ;;  %19369 = vmatpush3.bf16.msra.mxu1 %v22570_v62  ;;  %v22573_v16 = vld [vmem:[#allocation19 + $0xc8] sm:$0xff]  }
 0xa6c   :  { %19370 = vmatprep.subr.bf16.mxu1 %v22571_v48  ;;  %v22583_v62 = vld [vmem:[#allocation22 + $0x8] sm:$0xff]  }
 0xa6d   :  { %v22587_v48 = vld [vmem:[#allocation25 + $0x28] sm:$0xff]  }
 0xa6e   :  { %16199 = vmatpush2.bf16.msra.mxu0 %v22527_v40 }
 0xa6f   :  { %16200 = vmatprep.subr.bf16.mxu0 %v22532_v20  ;;  %19371 = vmatpush3.bf16.msra.mxu1 %v22572_v35  ;;  %v22589_v35 = vld [vmem:[#allocation25 + $0x18] sm:$0xff]  }
 0xa70   :  { %19372 = vmatprep.subr.bf16.mxu1 %v22573_v16 }
 0xa72   :  { %16201 = vmatpush2.bf16.msra.mxu0 %v22530_v34  ;;  %v22574_v34 = vld [vmem:[#allocation19 + $0x88] sm:$0xff]  }
 0xa73   :  { %16202 = vmatprep.subr.bf16.mxu0 %v22535_v29  ;;  %19373 = vmatpush3.bf16.msra.mxu1 %v22574_v34 }
 0xa76   :  { %16203 = vmatpush2.bf16.msra.mxu0 %v22533_v14 }
 0xa77   :  { %16204 = vmatprep.subr.bf16.mxu0 %v22538_v45 }
 0xa78   :  { %v15966_v53 = vpop.f32.mrf.mxu0 }
 0xa79   :  { %v15967_v60 = vadd.f32 %v15966_v53, %v23699_v59  ;;  %v16007_v37 = vpop.f32.mrf.mxu1  ;;  %v22545_v59 = vld [vmem:[#allocation19 + $0x78] sm:$0xff]   ;;  %v22576_v53 = vld [vmem:[#allocation19 + $0x80] sm:$0xff]  }
 0xa7a   :  { %16205 = vmatpush2.bf16.msra.mxu0 %v22536_v52  ;;  %v15968_v32 = vpop.f32.mrf.mxu0  ;;  %v22575_v52 = vld [vmem:[#allocation19 + $0xc0] sm:$0xff]  }
 0xa7b   :  { %v23708_v47 = vadd.f32 %v16007_v37, %v15967_v60  ;;  %v15969_v42 = vadd.f32 %v15968_v32, %v23702_v27  ;;  %v16009_v2 = vpop.f32.mrf.mxu1  ;;  %16206 = vmatprep.subr.bf16.mxu0 %v22541_v21  ;;  %v22548_v27 = vld [vmem:[#allocation19 + $0x30] sm:$0xff]   ;;  %19374 = vmatprep.subr.bf16.mxu1 %v22575_v52 }
 0xa7c   :  { %v15970_v49 = vpop.f32.mrf.mxu0  ;;  %19375 = vmatpush3.bf16.msra.mxu1 %v22576_v53  ;;  %v22592_v53 = vld [vmem:[#allocation25] sm:$0xff]  }
 0xa7d   :  { %v23711_v1 = vadd.f32 %v16009_v2, %v15969_v42  ;;  %v16011_v43 = vpop.f32.mrf.mxu1  ;;  %19449 = vmatprep.subr.bf16.mxu1 %v23036_v0  ;;  %v14405_v42 = vrot.slane %v23692_v44, %v23264_v17 }
 0xa7e   :  { %16207 = vmatpush2.bf16.msra.mxu0 %v22539_v4  ;;  %v15971_v51 = vpop.f32.mrf.mxu0 }
 0xa7f   :  { %v16012_v38 = vpop.f32.mrf.mxu1  ;;  %16208 = vmatprep.subr.bf16.mxu0 %v22544_v7 }
 0xa82   :  { %16209 = vmatpush2.bf16.msra.mxu0 %v22542_v11 }
 0xa83   :  { %19338 = vmatprep.subr.bf16.mxu0 %v22545_v59 }
 0xa85   :  { %16211 = vmatmul.mubr.bf16.vlgmr.msra.gmra.mxu0 %v23667_v36  ;;  %v22557_v36 = vld [vmem:[#allocation19 + $0x48] sm:$0xff]  }
 0xa86   :  { %19339 = vmatpush3.bf16.msra.mxu0 %v22546_v19 }
 0xa87   :  { %19340 = vmatprep.subr.bf16.mxu0 %v22547_v63  ;;  %v22577_v63 = vld [vmem:[#allocation22 + $0x38] sm:$0xff]  }
 0xa8a   :  { %19341 = vmatpush3.bf16.msra.mxu0 %v22548_v27  ;;  %v22578_v27 = vld [vmem:[#allocation22 + $0x30] sm:$0xff]  }
 0xa8b   :  { %19342 = vmatprep.subr.bf16.mxu0 %v22549_v56 }
 0xa8e   :  { %19343 = vmatpush3.bf16.msra.mxu0 %v22550_v10 }
 0xa8f   :  { %19344 = vmatprep.subr.bf16.mxu0 %v22551_v12 }
 0xa92   :  { %19345 = vmatpush3.bf16.msra.mxu0 %v22552_v33  ;;  %v22581_v33 = vld [vmem:[#allocation22 + $0x18] sm:$0xff]  }
 0xa93   :  { %19346 = vmatprep.subr.bf16.mxu0 %v22553_v55 }
 0xa96   :  { %19347 = vmatpush3.bf16.msra.mxu0 %v22554_v26 }
 0xa97   :  { %19348 = vmatprep.subr.bf16.mxu0 %v22555_v18 }
 0xa9a   :  { %19349 = vmatpush3.bf16.msra.mxu0 %v22556_v22 }
 0xa9b   :  { %19350 = vmatprep.subr.bf16.mxu0 %v22557_v36 }
 0xa9e   :  { %19351 = vmatpush3.bf16.msra.mxu0 %v22558_v46 }
 0xa9f   :  { %19352 = vmatprep.subr.bf16.mxu0 %v22559_v28 }
 0xaa2   :  { %19353 = vmatpush3.bf16.msra.mxu0 %v22560_v15 }
 0xaa3   :  { %19429 = vmatprep.subr.bf16.mxu0 %v23036_v0 }
 0xab9   :  { %v16089_v31 = vpop.f32.mrf.mxu1 }
 0xabb   :  { %v16091_v5 = vpop.f32.mrf.mxu1 }
 0xabc   :  { %v16092_v49 = vadd.f32 %v16091_v5, %v14405_v42  ;;  %v22584_v5 = vld [vmem:[#allocation22] sm:$0xff]   ;;  %v22598_v42 = vld [vmem:[#allocation28 + $0x10] sm:$0xff]  }
 0xabd   :  { %v16093_v24 = vpop.f32.mrf.mxu1 }
 0xabe   :  { %v22585_v24 = vld [vmem:[#allocation25 + $0x38] sm:$0xff]  }
 0xabf   :  { %v16094_v58 = vpop.f32.mrf.mxu1 }
 0xac0   :  { %v22586_v58 = vld [vmem:[#allocation25 + $0x30] sm:$0xff]  }
 0xac5   :  { %v16048_v8 = vpop.f32.mrf.mxu0 }
 0xac6   :  { %v16049_v39 = vadd.f32 %v16048_v8, %v23708_v47  ;;  %v14401_v47 = vrot.slane %v23692_v44, %v23291_v41  ;;  %v22579_v41 = vld [vmem:[#allocation22 + $0x28] sm:$0xff]   ;;  %v22580_v44 = vld [vmem:[#allocation22 + $0x20] sm:$0xff]  }
 0xac7   :  { %v16050_v9 = vpop.f32.mrf.mxu0  ;;  %v22588_v8 = vld [vmem:[#allocation25 + $0x20] sm:$0xff]  }
 0xac8   :  { %v16051_v3 = vadd.f32 %v16050_v9, %v23711_v1  ;;  %v16260_v40 = vmax.f32 %v16049_v39, 0.0  ;;  %v16090_v2 = vadd.f32 %v16089_v31, %v14401_v47  ;;  %v22590_v39 = vld [vmem:[#allocation25 + $0x10] sm:$0xff]   ;;  %v19049_v9 = vld [vmem:[#allocation20] ss:$0 sm:$0xff] }
 0xac9   :  { %v16052_v20 = vpop.f32.mrf.mxu0  ;;  %v22597_v47 = vld [vmem:[#allocation28 + $0x18] sm:$0xff]  }
 0xaca   :  { %v16261_v29 = vmax.f32 %v16051_v3, 0.0  ;;  %v16264_v21 = vpack.c.bf16 %v16260_v40, %v16260_v40 }
 0xacb   :  { %v16053_v14 = vpop.f32.mrf.mxu0 }
 0xacc   :  { %v16265_v45 = vpack.c.bf16 %v16261_v29, %v16261_v29 }
 0xace   :  { %16563 = vmatprep.mubr.bf16.mxu0 %v16265_v45 }
 0xacf   :  { %16564 = vmatmul.mubr.bf16.vlgmr.msra.gmra.mxu0 %v16264_v21  ;;  %v22591_v21 = vld [vmem:[#allocation25 + $0x8] sm:$0xff]  }
 0xad0   :  { %19445 = vmatprep.mubr.msk.bf16.mxu0 %vm23037_vm0, %v23036_v0  ;;  %19430 = vmatpush3.bf16.msra.mxu0 %v22577_v63  ;;  %v19091_v63 = vld [vmem:[#allocation26] ss:$0 sm:$0xff] }
 0xad1   :  { %19431 = vmatprep.subr.bf16.mxu0 %v23036_v0 }
 0xad4   :  { %19432 = vmatpush3.bf16.msra.mxu0 %v22578_v27 }
 0xad5   :  { %19433 = vmatprep.subr.bf16.mxu0 %v23036_v0 }
 0xad8   :  { %19434 = vmatpush3.bf16.msra.mxu0 %v22579_v41 }
 0xad9   :  { %19435 = vmatprep.subr.bf16.mxu0 %v23036_v0 }
 0xadc   :  { %19436 = vmatpush3.bf16.msra.mxu0 %v22580_v44 }
 0xadd   :  { %19437 = vmatprep.subr.bf16.mxu0 %v23036_v0 }
 0xae0   :  { %19438 = vmatpush3.bf16.msra.mxu0 %v22581_v33  ;;  %v19100_v33 = vld [vmem:[#allocation29] ss:$0 sm:$0xff] }
 0xae1   :  { %19439 = vmatprep.subr.bf16.mxu0 %v23036_v0 }
 0xae4   :  { %19440 = vmatpush3.bf16.msra.mxu0 %v22582_v57 }
 0xae5   :  { %19441 = vmatprep.subr.bf16.mxu0 %v23036_v0 }
 0xae8   :  { %19442 = vmatpush3.bf16.msra.mxu0 %v22583_v62 }
 0xae9   :  { %19443 = vmatprep.subr.bf16.mxu0 %v23036_v0 }
 0xaec   :  { %19444 = vmatpush3.bf16.msra.mxu0 %v22584_v5 }
 0xaed   :  { %19469 = vmatprep.subr.bf16.mxu0 %v23036_v0 }
 0xaf9   :  { %v16171_v60 = vpop.f32.mrf.mxu1 }
 0xafb   :  { %v16173_v37 = vpop.f32.mrf.mxu1 }
 0xafd   :  { %v16175_v32 = vpop.f32.mrf.mxu1 }
 0xafe   :  { %v22595_v32 = vld [vmem:[#allocation28 + $0x28] sm:$0xff]  }
 0xaff   :  { %v16176_v4 = vpop.f32.mrf.mxu1 }
 0xb00   :  { %v22596_v4 = vld [vmem:[#allocation28 + $0x20] sm:$0xff]  }
 0xb05   :  { %v16130_v7 = vpop.f32.mrf.mxu0 }
 0xb06   :  { %v16131_v1 = vadd.f32 %v16130_v7, %v16090_v2  ;;  %v19082_v2 = vld [vmem:[#allocation23] ss:$0 sm:$0xff] }
 0xb07   :  { %v16132_v43 = vpop.f32.mrf.mxu0 }
 0xb08   :  { %v16133_v51 = vadd.f32 %v16132_v43, %v16092_v49  ;;  %v16172_v11 = vadd.f32 %v16171_v60, %v16131_v1  ;;  %v22593_v60 = vld [vmem:[#allocation28 + $0x38] sm:$0xff]  }
 0xb09   :  { %v16134_v38 = vpop.f32.mrf.mxu0 }
 0xb0a   :  { %v16174_v59 = vadd.f32 %v16173_v37, %v16133_v51  ;;  %v22594_v37 = vld [vmem:[#allocation28 + $0x30] sm:$0xff]  }
 0xb0b   :  { %v16135_v19 = vpop.f32.mrf.mxu0 }
 0xb0c   :  { %v22600_v19 = vld [vmem:[#allocation28] sm:$0xff]  }
 0xb1a   :  { %v16253_v56 = vpop.f32.mrf.mxu1 }
 0xb1c   :  { %v16255_v10 = vpop.f32.mrf.mxu1 }
 0xb1e   :  { %v16257_v17 = vpop.f32.mrf.mxu1 }
 0xb20   :  { %v16258_v12 = vpop.f32.mrf.mxu1 }
 0xb45   :  { %v16212_v55 = vpop.f32.mrf.mxu0 }
 0xb46   :  { %v16213_v26 = vadd.f32 %v16212_v55, %v16172_v11 }
 0xb47   :  { %v16214_v18 = vpop.f32.mrf.mxu0 }
 0xb48   :  { %v16254_v22 = vadd.f32 %v16253_v56, %v16213_v26  ;;  %v16215_v36 = vadd.f32 %v16214_v18, %v16174_v59  ;;  %v22599_v59 = vld [vmem:[#allocation28 + $0x8] sm:$0xff]  }
 0xb49   :  { %v16216_v46 = vpop.f32.mrf.mxu0 }
 0xb4a   :  { %v16256_v28 = vadd.f32 %v16255_v10, %v16215_v36  ;;  %v16262_v15 = vmax.f32 %v16254_v22, 0.0 }
 0xb4b   :  { %v16217_v23 = vpop.f32.mrf.mxu0 }
 0xb4c   :  { %v16263_v6 = vmax.f32 %v16256_v28, 0.0  ;;  %v16266_v25 = vpack.c.bf16 %v16262_v15, %v16262_v15 }
 0xb4e   :  { %v16267_v50 = vpack.c.bf16 %v16263_v6, %v16263_v6 }
 0xb50   :  { %16603 = vmatprep.mubr.bf16.mxu1 %v16267_v50 }
 0xb51   :  { %16604 = vmatmul.mubr.bf16.vlgmr.msra.gmra.mxu1 %v16266_v25 }
 0xb52   :  { %19465 = vmatprep.mubr.msk.bf16.mxu1 %vm23037_vm0, %v23036_v0  ;;  %19450 = vmatpush3.bf16.msra.mxu1 %v22585_v24 }
 0xb53   :  { %19451 = vmatprep.subr.bf16.mxu1 %v23036_v0 }
 0xb56   :  { %19452 = vmatpush3.bf16.msra.mxu1 %v22586_v58 }
 0xb57   :  { %19453 = vmatprep.subr.bf16.mxu1 %v23036_v0 }
 0xb5a   :  { %19454 = vmatpush3.bf16.msra.mxu1 %v22587_v48 }
 0xb5b   :  { %19455 = vmatprep.subr.bf16.mxu1 %v23036_v0 }
 0xb5e   :  { %19456 = vmatpush3.bf16.msra.mxu1 %v22588_v8 }
 0xb5f   :  { %19457 = vmatprep.subr.bf16.mxu1 %v23036_v0 }
 0xb62   :  { %19458 = vmatpush3.bf16.msra.mxu1 %v22589_v35 }
 0xb63   :  { %19459 = vmatprep.subr.bf16.mxu1 %v23036_v0 }
 0xb66   :  { %19460 = vmatpush3.bf16.msra.mxu1 %v22590_v39 }
 0xb67   :  { %19461 = vmatprep.subr.bf16.mxu1 %v23036_v0 }
 0xb6a   :  { %19462 = vmatpush3.bf16.msra.mxu1 %v22591_v21 }
 0xb6b   :  { %19463 = vmatprep.subr.bf16.mxu1 %v23036_v0 }
 0xb6e   :  { %19464 = vmatpush3.bf16.msra.mxu1 %v22592_v53 }
 0xb8f   :  { %v19354_v30 = vpop.f32.mrf.mxu0 }
 0xb91   :  { %v19355_v61 = vpop.f32.mrf.mxu0 }
 0xb92   :  { %v19356_v54 = vadd.f32 %v19355_v61, %v19354_v30 }
 0xb93   :  { %v19357_v13 = vpop.f32.mrf.mxu0 }
 0xb94   :  { %v16566_v40 = vadd.f32 %v19356_v54, %v19049_v9 }
 0xb95   :  { %v19358_v31 = vpop.f32.mrf.mxu0 }
 0xc11   :  { %v19376_v3 = vpop.f32.mrf.mxu1 }
 0xc13   :  { %v19377_v16 = vpop.f32.mrf.mxu1 }
 0xc14   :  { %v19378_v20 = vadd.f32 %v19377_v16, %v19376_v3 }
 0xc15   :  { %v19379_v34 = vpop.f32.mrf.mxu1 }
 0xc16   :  { %v16606_v29 = vadd.f32 %v19378_v20, %v16566_v40 }
 0xc17   :  { %v19380_v14 = vpop.f32.mrf.mxu1 }
 0xc18   :  { %v16611_v45 = vmax.f32 %v16606_v29, 0.0 }
 0xc1a   :  { %v16612_v52 = vpack.c.bf16 %v16611_v45, %v16611_v45 }
 0xc1c   :  { %19446 = vmatmul.mubr.bf16.vlgmr.msra.gmra.mxu0 %v16612_v52 }
 0xc1d   :  { %19485 = vmatprep.mubr.msk.bf16.mxu0 %vm23037_vm0, %v23036_v0  ;;  %19470 = vmatpush3.bf16.msra.mxu0 %v22593_v60 }
 0xc1e   :  { %19471 = vmatprep.subr.bf16.mxu0 %v23036_v0 }
 0xc21   :  { %19472 = vmatpush3.bf16.msra.mxu0 %v22594_v37 }
 0xc22   :  { %19473 = vmatprep.subr.bf16.mxu0 %v23036_v0 }
 0xc25   :  { %19474 = vmatpush3.bf16.msra.mxu0 %v22595_v32 }
 0xc26   :  { %19475 = vmatprep.subr.bf16.mxu0 %v23036_v0 }
 0xc29   :  { %19476 = vmatpush3.bf16.msra.mxu0 %v22596_v4 }
 0xc2a   :  { %19477 = vmatprep.subr.bf16.mxu0 %v23036_v0 }
 0xc2d   :  { %19478 = vmatpush3.bf16.msra.mxu0 %v22597_v47 }
 0xc2e   :  { %19479 = vmatprep.subr.bf16.mxu0 %v23036_v0 }
 0xc31   :  { %19480 = vmatpush3.bf16.msra.mxu0 %v22598_v42 }
 0xc32   :  { %19481 = vmatprep.subr.bf16.mxu0 %v23036_v0 }
 0xc35   :  { %19482 = vmatpush3.bf16.msra.mxu0 %v22599_v59 }
 0xc36   :  { %19483 = vmatprep.subr.bf16.mxu0 %v23036_v0 }
 0xc39   :  { %19484 = vmatpush3.bf16.msra.mxu0 %v22600_v19 }
 0xcdc   :  { %v16718_v7 = vpop.f32.mrf.mxu0 }
 0xcdd   :  { %v16719_v49 = vadd.f32 %v19082_v2, %v16718_v7 }
 0xcde   :  { %v19447_v1 = vpop.f32.mrf.mxu0 }
 0xcdf   :  { %v16724_v43 = vmax.f32 %v16719_v49, 0.0 }
 0xce0   :  { %v16721_v51 = vpop.f32.mrf.mxu0 }
 0xce1   :  { %v16725_v11 = vpack.c.bf16 %v16724_v43, %v16724_v43 }
 0xce2   :  { %v19448_v38 = vpop.f32.mrf.mxu0 }
 0xce3   :  { %19466 = vmatmul.mubr.bf16.vlgmr.msra.gmra.mxu1 %v16725_v11 }
 0xda3   :  { %v16831_v27 = vpop.f32.mrf.mxu1 }
 0xda4   :  { %v16832_v56 = vadd.f32 %v19091_v63, %v16831_v27 }
 0xda5   :  { %v19467_v41 = vpop.f32.mrf.mxu1 }
 0xda6   :  { %v16837_v10 = vmax.f32 %v16832_v56, 0.0 }
 0xda7   :  { %v16834_v17 = vpop.f32.mrf.mxu1 }
 0xda8   :  { %v16838_v44 = vpack.c.bf16 %v16837_v10, %v16837_v10 }
 0xda9   :  { %v19468_v12 = vpop.f32.mrf.mxu1 }
 0xdaa   :  { %19486 = vmatmul.mubr.bf16.vlgmr.msra.gmra.mxu0 %v16838_v44 }
 0xe6a   :  { %v16944_v55 = vpop.f32.mrf.mxu0 }
 0xe6b   :  { %v16945_v26 = vadd.f32 %v19100_v33, %v16944_v55 }
 0xe6c   :  { %v19487_v18 = vpop.f32.mrf.mxu0 }
 0xe6d   :  { %16950 = vst [vmem:[#allocation31] sm:$0xff] %v16945_v26 }
 0xe6e   :  { %v16947_v0 = vpop.f32.mrf.mxu0 }
 0xe6f   :  { %22977 = shalt.err (!%p22974_p10)
}
 0xe70   :  { %16960 = dma.vmem_to_hbm [thread:$0]  %s16958_s21, 128, %s23772_s19, [#allocation4]   ;;  %v19488_v22 = vpop.f32.mrf.mxu0 }
 0xe71   :  { %23006 = dma.done.wait [#allocation4], 128  }
 0xe72   :  { %23007 = vsyncadd [#allocation4], 4294967168 }
 0xe73   :  { %16964 = vsyncpa [#allocation3], 1 }
 0xe74   :  { %16965 = vsyncpa [#allocation6], 1 }
 0xe75   :  { %16966 = vsyncpa [#allocation9], 1 }
 0xe76   :  { %16967 = vsyncpa [#allocation12], 1 }
 0xe77   :  { %16968 = vsyncpa [#allocation15], 1 }
 0xe78   :  { %16969 = vsyncpa [#allocation18], 1 }
 0xe79   :  { %16970 = vsyncpa [#allocation21], 1 }
 0xe7a   :  { %16971 = vsyncpa [#allocation24], 1 }
 0xe7b   :  { %16972 = vsyncpa [#allocation27], 1 }
 0xe7c   :  { %16973 = vsyncpa [#allocation30], 1 }
 0xe7d   :  { %16974 = vsyncpa [#allocation4], 1 }

</bundles_post_ra>
